<compile_context>
chip_gen: v7x
topology: tpu7x:2x2x1
jax: 0.10.0
libtpu: 0.0.40
codegen_flags: <defaults>
</compile_context>

<pallas_src>
import jax
import jax.numpy as jnp
from jax.experimental import pallas as pl
from jax.experimental.pallas import tpu as pltpu

IN_FEATURES = 10000      # K, unpadded (10000 % 8 == 0)
OUT_FEATURES = 500
N_PAD = 512              # next multiple of 256 >= 500 (padded once, at init)
TN = 256                 # output / weight lane tile -> 2 N blocks (2 TCs on v7x)
TB_MAX = 128             # batch tile cap so resident x never blows VMEM


def linear_kernel(x_ref, w_ref, b_ref, o_ref):
    """One grid step: full-K matmul producing one (TB, TN) output block."""
    o_ref[...] = b_ref[...] + jnp.dot(
        x_ref[...], w_ref[...], preferred_element_type=jnp.float32
    )


def linear_m_forward(x, w_tiled, b_pad):
    """x: [B, 10000] f32, w_tiled: [2, 10000, 256] f32, b_pad: [1, 512] f32 -> [B, 500]."""
    B, K = x.shape
    assert K == IN_FEATURES

    tb = B if B <= TB_MAX else TB_MAX
    grid_n = N_PAD // TN
    grid_b = pl.cdiv(B, tb)

    # Double-buffered VMEM footprint of the pipelined blocks (+25% slack).
    block_bytes = 2 * 4 * (K * TN + tb * K + TN + tb * TN)
    vmem_limit = min(int(block_bytes * 1.25) + (1 << 20), 128 * 1024 * 1024)

    cost = pl.CostEstimate(
        flops=2 * B * K * N_PAD,
        transcendentals=0,
        bytes_accessed=4 * (grid_n * K * TN + B * K + B * N_PAD),
    )

    out_pad = pl.pallas_call(
        linear_kernel,
        out_shape=jax.ShapeDtypeStruct((B, N_PAD), jnp.float32),
        grid_spec=pltpu.PrefetchScalarGridSpec(
            num_scalar_prefetch=0,
            # n outer / b inner: the weight slab (depends only on n) is reused
            # across consecutive b steps without a re-DMA.
            grid=(grid_n, grid_b),
            in_specs=[
                # x: one (tb, K) row block; K is the full lane dim (exception).
                pl.BlockSpec((tb, K), lambda n, b: (b, 0)),
                # W: one contiguous [K, TN] slab per n step (leading dim squeezed).
                pl.BlockSpec((None, K, TN), lambda n, b: (n, 0, 0)),
                # bias: matching 256-wide slice, broadcasts over the tb rows.
                pl.BlockSpec((1, TN), lambda n, b: (0, n)),
            ],
            out_specs=pl.BlockSpec((tb, TN), lambda n, b: (b, n)),
        ),
        compiler_params=pltpu.CompilerParams(
            dimension_semantics=("parallel", "parallel"),
            vmem_limit_bytes=vmem_limit,
        ),
        cost_estimate=cost,
    )(x, w_tiled, b_pad)

    # Drop the 12 padded output columns.
    return out_pad[:, :OUT_FEATURES]


def init_params(key):
    """Deterministic init matching nn.Linear(10000, 500) shapes.

    PyTorch uses U(-1/sqrt(in), 1/sqrt(in)); reproduced deterministically.
    The weight is stored transposed ([in, out]) vs. PyTorch's [out, in],
    zero-padded ONCE on N to 512, and pre-tiled into column-block-major
    [2, 10000, 256] so each grid step streams one contiguous slab.
    """
    kw, kb = jax.random.split(key)
    bound = 1.0 / jnp.sqrt(jnp.float32(IN_FEATURES))
    w = jax.random.uniform(
        kw, (IN_FEATURES, OUT_FEATURES), jnp.float32, minval=-bound, maxval=bound
    )
    b = jax.random.uniform(
        kb, (OUT_FEATURES,), jnp.float32, minval=-bound, maxval=bound
    )
    w_padn = jnp.pad(w, ((0, 0), (0, N_PAD - OUT_FEATURES)))
    w_tiled = w_padn.reshape(IN_FEATURES, N_PAD // TN, TN).transpose(1, 0, 2)
    b_pad = jnp.pad(b, (0, N_PAD - OUT_FEATURES)).reshape(1, N_PAD)
    return w, b, w_tiled, b_pad


if __name__ == "__main__":
    key = jax.random.PRNGKey(0)
    k_params, k_x = jax.random.split(key)

    w, b, w_tiled, b_pad = init_params(k_params)

    batch = 8
    x = jax.random.normal(k_x, (batch, IN_FEATURES), dtype=jnp.float32)

    out = jax.jit(linear_m_forward)(x, w_tiled, b_pad)
    out = jax.block_until_ready(out)

    # Sanity check against the plain-JAX reference.
    ref = x @ w + b
    assert out.shape == (batch, OUT_FEATURES)
    assert jnp.allclose(out, ref, atol=1e-3, rtol=1e-3)

    print("KERNEL_OK")
</pallas_src>

<mosaic_0001>
module attributes {stable_mosaic.version = 11 : i64} {
  func.func @linear_kernel(%arg0: i32, %arg1: i32, %arg2: memref<8x10000xf32, #tpu.memory_space<vmem>>, %arg3: memref<1x10000x256xf32, #tpu.memory_space<vmem>>, %arg4: memref<1x256xf32, #tpu.memory_space<vmem>>, %arg5: memref<8x256xf32, #tpu.memory_space<vmem>>) attributes {dimension_semantics = [#tpu.dimension_semantics<parallel>, #tpu.dimension_semantics<parallel>], iteration_bounds = array<i64: 2, 1>, scalar_prefetch = 0 : i64, scratch_operands = 0 : i64, tpu.core_type = #tpu.core_type<tc>, window_params = [{transform_indices = @transform_0, window_bounds = array<i64: 8, 10000>}, {transform_indices = @transform_1, window_bounds = array<i64: 1, 10000, 256>}, {transform_indices = @transform_2, window_bounds = array<i64: 1, 256>}, {transform_indices = @transform_3, window_bounds = array<i64: 8, 256>}]} {
    %c0 = arith.constant 0 : index
    %c0_0 = arith.constant 0 : index
    %0 = vector.load %arg4[%c0, %c0_0] : memref<1x256xf32, #tpu.memory_space<vmem>>, vector<1x256xf32>
    %c0_1 = arith.constant 0 : index
    %c0_2 = arith.constant 0 : index
    %1 = vector.load %arg2[%c0_1, %c0_2] : memref<8x10000xf32, #tpu.memory_space<vmem>>, vector<8x10000xf32>
    %c0_3 = arith.constant 0 : index
    %c0_4 = arith.constant 0 : index
    %c0_5 = arith.constant 0 : index
    %2 = vector.load %arg3[%c0_3, %c0_4, %c0_5] : memref<1x10000x256xf32, #tpu.memory_space<vmem>>, vector<1x10000x256xf32>
    %3 = vector.shape_cast %2 : vector<1x10000x256xf32> to vector<10000x256xf32>
    %cst = arith.constant dense<0.000000e+00> : vector<8x256xf32>
    %4 = tpu.matmul %1, %3, %cst {dimension_numbers = #tpu.dot_dimension_numbers<[1], [0], [0], [1], [0, 0, 1, 1], [], []>} : vector<8x10000xf32>, vector<10000x256xf32>, vector<8x256xf32> -> vector<8x256xf32>
    %5 = vector.broadcast %0 : vector<1x256xf32> to vector<8x256xf32>
    %6 = arith.addf %5, %4 : vector<8x256xf32>
    %c0_6 = arith.constant 0 : index
    %c0_7 = arith.constant 0 : index
    %7 = vector.load %arg5[%c0_6, %c0_7] : memref<8x256xf32, #tpu.memory_space<vmem>>, vector<8x256xf32>
    tpu.vector_store %arg5[%c0_6, %c0_7], %6 {strides = array<i32>} : memref<8x256xf32, #tpu.memory_space<vmem>>, vector<8x256xf32>,
    return
  }
  func.func @transform_0(%arg0: i32, %arg1: i32) -> (i32, i32) {
    %c0_i32 = arith.constant 0 : i32
    %c0_i32_0 = arith.constant 0 : i32
    return %arg1, %c0_i32 : i32, i32
  }
  func.func @transform_1(%arg0: i32, %arg1: i32) -> (i32, i32, i32) {
    %c0_i32 = arith.constant 0 : i32
    %c0_i32_0 = arith.constant 0 : i32
    %c0_i32_1 = arith.constant 0 : i32
    return %arg0, %c0_i32, %c0_i32_0 : i32, i32, i32
  }
  func.func @transform_2(%arg0: i32, %arg1: i32) -> (i32, i32) {
    %c0_i32 = arith.constant 0 : i32
    %c0_i32_0 = arith.constant 0 : i32
    return %c0_i32, %arg0 : i32, i32
  }
  func.func @transform_3(%arg0: i32, %arg1: i32) -> (i32, i32) {
    %c0_i32 = arith.constant 0 : i32
    return %arg1, %arg0 : i32, i32
  }
}

</mosaic_0001>

<bundles_post_ra>
// kernel: linear_m_forward.1
= control target key start
LH: loop header
LB: loop body
LE: loop exit
PB: predicated region body
PF: predicated region fallthrough
CT: control target
= control target key end

     0   :  { %s11470_s0 = inlined_call_operand.hbm [shape: f32[8,10000], index: 0, kind: input, shape index: {}]   ;;  %s11471_s1 = inlined_call_operand.hbm [shape: f32[2,10000,256], index: 1, kind: input, shape index: {}]   ;;  %s11472_s2 = inlined_call_operand.hbm [shape: f32[1,512], index: 2, kind: input, shape index: {}]   ;;  %s11473_s3 = inlined_call_operand.hbm [shape: f32[8,512], index: 3, kind: output, shape index: {}]  }
   0x1   :  { %11482 = sst [smem:[#allocation13_spill]] %s11471_s1 }
   0x2   :  { %8 = vsyncpa [#allocation3], 0 }
   0x3   :  { %9 = vsyncpa [#allocation6], 0 }
   0x4   :  { %11 = vsyncpa [#allocation6 + $0x1], 0 }
   0x5   :  { %12 = vsyncpa [#allocation4], 0 }
   0x6   :  { %14 = vsyncpa [#allocation4 + $0x1], 0  ;;  %s8718_s12 = smov 0   ;;  %s8720_s13 = smov 0  }
   0x7   :  { %s8722_s14 = smov 0   ;;  %s8724_s15 = smov 0  }
   0x8   :  { %s8726_s16 = smov 0   ;;  %s8728_s17 = smov 0  }
   0x9 LB: > { %s32_s18 = sadd.s32 1, %s8685_s16  ;;  %s65_s19 = sadd.s32 1, %s8677_s14  ;;  %s8689_s17 = sphi %s8728_s17, %s20_s17   ;;  %s8685_s16 = sphi %s8726_s16, %s11506_s16   ;;  %s8681_s15 = sphi %s8724_s15, %s11505_s15   ;;  %s8677_s14 = sphi %s8722_s14, %s11504_s14   ;;  %s8673_s13 = sphi %s8720_s13, %s11503_s13   ;;  %s8669_s12 = sphi %s8718_s12, %s11502_s12  }
   0xa   : > { %p34_p0 = scmp.ge.s32.totalorder %s32_s18, 2  ;;  %p72_p1 = scmp.ne.s32.totalorder %s8677_s14, %s8673_s13 }
   0xb   : > { %p73_p2 = scmp.eq.s32.totalorder %s8689_s17, 0  ;;  %p8460_p5 = scmp.lt.s32.totalorder %s8689_s17, 2 }
   0xc   : > { %s11508_s18 = smov (%p34_p0, %s32_s18), 0  ;;  %s170_s21 = sand.u32 1, %s8689_s17  }
   0xd   : > { %11483 = sst [smem:[#allocation12_spill]] %s11508_s18  ;;  %p74_p4 = por %p73_p2, %p72_p1 }
   0xe   : > { %s62_s20 = ssub.s32 %s8685_s16, %s11508_s18  ;;  %s172_s22 = sand.u32 1, %s8677_s14  }
   0xf   : > { %p63_p6 = scmp.eq.s32.totalorder %s62_s20, 0  ;;  %s8432_s23 = smul.u32 320000, %s8685_s16 }
  0x10   : > { %s8431_s25 = smul.u32 20000, %s172_s22  ;;  %s11484_s1 = sld [smem:[#allocation13_spill]] }
  0x11   : > { %s8766_s24 = scalar_select %p63_p6, %s8677_s14, %s65_s19  }
  0x12   : > { %p8775_p7 = pnand %p8460_p5, %p74_p4  ;;  %s174_s30 = scalar_lea.vmem [#allocation5], %s8431_s25 }
  0x13   : > { %s181_s4 = sshll.u32 %s174_s30, 4  ;;  %s8781_s5 = scalar_lea.sflag [#allocation6], %s170_s21  ;;  %s8779_s4 = int_to_ptr.vmem [resolvable:$true] %s181_s4 }
  0x14   : > { %s11485_s29 = scalar_select %p8775_p7, 1, 0 }
  0x15   : > { %p11476_p9 = pneg %p8775_p7 }
  0x16   : > { %s8773_s28 = scalar_lea.hbm %s11484_s1, %s8432_s23  ;;  %s8520_s9 = scalar_lea.hbm %s11484_s1, 640000 }
  0x17   : > { %s8515_s6 = scalar_lea.hbm %s8773_s28, 320000  ;;  %p8521_p12 = scmp.lt.u32.totalorder %s8773_s28, %s11484_s1 }
  0x18   : > { %p8516_p8 = scmp.ne.s32.totalorder %s8773_s28, %s8515_s6  ;;  %p8522_p13 = scmp.lt.u32.totalorder %s8520_s9, %s8515_s6 }
  0x19   : > { %p8524_p2 = scmp.lt.u32.totalorder %s8515_s6, %s8773_s28 }
  0x1a   : > { %p8518_p10 = pnand %p11476_p9, %p8516_p8  ;;  %p8523_p0 = por %p8522_p13, %p8521_p12 }
  0x1c   : > { %p8519_p11 = pneg %p8518_p10  ;;  %p8525_p4 = por %p8524_p2, %p8523_p0 }
  0x1e   : > { %p8526_p5 = pnand %p8525_p4, %p8519_p11 }
  0x20   : > { %8529 = shalt.err (!%p8526_p5)
}
  0x21   : > { %s8530_s19 = scalar_lea.vmem %s8779_s4, 320000  ;;  %s8691_s20 = smov [#allocation5]  }
  0x22   : > { %p8531_p6 = scmp.ne.s32.totalorder %s8779_s4, %s8530_s19  ;;  %s8535_s21 = sshll.u32 %s8691_s20, 4  ;;  %s8536_s21 = int_to_ptr.vmem [resolvable:$false] %s8535_s21 }
  0x23   : > { %s8537_s23 = scalar_lea.vmem %s8536_s21, 640000  ;;  %p8538_p3 = scmp.lt.s32.totalorder %s8779_s4, %s8536_s21 }
  0x24   : > { %p8533_p8 = pnand %p8531_p6, %p11476_p9  ;;  %p8539_p12 = scmp.lt.s32.totalorder %s8537_s23, %s8530_s19 }
  0x26   : > { %p8534_p10 = pneg %p8533_p8  ;;  %p8540_p13 = por %p8539_p12, %p8538_p3 }
  0x28   : > { %p8541_p0 = pnand %p8540_p13, %p8534_p10 }
  0x2a   : > { %8544 = shalt.err (!%p8541_p0)
}
  0x2b   : > { %s8692_s25 = smov 256   ;;  %s8693_s26 = smov 16  }
  0x2c   : > { %8451 = dma.hbm_to_vmem [thread:$0]  (!%p8775_p7), %s8773_s28, 320000, %s8779_s4, %s8781_s5, %s8692_s25, %s8692_s25, %s8693_s26  }
  0x2d   : > { %s8810_s27 = sadd.s32 4294967295, %s8689_s17   ;;  %s5833_s30 = sadd.s32 4294967294, %s8689_s17  }
  0x2e   : > { %p78_p3 = scmp.ne.s32.totalorder %s8673_s13, %s8669_s12  ;;  %p11475_p11 = scmp.eq.s32.totalorder %s8810_s27, 0 }
  0x2f   : > { %p130_p2 = scmp.eq.s32.totalorder %s8810_s27, 1  ;;  %p136_p4 = scmp.eq.s32.totalorder %s5833_s30, 1 }
  0x30   : > { %p5834_p5 = scmp.ge.s32.totalorder %s8689_s17, 1  ;;  %p8820_p6 = por %p11475_p11, %p78_p3 }
  0x31   : > { %p8827_p8 = por %p130_p2, %p72_p1  ;;  %p8831_p10 = por %p136_p4, %p78_p3 }
  0x32   : > { %s11486_s6 = scalar_select %p8820_p6, 1, 0 }
  0x33   : > { %s11487_s28 = scalar_select %p8827_p8, 1, 0 }
  0x34   : > { %s11488_s4 = scalar_select %p8831_p10, 1, 0 }
  0x35   : > { %p143_p12 = scmp.lt.s32.totalorder %s8689_s17, 3  ;;  %s8694_s8 = smov [#allocation2]  }
  0x36   : > { %s159_s9 = sshll.u32 %s8694_s8, 4  ;;  %s5838_s10 = sshll.u32 %s172_s22, 1  ;;  %s160_s9 = int_to_ptr.vmem [resolvable:$true] %s159_s9 }
  0x37   : > { %p8836_p13 = pnand %p5834_p5, %p143_p12  ;;  %s5851_s11 = sshll.u32 %s8685_s16, 5 }
  0x38   : > { %s195_s19 = scalar_lea.vmem [#allocation7], %s5838_s10  ;;  %s8854_s26 = scalar_lea.hbm %s11472_s2, %s5851_s11 }
  0x39   : > { %s11489_s7 = scalar_select %p8836_p13, 1, 0 }
  0x3a   : > { %p8444_p0 = pneg %p8836_p13  ;;  %s203_s20 = sshll.u32 %s195_s19, 4  ;;  %s8856_s20 = int_to_ptr.vmem [resolvable:$true] %s203_s20 }
  0x3b   : > { %s8545_s8 = scalar_lea.hbm %s11470_s0, 10112 }
  0x3c   : > { %p8847_p1 = pnand %p8444_p0, %p11475_p11  ;;  %p8546_p3 = scmp.ne.s32.totalorder %s11470_s0, %s8545_s8 }
  0x3d   : > { %p8552_p12 = scmp.lt.u32.totalorder %s8545_s8, %s11470_s0 }
  0x3e   : > { %p8547_p2 = pneg %p8847_p1 }
  0x40   : > { %p8548_p4 = pnand %p8547_p2, %p8546_p3 }
  0x42   : > { %p8549_p5 = pneg %p8548_p4 }
  0x44   : > { %p8554_p0 = pnand %p8552_p12, %p8549_p5 }
  0x46   : > { %8557 = shalt.err (!%p8554_p0)
}
  0x47   : > { %s8558_s11 = scalar_lea.vmem %s160_s9, 10112  ;;  %p8566_p8 = scmp.lt.s32.totalorder %s160_s9, %s160_s9 }
  0x48   : > { %p8559_p11 = scmp.ne.s32.totalorder %s160_s9, %s8558_s11  ;;  %p8567_p6 = scmp.lt.s32.totalorder %s8558_s11, %s8558_s11 }
  0x4a   : > { %p8561_p9 = pnand %p8559_p11, %p8547_p2  ;;  %p8568_p13 = por %p8567_p6, %p8566_p8 }
  0x4c   : > { %p8562_p10 = pneg %p8561_p9 }
  0x4e   : > { %p8569_p7 = pnand %p8568_p13, %p8562_p10 }
  0x50   : > { %8572 = shalt.err (!%p8569_p7)
}
  0x51   : > { %8447 = dma.hbm_to_vmem [thread:$0]  (!%p8847_p1), %s11470_s0, 10112, %s160_s9, [#allocation3]  }
  0x52   : > { %s8573_s1 = scalar_lea.hbm %s8854_s26, 32  ;;  %p11491_p11 = scmp.ne.s32.totalorder %s11485_s29, 0 }
  0x53   : > { %p8574_p3 = scmp.ne.s32.totalorder %s8854_s26, %s8573_s1  ;;  %s8578_s30 = scalar_lea.hbm %s11472_s2, 64 }
  0x54   : > { %p11492_p9 = pneg %p11491_p11  ;;  %p8579_p7 = scmp.lt.u32.totalorder %s8854_s26, %s11472_s2 }
  0x55   : > { %p8580_p6 = scmp.lt.u32.totalorder %s8578_s30, %s8573_s1  ;;  %p8582_p10 = scmp.lt.u32.totalorder %s8573_s1, %s8854_s26 }
  0x56   : > { %p8576_p2 = pnand %p8574_p3, %p11492_p9 }
  0x57   : > { %p8581_p8 = por %p8580_p6, %p8579_p7 }
  0x58   : > { %p8577_p4 = pneg %p8576_p2 }
  0x59   : > { %p8583_p13 = por %p8582_p10, %p8581_p8 }
  0x5b   : > { %p8584_p5 = pnand %p8583_p13, %p8577_p4 }
  0x5d   : > { %8587 = shalt.err (!%p8584_p5)
}
  0x5e   : > { %s8588_s9 = scalar_lea.vmem %s8856_s20, 32  ;;  %p11493_p12 = pmov %p11492_p9 }
  0x5f   : > { %p8589_p1 = scmp.ne.s32.totalorder %s8856_s20, %s8588_s9  ;;  %s8695_s10 = smov [#allocation7]  }
  0x60   : > { %s8593_s19 = sshll.u32 %s8695_s10, 4  ;;  %s8594_s19 = int_to_ptr.vmem [resolvable:$false] %s8593_s19 }
  0x61   : > { %p8591_p0 = pnand %p8589_p1, %p11493_p12  ;;  %s8595_s11 = scalar_lea.vmem %s8594_s19, 64 }
  0x62   : > { %p8596_p9 = scmp.lt.s32.totalorder %s8856_s20, %s8594_s19  ;;  %p8597_p2 = scmp.lt.s32.totalorder %s8595_s11, %s8588_s9 }
  0x63   : > { %p8592_p3 = pneg %p8591_p0 }
  0x64   : > { %p8598_p7 = por %p8597_p2, %p8596_p9 }
  0x66   : > { %p8599_p6 = pnand %p8598_p7, %p8592_p3 }
  0x68   : > { %8602 = shalt.err (!%p8599_p6)
}
  0x69   : > { %8454 = dma.hbm_to_vmem [thread:$0]  (!%p11491_p11), %s8854_s26, 32, %s8856_s20, %s8781_s5  }
  0x6a   : > { %p11494_p4 = scmp.ne.s32.totalorder %s11489_s7, 0 }
  0x6b   : > { %p11495_p8 = scmp.eq.s32.totalorder (!%p11494_p4), %s8810_s27, 0 }
  0x6c   : > { %212 = sbr.rel (%p11494_p4) target bundleno = 1636 (0x664), region = 32 }
  0x73   : > { %8656 = dma.done.wait (%p11495_p8), [#allocation3], 10112   ;;  %p11496_p10 = pmov %p11495_p8 }
  0x74   : > { %s218_s23 = sand.u32 1, %s8810_s27   ;;  %s8906_s25 = sand.u32 1, %s8673_s13  }
  0x75   : > { %8658 = vsyncadd (%p11496_p10), [#allocation3], 4294957184  ;;  %s8433_s29 = smul.u32 20000, %s8906_s25  ;;  %s219_s1 = scalar_lea.sflag [#allocation6], %s218_s23 }
  0x76   : > { %p11497_p11 = scmp.ne.s32.totalorder %s11486_s6, 0 }
  0x77   : > { %s8909_s18 = scalar_lea.vmem [#allocation5], %s8433_s29 }
  0x78   : > { %8660 = dma.done.wait (%p11497_p11), %s219_s1, 320032  }
  0x79   : > { %8662 = vsyncadd (%p11497_p11), %s219_s1, 4294647264  ;;  %v342_v0 = vld [vmem:[%s8909_s18 + $0x8] sm:$0xff]  ;;  %v344_v1 = vld [vmem:[%s8909_s18 + $0x18] sm:$0xff]  ;;  %vm2841_vm0 = vcmask 130048   ;;  %s5843_s5 = sshll.u32 %s8906_s25, 1  ;;  %s5844_s27 = sshll.u32 %s8906_s25, 4 }
  0x7a   : > { %v1622_v2 = vld [vmem:[%s8909_s18 + $0x2808] sm:$0xff]  ;;  %v5853_v3 = vpack.c.bf16 %v344_v1, %v342_v0  ;;  %v1624_v4 = vld [vmem:[%s8909_s18 + $0x2818] sm:$0xff]  ;;  %v341_v5 = vld [vmem:[%s8909_s18] sm:$0xff]  ;;  %s231_s6 = scalar_lea.vmem [#allocation7], %s5843_s5  ;;  %s5852_s7 = sshll.u32 %s8681_s15, 8 }
  0x7b   : > { %v343_v6 = vld [vmem:[%s8909_s18 + $0x10] sm:$0xff]  ;;  %v7133_v7 = vpack.c.bf16 %v1624_v4, %v1622_v2  ;;  %v1621_v9 = vld [vmem:[%s8909_s18 + $0x2800] sm:$0xff]  ;;  %v346_v11 = vld [vmem:[%s8909_s18 + $0x28] sm:$0xff]  ;;  %s258_s20 = scalar_lea.vmem [#allocation8], %s5844_s27  ;;  %s11421_s21 = scalar_lea.hbm %s11473_s3, %s5852_s7 }
  0x7c   : > { %v5855_v8 = vpack.c.bf16 %v343_v6, %v341_v5  ;;  %v1623_v10 = vld [vmem:[%s8909_s18 + $0x2810] sm:$0xff]  ;;  %5854 = vmatprep.subr.bf16.mxu1 %v5853_v3  ;;  %v348_v13 = vld [vmem:[%s8909_s18 + $0x38] sm:$0xff]  ;;  %v1626_v14 = vld [vmem:[%s8909_s18 + $0x2828] sm:$0xff]  ;;  %s5717_s26 = sshll.u32 %s258_s20, 4  ;;  %s5701_s8 = scalar_lea.sflag [#allocation4], %s8906_s25  ;;  %s11423_s26 = int_to_ptr.vmem [resolvable:$true] %s5717_s26 }
  0x7d   : > { %v7135_v12 = vpack.c.bf16 %v1623_v10, %v1621_v9  ;;  %v1628_v15 = vld [vmem:[%s8909_s18 + $0x2838] sm:$0xff]  ;;  %7134 = vmatprep.subr.bf16.mxu0 %v7133_v7  ;;  %v5857_v16 = vpack.c.bf16 %v348_v13, %v346_v11  ;;  %v345_v18 = vld [vmem:[%s8909_s18 + $0x20] sm:$0xff]  ;;  %v347_v19 = vld [vmem:[%s8909_s18 + $0x30] sm:$0xff]  ;;  %s8603_s9 = scalar_lea.vmem %s11423_s26, 256  ;;  %p11498_p5 = scmp.ne.s32.totalorder %s11487_s28, 0 }
  0x7e   : > { %5856 = vmatpush1.bf16.msra.mxu1 %v5855_v8  ;;  %v7137_v17 = vpack.c.bf16 %v1628_v15, %v1626_v14  ;;  %v1625_v20 = vld [vmem:[%s8909_s18 + $0x2820] sm:$0xff]  ;;  %v5859_v21 = vpack.c.bf16 %v347_v19, %v345_v18  ;;  %v1627_v22 = vld [vmem:[%s8909_s18 + $0x2830] sm:$0xff]  ;;  %v350_v23 = vld [vmem:[%s8909_s18 + $0x48] sm:$0xff]  ;;  %p8604_p13 = scmp.ne.s32.totalorder %s11423_s26, %s8603_s9  ;;  %s8697_s15 = smov [#allocation8]  }
  0x7f   : > { %7136 = vmatpush1.bf16.msra.mxu0 %v7135_v12  ;;  %v352_v24 = vld [vmem:[%s8909_s18 + $0x58] sm:$0xff]  ;;  %5858 = vmatprep.subr.bf16.mxu1 %v5857_v16  ;;  %v7139_v25 = vpack.c.bf16 %v1627_v22, %v1625_v20  ;;  %v1630_v27 = vld [vmem:[%s8909_s18 + $0x2848] sm:$0xff]  ;;  %v349_v29 = vld [vmem:[%s8909_s18 + $0x40] sm:$0xff]  ;;  %s8607_s10 = sshll.u32 %s8697_s15, 4  ;;  %s8608_s10 = int_to_ptr.vmem [resolvable:$false] %s8607_s10 }
  0x80   : > { %7138 = vmatprep.subr.bf16.mxu0 %v7137_v17  ;;  %v5861_v26 = vpack.c.bf16 %v352_v24, %v350_v23  ;;  %v1632_v28 = vld [vmem:[%s8909_s18 + $0x2858] sm:$0xff]  ;;  %v351_v31 = vld [vmem:[%s8909_s18 + $0x50] sm:$0xff]  ;;  %v1629_v32 = vld [vmem:[%s8909_s18 + $0x2840] sm:$0xff]  ;;  %p8605_p1 = pnand %p8604_p13, %p11498_p5  ;;  %s8609_s19 = scalar_lea.vmem %s8608_s10, 512 }
  0x81   : > { %v7141_v30 = vpack.c.bf16 %v1632_v28, %v1630_v27  ;;  %v1631_v33 = vld [vmem:[%s8909_s18 + $0x2850] sm:$0xff]  ;;  %v5863_v34 = vpack.c.bf16 %v351_v31, %v349_v29  ;;  %v354_v35 = vld [vmem:[%s8909_s18 + $0x68] sm:$0xff]  ;;  %v356_v36 = vld [vmem:[%s8909_s18 + $0x78] sm:$0xff]  ;;  %p8610_p0 = scmp.lt.s32.totalorder %s11423_s26, %s8608_s10  ;;  %p8611_p3 = scmp.lt.s32.totalorder %s8609_s19, %s8603_s9 }
  0x82   : > { %5860 = vmatpush1.bf16.msra.mxu1 %v5859_v21  ;;  %v1634_v37 = vld [vmem:[%s8909_s18 + $0x2868] sm:$0xff]  ;;  %v7143_v38 = vpack.c.bf16 %v1631_v33, %v1629_v32  ;;  %v5865_v39 = vpack.c.bf16 %v356_v36, %v354_v35  ;;  %v1636_v40 = vld [vmem:[%s8909_s18 + $0x2878] sm:$0xff]  ;;  %v353_v41 = vld [vmem:[%s8909_s18 + $0x60] sm:$0xff]  ;;  %p8606_p12 = pneg %p8605_p1 }
  0x83   : > { %7140 = vmatpush1.bf16.msra.mxu0 %v7139_v25  ;;  %5862 = vmatprep.subr.bf16.mxu1 %v5861_v26  ;;  %v355_v42 = vld [vmem:[%s8909_s18 + $0x70] sm:$0xff]  ;;  %v7145_v43 = vpack.c.bf16 %v1636_v40, %v1634_v37  ;;  %v1633_v44 = vld [vmem:[%s8909_s18 + $0x2860] sm:$0xff]  ;;  %v358_v46 = vld [vmem:[%s8909_s18 + $0x88] sm:$0xff]  ;;  %p8612_p9 = por %p8611_p3, %p8610_p0 }
  0x84   : > { %7142 = vmatprep.subr.bf16.mxu0 %v7141_v30  ;;  %v1635_v45 = vld [vmem:[%s8909_s18 + $0x2870] sm:$0xff]  ;;  %v360_v47 = vld [vmem:[%s8909_s18 + $0x98] sm:$0xff]  ;;  %v1638_v48 = vld [vmem:[%s8909_s18 + $0x2888] sm:$0xff]  ;;  %v5867_v50 = vpack.c.bf16 %v355_v42, %v353_v41 }
  0x85   : > { %v1640_v49 = vld [vmem:[%s8909_s18 + $0x2898] sm:$0xff]  ;;  %v7147_v51 = vpack.c.bf16 %v1635_v45, %v1633_v44  ;;  %v5869_v52 = vpack.c.bf16 %v360_v47, %v358_v46  ;;  %v357_v53 = vld [vmem:[%s8909_s18 + $0x80] sm:$0xff]  ;;  %v359_v54 = vld [vmem:[%s8909_s18 + $0x90] sm:$0xff]  ;;  %p8613_p2 = pnand %p8612_p9, %p8606_p12 }
  0x86   : > { %5864 = vmatpush1.bf16.msra.mxu1 %v5863_v34  ;;  %v1637_v55 = vld [vmem:[%s8909_s18 + $0x2880] sm:$0xff]  ;;  %v7149_v56 = vpack.c.bf16 %v1640_v49, %v1638_v48  ;;  %v1639_v57 = vld [vmem:[%s8909_s18 + $0x2890] sm:$0xff]  ;;  %v362_v58 = vld [vmem:[%s8909_s18 + $0xa8] sm:$0xff]  ;;  %v5871_v62 = vpack.c.bf16 %v359_v54, %v357_v53 }
  0x87   : > { %7144 = vmatpush1.bf16.msra.mxu0 %v7143_v38  ;;  %5866 = vmatprep.subr.bf16.mxu1 %v5865_v39  ;;  %v364_v59 = vld [vmem:[%s8909_s18 + $0xb8] sm:$0xff]  ;;  %v1642_v60 = vld [vmem:[%s8909_s18 + $0x28a8] sm:$0xff]  ;;  %v7151_v63 = vpack.c.bf16 %v1639_v57, %v1637_v55  ;;  %v361_v1 = vld [vmem:[%s8909_s18 + $0xa0] sm:$0xff] }
  0x88   : > { %7146 = vmatprep.subr.bf16.mxu0 %v7145_v43  ;;  %v1644_v61 = vld [vmem:[%s8909_s18 + $0x28b8] sm:$0xff]  ;;  %v5873_v0 = vpack.c.bf16 %v364_v59, %v362_v58  ;;  %v363_v2 = vld [vmem:[%s8909_s18 + $0xb0] sm:$0xff]  ;;  %v1641_v3 = vld [vmem:[%s8909_s18 + $0x28a0] sm:$0xff] }
  0x89   : > { %v7153_v4 = vpack.c.bf16 %v1644_v61, %v1642_v60  ;;  %v1643_v5 = vld [vmem:[%s8909_s18 + $0x28b0] sm:$0xff]  ;;  %v366_v6 = vld [vmem:[%s8909_s18 + $0xc8] sm:$0xff]  ;;  %v368_v7 = vld [vmem:[%s8909_s18 + $0xd8] sm:$0xff]  ;;  %v5875_v10 = vpack.c.bf16 %v363_v2, %v361_v1 }
  0x8a   : > { %5868 = vmatpush1.bf16.msra.mxu1 %v5867_v50  ;;  %v1646_v8 = vld [vmem:[%s8909_s18 + $0x28c8] sm:$0xff]  ;;  %v1648_v9 = vld [vmem:[%s8909_s18 + $0x28d8] sm:$0xff]  ;;  %v7155_v11 = vpack.c.bf16 %v1643_v5, %v1641_v3  ;;  %v5877_v12 = vpack.c.bf16 %v368_v7, %v366_v6  ;;  %v365_v13 = vld [vmem:[%s8909_s18 + $0xc0] sm:$0xff] }
  0x8b   : > { %7148 = vmatpush1.bf16.msra.mxu0 %v7147_v51  ;;  %5870 = vmatprep.subr.bf16.mxu1 %v5869_v52  ;;  %v367_v14 = vld [vmem:[%s8909_s18 + $0xd0] sm:$0xff]  ;;  %v1645_v15 = vld [vmem:[%s8909_s18 + $0x28c0] sm:$0xff]  ;;  %v7157_v16 = vpack.c.bf16 %v1648_v9, %v1646_v8  ;;  %v370_v18 = vld [vmem:[%s8909_s18 + $0xe8] sm:$0xff] }
  0x8c   : > { %7150 = vmatprep.subr.bf16.mxu0 %v7149_v56  ;;  %v1647_v17 = vld [vmem:[%s8909_s18 + $0x28d0] sm:$0xff]  ;;  %v372_v19 = vld [vmem:[%s8909_s18 + $0xf8] sm:$0xff]  ;;  %v1650_v20 = vld [vmem:[%s8909_s18 + $0x28e8] sm:$0xff]  ;;  %v5879_v22 = vpack.c.bf16 %v367_v14, %v365_v13 }
  0x8d   : > { %v1652_v21 = vld [vmem:[%s8909_s18 + $0x28f8] sm:$0xff]  ;;  %v7159_v23 = vpack.c.bf16 %v1647_v17, %v1645_v15  ;;  %v5881_v24 = vpack.c.bf16 %v372_v19, %v370_v18  ;;  %v369_v25 = vld [vmem:[%s8909_s18 + $0xe0] sm:$0xff]  ;;  %v371_v26 = vld [vmem:[%s8909_s18 + $0xf0] sm:$0xff] }
  0x8e   : > { %5872 = vmatpush1.bf16.msra.mxu1 %v5871_v62  ;;  %v1649_v27 = vld [vmem:[%s8909_s18 + $0x28e0] sm:$0xff]  ;;  %v7161_v28 = vpack.c.bf16 %v1652_v21, %v1650_v20  ;;  %v1651_v29 = vld [vmem:[%s8909_s18 + $0x28f0] sm:$0xff]  ;;  %v374_v30 = vld [vmem:[%s8909_s18 + $0x108] sm:$0xff]  ;;  %v5883_v34 = vpack.c.bf16 %v371_v26, %v369_v25 }
  0x8f   : > { %7152 = vmatpush1.bf16.msra.mxu0 %v7151_v63  ;;  %5874 = vmatprep.subr.bf16.mxu1 %v5873_v0  ;;  %v376_v31 = vld [vmem:[%s8909_s18 + $0x118] sm:$0xff]  ;;  %v1654_v32 = vld [vmem:[%s8909_s18 + $0x2908] sm:$0xff]  ;;  %v7163_v35 = vpack.c.bf16 %v1651_v29, %v1649_v27  ;;  %v373_v37 = vld [vmem:[%s8909_s18 + $0x100] sm:$0xff] }
  0x90   : > { %7154 = vmatprep.subr.bf16.mxu0 %v7153_v4  ;;  %v1656_v33 = vld [vmem:[%s8909_s18 + $0x2918] sm:$0xff]  ;;  %v5885_v36 = vpack.c.bf16 %v376_v31, %v374_v30  ;;  %v375_v38 = vld [vmem:[%s8909_s18 + $0x110] sm:$0xff]  ;;  %v1653_v39 = vld [vmem:[%s8909_s18 + $0x2900] sm:$0xff] }
  0x91   : > { %v7165_v40 = vpack.c.bf16 %v1656_v33, %v1654_v32  ;;  %v1655_v41 = vld [vmem:[%s8909_s18 + $0x2910] sm:$0xff]  ;;  %v378_v42 = vld [vmem:[%s8909_s18 + $0x128] sm:$0xff]  ;;  %v380_v43 = vld [vmem:[%s8909_s18 + $0x138] sm:$0xff]  ;;  %v5887_v46 = vpack.c.bf16 %v375_v38, %v373_v37 }
  0x92   : > { %5876 = vmatpush1.bf16.msra.mxu1 %v5875_v10  ;;  %v1658_v44 = vld [vmem:[%s8909_s18 + $0x2928] sm:$0xff]  ;;  %v1660_v45 = vld [vmem:[%s8909_s18 + $0x2938] sm:$0xff]  ;;  %v7167_v47 = vpack.c.bf16 %v1655_v41, %v1653_v39  ;;  %v5889_v48 = vpack.c.bf16 %v380_v43, %v378_v42  ;;  %v377_v49 = vld [vmem:[%s8909_s18 + $0x120] sm:$0xff] }
  0x93   : > { %7156 = vmatpush1.bf16.msra.mxu0 %v7155_v11  ;;  %5878 = vmatprep.subr.bf16.mxu1 %v5877_v12  ;;  %v379_v50 = vld [vmem:[%s8909_s18 + $0x130] sm:$0xff]  ;;  %v1657_v51 = vld [vmem:[%s8909_s18 + $0x2920] sm:$0xff]  ;;  %v7169_v52 = vpack.c.bf16 %v1660_v45, %v1658_v44  ;;  %v382_v54 = vld [vmem:[%s8909_s18 + $0x148] sm:$0xff] }
  0x94   : > { %7158 = vmatprep.subr.bf16.mxu0 %v7157_v16  ;;  %v1659_v53 = vld [vmem:[%s8909_s18 + $0x2930] sm:$0xff]  ;;  %v384_v55 = vld [vmem:[%s8909_s18 + $0x158] sm:$0xff]  ;;  %v1662_v56 = vld [vmem:[%s8909_s18 + $0x2948] sm:$0xff]  ;;  %v5891_v58 = vpack.c.bf16 %v379_v50, %v377_v49 }
  0x95   : > { %v1664_v57 = vld [vmem:[%s8909_s18 + $0x2958] sm:$0xff]  ;;  %v7171_v59 = vpack.c.bf16 %v1659_v53, %v1657_v51  ;;  %v5893_v60 = vpack.c.bf16 %v384_v55, %v382_v54  ;;  %v381_v61 = vld [vmem:[%s8909_s18 + $0x140] sm:$0xff]  ;;  %v383_v62 = vld [vmem:[%s8909_s18 + $0x150] sm:$0xff] }
  0x96   : > { %5880 = vmatpush1.bf16.msra.mxu1 %v5879_v22  ;;  %v1661_v63 = vld [vmem:[%s8909_s18 + $0x2940] sm:$0xff]  ;;  %v7173_v0 = vpack.c.bf16 %v1664_v57, %v1662_v56  ;;  %v1663_v1 = vld [vmem:[%s8909_s18 + $0x2950] sm:$0xff]  ;;  %v386_v2 = vld [vmem:[%s8909_s18 + $0x168] sm:$0xff]  ;;  %v5895_v6 = vpack.c.bf16 %v383_v62, %v381_v61 }
  0x97   : > { %7160 = vmatpush1.bf16.msra.mxu0 %v7159_v23  ;;  %5882 = vmatprep.subr.bf16.mxu1 %v5881_v24  ;;  %v388_v3 = vld [vmem:[%s8909_s18 + $0x178] sm:$0xff]  ;;  %v1666_v4 = vld [vmem:[%s8909_s18 + $0x2968] sm:$0xff]  ;;  %v385_v7 = vld [vmem:[%s8909_s18 + $0x160] sm:$0xff]  ;;  %v7175_v8 = vpack.c.bf16 %v1663_v1, %v1661_v63 }
  0x98   : > { %7162 = vmatprep.subr.bf16.mxu0 %v7161_v28  ;;  %v1668_v5 = vld [vmem:[%s8909_s18 + $0x2978] sm:$0xff]  ;;  %v5897_v9 = vpack.c.bf16 %v388_v3, %v386_v2  ;;  %v387_v10 = vld [vmem:[%s8909_s18 + $0x170] sm:$0xff]  ;;  %v1665_v11 = vld [vmem:[%s8909_s18 + $0x2960] sm:$0xff] }
  0x99   : > { %v1667_v12 = vld [vmem:[%s8909_s18 + $0x2970] sm:$0xff]  ;;  %v7177_v13 = vpack.c.bf16 %v1668_v5, %v1666_v4  ;;  %v390_v14 = vld [vmem:[%s8909_s18 + $0x188] sm:$0xff]  ;;  %v392_v15 = vld [vmem:[%s8909_s18 + $0x198] sm:$0xff]  ;;  %v5899_v20 = vpack.c.bf16 %v387_v10, %v385_v7 }
  0x9a   : > { %5884 = vmatpush1.bf16.msra.mxu1 %v5883_v34  ;;  %v263_v16 = vld [vmem:[#allocation2 + $0x8] sm:$0xff]  ;;  %v1670_v17 = vld [vmem:[%s8909_s18 + $0x2988] sm:$0xff]  ;;  %v1672_v18 = vld [vmem:[%s8909_s18 + $0x2998] sm:$0xff]  ;;  %v7179_v21 = vpack.c.bf16 %v1667_v12, %v1665_v11  ;;  %v5901_v22 = vpack.c.bf16 %v392_v15, %v390_v14 }
  0x9b   : > { %7164 = vmatpush1.bf16.msra.mxu0 %v7163_v35  ;;  %5886 = vmatprep.subr.bf16.mxu1 %v5885_v36  ;;  %v303_v19 = vld [vmem:[#allocation2 + $0x148] sm:$0xff]  ;;  %v389_v23 = vld [vmem:[%s8909_s18 + $0x180] sm:$0xff]  ;;  %v7181_v26 = vpack.c.bf16 %v1672_v18, %v1670_v17  ;;  %v394_v28 = vld [vmem:[%s8909_s18 + $0x1a8] sm:$0xff] }
  0x9c   : > { %7166 = vmatprep.subr.bf16.mxu0 %v7165_v40  ;;  %2909 = vmatprep.mubr.f32.mxu1 %v263_v16  ;;  %v391_v24 = vld [vmem:[%s8909_s18 + $0x190] sm:$0xff]  ;;  %v1669_v25 = vld [vmem:[%s8909_s18 + $0x2980] sm:$0xff]  ;;  %v396_v29 = vld [vmem:[%s8909_s18 + $0x1b8] sm:$0xff] }
  0x9d   : > { %4329 = vmatprep.mubr.f32.mxu0 %v303_v19  ;;  %v1671_v27 = vld [vmem:[%s8909_s18 + $0x2990] sm:$0xff]  ;;  %v1674_v30 = vld [vmem:[%s8909_s18 + $0x29a8] sm:$0xff]  ;;  %v1676_v31 = vld [vmem:[%s8909_s18 + $0x29b8] sm:$0xff]  ;;  %v5903_v32 = vpack.c.bf16 %v391_v24, %v389_v23  ;;  %v5905_v34 = vpack.c.bf16 %v396_v29, %v394_v28 }
  0x9e   : > { %5888 = vmatpush1.bf16.msra.mxu1 %v5887_v46  ;;  %v7183_v33 = vpack.c.bf16 %v1671_v27, %v1669_v25  ;;  %v393_v35 = vld [vmem:[%s8909_s18 + $0x1a0] sm:$0xff]  ;;  %v395_v36 = vld [vmem:[%s8909_s18 + $0x1b0] sm:$0xff]  ;;  %v7185_v38 = vpack.c.bf16 %v1676_v31, %v1674_v30  ;;  %v398_v40 = vld [vmem:[%s8909_s18 + $0x1c8] sm:$0xff] }
  0x9f   : > { %7168 = vmatpush1.bf16.msra.mxu0 %v7167_v47  ;;  %5890 = vmatprep.subr.bf16.mxu1 %v5889_v48  ;;  %v1673_v37 = vld [vmem:[%s8909_s18 + $0x29a0] sm:$0xff]  ;;  %v1675_v39 = vld [vmem:[%s8909_s18 + $0x29b0] sm:$0xff]  ;;  %v400_v41 = vld [vmem:[%s8909_s18 + $0x1d8] sm:$0xff]  ;;  %v5907_v44 = vpack.c.bf16 %v395_v36, %v393_v35 }
  0xa0   : > { %7170 = vmatprep.subr.bf16.mxu0 %v7169_v52  ;;  %v1678_v42 = vld [vmem:[%s8909_s18 + $0x29c8] sm:$0xff]  ;;  %v1680_v43 = vld [vmem:[%s8909_s18 + $0x29d8] sm:$0xff]  ;;  %v7187_v45 = vpack.c.bf16 %v1675_v39, %v1673_v37  ;;  %v5909_v46 = vpack.c.bf16 %v400_v41, %v398_v40  ;;  %v397_v47 = vld [vmem:[%s8909_s18 + $0x1c0] sm:$0xff] }
  0xa1   : > { %v399_v48 = vld [vmem:[%s8909_s18 + $0x1d0] sm:$0xff]  ;;  %v1677_v49 = vld [vmem:[%s8909_s18 + $0x29c0] sm:$0xff]  ;;  %v7189_v50 = vpack.c.bf16 %v1680_v43, %v1678_v42  ;;  %v402_v52 = vld [vmem:[%s8909_s18 + $0x1e8] sm:$0xff] }
  0xa2   : > { %5892 = vmatpush1.bf16.msra.mxu1 %v5891_v58  ;;  %v1679_v51 = vld [vmem:[%s8909_s18 + $0x29d0] sm:$0xff]  ;;  %v404_v53 = vld [vmem:[%s8909_s18 + $0x1f8] sm:$0xff]  ;;  %v1682_v54 = vld [vmem:[%s8909_s18 + $0x29e8] sm:$0xff]  ;;  %v5911_v56 = vpack.c.bf16 %v399_v48, %v397_v47 }
  0xa3   : > { %7172 = vmatpush1.bf16.msra.mxu0 %v7171_v59  ;;  %5894 = vmatprep.subr.bf16.mxu1 %v5893_v60  ;;  %v1684_v55 = vld [vmem:[%s8909_s18 + $0x29f8] sm:$0xff]  ;;  %v7191_v57 = vpack.c.bf16 %v1679_v51, %v1677_v49  ;;  %v5913_v58 = vpack.c.bf16 %v404_v53, %v402_v52  ;;  %v401_v59 = vld [vmem:[%s8909_s18 + $0x1e0] sm:$0xff]  ;;  %v403_v60 = vld [vmem:[%s8909_s18 + $0x1f0] sm:$0xff] }
  0xa4   : > { %7174 = vmatprep.subr.bf16.mxu0 %v7173_v0  ;;  %v1681_v61 = vld [vmem:[%s8909_s18 + $0x29e0] sm:$0xff]  ;;  %v7193_v62 = vpack.c.bf16 %v1684_v55, %v1682_v54  ;;  %v1683_v63 = vld [vmem:[%s8909_s18 + $0x29f0] sm:$0xff]  ;;  %v406_v0 = vld [vmem:[%s8909_s18 + $0x208] sm:$0xff]  ;;  %v5915_v4 = vpack.c.bf16 %v403_v60, %v401_v59 }
  0xa5   : > { %v408_v1 = vld [vmem:[%s8909_s18 + $0x218] sm:$0xff]  ;;  %v1686_v2 = vld [vmem:[%s8909_s18 + $0x2a08] sm:$0xff]  ;;  %v7195_v5 = vpack.c.bf16 %v1683_v63, %v1681_v61  ;;  %v405_v7 = vld [vmem:[%s8909_s18 + $0x200] sm:$0xff] }
  0xa6   : > { %5896 = vmatpush1.bf16.msra.mxu1 %v5895_v6  ;;  %v1688_v3 = vld [vmem:[%s8909_s18 + $0x2a18] sm:$0xff]  ;;  %v5917_v6 = vpack.c.bf16 %v408_v1, %v406_v0  ;;  %v1687_v11 = vld [vmem:[%s8909_s18 + $0x2a10] sm:$0xff]  ;;  %v410_v12 = vld [vmem:[%s8909_s18 + $0x228] sm:$0xff] }
  0xa7   : > { %7176 = vmatpush1.bf16.msra.mxu0 %v7175_v8  ;;  %5898 = vmatprep.subr.bf16.mxu1 %v5897_v9  ;;  %v407_v8 = vld [vmem:[%s8909_s18 + $0x210] sm:$0xff]  ;;  %v1685_v9 = vld [vmem:[%s8909_s18 + $0x2a00] sm:$0xff]  ;;  %v7197_v10 = vpack.c.bf16 %v1688_v3, %v1686_v2  ;;  %v1690_v14 = vld [vmem:[%s8909_s18 + $0x2a28] sm:$0xff] }
  0xa8   : > { %7178 = vmatprep.subr.bf16.mxu0 %v7177_v13  ;;  %v412_v13 = vld [vmem:[%s8909_s18 + $0x238] sm:$0xff]  ;;  %v262_v16 = vld [vmem:[#allocation2] sm:$0xff]  ;;  %v5919_v17 = vpack.c.bf16 %v407_v8, %v405_v7  ;;  %v7199_v19 = vpack.c.bf16 %v1687_v11, %v1685_v9  ;;  %v1689_v23 = vld [vmem:[%s8909_s18 + $0x2a20] sm:$0xff] }
  0xa9   : > { %v1692_v15 = vld [vmem:[%s8909_s18 + $0x2a38] sm:$0xff]  ;;  %v302_v18 = vld [vmem:[#allocation2 + $0x140] sm:$0xff]  ;;  %v1691_v25 = vld [vmem:[%s8909_s18 + $0x2a30] sm:$0xff] }
  0xaa   : > { %5900 = vmatpush1.bf16.msra.mxu1 %v5899_v20  ;;  %v5921_v20 = vpack.c.bf16 %v412_v13, %v410_v12  ;;  %v7201_v24 = vpack.c.bf16 %v1692_v15, %v1690_v14  ;;  %v416_v27 = vld [vmem:[%s8909_s18 + $0x258] sm:$0xff]  ;;  %v1694_v28 = vld [vmem:[%s8909_s18 + $0x2a48] sm:$0xff]  ;;  %v7203_v31 = vpack.c.bf16 %v1691_v25, %v1689_v23  ;;  %v1693_v35 = vld [vmem:[%s8909_s18 + $0x2a40] sm:$0xff] }
  0xab   : > { %7180 = vmatpush1.bf16.msra.mxu0 %v7179_v21  ;;  %5902 = vmatprep.subr.bf16.mxu1 %v5901_v22  ;;  %v409_v21 = vld [vmem:[%s8909_s18 + $0x220] sm:$0xff]  ;;  %v411_v22 = vld [vmem:[%s8909_s18 + $0x230] sm:$0xff]  ;;  %v1696_v29 = vld [vmem:[%s8909_s18 + $0x2a58] sm:$0xff] }
  0xac   : > { %7182 = vmatprep.subr.bf16.mxu0 %v7181_v26  ;;  %v414_v26 = vld [vmem:[%s8909_s18 + $0x248] sm:$0xff]  ;;  %v5923_v30 = vpack.c.bf16 %v411_v22, %v409_v21  ;;  %v7205_v36 = vpack.c.bf16 %v1696_v29, %v1694_v28  ;;  %v1695_v37 = vld [vmem:[%s8909_s18 + $0x2a50] sm:$0xff]  ;;  %v420_v39 = vld [vmem:[%s8909_s18 + $0x278] sm:$0xff] }
  0xad   : > { %v1698_v40 = vld [vmem:[%s8909_s18 + $0x2a68] sm:$0xff]  ;;  %v1700_v41 = vld [vmem:[%s8909_s18 + $0x2a78] sm:$0xff]  ;;  %v7207_v43 = vpack.c.bf16 %v1695_v37, %v1693_v35  ;;  %v1697_v47 = vld [vmem:[%s8909_s18 + $0x2a60] sm:$0xff] }
  0xae   : > { %5904 = vmatpush1.bf16.msra.mxu1 %v5903_v32  ;;  %v5925_v32 = vpack.c.bf16 %v416_v27, %v414_v26  ;;  %v7209_v48 = vpack.c.bf16 %v1700_v41, %v1698_v40  ;;  %v1699_v49 = vld [vmem:[%s8909_s18 + $0x2a70] sm:$0xff]  ;;  %v424_v51 = vld [vmem:[%s8909_s18 + $0x298] sm:$0xff]  ;;  %v1702_v52 = vld [vmem:[%s8909_s18 + $0x2a88] sm:$0xff] }
  0xaf   : > { %7184 = vmatpush1.bf16.msra.mxu0 %v7183_v33  ;;  %5906 = vmatprep.subr.bf16.mxu1 %v5905_v34  ;;  %v413_v33 = vld [vmem:[%s8909_s18 + $0x240] sm:$0xff]  ;;  %v415_v34 = vld [vmem:[%s8909_s18 + $0x250] sm:$0xff]  ;;  %v1704_v53 = vld [vmem:[%s8909_s18 + $0x2a98] sm:$0xff]  ;;  %v7211_v55 = vpack.c.bf16 %v1699_v49, %v1697_v47 }
  0xb0   : > { %7186 = vmatprep.subr.bf16.mxu0 %v7185_v38  ;;  %v418_v38 = vld [vmem:[%s8909_s18 + $0x268] sm:$0xff]  ;;  %v5927_v42 = vpack.c.bf16 %v415_v34, %v413_v33  ;;  %v1701_v59 = vld [vmem:[%s8909_s18 + $0x2a80] sm:$0xff]  ;;  %v7213_v60 = vpack.c.bf16 %v1704_v53, %v1702_v52  ;;  %v1703_v61 = vld [vmem:[%s8909_s18 + $0x2a90] sm:$0xff] }
  0xb1   : > { %v428_v63 = vld [vmem:[%s8909_s18 + $0x2b8] sm:$0xff]  ;;  %v1706_v0 = vld [vmem:[%s8909_s18 + $0x2aa8] sm:$0xff]  ;;  %v7215_v3 = vpack.c.bf16 %v1703_v61, %v1701_v59  ;;  %v1705_v7 = vld [vmem:[%s8909_s18 + $0x2aa0] sm:$0xff] }
  0xb2   : > { %5908 = vmatpush1.bf16.msra.mxu1 %v5907_v44  ;;  %v5929_v44 = vpack.c.bf16 %v420_v39, %v418_v38  ;;  %v1708_v1 = vld [vmem:[%s8909_s18 + $0x2ab8] sm:$0xff]  ;;  %v1707_v9 = vld [vmem:[%s8909_s18 + $0x2ab0] sm:$0xff]  ;;  %v1710_v12 = vld [vmem:[%s8909_s18 + $0x2ac8] sm:$0xff] }
  0xb3   : > { %7188 = vmatpush1.bf16.msra.mxu0 %v7187_v45  ;;  %5910 = vmatprep.subr.bf16.mxu1 %v5909_v46  ;;  %v417_v45 = vld [vmem:[%s8909_s18 + $0x260] sm:$0xff]  ;;  %v419_v46 = vld [vmem:[%s8909_s18 + $0x270] sm:$0xff]  ;;  %v7217_v8 = vpack.c.bf16 %v1708_v1, %v1706_v0  ;;  %v432_v11 = vld [vmem:[%s8909_s18 + $0x2d8] sm:$0xff] }
  0xb4   : > { %7190 = vmatprep.subr.bf16.mxu0 %v7189_v50  ;;  %v422_v50 = vld [vmem:[%s8909_s18 + $0x288] sm:$0xff]  ;;  %v5931_v54 = vpack.c.bf16 %v419_v46, %v417_v45  ;;  %v1712_v13 = vld [vmem:[%s8909_s18 + $0x2ad8] sm:$0xff]  ;;  %v429_v15 = vld [vmem:[%s8909_s18 + $0x2c0] sm:$0xff] }
  0xb5   : > { %v7221_v21 = vpack.c.bf16 %v1712_v13, %v1710_v12  ;;  %v434_v22 = vld [vmem:[%s8909_s18 + $0x2e8] sm:$0xff]  ;;  %v436_v23 = vld [vmem:[%s8909_s18 + $0x2f8] sm:$0xff]  ;;  %v305_v27 = vld [vmem:[#allocation2 + $0x158] sm:$0xff] }
  0xb6   : > { %5912 = vmatpush1.bf16.msra.mxu1 %v5911_v56  ;;  %v5933_v56 = vpack.c.bf16 %v424_v51, %v422_v50  ;;  %v1714_v25 = vld [vmem:[%s8909_s18 + $0x2ae8] sm:$0xff]  ;;  %v1716_v26 = vld [vmem:[%s8909_s18 + $0x2af8] sm:$0xff]  ;;  %v1713_v33 = vld [vmem:[%s8909_s18 + $0x2ae0] sm:$0xff] }
  0xb7   : > { %7192 = vmatpush1.bf16.msra.mxu0 %v7191_v57  ;;  %5914 = vmatprep.subr.bf16.mxu1 %v5913_v58  ;;  %v421_v57 = vld [vmem:[%s8909_s18 + $0x280] sm:$0xff]  ;;  %v423_v58 = vld [vmem:[%s8909_s18 + $0x290] sm:$0xff]  ;;  %v7225_v34 = vpack.c.bf16 %v1716_v26, %v1714_v25  ;;  %v440_v37 = vld [vmem:[%s8909_s18 + $0x318] sm:$0xff] }
  0xb8   : > { %7194 = vmatprep.subr.bf16.mxu0 %v7193_v62  ;;  %v426_v62 = vld [vmem:[%s8909_s18 + $0x2a8] sm:$0xff]  ;;  %v5935_v2 = vpack.c.bf16 %v423_v58, %v421_v57  ;;  %v1715_v35 = vld [vmem:[%s8909_s18 + $0x2af0] sm:$0xff]  ;;  %v1720_v39 = vld [vmem:[%s8909_s18 + $0x2b18] sm:$0xff] }
  0xb9   : > { %v1718_v38 = vld [vmem:[%s8909_s18 + $0x2b08] sm:$0xff]  ;;  %v7227_v41 = vpack.c.bf16 %v1715_v35, %v1713_v33  ;;  %v1717_v45 = vld [vmem:[%s8909_s18 + $0x2b00] sm:$0xff]  ;;  %v1719_v47 = vld [vmem:[%s8909_s18 + $0x2b10] sm:$0xff] }
  0xba   : > { %5916 = vmatpush1.bf16.msra.mxu1 %v5915_v4  ;;  %v5937_v4 = vpack.c.bf16 %v428_v63, %v426_v62  ;;  %v7229_v46 = vpack.c.bf16 %v1720_v39, %v1718_v38  ;;  %v444_v49 = vld [vmem:[%s8909_s18 + $0x338] sm:$0xff]  ;;  %v1722_v50 = vld [vmem:[%s8909_s18 + $0x2b28] sm:$0xff]  ;;  %v7231_v53 = vpack.c.bf16 %v1719_v47, %v1717_v45  ;;  %v1721_v57 = vld [vmem:[%s8909_s18 + $0x2b20] sm:$0xff] }
  0xbb   : > { %7196 = vmatpush1.bf16.msra.mxu0 %v7195_v5  ;;  %5918 = vmatprep.subr.bf16.mxu1 %v5917_v6  ;;  %v425_v5 = vld [vmem:[%s8909_s18 + $0x2a0] sm:$0xff]  ;;  %v427_v6 = vld [vmem:[%s8909_s18 + $0x2b0] sm:$0xff]  ;;  %v1724_v51 = vld [vmem:[%s8909_s18 + $0x2b38] sm:$0xff] }
  0xbc   : > { %7198 = vmatprep.subr.bf16.mxu0 %v7197_v10  ;;  %v430_v10 = vld [vmem:[%s8909_s18 + $0x2c8] sm:$0xff]  ;;  %v5939_v14 = vpack.c.bf16 %v427_v6, %v425_v5  ;;  %v7233_v58 = vpack.c.bf16 %v1724_v51, %v1722_v50  ;;  %v1723_v59 = vld [vmem:[%s8909_s18 + $0x2b30] sm:$0xff]  ;;  %v448_v61 = vld [vmem:[%s8909_s18 + $0x358] sm:$0xff] }
  0xbd   : > { %2910 = vmatmul.mubr.f32.vlgmr.msra.gmra.mrb[0].mxu1 %v262_v16  ;;  %v7219_v16 = vpack.c.bf16 %v1707_v9, %v1705_v7  ;;  %v1726_v62 = vld [vmem:[%s8909_s18 + $0x2b48] sm:$0xff]  ;;  %v1728_v63 = vld [vmem:[%s8909_s18 + $0x2b58] sm:$0xff]  ;;  %v7235_v1 = vpack.c.bf16 %v1723_v59, %v1721_v57  ;;  %v1725_v5 = vld [vmem:[%s8909_s18 + $0x2b40] sm:$0xff] }
  0xbe   : > { %5920 = vmatpush1.bf16.msra.mxu1 %v5919_v17  ;;  %4330 = vmatmul.mubr.f32.vlgmr.msra.gmra.mrb[0].mxu0 %v302_v18  ;;  %v5941_v17 = vpack.c.bf16 %v432_v11, %v430_v10  ;;  %v431_v18 = vld [vmem:[%s8909_s18 + $0x2d0] sm:$0xff]  ;;  %v7237_v6 = vpack.c.bf16 %v1728_v63, %v1726_v62  ;;  %v452_v9 = vld [vmem:[%s8909_s18 + $0x378] sm:$0xff]  ;;  %v1730_v10 = vld [vmem:[%s8909_s18 + $0x2b68] sm:$0xff] }
  0xbf   : > { %7200 = vmatpush1.bf16.msra.mxu0 %v7199_v19  ;;  %5922 = vmatprep.subr.bf16.mxu1 %v5921_v20  ;;  %v1709_v19 = vld [vmem:[%s8909_s18 + $0x2ac0] sm:$0xff]  ;;  %v1711_v20 = vld [vmem:[%s8909_s18 + $0x2ad0] sm:$0xff]  ;;  %v5943_v28 = vpack.c.bf16 %v431_v18, %v429_v15  ;;  %v1732_v11 = vld [vmem:[%s8909_s18 + $0x2b78] sm:$0xff] }
  0xc0   : > { %7202 = vmatprep.subr.bf16.mxu0 %v7201_v24  ;;  %v265_v24 = vld [vmem:[#allocation2 + $0x18] sm:$0xff]  ;;  %4400 = vmatprep.mubr.f32.mxu0 %v305_v27  ;;  %v7223_v29 = vpack.c.bf16 %v1711_v20, %v1709_v19  ;;  %v1727_v7 = vld [vmem:[%s8909_s18 + $0x2b50] sm:$0xff]  ;;  %v7241_v18 = vpack.c.bf16 %v1732_v11, %v1730_v10  ;;  %v454_v20 = vld [vmem:[%s8909_s18 + $0x388] sm:$0xff] }
  0xc1   : > { %2980 = vmatprep.mubr.f32.mxu1 %v265_v24  ;;  %v7239_v13 = vpack.c.bf16 %v1727_v7, %v1725_v5  ;;  %v449_v15 = vld [vmem:[%s8909_s18 + $0x360] sm:$0xff]  ;;  %v1731_v19 = vld [vmem:[%s8909_s18 + $0x2b70] sm:$0xff]  ;;  %v460_v33 = vld [vmem:[%s8909_s18 + $0x3b8] sm:$0xff] }
  0xc2   : > { %5924 = vmatpush1.bf16.msra.mxu1 %v5923_v30  ;;  %v5945_v30 = vpack.c.bf16 %v436_v23, %v434_v22  ;;  %v1734_v22 = vld [vmem:[%s8909_s18 + $0x2b88] sm:$0xff]  ;;  %v1736_v23 = vld [vmem:[%s8909_s18 + $0x2b98] sm:$0xff]  ;;  %v453_v27 = vld [vmem:[%s8909_s18 + $0x380] sm:$0xff] }
  0xc3   : > { %7204 = vmatpush1.bf16.msra.mxu0 %v7203_v31  ;;  %5926 = vmatprep.subr.bf16.mxu1 %v5925_v32  ;;  %v433_v31 = vld [vmem:[%s8909_s18 + $0x2e0] sm:$0xff]  ;;  %v435_v32 = vld [vmem:[%s8909_s18 + $0x2f0] sm:$0xff]  ;;  %v1740_v35 = vld [vmem:[%s8909_s18 + $0x2bb8] sm:$0xff] }
  0xc4   : > { %7206 = vmatprep.subr.bf16.mxu0 %v7205_v36  ;;  %v438_v36 = vld [vmem:[%s8909_s18 + $0x308] sm:$0xff]  ;;  %v5947_v40 = vpack.c.bf16 %v435_v32, %v433_v31  ;;  %v1735_v31 = vld [vmem:[%s8909_s18 + $0x2b90] sm:$0xff]  ;;  %v457_v39 = vld [vmem:[%s8909_s18 + $0x3a0] sm:$0xff] }
  0xc5   : > { %v458_v32 = vld [vmem:[%s8909_s18 + $0x3a8] sm:$0xff]  ;;  %v464_v45 = vld [vmem:[%s8909_s18 + $0x3d8] sm:$0xff]  ;;  %v461_v51 = vld [vmem:[%s8909_s18 + $0x3c0] sm:$0xff] }
  0xc6   : > { %5928 = vmatpush1.bf16.msra.mxu1 %v5927_v42  ;;  %v5949_v42 = vpack.c.bf16 %v440_v37, %v438_v36  ;;  %v5969_v38 = vpack.c.bf16 %v460_v33, %v458_v32  ;;  %v1744_v47 = vld [vmem:[%s8909_s18 + $0x2bd8] sm:$0xff]  ;;  %v465_v63 = vld [vmem:[%s8909_s18 + $0x3e0] sm:$0xff]  ;;  %v1758_v32 = vld [vmem:[%s8909_s18 + $0x2c48] sm:$0xff] }
  0xc7   : > { %7208 = vmatpush1.bf16.msra.mxu0 %v7207_v43  ;;  %5930 = vmatprep.subr.bf16.mxu1 %v5929_v44  ;;  %v437_v43 = vld [vmem:[%s8909_s18 + $0x300] sm:$0xff]  ;;  %v439_v44 = vld [vmem:[%s8909_s18 + $0x310] sm:$0xff]  ;;  %v468_v57 = vld [vmem:[%s8909_s18 + $0x3f8] sm:$0xff] }
  0xc8   : > { %7210 = vmatprep.subr.bf16.mxu0 %v7209_v48  ;;  %v442_v48 = vld [vmem:[%s8909_s18 + $0x328] sm:$0xff]  ;;  %v5951_v52 = vpack.c.bf16 %v439_v44, %v437_v43  ;;  %v1739_v43 = vld [vmem:[%s8909_s18 + $0x2bb0] sm:$0xff]  ;;  %v1748_v59 = vld [vmem:[%s8909_s18 + $0x2bf8] sm:$0xff] }
  0xc9   : > { %v462_v44 = vld [vmem:[%s8909_s18 + $0x3c8] sm:$0xff]  ;;  %v472_v5 = vld [vmem:[%s8909_s18 + $0x418] sm:$0xff]  ;;  %v469_v11 = vld [vmem:[%s8909_s18 + $0x400] sm:$0xff] }
  0xca   : > { %5932 = vmatpush1.bf16.msra.mxu1 %v5931_v54  ;;  %v5953_v54 = vpack.c.bf16 %v444_v49, %v442_v48  ;;  %v5973_v50 = vpack.c.bf16 %v464_v45, %v462_v44  ;;  %v1752_v7 = vld [vmem:[%s8909_s18 + $0x2c18] sm:$0xff]  ;;  %v482_v44 = vld [vmem:[%s8909_s18 + $0x468] sm:$0xff] }
  0xcb   : > { %7212 = vmatpush1.bf16.msra.mxu0 %v7211_v55  ;;  %5934 = vmatprep.subr.bf16.mxu1 %v5933_v56  ;;  %v441_v55 = vld [vmem:[%s8909_s18 + $0x320] sm:$0xff]  ;;  %v443_v56 = vld [vmem:[%s8909_s18 + $0x330] sm:$0xff]  ;;  %v1760_v33 = vld [vmem:[%s8909_s18 + $0x2c58] sm:$0xff] }
  0xcc   : > { %7214 = vmatprep.subr.bf16.mxu0 %v7213_v60  ;;  %v446_v60 = vld [vmem:[%s8909_s18 + $0x348] sm:$0xff]  ;;  %v5955_v0 = vpack.c.bf16 %v443_v56, %v441_v55  ;;  %v1743_v55 = vld [vmem:[%s8909_s18 + $0x2bd0] sm:$0xff]  ;;  %v484_v45 = vld [vmem:[%s8909_s18 + $0x478] sm:$0xff] }
  0xcd   : > { %v466_v56 = vld [vmem:[%s8909_s18 + $0x3e8] sm:$0xff] }
  0xce   : > { %5936 = vmatpush1.bf16.msra.mxu1 %v5935_v2  ;;  %v5957_v2 = vpack.c.bf16 %v448_v61, %v446_v60  ;;  %v5977_v62 = vpack.c.bf16 %v468_v57, %v466_v56  ;;  %v486_v56 = vld [vmem:[%s8909_s18 + $0x488] sm:$0xff]  ;;  %v488_v57 = vld [vmem:[%s8909_s18 + $0x498] sm:$0xff] }
  0xcf   : > { %7216 = vmatpush1.bf16.msra.mxu0 %v7215_v3  ;;  %5938 = vmatprep.subr.bf16.mxu1 %v5937_v4  ;;  %v445_v3 = vld [vmem:[%s8909_s18 + $0x340] sm:$0xff]  ;;  %v447_v4 = vld [vmem:[%s8909_s18 + $0x350] sm:$0xff] }
  0xd0   : > { %7218 = vmatprep.subr.bf16.mxu0 %v7217_v8  ;;  %v450_v8 = vld [vmem:[%s8909_s18 + $0x368] sm:$0xff]  ;;  %v5959_v12 = vpack.c.bf16 %v447_v4, %v445_v3  ;;  %v1747_v3 = vld [vmem:[%s8909_s18 + $0x2bf0] sm:$0xff] }
  0xd1   : > { %v470_v4 = vld [vmem:[%s8909_s18 + $0x408] sm:$0xff] }
  0xd2   : > { %5940 = vmatpush1.bf16.msra.mxu1 %v5939_v14  ;;  %v5961_v14 = vpack.c.bf16 %v452_v9, %v450_v8  ;;  %v5981_v10 = vpack.c.bf16 %v472_v5, %v470_v4  ;;  %v490_v4 = vld [vmem:[%s8909_s18 + $0x4a8] sm:$0xff]  ;;  %v492_v5 = vld [vmem:[%s8909_s18 + $0x4b8] sm:$0xff] }
  0xd3   : > { %7220 = vmatpush1.bf16.msra.mxu0 %v7219_v16  ;;  %5942 = vmatprep.subr.bf16.mxu1 %v5941_v17  ;;  %v451_v16 = vld [vmem:[%s8909_s18 + $0x370] sm:$0xff]  ;;  %v1729_v17 = vld [vmem:[%s8909_s18 + $0x2b60] sm:$0xff] }
  0xd4   : > { %7222 = vmatprep.subr.bf16.mxu0 %v7221_v21  ;;  %v456_v21 = vld [vmem:[%s8909_s18 + $0x398] sm:$0xff]  ;;  %v5963_v24 = vpack.c.bf16 %v451_v16, %v449_v15  ;;  %v7243_v25 = vpack.c.bf16 %v1731_v19, %v1729_v17  ;;  %v1751_v15 = vld [vmem:[%s8909_s18 + $0x2c10] sm:$0xff]  ;;  %v474_v16 = vld [vmem:[%s8909_s18 + $0x428] sm:$0xff] }
  0xd5   : > { %v5965_v26 = vpack.c.bf16 %v456_v21, %v454_v20  ;;  %v476_v17 = vld [vmem:[%s8909_s18 + $0x438] sm:$0xff] }
  0xd6   : > { %5944 = vmatpush1.bf16.msra.mxu1 %v5943_v28  ;;  %v455_v28 = vld [vmem:[%s8909_s18 + $0x390] sm:$0xff]  ;;  %v1756_v19 = vld [vmem:[%s8909_s18 + $0x2c38] sm:$0xff] }
  0xd7   : > { %7224 = vmatpush1.bf16.msra.mxu0 %v7223_v29  ;;  %5946 = vmatprep.subr.bf16.mxu1 %v5945_v30  ;;  %v1733_v29 = vld [vmem:[%s8909_s18 + $0x2b80] sm:$0xff]  ;;  %v7245_v30 = vpack.c.bf16 %v1736_v23, %v1734_v22  ;;  %v5967_v36 = vpack.c.bf16 %v455_v28, %v453_v27  ;;  %v264_v20 = vld [vmem:[#allocation2 + $0x10] sm:$0xff] }
  0xd8   : > { %7226 = vmatprep.subr.bf16.mxu0 %v7225_v34  ;;  %v1738_v34 = vld [vmem:[%s8909_s18 + $0x2ba8] sm:$0xff]  ;;  %v7247_v37 = vpack.c.bf16 %v1735_v31, %v1733_v29  ;;  %v304_v22 = vld [vmem:[#allocation2 + $0x150] sm:$0xff]  ;;  %v1753_v27 = vld [vmem:[%s8909_s18 + $0x2c20] sm:$0xff] }
  0xd9   : > { %v1755_v29 = vld [vmem:[%s8909_s18 + $0x2c30] sm:$0xff]  ;;  %v480_v31 = vld [vmem:[%s8909_s18 + $0x458] sm:$0xff] }
  0xda   : > { %5948 = vmatpush1.bf16.msra.mxu1 %v5947_v40  ;;  %v459_v40 = vld [vmem:[%s8909_s18 + $0x3b0] sm:$0xff] }
  0xdb   : > { %7228 = vmatpush1.bf16.msra.mxu0 %v7227_v41  ;;  %5950 = vmatprep.subr.bf16.mxu1 %v5949_v42  ;;  %v1737_v41 = vld [vmem:[%s8909_s18 + $0x2ba0] sm:$0xff]  ;;  %v7249_v42 = vpack.c.bf16 %v1740_v35, %v1738_v34  ;;  %v5971_v48 = vpack.c.bf16 %v459_v40, %v457_v39  ;;  %v267_v34 = vld [vmem:[#allocation2 + $0x28] sm:$0xff] }
  0xdc   : > { %7230 = vmatprep.subr.bf16.mxu0 %v7229_v46  ;;  %v1742_v46 = vld [vmem:[%s8909_s18 + $0x2bc8] sm:$0xff]  ;;  %v7251_v49 = vpack.c.bf16 %v1739_v43, %v1737_v41  ;;  %v477_v39 = vld [vmem:[%s8909_s18 + $0x440] sm:$0xff]  ;;  %v479_v40 = vld [vmem:[%s8909_s18 + $0x450] sm:$0xff] }
  0xdd   : > { %v1757_v41 = vld [vmem:[%s8909_s18 + $0x2c40] sm:$0xff]  ;;  %v1759_v43 = vld [vmem:[%s8909_s18 + $0x2c50] sm:$0xff] }
  0xde   : > { %5952 = vmatpush1.bf16.msra.mxu1 %v5951_v52  ;;  %v463_v52 = vld [vmem:[%s8909_s18 + $0x3d0] sm:$0xff] }
  0xdf   : > { %7232 = vmatpush1.bf16.msra.mxu0 %v7231_v53  ;;  %5954 = vmatprep.subr.bf16.mxu1 %v5953_v54  ;;  %v1741_v53 = vld [vmem:[%s8909_s18 + $0x2bc0] sm:$0xff]  ;;  %v7253_v54 = vpack.c.bf16 %v1744_v47, %v1742_v46  ;;  %v5975_v60 = vpack.c.bf16 %v463_v52, %v461_v51  ;;  %v1762_v46 = vld [vmem:[%s8909_s18 + $0x2c68] sm:$0xff]  ;;  %v1764_v47 = vld [vmem:[%s8909_s18 + $0x2c78] sm:$0xff] }
  0xe0   : > { %7234 = vmatprep.subr.bf16.mxu0 %v7233_v58  ;;  %v1746_v58 = vld [vmem:[%s8909_s18 + $0x2be8] sm:$0xff]  ;;  %v7255_v61 = vpack.c.bf16 %v1743_v55, %v1741_v53  ;;  %v481_v51 = vld [vmem:[%s8909_s18 + $0x460] sm:$0xff]  ;;  %v483_v52 = vld [vmem:[%s8909_s18 + $0x470] sm:$0xff] }
  0xe1   : > { %v1761_v53 = vld [vmem:[%s8909_s18 + $0x2c60] sm:$0xff]  ;;  %v1763_v55 = vld [vmem:[%s8909_s18 + $0x2c70] sm:$0xff] }
  0xe2   : > { %5956 = vmatpush1.bf16.msra.mxu1 %v5955_v0  ;;  %v467_v0 = vld [vmem:[%s8909_s18 + $0x3f0] sm:$0xff] }
  0xe3   : > { %7236 = vmatpush1.bf16.msra.mxu0 %v7235_v1  ;;  %5958 = vmatprep.subr.bf16.mxu1 %v5957_v2  ;;  %v1745_v1 = vld [vmem:[%s8909_s18 + $0x2be0] sm:$0xff]  ;;  %v7257_v2 = vpack.c.bf16 %v1748_v59, %v1746_v58  ;;  %v5979_v8 = vpack.c.bf16 %v467_v0, %v465_v63  ;;  %v1766_v58 = vld [vmem:[%s8909_s18 + $0x2c88] sm:$0xff]  ;;  %v1768_v59 = vld [vmem:[%s8909_s18 + $0x2c98] sm:$0xff] }
  0xe4   : > { %7238 = vmatprep.subr.bf16.mxu0 %v7237_v6  ;;  %v1750_v6 = vld [vmem:[%s8909_s18 + $0x2c08] sm:$0xff]  ;;  %v7259_v9 = vpack.c.bf16 %v1747_v3, %v1745_v1  ;;  %v485_v63 = vld [vmem:[%s8909_s18 + $0x480] sm:$0xff]  ;;  %v487_v0 = vld [vmem:[%s8909_s18 + $0x490] sm:$0xff] }
  0xe5   : > { %v1765_v1 = vld [vmem:[%s8909_s18 + $0x2c80] sm:$0xff]  ;;  %v1767_v3 = vld [vmem:[%s8909_s18 + $0x2c90] sm:$0xff] }
  0xe6   : > { %5960 = vmatpush1.bf16.msra.mxu1 %v5959_v12  ;;  %v471_v12 = vld [vmem:[%s8909_s18 + $0x410] sm:$0xff] }
  0xe7   : > { %7240 = vmatpush1.bf16.msra.mxu0 %v7239_v13  ;;  %5962 = vmatprep.subr.bf16.mxu1 %v5961_v14  ;;  %v1749_v13 = vld [vmem:[%s8909_s18 + $0x2c00] sm:$0xff]  ;;  %v7261_v14 = vpack.c.bf16 %v1752_v7, %v1750_v6  ;;  %v5983_v21 = vpack.c.bf16 %v471_v12, %v469_v11  ;;  %v1770_v6 = vld [vmem:[%s8909_s18 + $0x2ca8] sm:$0xff]  ;;  %v1772_v7 = vld [vmem:[%s8909_s18 + $0x2cb8] sm:$0xff] }
  0xe8   : > { %7242 = vmatprep.subr.bf16.mxu0 %v7241_v18  ;;  %v1754_v18 = vld [vmem:[%s8909_s18 + $0x2c28] sm:$0xff]  ;;  %v7263_v23 = vpack.c.bf16 %v1751_v15, %v1749_v13  ;;  %v489_v11 = vld [vmem:[%s8909_s18 + $0x4a0] sm:$0xff]  ;;  %v491_v12 = vld [vmem:[%s8909_s18 + $0x4b0] sm:$0xff] }
  0xe9   : > { %v7265_v28 = vpack.c.bf16 %v1756_v19, %v1754_v18  ;;  %v1769_v13 = vld [vmem:[%s8909_s18 + $0x2ca0] sm:$0xff]  ;;  %v1771_v15 = vld [vmem:[%s8909_s18 + $0x2cb0] sm:$0xff]  ;;  %v1774_v18 = vld [vmem:[%s8909_s18 + $0x2cc8] sm:$0xff] }
  0xea   : > { %5964 = vmatpush1.bf16.msra.mxu1 %v5963_v24  ;;  %v5985_v24 = vpack.c.bf16 %v476_v17, %v474_v16  ;;  %v494_v16 = vld [vmem:[%s8909_s18 + $0x4c8] sm:$0xff]  ;;  %v496_v17 = vld [vmem:[%s8909_s18 + $0x4d8] sm:$0xff] }
  0xeb   : > { %7244 = vmatpush1.bf16.msra.mxu0 %v7243_v25  ;;  %5966 = vmatprep.subr.bf16.mxu1 %v5965_v26  ;;  %v473_v25 = vld [vmem:[%s8909_s18 + $0x420] sm:$0xff]  ;;  %v475_v26 = vld [vmem:[%s8909_s18 + $0x430] sm:$0xff]  ;;  %v1776_v19 = vld [vmem:[%s8909_s18 + $0x2cd8] sm:$0xff] }
  0xec   : > { %7246 = vmatprep.subr.bf16.mxu0 %v7245_v30  ;;  %v478_v30 = vld [vmem:[%s8909_s18 + $0x448] sm:$0xff]  ;;  %v5987_v35 = vpack.c.bf16 %v475_v26, %v473_v25  ;;  %v1773_v25 = vld [vmem:[%s8909_s18 + $0x2cc0] sm:$0xff]  ;;  %v7285_v26 = vpack.c.bf16 %v1776_v19, %v1774_v18 }
  0xed   : > { %v513_v19 = vld [vmem:[%s8909_s18 + $0x560] sm:$0xff] }
  0xee   : > { %5968 = vmatpush1.bf16.msra.mxu1 %v5967_v36  ;;  %v307_v36 = vld [vmem:[#allocation2 + $0x168] sm:$0xff] }
  0xef   : > { %7248 = vmatpush1.bf16.msra.mxu0 %v7247_v37  ;;  %5970 = vmatprep.subr.bf16.mxu1 %v5969_v38  ;;  %v7267_v37 = vpack.c.bf16 %v1755_v29, %v1753_v27  ;;  %v5989_v38 = vpack.c.bf16 %v480_v31, %v478_v30  ;;  %v1775_v27 = vld [vmem:[%s8909_s18 + $0x2cd0] sm:$0xff]  ;;  %v500_v29 = vld [vmem:[%s8909_s18 + $0x4f8] sm:$0xff]  ;;  %v1778_v30 = vld [vmem:[%s8909_s18 + $0x2ce8] sm:$0xff] }
  0xf0   : > { %7250 = vmatprep.subr.bf16.mxu0 %v7249_v42  ;;  %v7269_v42 = vpack.c.bf16 %v1760_v33, %v1758_v32  ;;  %v1780_v31 = vld [vmem:[%s8909_s18 + $0x2cf8] sm:$0xff]  ;;  %v7287_v33 = vpack.c.bf16 %v1775_v27, %v1773_v25 }
  0xf1   : > { %v520_v25 = vld [vmem:[%s8909_s18 + $0x598] sm:$0xff] }
  0xf2   : > { %5972 = vmatpush1.bf16.msra.mxu1 %v5971_v48  ;;  %v5991_v48 = vpack.c.bf16 %v479_v40, %v477_v39  ;;  %v1779_v39 = vld [vmem:[%s8909_s18 + $0x2cf0] sm:$0xff]  ;;  %v502_v40 = vld [vmem:[%s8909_s18 + $0x508] sm:$0xff]  ;;  %v1800_v27 = vld [vmem:[%s8909_s18 + $0x2d98] sm:$0xff] }
  0xf3   : > { %7252 = vmatpush1.bf16.msra.mxu0 %v7251_v49  ;;  %5974 = vmatprep.subr.bf16.mxu1 %v5973_v50  ;;  %v7271_v49 = vpack.c.bf16 %v1759_v43, %v1757_v41  ;;  %v5993_v50 = vpack.c.bf16 %v484_v45, %v482_v44  ;;  %v504_v41 = vld [vmem:[%s8909_s18 + $0x518] sm:$0xff] }
  0xf4   : > { %7254 = vmatprep.subr.bf16.mxu0 %v7253_v54  ;;  %v7273_v54 = vpack.c.bf16 %v1764_v47, %v1762_v46  ;;  %v1784_v43 = vld [vmem:[%s8909_s18 + $0x2d18] sm:$0xff]  ;;  %v6013_v46 = vpack.c.bf16 %v504_v41, %v502_v40  ;;  %v501_v47 = vld [vmem:[%s8909_s18 + $0x500] sm:$0xff] }
  0xf6   : > { %5976 = vmatpush1.bf16.msra.mxu1 %v5975_v60  ;;  %v5995_v60 = vpack.c.bf16 %v483_v52, %v481_v51  ;;  %v1783_v51 = vld [vmem:[%s8909_s18 + $0x2d10] sm:$0xff]  ;;  %v506_v52 = vld [vmem:[%s8909_s18 + $0x528] sm:$0xff] }
  0xf7   : > { %7256 = vmatpush1.bf16.msra.mxu0 %v7255_v61  ;;  %5978 = vmatprep.subr.bf16.mxu1 %v5977_v62  ;;  %v7275_v61 = vpack.c.bf16 %v1763_v55, %v1761_v53  ;;  %v5997_v62 = vpack.c.bf16 %v488_v57, %v486_v56  ;;  %v508_v53 = vld [vmem:[%s8909_s18 + $0x538] sm:$0xff] }
  0xf8   : > { %7258 = vmatprep.subr.bf16.mxu0 %v7257_v2  ;;  %v7277_v2 = vpack.c.bf16 %v1768_v59, %v1766_v58  ;;  %v1788_v55 = vld [vmem:[%s8909_s18 + $0x2d38] sm:$0xff]  ;;  %v6017_v58 = vpack.c.bf16 %v508_v53, %v506_v52  ;;  %v505_v59 = vld [vmem:[%s8909_s18 + $0x520] sm:$0xff] }
  0xfa   : > { %5980 = vmatpush1.bf16.msra.mxu1 %v5979_v8  ;;  %v5999_v8 = vpack.c.bf16 %v487_v0, %v485_v63  ;;  %v1787_v63 = vld [vmem:[%s8909_s18 + $0x2d30] sm:$0xff]  ;;  %v510_v0 = vld [vmem:[%s8909_s18 + $0x548] sm:$0xff] }
  0xfb   : > { %7260 = vmatpush1.bf16.msra.mxu0 %v7259_v9  ;;  %5982 = vmatprep.subr.bf16.mxu1 %v5981_v10  ;;  %v7279_v9 = vpack.c.bf16 %v1767_v3, %v1765_v1  ;;  %v6001_v10 = vpack.c.bf16 %v492_v5, %v490_v4  ;;  %v512_v1 = vld [vmem:[%s8909_s18 + $0x558] sm:$0xff] }
  0xfc   : > { %7262 = vmatprep.subr.bf16.mxu0 %v7261_v14  ;;  %v7281_v14 = vpack.c.bf16 %v1772_v7, %v1770_v6  ;;  %v1792_v3 = vld [vmem:[%s8909_s18 + $0x2d58] sm:$0xff]  ;;  %v6021_v6 = vpack.c.bf16 %v512_v1, %v510_v0  ;;  %v509_v7 = vld [vmem:[%s8909_s18 + $0x540] sm:$0xff] }
  0xfd   : > { %2981 = vmatmul.mubr.f32.vlgmr.msra.gmra.mrb[0].mxu1 %v264_v20  ;;  %v6003_v20 = vpack.c.bf16 %v491_v12, %v489_v11  ;;  %v1791_v11 = vld [vmem:[%s8909_s18 + $0x2d50] sm:$0xff]  ;;  %v514_v12 = vld [vmem:[%s8909_s18 + $0x568] sm:$0xff] }
  0xfe   : > { %5984 = vmatpush1.bf16.msra.mxu1 %v5983_v21  ;;  %4401 = vmatmul.mubr.f32.vlgmr.msra.gmra.mrb[0].mxu0 %v304_v22  ;;  %v7283_v21 = vpack.c.bf16 %v1771_v15, %v1769_v13  ;;  %v6005_v22 = vpack.c.bf16 %v496_v17, %v494_v16  ;;  %v516_v13 = vld [vmem:[%s8909_s18 + $0x578] sm:$0xff] }
  0xff   : > { %7264 = vmatpush1.bf16.msra.mxu0 %v7263_v23  ;;  %5986 = vmatprep.subr.bf16.mxu1 %v5985_v24  ;;  %v493_v23 = vld [vmem:[%s8909_s18 + $0x4c0] sm:$0xff]  ;;  %v495_v24 = vld [vmem:[%s8909_s18 + $0x4d0] sm:$0xff]  ;;  %v1796_v15 = vld [vmem:[%s8909_s18 + $0x2d78] sm:$0xff]  ;;  %v6025_v18 = vpack.c.bf16 %v516_v13, %v514_v12 }
 0x100   : > { %7266 = vmatprep.subr.bf16.mxu0 %v7265_v28  ;;  %3051 = vmatprep.mubr.f32.mxu1 %v267_v34  ;;  %v498_v28 = vld [vmem:[%s8909_s18 + $0x4e8] sm:$0xff]  ;;  %v6007_v32 = vpack.c.bf16 %v495_v24, %v493_v23  ;;  %v1795_v23 = vld [vmem:[%s8909_s18 + $0x2d70] sm:$0xff] }
 0x101   : > { %4471 = vmatprep.mubr.f32.mxu0 %v307_v36  ;;  %v6009_v34 = vpack.c.bf16 %v500_v29, %v498_v28  ;;  %v499_v36 = vld [vmem:[%s8909_s18 + $0x4f0] sm:$0xff]  ;;  %v518_v24 = vld [vmem:[%s8909_s18 + $0x588] sm:$0xff] }
 0x102   : > { %5988 = vmatpush1.bf16.msra.mxu1 %v5987_v35  ;;  %v497_v35 = vld [vmem:[%s8909_s18 + $0x4e0] sm:$0xff] }
 0x103   : > { %7268 = vmatpush1.bf16.msra.mxu0 %v7267_v37  ;;  %5990 = vmatprep.subr.bf16.mxu1 %v5989_v38  ;;  %v1777_v37 = vld [vmem:[%s8909_s18 + $0x2ce0] sm:$0xff]  ;;  %v7289_v38 = vpack.c.bf16 %v1780_v31, %v1778_v30  ;;  %v6011_v44 = vpack.c.bf16 %v499_v36, %v497_v35  ;;  %v6029_v30 = vpack.c.bf16 %v520_v25, %v518_v24  ;;  %v1799_v35 = vld [vmem:[%s8909_s18 + $0x2d90] sm:$0xff]  ;;  %v522_v36 = vld [vmem:[%s8909_s18 + $0x5a8] sm:$0xff] }
 0x104   : > { %7270 = vmatprep.subr.bf16.mxu0 %v7269_v42  ;;  %v1782_v42 = vld [vmem:[%s8909_s18 + $0x2d08] sm:$0xff]  ;;  %v7291_v45 = vpack.c.bf16 %v1779_v39, %v1777_v37  ;;  %v517_v31 = vld [vmem:[%s8909_s18 + $0x580] sm:$0xff]  ;;  %v524_v37 = vld [vmem:[%s8909_s18 + $0x5b8] sm:$0xff] }
 0x105   : > { %v1804_v39 = vld [vmem:[%s8909_s18 + $0x2db8] sm:$0xff]  ;;  %v266_v24 = vld [vmem:[#allocation2 + $0x20] sm:$0xff] }
 0x106   : > { %5992 = vmatpush1.bf16.msra.mxu1 %v5991_v48  ;;  %v503_v48 = vld [vmem:[%s8909_s18 + $0x510] sm:$0xff] }
 0x107   : > { %7272 = vmatpush1.bf16.msra.mxu0 %v7271_v49  ;;  %5994 = vmatprep.subr.bf16.mxu1 %v5993_v50  ;;  %v1781_v49 = vld [vmem:[%s8909_s18 + $0x2d00] sm:$0xff]  ;;  %v7293_v50 = vpack.c.bf16 %v1784_v43, %v1782_v42  ;;  %v6015_v56 = vpack.c.bf16 %v503_v48, %v501_v47  ;;  %v6033_v42 = vpack.c.bf16 %v524_v37, %v522_v36  ;;  %v1803_v47 = vld [vmem:[%s8909_s18 + $0x2db0] sm:$0xff]  ;;  %v526_v48 = vld [vmem:[%s8909_s18 + $0x5c8] sm:$0xff] }
 0x108   : > { %7274 = vmatprep.subr.bf16.mxu0 %v7273_v54  ;;  %v1786_v54 = vld [vmem:[%s8909_s18 + $0x2d28] sm:$0xff]  ;;  %v7295_v57 = vpack.c.bf16 %v1783_v51, %v1781_v49  ;;  %v521_v43 = vld [vmem:[%s8909_s18 + $0x5a0] sm:$0xff]  ;;  %v528_v49 = vld [vmem:[%s8909_s18 + $0x5d8] sm:$0xff] }
 0x109   : > { %v1808_v51 = vld [vmem:[%s8909_s18 + $0x2dd8] sm:$0xff]  ;;  %v1822_v36 = vld [vmem:[%s8909_s18 + $0x2e48] sm:$0xff] }
 0x10a   : > { %5996 = vmatpush1.bf16.msra.mxu1 %v5995_v60  ;;  %v507_v60 = vld [vmem:[%s8909_s18 + $0x530] sm:$0xff]  ;;  %v1824_v37 = vld [vmem:[%s8909_s18 + $0x2e58] sm:$0xff] }
 0x10b   : > { %7276 = vmatpush1.bf16.msra.mxu0 %v7275_v61  ;;  %5998 = vmatprep.subr.bf16.mxu1 %v5997_v62  ;;  %v1785_v61 = vld [vmem:[%s8909_s18 + $0x2d20] sm:$0xff]  ;;  %v7297_v62 = vpack.c.bf16 %v1788_v55, %v1786_v54  ;;  %v6019_v4 = vpack.c.bf16 %v507_v60, %v505_v59  ;;  %v6037_v54 = vpack.c.bf16 %v528_v49, %v526_v48  ;;  %v1807_v59 = vld [vmem:[%s8909_s18 + $0x2dd0] sm:$0xff]  ;;  %v530_v60 = vld [vmem:[%s8909_s18 + $0x5e8] sm:$0xff] }
 0x10c   : > { %7278 = vmatprep.subr.bf16.mxu0 %v7277_v2  ;;  %v1790_v2 = vld [vmem:[%s8909_s18 + $0x2d48] sm:$0xff]  ;;  %v7299_v5 = vpack.c.bf16 %v1787_v63, %v1785_v61  ;;  %v525_v55 = vld [vmem:[%s8909_s18 + $0x5c0] sm:$0xff]  ;;  %v532_v61 = vld [vmem:[%s8909_s18 + $0x5f8] sm:$0xff] }
 0x10d   : > { %v1812_v63 = vld [vmem:[%s8909_s18 + $0x2df8] sm:$0xff]  ;;  %v546_v48 = vld [vmem:[%s8909_s18 + $0x668] sm:$0xff] }
 0x10e   : > { %6000 = vmatpush1.bf16.msra.mxu1 %v5999_v8  ;;  %v511_v8 = vld [vmem:[%s8909_s18 + $0x550] sm:$0xff]  ;;  %v548_v49 = vld [vmem:[%s8909_s18 + $0x678] sm:$0xff] }
 0x10f   : > { %7280 = vmatpush1.bf16.msra.mxu0 %v7279_v9  ;;  %6002 = vmatprep.subr.bf16.mxu1 %v6001_v10  ;;  %v1789_v9 = vld [vmem:[%s8909_s18 + $0x2d40] sm:$0xff]  ;;  %v7301_v10 = vpack.c.bf16 %v1792_v3, %v1790_v2  ;;  %v6023_v16 = vpack.c.bf16 %v511_v8, %v509_v7  ;;  %v6041_v2 = vpack.c.bf16 %v532_v61, %v530_v60  ;;  %v1811_v7 = vld [vmem:[%s8909_s18 + $0x2df0] sm:$0xff]  ;;  %v534_v8 = vld [vmem:[%s8909_s18 + $0x608] sm:$0xff] }
 0x110   : > { %7282 = vmatprep.subr.bf16.mxu0 %v7281_v14  ;;  %v1794_v14 = vld [vmem:[%s8909_s18 + $0x2d68] sm:$0xff]  ;;  %v7303_v17 = vpack.c.bf16 %v1791_v11, %v1789_v9  ;;  %v529_v3 = vld [vmem:[%s8909_s18 + $0x5e0] sm:$0xff]  ;;  %v536_v9 = vld [vmem:[%s8909_s18 + $0x618] sm:$0xff] }
 0x111   : > { %v1816_v11 = vld [vmem:[%s8909_s18 + $0x2e18] sm:$0xff]  ;;  %v550_v60 = vld [vmem:[%s8909_s18 + $0x688] sm:$0xff] }
 0x112   : > { %6004 = vmatpush1.bf16.msra.mxu1 %v6003_v20  ;;  %v515_v20 = vld [vmem:[%s8909_s18 + $0x570] sm:$0xff]  ;;  %v552_v61 = vld [vmem:[%s8909_s18 + $0x698] sm:$0xff] }
 0x113   : > { %7284 = vmatpush1.bf16.msra.mxu0 %v7283_v21  ;;  %6006 = vmatprep.subr.bf16.mxu1 %v6005_v22  ;;  %v1793_v21 = vld [vmem:[%s8909_s18 + $0x2d60] sm:$0xff]  ;;  %v7305_v22 = vpack.c.bf16 %v1796_v15, %v1794_v14  ;;  %v6027_v28 = vpack.c.bf16 %v515_v20, %v513_v19  ;;  %v6045_v14 = vpack.c.bf16 %v536_v9, %v534_v8  ;;  %v1815_v19 = vld [vmem:[%s8909_s18 + $0x2e10] sm:$0xff]  ;;  %v538_v20 = vld [vmem:[%s8909_s18 + $0x628] sm:$0xff] }
 0x114   : > { %7286 = vmatprep.subr.bf16.mxu0 %v7285_v26  ;;  %v1798_v26 = vld [vmem:[%s8909_s18 + $0x2d88] sm:$0xff]  ;;  %v7307_v29 = vpack.c.bf16 %v1795_v23, %v1793_v21  ;;  %v533_v15 = vld [vmem:[%s8909_s18 + $0x600] sm:$0xff]  ;;  %v540_v21 = vld [vmem:[%s8909_s18 + $0x638] sm:$0xff] }
 0x115   : > { %v1820_v23 = vld [vmem:[%s8909_s18 + $0x2e38] sm:$0xff]  ;;  %v554_v8 = vld [vmem:[%s8909_s18 + $0x6a8] sm:$0xff] }
 0x116   : > { %6008 = vmatpush1.bf16.msra.mxu1 %v6007_v32  ;;  %v519_v32 = vld [vmem:[%s8909_s18 + $0x590] sm:$0xff]  ;;  %v556_v9 = vld [vmem:[%s8909_s18 + $0x6b8] sm:$0xff] }
 0x117   : > { %7288 = vmatpush1.bf16.msra.mxu0 %v7287_v33  ;;  %6010 = vmatprep.subr.bf16.mxu1 %v6009_v34  ;;  %v1797_v33 = vld [vmem:[%s8909_s18 + $0x2d80] sm:$0xff]  ;;  %v7309_v34 = vpack.c.bf16 %v1800_v27, %v1798_v26  ;;  %v6031_v40 = vpack.c.bf16 %v519_v32, %v517_v31  ;;  %v306_v26 = vld [vmem:[#allocation2 + $0x160] sm:$0xff] }
 0x118   : > { %7290 = vmatprep.subr.bf16.mxu0 %v7289_v38  ;;  %v1802_v38 = vld [vmem:[%s8909_s18 + $0x2da8] sm:$0xff]  ;;  %v7311_v41 = vpack.c.bf16 %v1799_v35, %v1797_v33  ;;  %v1817_v31 = vld [vmem:[%s8909_s18 + $0x2e20] sm:$0xff]  ;;  %v1819_v33 = vld [vmem:[%s8909_s18 + $0x2e30] sm:$0xff] }
 0x119   : > { %v544_v35 = vld [vmem:[%s8909_s18 + $0x658] sm:$0xff] }
 0x11a   : > { %6012 = vmatpush1.bf16.msra.mxu1 %v6011_v44  ;;  %v523_v44 = vld [vmem:[%s8909_s18 + $0x5b0] sm:$0xff] }
 0x11b   : > { %7292 = vmatpush1.bf16.msra.mxu0 %v7291_v45  ;;  %6014 = vmatprep.subr.bf16.mxu1 %v6013_v46  ;;  %v1801_v45 = vld [vmem:[%s8909_s18 + $0x2da0] sm:$0xff]  ;;  %v7313_v46 = vpack.c.bf16 %v1804_v39, %v1802_v38  ;;  %v6035_v52 = vpack.c.bf16 %v523_v44, %v521_v43  ;;  %v543_v44 = vld [vmem:[%s8909_s18 + $0x650] sm:$0xff] }
 0x11c   : > { %7294 = vmatprep.subr.bf16.mxu0 %v7293_v50  ;;  %v1806_v50 = vld [vmem:[%s8909_s18 + $0x2dc8] sm:$0xff]  ;;  %v7315_v53 = vpack.c.bf16 %v1803_v47, %v1801_v45  ;;  %v269_v38 = vld [vmem:[#allocation2 + $0x38] sm:$0xff]  ;;  %v1823_v47 = vld [vmem:[%s8909_s18 + $0x2e50] sm:$0xff] }
 0x11d   : > { %v541_v43 = vld [vmem:[%s8909_s18 + $0x640] sm:$0xff] }
 0x11e   : > { %6016 = vmatpush1.bf16.msra.mxu1 %v6015_v56  ;;  %v527_v56 = vld [vmem:[%s8909_s18 + $0x5d0] sm:$0xff]  ;;  %v1821_v45 = vld [vmem:[%s8909_s18 + $0x2e40] sm:$0xff] }
 0x11f   : > { %7296 = vmatpush1.bf16.msra.mxu0 %v7295_v57  ;;  %6018 = vmatprep.subr.bf16.mxu1 %v6017_v58  ;;  %v1805_v57 = vld [vmem:[%s8909_s18 + $0x2dc0] sm:$0xff]  ;;  %v7317_v58 = vpack.c.bf16 %v1808_v51, %v1806_v50  ;;  %v6039_v0 = vpack.c.bf16 %v527_v56, %v525_v55  ;;  %v1826_v50 = vld [vmem:[%s8909_s18 + $0x2e68] sm:$0xff]  ;;  %v1828_v51 = vld [vmem:[%s8909_s18 + $0x2e78] sm:$0xff] }
 0x120   : > { %7298 = vmatprep.subr.bf16.mxu0 %v7297_v62  ;;  %v1810_v62 = vld [vmem:[%s8909_s18 + $0x2de8] sm:$0xff]  ;;  %v7319_v1 = vpack.c.bf16 %v1807_v59, %v1805_v57  ;;  %v545_v55 = vld [vmem:[%s8909_s18 + $0x660] sm:$0xff]  ;;  %v547_v56 = vld [vmem:[%s8909_s18 + $0x670] sm:$0xff] }
 0x121   : > { %v1825_v57 = vld [vmem:[%s8909_s18 + $0x2e60] sm:$0xff]  ;;  %v1827_v59 = vld [vmem:[%s8909_s18 + $0x2e70] sm:$0xff] }
 0x122   : > { %6020 = vmatpush1.bf16.msra.mxu1 %v6019_v4  ;;  %v531_v4 = vld [vmem:[%s8909_s18 + $0x5f0] sm:$0xff] }
 0x123   : > { %7300 = vmatpush1.bf16.msra.mxu0 %v7299_v5  ;;  %6022 = vmatprep.subr.bf16.mxu1 %v6021_v6  ;;  %v1809_v5 = vld [vmem:[%s8909_s18 + $0x2de0] sm:$0xff]  ;;  %v7321_v6 = vpack.c.bf16 %v1812_v63, %v1810_v62  ;;  %v6043_v12 = vpack.c.bf16 %v531_v4, %v529_v3  ;;  %v1830_v62 = vld [vmem:[%s8909_s18 + $0x2e88] sm:$0xff]  ;;  %v1832_v63 = vld [vmem:[%s8909_s18 + $0x2e98] sm:$0xff] }
 0x124   : > { %7302 = vmatprep.subr.bf16.mxu0 %v7301_v10  ;;  %v1814_v10 = vld [vmem:[%s8909_s18 + $0x2e08] sm:$0xff]  ;;  %v7323_v13 = vpack.c.bf16 %v1811_v7, %v1809_v5  ;;  %v549_v3 = vld [vmem:[%s8909_s18 + $0x680] sm:$0xff]  ;;  %v551_v4 = vld [vmem:[%s8909_s18 + $0x690] sm:$0xff] }
 0x125   : > { %v1829_v5 = vld [vmem:[%s8909_s18 + $0x2e80] sm:$0xff]  ;;  %v1831_v7 = vld [vmem:[%s8909_s18 + $0x2e90] sm:$0xff] }
 0x126   : > { %6024 = vmatpush1.bf16.msra.mxu1 %v6023_v16  ;;  %v535_v16 = vld [vmem:[%s8909_s18 + $0x610] sm:$0xff] }
 0x127   : > { %7304 = vmatpush1.bf16.msra.mxu0 %v7303_v17  ;;  %6026 = vmatprep.subr.bf16.mxu1 %v6025_v18  ;;  %v1813_v17 = vld [vmem:[%s8909_s18 + $0x2e00] sm:$0xff]  ;;  %v7325_v18 = vpack.c.bf16 %v1816_v11, %v1814_v10  ;;  %v6047_v25 = vpack.c.bf16 %v535_v16, %v533_v15  ;;  %v1834_v10 = vld [vmem:[%s8909_s18 + $0x2ea8] sm:$0xff]  ;;  %v1836_v11 = vld [vmem:[%s8909_s18 + $0x2eb8] sm:$0xff] }
 0x128   : > { %7306 = vmatprep.subr.bf16.mxu0 %v7305_v22  ;;  %v1818_v22 = vld [vmem:[%s8909_s18 + $0x2e28] sm:$0xff]  ;;  %v7327_v27 = vpack.c.bf16 %v1815_v19, %v1813_v17  ;;  %v553_v15 = vld [vmem:[%s8909_s18 + $0x6a0] sm:$0xff]  ;;  %v555_v16 = vld [vmem:[%s8909_s18 + $0x6b0] sm:$0xff] }
 0x129   : > { %v7329_v32 = vpack.c.bf16 %v1820_v23, %v1818_v22  ;;  %v1833_v17 = vld [vmem:[%s8909_s18 + $0x2ea0] sm:$0xff]  ;;  %v1835_v19 = vld [vmem:[%s8909_s18 + $0x2eb0] sm:$0xff]  ;;  %v1838_v22 = vld [vmem:[%s8909_s18 + $0x2ec8] sm:$0xff] }
 0x12a   : > { %6028 = vmatpush1.bf16.msra.mxu1 %v6027_v28  ;;  %v6049_v28 = vpack.c.bf16 %v540_v21, %v538_v20  ;;  %v558_v20 = vld [vmem:[%s8909_s18 + $0x6c8] sm:$0xff]  ;;  %v560_v21 = vld [vmem:[%s8909_s18 + $0x6d8] sm:$0xff] }
 0x12b   : > { %7308 = vmatpush1.bf16.msra.mxu0 %v7307_v29  ;;  %6030 = vmatprep.subr.bf16.mxu1 %v6029_v30  ;;  %v537_v29 = vld [vmem:[%s8909_s18 + $0x620] sm:$0xff]  ;;  %v539_v30 = vld [vmem:[%s8909_s18 + $0x630] sm:$0xff]  ;;  %v1840_v23 = vld [vmem:[%s8909_s18 + $0x2ed8] sm:$0xff] }
 0x12c   : > { %7310 = vmatprep.subr.bf16.mxu0 %v7309_v34  ;;  %v542_v34 = vld [vmem:[%s8909_s18 + $0x648] sm:$0xff]  ;;  %v6051_v39 = vpack.c.bf16 %v539_v30, %v537_v29  ;;  %v1837_v29 = vld [vmem:[%s8909_s18 + $0x2ec0] sm:$0xff]  ;;  %v7349_v30 = vpack.c.bf16 %v1840_v23, %v1838_v22 }
 0x12d   : > { %v577_v23 = vld [vmem:[%s8909_s18 + $0x760] sm:$0xff] }
 0x12e   : > { %6032 = vmatpush1.bf16.msra.mxu1 %v6031_v40  ;;  %v309_v40 = vld [vmem:[#allocation2 + $0x178] sm:$0xff] }
 0x12f   : > { %7312 = vmatpush1.bf16.msra.mxu0 %v7311_v41  ;;  %6034 = vmatprep.subr.bf16.mxu1 %v6033_v42  ;;  %v7331_v41 = vpack.c.bf16 %v1819_v33, %v1817_v31  ;;  %v6053_v42 = vpack.c.bf16 %v544_v35, %v542_v34  ;;  %v1839_v31 = vld [vmem:[%s8909_s18 + $0x2ed0] sm:$0xff]  ;;  %v564_v33 = vld [vmem:[%s8909_s18 + $0x6f8] sm:$0xff]  ;;  %v1842_v34 = vld [vmem:[%s8909_s18 + $0x2ee8] sm:$0xff] }
 0x130   : > { %7314 = vmatprep.subr.bf16.mxu0 %v7313_v46  ;;  %v7333_v46 = vpack.c.bf16 %v1824_v37, %v1822_v36  ;;  %v1844_v35 = vld [vmem:[%s8909_s18 + $0x2ef8] sm:$0xff]  ;;  %v7351_v37 = vpack.c.bf16 %v1839_v31, %v1837_v29 }
 0x131   : > { %v584_v29 = vld [vmem:[%s8909_s18 + $0x798] sm:$0xff] }
 0x132   : > { %6036 = vmatpush1.bf16.msra.mxu1 %v6035_v52  ;;  %v6055_v52 = vpack.c.bf16 %v543_v44, %v541_v43  ;;  %v1843_v43 = vld [vmem:[%s8909_s18 + $0x2ef0] sm:$0xff]  ;;  %v566_v44 = vld [vmem:[%s8909_s18 + $0x708] sm:$0xff]  ;;  %v1864_v31 = vld [vmem:[%s8909_s18 + $0x2f98] sm:$0xff] }
 0x133   : > { %7316 = vmatpush1.bf16.msra.mxu0 %v7315_v53  ;;  %6038 = vmatprep.subr.bf16.mxu1 %v6037_v54  ;;  %v7335_v53 = vpack.c.bf16 %v1823_v47, %v1821_v45  ;;  %v6057_v54 = vpack.c.bf16 %v548_v49, %v546_v48  ;;  %v568_v45 = vld [vmem:[%s8909_s18 + $0x718] sm:$0xff] }
 0x134   : > { %7318 = vmatprep.subr.bf16.mxu0 %v7317_v58  ;;  %v7337_v58 = vpack.c.bf16 %v1828_v51, %v1826_v50  ;;  %v1848_v47 = vld [vmem:[%s8909_s18 + $0x2f18] sm:$0xff]  ;;  %v6077_v50 = vpack.c.bf16 %v568_v45, %v566_v44  ;;  %v565_v51 = vld [vmem:[%s8909_s18 + $0x700] sm:$0xff] }
 0x136   : > { %6040 = vmatpush1.bf16.msra.mxu1 %v6039_v0  ;;  %v6059_v0 = vpack.c.bf16 %v547_v56, %v545_v55  ;;  %v1847_v55 = vld [vmem:[%s8909_s18 + $0x2f10] sm:$0xff]  ;;  %v570_v56 = vld [vmem:[%s8909_s18 + $0x728] sm:$0xff] }
 0x137   : > { %7320 = vmatpush1.bf16.msra.mxu0 %v7319_v1  ;;  %6042 = vmatprep.subr.bf16.mxu1 %v6041_v2  ;;  %v7339_v1 = vpack.c.bf16 %v1827_v59, %v1825_v57  ;;  %v6061_v2 = vpack.c.bf16 %v552_v61, %v550_v60  ;;  %v572_v57 = vld [vmem:[%s8909_s18 + $0x738] sm:$0xff] }
 0x138   : > { %7322 = vmatprep.subr.bf16.mxu0 %v7321_v6  ;;  %v7341_v6 = vpack.c.bf16 %v1832_v63, %v1830_v62  ;;  %v1852_v59 = vld [vmem:[%s8909_s18 + $0x2f38] sm:$0xff]  ;;  %v6081_v62 = vpack.c.bf16 %v572_v57, %v570_v56  ;;  %v569_v63 = vld [vmem:[%s8909_s18 + $0x720] sm:$0xff] }
 0x13a   : > { %6044 = vmatpush1.bf16.msra.mxu1 %v6043_v12  ;;  %v6063_v12 = vpack.c.bf16 %v551_v4, %v549_v3  ;;  %v1851_v3 = vld [vmem:[%s8909_s18 + $0x2f30] sm:$0xff]  ;;  %v574_v4 = vld [vmem:[%s8909_s18 + $0x748] sm:$0xff] }
 0x13b   : > { %7324 = vmatpush1.bf16.msra.mxu0 %v7323_v13  ;;  %6046 = vmatprep.subr.bf16.mxu1 %v6045_v14  ;;  %v7343_v13 = vpack.c.bf16 %v1831_v7, %v1829_v5  ;;  %v6065_v14 = vpack.c.bf16 %v556_v9, %v554_v8  ;;  %v576_v5 = vld [vmem:[%s8909_s18 + $0x758] sm:$0xff] }
 0x13c   : > { %7326 = vmatprep.subr.bf16.mxu0 %v7325_v18  ;;  %v7345_v18 = vpack.c.bf16 %v1836_v11, %v1834_v10  ;;  %v1856_v7 = vld [vmem:[%s8909_s18 + $0x2f58] sm:$0xff]  ;;  %v6085_v10 = vpack.c.bf16 %v576_v5, %v574_v4  ;;  %v573_v11 = vld [vmem:[%s8909_s18 + $0x740] sm:$0xff] }
 0x13d   : > { %3052 = vmatmul.mubr.f32.vlgmr.msra.gmra.mrb[0].mxu1 %v266_v24  ;;  %v6067_v24 = vpack.c.bf16 %v555_v16, %v553_v15  ;;  %v1855_v15 = vld [vmem:[%s8909_s18 + $0x2f50] sm:$0xff]  ;;  %v578_v16 = vld [vmem:[%s8909_s18 + $0x768] sm:$0xff] }
 0x13e   : > { %6048 = vmatpush1.bf16.msra.mxu1 %v6047_v25  ;;  %4472 = vmatmul.mubr.f32.vlgmr.msra.gmra.mrb[0].mxu0 %v306_v26  ;;  %v7347_v25 = vpack.c.bf16 %v1835_v19, %v1833_v17  ;;  %v6069_v26 = vpack.c.bf16 %v560_v21, %v558_v20  ;;  %v580_v17 = vld [vmem:[%s8909_s18 + $0x778] sm:$0xff] }
 0x13f   : > { %7328 = vmatpush1.bf16.msra.mxu0 %v7327_v27  ;;  %6050 = vmatprep.subr.bf16.mxu1 %v6049_v28  ;;  %v557_v27 = vld [vmem:[%s8909_s18 + $0x6c0] sm:$0xff]  ;;  %v559_v28 = vld [vmem:[%s8909_s18 + $0x6d0] sm:$0xff]  ;;  %v1860_v19 = vld [vmem:[%s8909_s18 + $0x2f78] sm:$0xff]  ;;  %v6089_v22 = vpack.c.bf16 %v580_v17, %v578_v16 }
 0x140   : > { %7330 = vmatprep.subr.bf16.mxu0 %v7329_v32  ;;  %3122 = vmatprep.mubr.f32.mxu1 %v269_v38  ;;  %v562_v32 = vld [vmem:[%s8909_s18 + $0x6e8] sm:$0xff]  ;;  %v6071_v36 = vpack.c.bf16 %v559_v28, %v557_v27  ;;  %v1859_v27 = vld [vmem:[%s8909_s18 + $0x2f70] sm:$0xff] }
 0x141   : > { %4542 = vmatprep.mubr.f32.mxu0 %v309_v40  ;;  %v6073_v38 = vpack.c.bf16 %v564_v33, %v562_v32  ;;  %v563_v40 = vld [vmem:[%s8909_s18 + $0x6f0] sm:$0xff]  ;;  %v582_v28 = vld [vmem:[%s8909_s18 + $0x788] sm:$0xff] }
 0x142   : > { %6052 = vmatpush1.bf16.msra.mxu1 %v6051_v39  ;;  %v561_v39 = vld [vmem:[%s8909_s18 + $0x6e0] sm:$0xff] }
 0x143   : > { %7332 = vmatpush1.bf16.msra.mxu0 %v7331_v41  ;;  %6054 = vmatprep.subr.bf16.mxu1 %v6053_v42  ;;  %v1841_v41 = vld [vmem:[%s8909_s18 + $0x2ee0] sm:$0xff]  ;;  %v7353_v42 = vpack.c.bf16 %v1844_v35, %v1842_v34  ;;  %v6075_v48 = vpack.c.bf16 %v563_v40, %v561_v39  ;;  %v6093_v34 = vpack.c.bf16 %v584_v29, %v582_v28  ;;  %v1863_v39 = vld [vmem:[%s8909_s18 + $0x2f90] sm:$0xff]  ;;  %v586_v40 = vld [vmem:[%s8909_s18 + $0x7a8] sm:$0xff] }
 0x144   : > { %7334 = vmatprep.subr.bf16.mxu0 %v7333_v46  ;;  %v1846_v46 = vld [vmem:[%s8909_s18 + $0x2f08] sm:$0xff]  ;;  %v7355_v49 = vpack.c.bf16 %v1843_v43, %v1841_v41  ;;  %v581_v35 = vld [vmem:[%s8909_s18 + $0x780] sm:$0xff]  ;;  %v588_v41 = vld [vmem:[%s8909_s18 + $0x7b8] sm:$0xff] }
 0x145   : > { %v1868_v43 = vld [vmem:[%s8909_s18 + $0x2fb8] sm:$0xff] }
 0x146   : > { %6056 = vmatpush1.bf16.msra.mxu1 %v6055_v52  ;;  %v567_v52 = vld [vmem:[%s8909_s18 + $0x710] sm:$0xff]  ;;  %v268_v28 = vld [vmem:[#allocation2 + $0x30] sm:$0xff] }
 0x147   : > { %7336 = vmatpush1.bf16.msra.mxu0 %v7335_v53  ;;  %6058 = vmatprep.subr.bf16.mxu1 %v6057_v54  ;;  %v1845_v53 = vld [vmem:[%s8909_s18 + $0x2f00] sm:$0xff]  ;;  %v7357_v54 = vpack.c.bf16 %v1848_v47, %v1846_v46  ;;  %v6079_v60 = vpack.c.bf16 %v567_v52, %v565_v51  ;;  %v6097_v46 = vpack.c.bf16 %v588_v41, %v586_v40  ;;  %v1867_v51 = vld [vmem:[%s8909_s18 + $0x2fb0] sm:$0xff]  ;;  %v590_v52 = vld [vmem:[%s8909_s18 + $0x7c8] sm:$0xff] }
 0x148   : > { %7338 = vmatprep.subr.bf16.mxu0 %v7337_v58  ;;  %v1850_v58 = vld [vmem:[%s8909_s18 + $0x2f28] sm:$0xff]  ;;  %v7359_v61 = vpack.c.bf16 %v1847_v55, %v1845_v53  ;;  %v585_v47 = vld [vmem:[%s8909_s18 + $0x7a0] sm:$0xff]  ;;  %v592_v53 = vld [vmem:[%s8909_s18 + $0x7d8] sm:$0xff] }
 0x149   : > { %v1872_v55 = vld [vmem:[%s8909_s18 + $0x2fd8] sm:$0xff]  ;;  %v1886_v40 = vld [vmem:[%s8909_s18 + $0x3048] sm:$0xff] }
 0x14a   : > { %6060 = vmatpush1.bf16.msra.mxu1 %v6059_v0  ;;  %v571_v0 = vld [vmem:[%s8909_s18 + $0x730] sm:$0xff]  ;;  %v1888_v41 = vld [vmem:[%s8909_s18 + $0x3058] sm:$0xff] }
 0x14b   : > { %7340 = vmatpush1.bf16.msra.mxu0 %v7339_v1  ;;  %6062 = vmatprep.subr.bf16.mxu1 %v6061_v2  ;;  %v1849_v1 = vld [vmem:[%s8909_s18 + $0x2f20] sm:$0xff]  ;;  %v7361_v2 = vpack.c.bf16 %v1852_v59, %v1850_v58  ;;  %v6083_v8 = vpack.c.bf16 %v571_v0, %v569_v63  ;;  %v6101_v58 = vpack.c.bf16 %v592_v53, %v590_v52  ;;  %v1871_v63 = vld [vmem:[%s8909_s18 + $0x2fd0] sm:$0xff]  ;;  %v594_v0 = vld [vmem:[%s8909_s18 + $0x7e8] sm:$0xff] }
 0x14c   : > { %7342 = vmatprep.subr.bf16.mxu0 %v7341_v6  ;;  %v1854_v6 = vld [vmem:[%s8909_s18 + $0x2f48] sm:$0xff]  ;;  %v7363_v9 = vpack.c.bf16 %v1851_v3, %v1849_v1  ;;  %v589_v59 = vld [vmem:[%s8909_s18 + $0x7c0] sm:$0xff]  ;;  %v596_v1 = vld [vmem:[%s8909_s18 + $0x7f8] sm:$0xff] }
 0x14d   : > { %v1876_v3 = vld [vmem:[%s8909_s18 + $0x2ff8] sm:$0xff]  ;;  %v610_v52 = vld [vmem:[%s8909_s18 + $0x868] sm:$0xff] }
 0x14e   : > { %6064 = vmatpush1.bf16.msra.mxu1 %v6063_v12  ;;  %v575_v12 = vld [vmem:[%s8909_s18 + $0x750] sm:$0xff]  ;;  %v612_v53 = vld [vmem:[%s8909_s18 + $0x878] sm:$0xff] }
 0x14f   : > { %7344 = vmatpush1.bf16.msra.mxu0 %v7343_v13  ;;  %6066 = vmatprep.subr.bf16.mxu1 %v6065_v14  ;;  %v1853_v13 = vld [vmem:[%s8909_s18 + $0x2f40] sm:$0xff]  ;;  %v7365_v14 = vpack.c.bf16 %v1856_v7, %v1854_v6  ;;  %v6087_v20 = vpack.c.bf16 %v575_v12, %v573_v11  ;;  %v6105_v6 = vpack.c.bf16 %v596_v1, %v594_v0  ;;  %v1875_v11 = vld [vmem:[%s8909_s18 + $0x2ff0] sm:$0xff]  ;;  %v598_v12 = vld [vmem:[%s8909_s18 + $0x808] sm:$0xff] }
 0x150   : > { %7346 = vmatprep.subr.bf16.mxu0 %v7345_v18  ;;  %v1858_v18 = vld [vmem:[%s8909_s18 + $0x2f68] sm:$0xff]  ;;  %v7367_v21 = vpack.c.bf16 %v1855_v15, %v1853_v13  ;;  %v593_v7 = vld [vmem:[%s8909_s18 + $0x7e0] sm:$0xff]  ;;  %v600_v13 = vld [vmem:[%s8909_s18 + $0x818] sm:$0xff] }
 0x151   : > { %v1880_v15 = vld [vmem:[%s8909_s18 + $0x3018] sm:$0xff]  ;;  %v614_v0 = vld [vmem:[%s8909_s18 + $0x888] sm:$0xff] }
 0x152   : > { %6068 = vmatpush1.bf16.msra.mxu1 %v6067_v24  ;;  %v579_v24 = vld [vmem:[%s8909_s18 + $0x770] sm:$0xff]  ;;  %v616_v1 = vld [vmem:[%s8909_s18 + $0x898] sm:$0xff] }
 0x153   : > { %7348 = vmatpush1.bf16.msra.mxu0 %v7347_v25  ;;  %6070 = vmatprep.subr.bf16.mxu1 %v6069_v26  ;;  %v1857_v25 = vld [vmem:[%s8909_s18 + $0x2f60] sm:$0xff]  ;;  %v7369_v26 = vpack.c.bf16 %v1860_v19, %v1858_v18  ;;  %v6091_v32 = vpack.c.bf16 %v579_v24, %v577_v23  ;;  %v6109_v18 = vpack.c.bf16 %v600_v13, %v598_v12  ;;  %v1879_v23 = vld [vmem:[%s8909_s18 + $0x3010] sm:$0xff]  ;;  %v602_v24 = vld [vmem:[%s8909_s18 + $0x828] sm:$0xff] }
 0x154   : > { %7350 = vmatprep.subr.bf16.mxu0 %v7349_v30  ;;  %v1862_v30 = vld [vmem:[%s8909_s18 + $0x2f88] sm:$0xff]  ;;  %v7371_v33 = vpack.c.bf16 %v1859_v27, %v1857_v25  ;;  %v597_v19 = vld [vmem:[%s8909_s18 + $0x800] sm:$0xff]  ;;  %v604_v25 = vld [vmem:[%s8909_s18 + $0x838] sm:$0xff] }
 0x155   : > { %v1884_v27 = vld [vmem:[%s8909_s18 + $0x3038] sm:$0xff]  ;;  %v618_v12 = vld [vmem:[%s8909_s18 + $0x8a8] sm:$0xff] }
 0x156   : > { %6072 = vmatpush1.bf16.msra.mxu1 %v6071_v36  ;;  %v583_v36 = vld [vmem:[%s8909_s18 + $0x790] sm:$0xff]  ;;  %v620_v13 = vld [vmem:[%s8909_s18 + $0x8b8] sm:$0xff] }
 0x157   : > { %7352 = vmatpush1.bf16.msra.mxu0 %v7351_v37  ;;  %6074 = vmatprep.subr.bf16.mxu1 %v6073_v38  ;;  %v1861_v37 = vld [vmem:[%s8909_s18 + $0x2f80] sm:$0xff]  ;;  %v7373_v38 = vpack.c.bf16 %v1864_v31, %v1862_v30  ;;  %v6095_v44 = vpack.c.bf16 %v583_v36, %v581_v35  ;;  %v308_v30 = vld [vmem:[#allocation2 + $0x170] sm:$0xff] }
 0x158   : > { %7354 = vmatprep.subr.bf16.mxu0 %v7353_v42  ;;  %v1866_v42 = vld [vmem:[%s8909_s18 + $0x2fa8] sm:$0xff]  ;;  %v7375_v45 = vpack.c.bf16 %v1863_v39, %v1861_v37  ;;  %v1881_v35 = vld [vmem:[%s8909_s18 + $0x3020] sm:$0xff]  ;;  %v1883_v37 = vld [vmem:[%s8909_s18 + $0x3030] sm:$0xff] }
 0x159   : > { %v608_v39 = vld [vmem:[%s8909_s18 + $0x858] sm:$0xff] }
 0x15a   : > { %6076 = vmatpush1.bf16.msra.mxu1 %v6075_v48  ;;  %v587_v48 = vld [vmem:[%s8909_s18 + $0x7b0] sm:$0xff] }
 0x15b   : > { %7356 = vmatpush1.bf16.msra.mxu0 %v7355_v49  ;;  %6078 = vmatprep.subr.bf16.mxu1 %v6077_v50  ;;  %v1865_v49 = vld [vmem:[%s8909_s18 + $0x2fa0] sm:$0xff]  ;;  %v7377_v50 = vpack.c.bf16 %v1868_v43, %v1866_v42  ;;  %v6099_v56 = vpack.c.bf16 %v587_v48, %v585_v47  ;;  %v271_v42 = vld [vmem:[#allocation2 + $0x48] sm:$0xff] }
 0x15c   : > { %7358 = vmatprep.subr.bf16.mxu0 %v7357_v54  ;;  %v1870_v54 = vld [vmem:[%s8909_s18 + $0x2fc8] sm:$0xff]  ;;  %v7379_v57 = vpack.c.bf16 %v1867_v51, %v1865_v49  ;;  %v605_v47 = vld [vmem:[%s8909_s18 + $0x840] sm:$0xff]  ;;  %v607_v48 = vld [vmem:[%s8909_s18 + $0x850] sm:$0xff] }
 0x15d   : > { %v1885_v49 = vld [vmem:[%s8909_s18 + $0x3040] sm:$0xff]  ;;  %v1887_v51 = vld [vmem:[%s8909_s18 + $0x3050] sm:$0xff] }
 0x15e   : > { %6080 = vmatpush1.bf16.msra.mxu1 %v6079_v60  ;;  %v591_v60 = vld [vmem:[%s8909_s18 + $0x7d0] sm:$0xff] }
 0x15f   : > { %7360 = vmatpush1.bf16.msra.mxu0 %v7359_v61  ;;  %6082 = vmatprep.subr.bf16.mxu1 %v6081_v62  ;;  %v1869_v61 = vld [vmem:[%s8909_s18 + $0x2fc0] sm:$0xff]  ;;  %v7381_v62 = vpack.c.bf16 %v1872_v55, %v1870_v54  ;;  %v6103_v4 = vpack.c.bf16 %v591_v60, %v589_v59  ;;  %v1890_v54 = vld [vmem:[%s8909_s18 + $0x3068] sm:$0xff]  ;;  %v1892_v55 = vld [vmem:[%s8909_s18 + $0x3078] sm:$0xff] }
 0x160   : > { %7362 = vmatprep.subr.bf16.mxu0 %v7361_v2  ;;  %v1874_v2 = vld [vmem:[%s8909_s18 + $0x2fe8] sm:$0xff]  ;;  %v7383_v5 = vpack.c.bf16 %v1871_v63, %v1869_v61  ;;  %v609_v59 = vld [vmem:[%s8909_s18 + $0x860] sm:$0xff]  ;;  %v611_v60 = vld [vmem:[%s8909_s18 + $0x870] sm:$0xff] }
 0x161   : > { %v1889_v61 = vld [vmem:[%s8909_s18 + $0x3060] sm:$0xff]  ;;  %v1891_v63 = vld [vmem:[%s8909_s18 + $0x3070] sm:$0xff] }
 0x162   : > { %6084 = vmatpush1.bf16.msra.mxu1 %v6083_v8  ;;  %v595_v8 = vld [vmem:[%s8909_s18 + $0x7f0] sm:$0xff] }
 0x163   : > { %7364 = vmatpush1.bf16.msra.mxu0 %v7363_v9  ;;  %6086 = vmatprep.subr.bf16.mxu1 %v6085_v10  ;;  %v1873_v9 = vld [vmem:[%s8909_s18 + $0x2fe0] sm:$0xff]  ;;  %v7385_v10 = vpack.c.bf16 %v1876_v3, %v1874_v2  ;;  %v6107_v16 = vpack.c.bf16 %v595_v8, %v593_v7  ;;  %v1894_v2 = vld [vmem:[%s8909_s18 + $0x3088] sm:$0xff]  ;;  %v1896_v3 = vld [vmem:[%s8909_s18 + $0x3098] sm:$0xff] }
 0x164   : > { %7366 = vmatprep.subr.bf16.mxu0 %v7365_v14  ;;  %v1878_v14 = vld [vmem:[%s8909_s18 + $0x3008] sm:$0xff]  ;;  %v7387_v17 = vpack.c.bf16 %v1875_v11, %v1873_v9  ;;  %v613_v7 = vld [vmem:[%s8909_s18 + $0x880] sm:$0xff]  ;;  %v615_v8 = vld [vmem:[%s8909_s18 + $0x890] sm:$0xff] }
 0x165   : > { %v1893_v9 = vld [vmem:[%s8909_s18 + $0x3080] sm:$0xff]  ;;  %v1895_v11 = vld [vmem:[%s8909_s18 + $0x3090] sm:$0xff] }
 0x166   : > { %6088 = vmatpush1.bf16.msra.mxu1 %v6087_v20  ;;  %v599_v20 = vld [vmem:[%s8909_s18 + $0x810] sm:$0xff] }
 0x167   : > { %7368 = vmatpush1.bf16.msra.mxu0 %v7367_v21  ;;  %6090 = vmatprep.subr.bf16.mxu1 %v6089_v22  ;;  %v1877_v21 = vld [vmem:[%s8909_s18 + $0x3000] sm:$0xff]  ;;  %v7389_v22 = vpack.c.bf16 %v1880_v15, %v1878_v14  ;;  %v6111_v29 = vpack.c.bf16 %v599_v20, %v597_v19  ;;  %v1898_v14 = vld [vmem:[%s8909_s18 + $0x30a8] sm:$0xff]  ;;  %v1900_v15 = vld [vmem:[%s8909_s18 + $0x30b8] sm:$0xff] }
 0x168   : > { %7370 = vmatprep.subr.bf16.mxu0 %v7369_v26  ;;  %v1882_v26 = vld [vmem:[%s8909_s18 + $0x3028] sm:$0xff]  ;;  %v7391_v31 = vpack.c.bf16 %v1879_v23, %v1877_v21  ;;  %v617_v19 = vld [vmem:[%s8909_s18 + $0x8a0] sm:$0xff]  ;;  %v619_v20 = vld [vmem:[%s8909_s18 + $0x8b0] sm:$0xff] }
 0x169   : > { %v7393_v36 = vpack.c.bf16 %v1884_v27, %v1882_v26  ;;  %v1897_v21 = vld [vmem:[%s8909_s18 + $0x30a0] sm:$0xff]  ;;  %v1899_v23 = vld [vmem:[%s8909_s18 + $0x30b0] sm:$0xff]  ;;  %v1902_v26 = vld [vmem:[%s8909_s18 + $0x30c8] sm:$0xff] }
 0x16a   : > { %6092 = vmatpush1.bf16.msra.mxu1 %v6091_v32  ;;  %v6113_v32 = vpack.c.bf16 %v604_v25, %v602_v24  ;;  %v622_v24 = vld [vmem:[%s8909_s18 + $0x8c8] sm:$0xff]  ;;  %v624_v25 = vld [vmem:[%s8909_s18 + $0x8d8] sm:$0xff] }
 0x16b   : > { %7372 = vmatpush1.bf16.msra.mxu0 %v7371_v33  ;;  %6094 = vmatprep.subr.bf16.mxu1 %v6093_v34  ;;  %v601_v33 = vld [vmem:[%s8909_s18 + $0x820] sm:$0xff]  ;;  %v603_v34 = vld [vmem:[%s8909_s18 + $0x830] sm:$0xff]  ;;  %v1904_v27 = vld [vmem:[%s8909_s18 + $0x30d8] sm:$0xff] }
 0x16c   : > { %7374 = vmatprep.subr.bf16.mxu0 %v7373_v38  ;;  %v606_v38 = vld [vmem:[%s8909_s18 + $0x848] sm:$0xff]  ;;  %v6115_v43 = vpack.c.bf16 %v603_v34, %v601_v33  ;;  %v1901_v33 = vld [vmem:[%s8909_s18 + $0x30c0] sm:$0xff]  ;;  %v7413_v34 = vpack.c.bf16 %v1904_v27, %v1902_v26 }
 0x16d   : > { %v641_v27 = vld [vmem:[%s8909_s18 + $0x960] sm:$0xff] }
 0x16e   : > { %6096 = vmatpush1.bf16.msra.mxu1 %v6095_v44  ;;  %v311_v44 = vld [vmem:[#allocation2 + $0x188] sm:$0xff] }
 0x16f   : > { %7376 = vmatpush1.bf16.msra.mxu0 %v7375_v45  ;;  %6098 = vmatprep.subr.bf16.mxu1 %v6097_v46  ;;  %v7395_v45 = vpack.c.bf16 %v1883_v37, %v1881_v35  ;;  %v6117_v46 = vpack.c.bf16 %v608_v39, %v606_v38  ;;  %v1903_v35 = vld [vmem:[%s8909_s18 + $0x30d0] sm:$0xff]  ;;  %v628_v37 = vld [vmem:[%s8909_s18 + $0x8f8] sm:$0xff]  ;;  %v1906_v38 = vld [vmem:[%s8909_s18 + $0x30e8] sm:$0xff] }
 0x170   : > { %7378 = vmatprep.subr.bf16.mxu0 %v7377_v50  ;;  %v7397_v50 = vpack.c.bf16 %v1888_v41, %v1886_v40  ;;  %v1908_v39 = vld [vmem:[%s8909_s18 + $0x30f8] sm:$0xff]  ;;  %v7415_v41 = vpack.c.bf16 %v1903_v35, %v1901_v33 }
 0x171   : > { %v648_v33 = vld [vmem:[%s8909_s18 + $0x998] sm:$0xff] }
 0x172   : > { %6100 = vmatpush1.bf16.msra.mxu1 %v6099_v56  ;;  %v6119_v56 = vpack.c.bf16 %v607_v48, %v605_v47  ;;  %v1907_v47 = vld [vmem:[%s8909_s18 + $0x30f0] sm:$0xff]  ;;  %v630_v48 = vld [vmem:[%s8909_s18 + $0x908] sm:$0xff]  ;;  %v1928_v35 = vld [vmem:[%s8909_s18 + $0x3198] sm:$0xff] }
 0x173   : > { %7380 = vmatpush1.bf16.msra.mxu0 %v7379_v57  ;;  %6102 = vmatprep.subr.bf16.mxu1 %v6101_v58  ;;  %v7399_v57 = vpack.c.bf16 %v1887_v51, %v1885_v49  ;;  %v6121_v58 = vpack.c.bf16 %v612_v53, %v610_v52  ;;  %v632_v49 = vld [vmem:[%s8909_s18 + $0x918] sm:$0xff] }
 0x174   : > { %7382 = vmatprep.subr.bf16.mxu0 %v7381_v62  ;;  %v7401_v62 = vpack.c.bf16 %v1892_v55, %v1890_v54  ;;  %v1912_v51 = vld [vmem:[%s8909_s18 + $0x3118] sm:$0xff]  ;;  %v6141_v54 = vpack.c.bf16 %v632_v49, %v630_v48  ;;  %v629_v55 = vld [vmem:[%s8909_s18 + $0x900] sm:$0xff] }
 0x176   : > { %6104 = vmatpush1.bf16.msra.mxu1 %v6103_v4  ;;  %v6123_v4 = vpack.c.bf16 %v611_v60, %v609_v59  ;;  %v1911_v59 = vld [vmem:[%s8909_s18 + $0x3110] sm:$0xff]  ;;  %v634_v60 = vld [vmem:[%s8909_s18 + $0x928] sm:$0xff] }
 0x177   : > { %7384 = vmatpush1.bf16.msra.mxu0 %v7383_v5  ;;  %6106 = vmatprep.subr.bf16.mxu1 %v6105_v6  ;;  %v7403_v5 = vpack.c.bf16 %v1891_v63, %v1889_v61  ;;  %v6125_v6 = vpack.c.bf16 %v616_v1, %v614_v0  ;;  %v636_v61 = vld [vmem:[%s8909_s18 + $0x938] sm:$0xff] }
 0x178   : > { %7386 = vmatprep.subr.bf16.mxu0 %v7385_v10  ;;  %v7405_v10 = vpack.c.bf16 %v1896_v3, %v1894_v2  ;;  %v1916_v63 = vld [vmem:[%s8909_s18 + $0x3138] sm:$0xff]  ;;  %v6145_v2 = vpack.c.bf16 %v636_v61, %v634_v60  ;;  %v633_v3 = vld [vmem:[%s8909_s18 + $0x920] sm:$0xff] }
 0x17a   : > { %6108 = vmatpush1.bf16.msra.mxu1 %v6107_v16  ;;  %v6127_v16 = vpack.c.bf16 %v615_v8, %v613_v7  ;;  %v1915_v7 = vld [vmem:[%s8909_s18 + $0x3130] sm:$0xff]  ;;  %v638_v8 = vld [vmem:[%s8909_s18 + $0x948] sm:$0xff] }
 0x17b   : > { %7388 = vmatpush1.bf16.msra.mxu0 %v7387_v17  ;;  %6110 = vmatprep.subr.bf16.mxu1 %v6109_v18  ;;  %v7407_v17 = vpack.c.bf16 %v1895_v11, %v1893_v9  ;;  %v6129_v18 = vpack.c.bf16 %v620_v13, %v618_v12  ;;  %v640_v9 = vld [vmem:[%s8909_s18 + $0x958] sm:$0xff] }
 0x17c   : > { %7390 = vmatprep.subr.bf16.mxu0 %v7389_v22  ;;  %v7409_v22 = vpack.c.bf16 %v1900_v15, %v1898_v14  ;;  %v1920_v11 = vld [vmem:[%s8909_s18 + $0x3158] sm:$0xff]  ;;  %v6149_v14 = vpack.c.bf16 %v640_v9, %v638_v8  ;;  %v637_v15 = vld [vmem:[%s8909_s18 + $0x940] sm:$0xff] }
 0x17d   : > { %3123 = vmatmul.mubr.f32.vlgmr.msra.gmra.mrb[0].mxu1 %v268_v28  ;;  %v6131_v28 = vpack.c.bf16 %v619_v20, %v617_v19  ;;  %v1919_v19 = vld [vmem:[%s8909_s18 + $0x3150] sm:$0xff]  ;;  %v642_v20 = vld [vmem:[%s8909_s18 + $0x968] sm:$0xff] }
 0x17e   : > { %6112 = vmatpush1.bf16.msra.mxu1 %v6111_v29  ;;  %4543 = vmatmul.mubr.f32.vlgmr.msra.gmra.mrb[0].mxu0 %v308_v30  ;;  %v7411_v29 = vpack.c.bf16 %v1899_v23, %v1897_v21  ;;  %v6133_v30 = vpack.c.bf16 %v624_v25, %v622_v24  ;;  %v644_v21 = vld [vmem:[%s8909_s18 + $0x978] sm:$0xff] }
 0x17f   : > { %7392 = vmatpush1.bf16.msra.mxu0 %v7391_v31  ;;  %6114 = vmatprep.subr.bf16.mxu1 %v6113_v32  ;;  %v621_v31 = vld [vmem:[%s8909_s18 + $0x8c0] sm:$0xff]  ;;  %v623_v32 = vld [vmem:[%s8909_s18 + $0x8d0] sm:$0xff]  ;;  %v1924_v23 = vld [vmem:[%s8909_s18 + $0x3178] sm:$0xff]  ;;  %v6153_v26 = vpack.c.bf16 %v644_v21, %v642_v20 }
 0x180   : > { %7394 = vmatprep.subr.bf16.mxu0 %v7393_v36  ;;  %3193 = vmatprep.mubr.f32.mxu1 %v271_v42  ;;  %v626_v36 = vld [vmem:[%s8909_s18 + $0x8e8] sm:$0xff]  ;;  %v6135_v40 = vpack.c.bf16 %v623_v32, %v621_v31  ;;  %v1923_v31 = vld [vmem:[%s8909_s18 + $0x3170] sm:$0xff] }
 0x181   : > { %4613 = vmatprep.mubr.f32.mxu0 %v311_v44  ;;  %v6137_v42 = vpack.c.bf16 %v628_v37, %v626_v36  ;;  %v627_v44 = vld [vmem:[%s8909_s18 + $0x8f0] sm:$0xff]  ;;  %v646_v32 = vld [vmem:[%s8909_s18 + $0x988] sm:$0xff] }
 0x182   : > { %6116 = vmatpush1.bf16.msra.mxu1 %v6115_v43  ;;  %v625_v43 = vld [vmem:[%s8909_s18 + $0x8e0] sm:$0xff] }
 0x183   : > { %7396 = vmatpush1.bf16.msra.mxu0 %v7395_v45  ;;  %6118 = vmatprep.subr.bf16.mxu1 %v6117_v46  ;;  %v1905_v45 = vld [vmem:[%s8909_s18 + $0x30e0] sm:$0xff]  ;;  %v7417_v46 = vpack.c.bf16 %v1908_v39, %v1906_v38  ;;  %v6139_v52 = vpack.c.bf16 %v627_v44, %v625_v43  ;;  %v6157_v38 = vpack.c.bf16 %v648_v33, %v646_v32  ;;  %v1927_v43 = vld [vmem:[%s8909_s18 + $0x3190] sm:$0xff]  ;;  %v650_v44 = vld [vmem:[%s8909_s18 + $0x9a8] sm:$0xff] }
 0x184   : > { %7398 = vmatprep.subr.bf16.mxu0 %v7397_v50  ;;  %v1910_v50 = vld [vmem:[%s8909_s18 + $0x3108] sm:$0xff]  ;;  %v7419_v53 = vpack.c.bf16 %v1907_v47, %v1905_v45  ;;  %v645_v39 = vld [vmem:[%s8909_s18 + $0x980] sm:$0xff]  ;;  %v652_v45 = vld [vmem:[%s8909_s18 + $0x9b8] sm:$0xff] }
 0x185   : > { %v1932_v47 = vld [vmem:[%s8909_s18 + $0x31b8] sm:$0xff]  ;;  %v270_v32 = vld [vmem:[#allocation2 + $0x40] sm:$0xff] }
 0x186   : > { %6120 = vmatpush1.bf16.msra.mxu1 %v6119_v56  ;;  %v631_v56 = vld [vmem:[%s8909_s18 + $0x910] sm:$0xff] }
 0x187   : > { %7400 = vmatpush1.bf16.msra.mxu0 %v7399_v57  ;;  %6122 = vmatprep.subr.bf16.mxu1 %v6121_v58  ;;  %v1909_v57 = vld [vmem:[%s8909_s18 + $0x3100] sm:$0xff]  ;;  %v7421_v58 = vpack.c.bf16 %v1912_v51, %v1910_v50  ;;  %v6143_v0 = vpack.c.bf16 %v631_v56, %v629_v55  ;;  %v6161_v50 = vpack.c.bf16 %v652_v45, %v650_v44  ;;  %v1931_v55 = vld [vmem:[%s8909_s18 + $0x31b0] sm:$0xff]  ;;  %v654_v56 = vld [vmem:[%s8909_s18 + $0x9c8] sm:$0xff] }
 0x188   : > { %7402 = vmatprep.subr.bf16.mxu0 %v7401_v62  ;;  %v1914_v62 = vld [vmem:[%s8909_s18 + $0x3128] sm:$0xff]  ;;  %v7423_v1 = vpack.c.bf16 %v1911_v59, %v1909_v57  ;;  %v649_v51 = vld [vmem:[%s8909_s18 + $0x9a0] sm:$0xff]  ;;  %v656_v57 = vld [vmem:[%s8909_s18 + $0x9d8] sm:$0xff] }
 0x189   : > { %v1936_v59 = vld [vmem:[%s8909_s18 + $0x31d8] sm:$0xff]  ;;  %v1950_v44 = vld [vmem:[%s8909_s18 + $0x3248] sm:$0xff] }
 0x18a   : > { %6124 = vmatpush1.bf16.msra.mxu1 %v6123_v4  ;;  %v635_v4 = vld [vmem:[%s8909_s18 + $0x930] sm:$0xff]  ;;  %v1952_v45 = vld [vmem:[%s8909_s18 + $0x3258] sm:$0xff] }
 0x18b   : > { %7404 = vmatpush1.bf16.msra.mxu0 %v7403_v5  ;;  %6126 = vmatprep.subr.bf16.mxu1 %v6125_v6  ;;  %v1913_v5 = vld [vmem:[%s8909_s18 + $0x3120] sm:$0xff]  ;;  %v7425_v6 = vpack.c.bf16 %v1916_v63, %v1914_v62  ;;  %v6147_v12 = vpack.c.bf16 %v635_v4, %v633_v3  ;;  %v6165_v62 = vpack.c.bf16 %v656_v57, %v654_v56  ;;  %v1935_v3 = vld [vmem:[%s8909_s18 + $0x31d0] sm:$0xff]  ;;  %v658_v4 = vld [vmem:[%s8909_s18 + $0x9e8] sm:$0xff] }
 0x18c   : > { %7406 = vmatprep.subr.bf16.mxu0 %v7405_v10  ;;  %v1918_v10 = vld [vmem:[%s8909_s18 + $0x3148] sm:$0xff]  ;;  %v7427_v13 = vpack.c.bf16 %v1915_v7, %v1913_v5  ;;  %v653_v63 = vld [vmem:[%s8909_s18 + $0x9c0] sm:$0xff]  ;;  %v660_v5 = vld [vmem:[%s8909_s18 + $0x9f8] sm:$0xff] }
 0x18d   : > { %v1940_v7 = vld [vmem:[%s8909_s18 + $0x31f8] sm:$0xff]  ;;  %v674_v56 = vld [vmem:[%s8909_s18 + $0xa68] sm:$0xff] }
 0x18e   : > { %6128 = vmatpush1.bf16.msra.mxu1 %v6127_v16  ;;  %v639_v16 = vld [vmem:[%s8909_s18 + $0x950] sm:$0xff]  ;;  %v676_v57 = vld [vmem:[%s8909_s18 + $0xa78] sm:$0xff] }
 0x18f   : > { %7408 = vmatpush1.bf16.msra.mxu0 %v7407_v17  ;;  %6130 = vmatprep.subr.bf16.mxu1 %v6129_v18  ;;  %v1917_v17 = vld [vmem:[%s8909_s18 + $0x3140] sm:$0xff]  ;;  %v7429_v18 = vpack.c.bf16 %v1920_v11, %v1918_v10  ;;  %v6151_v24 = vpack.c.bf16 %v639_v16, %v637_v15  ;;  %v6169_v10 = vpack.c.bf16 %v660_v5, %v658_v4  ;;  %v1939_v15 = vld [vmem:[%s8909_s18 + $0x31f0] sm:$0xff]  ;;  %v662_v16 = vld [vmem:[%s8909_s18 + $0xa08] sm:$0xff] }
 0x190   : > { %7410 = vmatprep.subr.bf16.mxu0 %v7409_v22  ;;  %v1922_v22 = vld [vmem:[%s8909_s18 + $0x3168] sm:$0xff]  ;;  %v7431_v25 = vpack.c.bf16 %v1919_v19, %v1917_v17  ;;  %v657_v11 = vld [vmem:[%s8909_s18 + $0x9e0] sm:$0xff]  ;;  %v664_v17 = vld [vmem:[%s8909_s18 + $0xa18] sm:$0xff] }
 0x191   : > { %v1944_v19 = vld [vmem:[%s8909_s18 + $0x3218] sm:$0xff]  ;;  %v678_v4 = vld [vmem:[%s8909_s18 + $0xa88] sm:$0xff] }
 0x192   : > { %6132 = vmatpush1.bf16.msra.mxu1 %v6131_v28  ;;  %v643_v28 = vld [vmem:[%s8909_s18 + $0x970] sm:$0xff]  ;;  %v680_v5 = vld [vmem:[%s8909_s18 + $0xa98] sm:$0xff] }
 0x193   : > { %7412 = vmatpush1.bf16.msra.mxu0 %v7411_v29  ;;  %6134 = vmatprep.subr.bf16.mxu1 %v6133_v30  ;;  %v1921_v29 = vld [vmem:[%s8909_s18 + $0x3160] sm:$0xff]  ;;  %v7433_v30 = vpack.c.bf16 %v1924_v23, %v1922_v22  ;;  %v6155_v36 = vpack.c.bf16 %v643_v28, %v641_v27  ;;  %v6173_v22 = vpack.c.bf16 %v664_v17, %v662_v16  ;;  %v1943_v27 = vld [vmem:[%s8909_s18 + $0x3210] sm:$0xff]  ;;  %v666_v28 = vld [vmem:[%s8909_s18 + $0xa28] sm:$0xff] }
 0x194   : > { %7414 = vmatprep.subr.bf16.mxu0 %v7413_v34  ;;  %v1926_v34 = vld [vmem:[%s8909_s18 + $0x3188] sm:$0xff]  ;;  %v7435_v37 = vpack.c.bf16 %v1923_v31, %v1921_v29  ;;  %v661_v23 = vld [vmem:[%s8909_s18 + $0xa00] sm:$0xff]  ;;  %v668_v29 = vld [vmem:[%s8909_s18 + $0xa38] sm:$0xff] }
 0x195   : > { %v1948_v31 = vld [vmem:[%s8909_s18 + $0x3238] sm:$0xff]  ;;  %v682_v16 = vld [vmem:[%s8909_s18 + $0xaa8] sm:$0xff] }
 0x196   : > { %6136 = vmatpush1.bf16.msra.mxu1 %v6135_v40  ;;  %v647_v40 = vld [vmem:[%s8909_s18 + $0x990] sm:$0xff]  ;;  %v684_v17 = vld [vmem:[%s8909_s18 + $0xab8] sm:$0xff] }
 0x197   : > { %7416 = vmatpush1.bf16.msra.mxu0 %v7415_v41  ;;  %6138 = vmatprep.subr.bf16.mxu1 %v6137_v42  ;;  %v1925_v41 = vld [vmem:[%s8909_s18 + $0x3180] sm:$0xff]  ;;  %v7437_v42 = vpack.c.bf16 %v1928_v35, %v1926_v34  ;;  %v6159_v48 = vpack.c.bf16 %v647_v40, %v645_v39  ;;  %v310_v34 = vld [vmem:[#allocation2 + $0x180] sm:$0xff] }
 0x198   : > { %7418 = vmatprep.subr.bf16.mxu0 %v7417_v46  ;;  %v1930_v46 = vld [vmem:[%s8909_s18 + $0x31a8] sm:$0xff]  ;;  %v7439_v49 = vpack.c.bf16 %v1927_v43, %v1925_v41  ;;  %v1945_v39 = vld [vmem:[%s8909_s18 + $0x3220] sm:$0xff]  ;;  %v1947_v41 = vld [vmem:[%s8909_s18 + $0x3230] sm:$0xff] }
 0x199   : > { %v672_v43 = vld [vmem:[%s8909_s18 + $0xa58] sm:$0xff] }
 0x19a   : > { %6140 = vmatpush1.bf16.msra.mxu1 %v6139_v52  ;;  %v651_v52 = vld [vmem:[%s8909_s18 + $0x9b0] sm:$0xff] }
 0x19b   : > { %7420 = vmatpush1.bf16.msra.mxu0 %v7419_v53  ;;  %6142 = vmatprep.subr.bf16.mxu1 %v6141_v54  ;;  %v1929_v53 = vld [vmem:[%s8909_s18 + $0x31a0] sm:$0xff]  ;;  %v7441_v54 = vpack.c.bf16 %v1932_v47, %v1930_v46  ;;  %v6163_v60 = vpack.c.bf16 %v651_v52, %v649_v51  ;;  %v671_v52 = vld [vmem:[%s8909_s18 + $0xa50] sm:$0xff] }
 0x19c   : > { %7422 = vmatprep.subr.bf16.mxu0 %v7421_v58  ;;  %v1934_v58 = vld [vmem:[%s8909_s18 + $0x31c8] sm:$0xff]  ;;  %v7443_v61 = vpack.c.bf16 %v1931_v55, %v1929_v53  ;;  %v273_v46 = vld [vmem:[#allocation2 + $0x58] sm:$0xff]  ;;  %v1951_v55 = vld [vmem:[%s8909_s18 + $0x3250] sm:$0xff] }
 0x19d   : > { %v669_v51 = vld [vmem:[%s8909_s18 + $0xa40] sm:$0xff] }
 0x19e   : > { %6144 = vmatpush1.bf16.msra.mxu1 %v6143_v0  ;;  %v655_v0 = vld [vmem:[%s8909_s18 + $0x9d0] sm:$0xff]  ;;  %v1949_v53 = vld [vmem:[%s8909_s18 + $0x3240] sm:$0xff] }
 0x19f   : > { %7424 = vmatpush1.bf16.msra.mxu0 %v7423_v1  ;;  %6146 = vmatprep.subr.bf16.mxu1 %v6145_v2  ;;  %v1933_v1 = vld [vmem:[%s8909_s18 + $0x31c0] sm:$0xff]  ;;  %v7445_v2 = vpack.c.bf16 %v1936_v59, %v1934_v58  ;;  %v6167_v8 = vpack.c.bf16 %v655_v0, %v653_v63  ;;  %v1954_v58 = vld [vmem:[%s8909_s18 + $0x3268] sm:$0xff]  ;;  %v1956_v59 = vld [vmem:[%s8909_s18 + $0x3278] sm:$0xff] }
 0x1a0   : > { %7426 = vmatprep.subr.bf16.mxu0 %v7425_v6  ;;  %v1938_v6 = vld [vmem:[%s8909_s18 + $0x31e8] sm:$0xff]  ;;  %v7447_v9 = vpack.c.bf16 %v1935_v3, %v1933_v1  ;;  %v673_v63 = vld [vmem:[%s8909_s18 + $0xa60] sm:$0xff]  ;;  %v675_v0 = vld [vmem:[%s8909_s18 + $0xa70] sm:$0xff] }
 0x1a1   : > { %v1953_v1 = vld [vmem:[%s8909_s18 + $0x3260] sm:$0xff]  ;;  %v1955_v3 = vld [vmem:[%s8909_s18 + $0x3270] sm:$0xff] }
 0x1a2   : > { %6148 = vmatpush1.bf16.msra.mxu1 %v6147_v12  ;;  %v659_v12 = vld [vmem:[%s8909_s18 + $0x9f0] sm:$0xff] }
 0x1a3   : > { %7428 = vmatpush1.bf16.msra.mxu0 %v7427_v13  ;;  %6150 = vmatprep.subr.bf16.mxu1 %v6149_v14  ;;  %v1937_v13 = vld [vmem:[%s8909_s18 + $0x31e0] sm:$0xff]  ;;  %v7449_v14 = vpack.c.bf16 %v1940_v7, %v1938_v6  ;;  %v6171_v20 = vpack.c.bf16 %v659_v12, %v657_v11  ;;  %v1958_v6 = vld [vmem:[%s8909_s18 + $0x3288] sm:$0xff]  ;;  %v1960_v7 = vld [vmem:[%s8909_s18 + $0x3298] sm:$0xff] }
 0x1a4   : > { %7430 = vmatprep.subr.bf16.mxu0 %v7429_v18  ;;  %v1942_v18 = vld [vmem:[%s8909_s18 + $0x3208] sm:$0xff]  ;;  %v7451_v21 = vpack.c.bf16 %v1939_v15, %v1937_v13  ;;  %v677_v11 = vld [vmem:[%s8909_s18 + $0xa80] sm:$0xff]  ;;  %v679_v12 = vld [vmem:[%s8909_s18 + $0xa90] sm:$0xff] }
 0x1a5   : > { %v1957_v13 = vld [vmem:[%s8909_s18 + $0x3280] sm:$0xff]  ;;  %v1959_v15 = vld [vmem:[%s8909_s18 + $0x3290] sm:$0xff] }
 0x1a6   : > { %6152 = vmatpush1.bf16.msra.mxu1 %v6151_v24  ;;  %v663_v24 = vld [vmem:[%s8909_s18 + $0xa10] sm:$0xff] }
 0x1a7   : > { %7432 = vmatpush1.bf16.msra.mxu0 %v7431_v25  ;;  %6154 = vmatprep.subr.bf16.mxu1 %v6153_v26  ;;  %v1941_v25 = vld [vmem:[%s8909_s18 + $0x3200] sm:$0xff]  ;;  %v7453_v26 = vpack.c.bf16 %v1944_v19, %v1942_v18  ;;  %v6175_v33 = vpack.c.bf16 %v663_v24, %v661_v23  ;;  %v1962_v18 = vld [vmem:[%s8909_s18 + $0x32a8] sm:$0xff]  ;;  %v1964_v19 = vld [vmem:[%s8909_s18 + $0x32b8] sm:$0xff] }
 0x1a8   : > { %7434 = vmatprep.subr.bf16.mxu0 %v7433_v30  ;;  %v1946_v30 = vld [vmem:[%s8909_s18 + $0x3228] sm:$0xff]  ;;  %v7455_v35 = vpack.c.bf16 %v1943_v27, %v1941_v25  ;;  %v681_v23 = vld [vmem:[%s8909_s18 + $0xaa0] sm:$0xff]  ;;  %v683_v24 = vld [vmem:[%s8909_s18 + $0xab0] sm:$0xff] }
 0x1a9   : > { %v7457_v40 = vpack.c.bf16 %v1948_v31, %v1946_v30  ;;  %v1961_v25 = vld [vmem:[%s8909_s18 + $0x32a0] sm:$0xff]  ;;  %v1963_v27 = vld [vmem:[%s8909_s18 + $0x32b0] sm:$0xff]  ;;  %v1966_v30 = vld [vmem:[%s8909_s18 + $0x32c8] sm:$0xff] }
 0x1aa   : > { %6156 = vmatpush1.bf16.msra.mxu1 %v6155_v36  ;;  %v6177_v36 = vpack.c.bf16 %v668_v29, %v666_v28  ;;  %v686_v28 = vld [vmem:[%s8909_s18 + $0xac8] sm:$0xff]  ;;  %v688_v29 = vld [vmem:[%s8909_s18 + $0xad8] sm:$0xff] }
 0x1ab   : > { %7436 = vmatpush1.bf16.msra.mxu0 %v7435_v37  ;;  %6158 = vmatprep.subr.bf16.mxu1 %v6157_v38  ;;  %v665_v37 = vld [vmem:[%s8909_s18 + $0xa20] sm:$0xff]  ;;  %v667_v38 = vld [vmem:[%s8909_s18 + $0xa30] sm:$0xff]  ;;  %v1968_v31 = vld [vmem:[%s8909_s18 + $0x32d8] sm:$0xff] }
 0x1ac   : > { %7438 = vmatprep.subr.bf16.mxu0 %v7437_v42  ;;  %v670_v42 = vld [vmem:[%s8909_s18 + $0xa48] sm:$0xff]  ;;  %v6179_v47 = vpack.c.bf16 %v667_v38, %v665_v37  ;;  %v1965_v37 = vld [vmem:[%s8909_s18 + $0x32c0] sm:$0xff]  ;;  %v7477_v38 = vpack.c.bf16 %v1968_v31, %v1966_v30 }
 0x1ad   : > { %v705_v31 = vld [vmem:[%s8909_s18 + $0xb60] sm:$0xff] }
 0x1ae   : > { %6160 = vmatpush1.bf16.msra.mxu1 %v6159_v48  ;;  %v313_v48 = vld [vmem:[#allocation2 + $0x198] sm:$0xff] }
 0x1af   : > { %7440 = vmatpush1.bf16.msra.mxu0 %v7439_v49  ;;  %6162 = vmatprep.subr.bf16.mxu1 %v6161_v50  ;;  %v7459_v49 = vpack.c.bf16 %v1947_v41, %v1945_v39  ;;  %v6181_v50 = vpack.c.bf16 %v672_v43, %v670_v42  ;;  %v1967_v39 = vld [vmem:[%s8909_s18 + $0x32d0] sm:$0xff]  ;;  %v692_v41 = vld [vmem:[%s8909_s18 + $0xaf8] sm:$0xff]  ;;  %v1970_v42 = vld [vmem:[%s8909_s18 + $0x32e8] sm:$0xff] }
 0x1b0   : > { %7442 = vmatprep.subr.bf16.mxu0 %v7441_v54  ;;  %v7461_v54 = vpack.c.bf16 %v1952_v45, %v1950_v44  ;;  %v1972_v43 = vld [vmem:[%s8909_s18 + $0x32f8] sm:$0xff]  ;;  %v7479_v45 = vpack.c.bf16 %v1967_v39, %v1965_v37 }
 0x1b1   : > { %v712_v37 = vld [vmem:[%s8909_s18 + $0xb98] sm:$0xff] }
 0x1b2   : > { %6164 = vmatpush1.bf16.msra.mxu1 %v6163_v60  ;;  %v6183_v60 = vpack.c.bf16 %v671_v52, %v669_v51  ;;  %v1971_v51 = vld [vmem:[%s8909_s18 + $0x32f0] sm:$0xff]  ;;  %v694_v52 = vld [vmem:[%s8909_s18 + $0xb08] sm:$0xff]  ;;  %v1992_v39 = vld [vmem:[%s8909_s18 + $0x3398] sm:$0xff] }
 0x1b3   : > { %7444 = vmatpush1.bf16.msra.mxu0 %v7443_v61  ;;  %6166 = vmatprep.subr.bf16.mxu1 %v6165_v62  ;;  %v7463_v61 = vpack.c.bf16 %v1951_v55, %v1949_v53  ;;  %v6185_v62 = vpack.c.bf16 %v676_v57, %v674_v56  ;;  %v696_v53 = vld [vmem:[%s8909_s18 + $0xb18] sm:$0xff] }
 0x1b4   : > { %7446 = vmatprep.subr.bf16.mxu0 %v7445_v2  ;;  %v7465_v2 = vpack.c.bf16 %v1956_v59, %v1954_v58  ;;  %v1976_v55 = vld [vmem:[%s8909_s18 + $0x3318] sm:$0xff]  ;;  %v6205_v58 = vpack.c.bf16 %v696_v53, %v694_v52  ;;  %v693_v59 = vld [vmem:[%s8909_s18 + $0xb00] sm:$0xff] }
 0x1b6   : > { %6168 = vmatpush1.bf16.msra.mxu1 %v6167_v8  ;;  %v6187_v8 = vpack.c.bf16 %v675_v0, %v673_v63  ;;  %v1975_v63 = vld [vmem:[%s8909_s18 + $0x3310] sm:$0xff]  ;;  %v698_v0 = vld [vmem:[%s8909_s18 + $0xb28] sm:$0xff] }
 0x1b7   : > { %7448 = vmatpush1.bf16.msra.mxu0 %v7447_v9  ;;  %6170 = vmatprep.subr.bf16.mxu1 %v6169_v10  ;;  %v7467_v9 = vpack.c.bf16 %v1955_v3, %v1953_v1  ;;  %v6189_v10 = vpack.c.bf16 %v680_v5, %v678_v4  ;;  %v700_v1 = vld [vmem:[%s8909_s18 + $0xb38] sm:$0xff] }
 0x1b8   : > { %7450 = vmatprep.subr.bf16.mxu0 %v7449_v14  ;;  %v7469_v14 = vpack.c.bf16 %v1960_v7, %v1958_v6  ;;  %v1980_v3 = vld [vmem:[%s8909_s18 + $0x3338] sm:$0xff]  ;;  %v6209_v6 = vpack.c.bf16 %v700_v1, %v698_v0  ;;  %v697_v7 = vld [vmem:[%s8909_s18 + $0xb20] sm:$0xff] }
 0x1ba   : > { %6172 = vmatpush1.bf16.msra.mxu1 %v6171_v20  ;;  %v6191_v20 = vpack.c.bf16 %v679_v12, %v677_v11  ;;  %v1979_v11 = vld [vmem:[%s8909_s18 + $0x3330] sm:$0xff]  ;;  %v702_v12 = vld [vmem:[%s8909_s18 + $0xb48] sm:$0xff] }
 0x1bb   : > { %7452 = vmatpush1.bf16.msra.mxu0 %v7451_v21  ;;  %6174 = vmatprep.subr.bf16.mxu1 %v6173_v22  ;;  %v7471_v21 = vpack.c.bf16 %v1959_v15, %v1957_v13  ;;  %v6193_v22 = vpack.c.bf16 %v684_v17, %v682_v16  ;;  %v704_v13 = vld [vmem:[%s8909_s18 + $0xb58] sm:$0xff] }
 0x1bc   : > { %7454 = vmatprep.subr.bf16.mxu0 %v7453_v26  ;;  %v7473_v26 = vpack.c.bf16 %v1964_v19, %v1962_v18  ;;  %v1984_v15 = vld [vmem:[%s8909_s18 + $0x3358] sm:$0xff]  ;;  %v6213_v18 = vpack.c.bf16 %v704_v13, %v702_v12  ;;  %v701_v19 = vld [vmem:[%s8909_s18 + $0xb40] sm:$0xff] }
 0x1bd   : > { %3194 = vmatmul.mubr.f32.vlgmr.msra.gmra.mrb[0].mxu1 %v270_v32  ;;  %v6195_v32 = vpack.c.bf16 %v683_v24, %v681_v23  ;;  %v1983_v23 = vld [vmem:[%s8909_s18 + $0x3350] sm:$0xff]  ;;  %v706_v24 = vld [vmem:[%s8909_s18 + $0xb68] sm:$0xff] }
 0x1be   : > { %6176 = vmatpush1.bf16.msra.mxu1 %v6175_v33  ;;  %4614 = vmatmul.mubr.f32.vlgmr.msra.gmra.mrb[0].mxu0 %v310_v34  ;;  %v7475_v33 = vpack.c.bf16 %v1963_v27, %v1961_v25  ;;  %v6197_v34 = vpack.c.bf16 %v688_v29, %v686_v28  ;;  %v708_v25 = vld [vmem:[%s8909_s18 + $0xb78] sm:$0xff] }
 0x1bf   : > { %7456 = vmatpush1.bf16.msra.mxu0 %v7455_v35  ;;  %6178 = vmatprep.subr.bf16.mxu1 %v6177_v36  ;;  %v685_v35 = vld [vmem:[%s8909_s18 + $0xac0] sm:$0xff]  ;;  %v687_v36 = vld [vmem:[%s8909_s18 + $0xad0] sm:$0xff]  ;;  %v1988_v27 = vld [vmem:[%s8909_s18 + $0x3378] sm:$0xff]  ;;  %v6217_v30 = vpack.c.bf16 %v708_v25, %v706_v24 }
 0x1c0   : > { %7458 = vmatprep.subr.bf16.mxu0 %v7457_v40  ;;  %3264 = vmatprep.mubr.f32.mxu1 %v273_v46  ;;  %v690_v40 = vld [vmem:[%s8909_s18 + $0xae8] sm:$0xff]  ;;  %v6199_v44 = vpack.c.bf16 %v687_v36, %v685_v35  ;;  %v1987_v35 = vld [vmem:[%s8909_s18 + $0x3370] sm:$0xff] }
 0x1c1   : > { %4684 = vmatprep.mubr.f32.mxu0 %v313_v48  ;;  %v6201_v46 = vpack.c.bf16 %v692_v41, %v690_v40  ;;  %v691_v48 = vld [vmem:[%s8909_s18 + $0xaf0] sm:$0xff]  ;;  %v710_v36 = vld [vmem:[%s8909_s18 + $0xb88] sm:$0xff] }
 0x1c2   : > { %6180 = vmatpush1.bf16.msra.mxu1 %v6179_v47  ;;  %v689_v47 = vld [vmem:[%s8909_s18 + $0xae0] sm:$0xff] }
 0x1c3   : > { %7460 = vmatpush1.bf16.msra.mxu0 %v7459_v49  ;;  %6182 = vmatprep.subr.bf16.mxu1 %v6181_v50  ;;  %v1969_v49 = vld [vmem:[%s8909_s18 + $0x32e0] sm:$0xff]  ;;  %v7481_v50 = vpack.c.bf16 %v1972_v43, %v1970_v42  ;;  %v6203_v56 = vpack.c.bf16 %v691_v48, %v689_v47  ;;  %v6221_v42 = vpack.c.bf16 %v712_v37, %v710_v36  ;;  %v1991_v47 = vld [vmem:[%s8909_s18 + $0x3390] sm:$0xff]  ;;  %v714_v48 = vld [vmem:[%s8909_s18 + $0xba8] sm:$0xff] }
 0x1c4   : > { %7462 = vmatprep.subr.bf16.mxu0 %v7461_v54  ;;  %v1974_v54 = vld [vmem:[%s8909_s18 + $0x3308] sm:$0xff]  ;;  %v7483_v57 = vpack.c.bf16 %v1971_v51, %v1969_v49  ;;  %v709_v43 = vld [vmem:[%s8909_s18 + $0xb80] sm:$0xff]  ;;  %v716_v49 = vld [vmem:[%s8909_s18 + $0xbb8] sm:$0xff] }
 0x1c5   : > { %v1996_v51 = vld [vmem:[%s8909_s18 + $0x33b8] sm:$0xff] }
 0x1c6   : > { %6184 = vmatpush1.bf16.msra.mxu1 %v6183_v60  ;;  %v695_v60 = vld [vmem:[%s8909_s18 + $0xb10] sm:$0xff]  ;;  %v272_v36 = vld [vmem:[#allocation2 + $0x50] sm:$0xff] }
 0x1c7   : > { %7464 = vmatpush1.bf16.msra.mxu0 %v7463_v61  ;;  %6186 = vmatprep.subr.bf16.mxu1 %v6185_v62  ;;  %v1973_v61 = vld [vmem:[%s8909_s18 + $0x3300] sm:$0xff]  ;;  %v7485_v62 = vpack.c.bf16 %v1976_v55, %v1974_v54  ;;  %v6207_v4 = vpack.c.bf16 %v695_v60, %v693_v59  ;;  %v6225_v54 = vpack.c.bf16 %v716_v49, %v714_v48  ;;  %v1995_v59 = vld [vmem:[%s8909_s18 + $0x33b0] sm:$0xff]  ;;  %v718_v60 = vld [vmem:[%s8909_s18 + $0xbc8] sm:$0xff] }
 0x1c8   : > { %7466 = vmatprep.subr.bf16.mxu0 %v7465_v2  ;;  %v1978_v2 = vld [vmem:[%s8909_s18 + $0x3328] sm:$0xff]  ;;  %v7487_v5 = vpack.c.bf16 %v1975_v63, %v1973_v61  ;;  %v713_v55 = vld [vmem:[%s8909_s18 + $0xba0] sm:$0xff]  ;;  %v720_v61 = vld [vmem:[%s8909_s18 + $0xbd8] sm:$0xff] }
 0x1c9   : > { %v2000_v63 = vld [vmem:[%s8909_s18 + $0x33d8] sm:$0xff]  ;;  %v2014_v48 = vld [vmem:[%s8909_s18 + $0x3448] sm:$0xff] }
 0x1ca   : > { %6188 = vmatpush1.bf16.msra.mxu1 %v6187_v8  ;;  %v699_v8 = vld [vmem:[%s8909_s18 + $0xb30] sm:$0xff]  ;;  %v2016_v49 = vld [vmem:[%s8909_s18 + $0x3458] sm:$0xff] }
 0x1cb   : > { %7468 = vmatpush1.bf16.msra.mxu0 %v7467_v9  ;;  %6190 = vmatprep.subr.bf16.mxu1 %v6189_v10  ;;  %v1977_v9 = vld [vmem:[%s8909_s18 + $0x3320] sm:$0xff]  ;;  %v7489_v10 = vpack.c.bf16 %v1980_v3, %v1978_v2  ;;  %v6211_v16 = vpack.c.bf16 %v699_v8, %v697_v7  ;;  %v6229_v2 = vpack.c.bf16 %v720_v61, %v718_v60  ;;  %v1999_v7 = vld [vmem:[%s8909_s18 + $0x33d0] sm:$0xff]  ;;  %v722_v8 = vld [vmem:[%s8909_s18 + $0xbe8] sm:$0xff] }
 0x1cc   : > { %7470 = vmatprep.subr.bf16.mxu0 %v7469_v14  ;;  %v1982_v14 = vld [vmem:[%s8909_s18 + $0x3348] sm:$0xff]  ;;  %v7491_v17 = vpack.c.bf16 %v1979_v11, %v1977_v9  ;;  %v717_v3 = vld [vmem:[%s8909_s18 + $0xbc0] sm:$0xff]  ;;  %v724_v9 = vld [vmem:[%s8909_s18 + $0xbf8] sm:$0xff] }
 0x1cd   : > { %v2004_v11 = vld [vmem:[%s8909_s18 + $0x33f8] sm:$0xff]  ;;  %v738_v60 = vld [vmem:[%s8909_s18 + $0xc68] sm:$0xff] }
 0x1ce   : > { %6192 = vmatpush1.bf16.msra.mxu1 %v6191_v20  ;;  %v703_v20 = vld [vmem:[%s8909_s18 + $0xb50] sm:$0xff]  ;;  %v740_v61 = vld [vmem:[%s8909_s18 + $0xc78] sm:$0xff] }
 0x1cf   : > { %7472 = vmatpush1.bf16.msra.mxu0 %v7471_v21  ;;  %6194 = vmatprep.subr.bf16.mxu1 %v6193_v22  ;;  %v1981_v21 = vld [vmem:[%s8909_s18 + $0x3340] sm:$0xff]  ;;  %v7493_v22 = vpack.c.bf16 %v1984_v15, %v1982_v14  ;;  %v6215_v28 = vpack.c.bf16 %v703_v20, %v701_v19  ;;  %v6233_v14 = vpack.c.bf16 %v724_v9, %v722_v8  ;;  %v2003_v19 = vld [vmem:[%s8909_s18 + $0x33f0] sm:$0xff]  ;;  %v726_v20 = vld [vmem:[%s8909_s18 + $0xc08] sm:$0xff] }
 0x1d0   : > { %7474 = vmatprep.subr.bf16.mxu0 %v7473_v26  ;;  %v1986_v26 = vld [vmem:[%s8909_s18 + $0x3368] sm:$0xff]  ;;  %v7495_v29 = vpack.c.bf16 %v1983_v23, %v1981_v21  ;;  %v721_v15 = vld [vmem:[%s8909_s18 + $0xbe0] sm:$0xff]  ;;  %v728_v21 = vld [vmem:[%s8909_s18 + $0xc18] sm:$0xff] }
 0x1d1   : > { %v2008_v23 = vld [vmem:[%s8909_s18 + $0x3418] sm:$0xff]  ;;  %v742_v8 = vld [vmem:[%s8909_s18 + $0xc88] sm:$0xff] }
 0x1d2   : > { %6196 = vmatpush1.bf16.msra.mxu1 %v6195_v32  ;;  %v707_v32 = vld [vmem:[%s8909_s18 + $0xb70] sm:$0xff]  ;;  %v744_v9 = vld [vmem:[%s8909_s18 + $0xc98] sm:$0xff] }
 0x1d3   : > { %7476 = vmatpush1.bf16.msra.mxu0 %v7475_v33  ;;  %6198 = vmatprep.subr.bf16.mxu1 %v6197_v34  ;;  %v1985_v33 = vld [vmem:[%s8909_s18 + $0x3360] sm:$0xff]  ;;  %v7497_v34 = vpack.c.bf16 %v1988_v27, %v1986_v26  ;;  %v6219_v40 = vpack.c.bf16 %v707_v32, %v705_v31  ;;  %v6237_v26 = vpack.c.bf16 %v728_v21, %v726_v20  ;;  %v2007_v31 = vld [vmem:[%s8909_s18 + $0x3410] sm:$0xff]  ;;  %v730_v32 = vld [vmem:[%s8909_s18 + $0xc28] sm:$0xff] }
 0x1d4   : > { %7478 = vmatprep.subr.bf16.mxu0 %v7477_v38  ;;  %v1990_v38 = vld [vmem:[%s8909_s18 + $0x3388] sm:$0xff]  ;;  %v7499_v41 = vpack.c.bf16 %v1987_v35, %v1985_v33  ;;  %v725_v27 = vld [vmem:[%s8909_s18 + $0xc00] sm:$0xff]  ;;  %v732_v33 = vld [vmem:[%s8909_s18 + $0xc38] sm:$0xff] }
 0x1d5   : > { %v2012_v35 = vld [vmem:[%s8909_s18 + $0x3438] sm:$0xff]  ;;  %v746_v20 = vld [vmem:[%s8909_s18 + $0xca8] sm:$0xff] }
 0x1d6   : > { %6200 = vmatpush1.bf16.msra.mxu1 %v6199_v44  ;;  %v711_v44 = vld [vmem:[%s8909_s18 + $0xb90] sm:$0xff]  ;;  %v748_v21 = vld [vmem:[%s8909_s18 + $0xcb8] sm:$0xff] }
 0x1d7   : > { %7480 = vmatpush1.bf16.msra.mxu0 %v7479_v45  ;;  %6202 = vmatprep.subr.bf16.mxu1 %v6201_v46  ;;  %v1989_v45 = vld [vmem:[%s8909_s18 + $0x3380] sm:$0xff]  ;;  %v7501_v46 = vpack.c.bf16 %v1992_v39, %v1990_v38  ;;  %v6223_v52 = vpack.c.bf16 %v711_v44, %v709_v43  ;;  %v312_v38 = vld [vmem:[#allocation2 + $0x190] sm:$0xff] }
 0x1d8   : > { %7482 = vmatprep.subr.bf16.mxu0 %v7481_v50  ;;  %v1994_v50 = vld [vmem:[%s8909_s18 + $0x33a8] sm:$0xff]  ;;  %v7503_v53 = vpack.c.bf16 %v1991_v47, %v1989_v45  ;;  %v2009_v43 = vld [vmem:[%s8909_s18 + $0x3420] sm:$0xff]  ;;  %v2011_v45 = vld [vmem:[%s8909_s18 + $0x3430] sm:$0xff] }
 0x1d9   : > { %v736_v47 = vld [vmem:[%s8909_s18 + $0xc58] sm:$0xff] }
 0x1da   : > { %6204 = vmatpush1.bf16.msra.mxu1 %v6203_v56  ;;  %v715_v56 = vld [vmem:[%s8909_s18 + $0xbb0] sm:$0xff] }
 0x1db   : > { %7484 = vmatpush1.bf16.msra.mxu0 %v7483_v57  ;;  %6206 = vmatprep.subr.bf16.mxu1 %v6205_v58  ;;  %v1993_v57 = vld [vmem:[%s8909_s18 + $0x33a0] sm:$0xff]  ;;  %v7505_v58 = vpack.c.bf16 %v1996_v51, %v1994_v50  ;;  %v6227_v0 = vpack.c.bf16 %v715_v56, %v713_v55  ;;  %v275_v50 = vld [vmem:[#allocation2 + $0x68] sm:$0xff] }
 0x1dc   : > { %7486 = vmatprep.subr.bf16.mxu0 %v7485_v62  ;;  %v1998_v62 = vld [vmem:[%s8909_s18 + $0x33c8] sm:$0xff]  ;;  %v7507_v1 = vpack.c.bf16 %v1995_v59, %v1993_v57  ;;  %v733_v55 = vld [vmem:[%s8909_s18 + $0xc40] sm:$0xff]  ;;  %v735_v56 = vld [vmem:[%s8909_s18 + $0xc50] sm:$0xff] }
 0x1dd   : > { %v2013_v57 = vld [vmem:[%s8909_s18 + $0x3440] sm:$0xff]  ;;  %v2015_v59 = vld [vmem:[%s8909_s18 + $0x3450] sm:$0xff] }
 0x1de   : > { %6208 = vmatpush1.bf16.msra.mxu1 %v6207_v4  ;;  %v719_v4 = vld [vmem:[%s8909_s18 + $0xbd0] sm:$0xff] }
 0x1df   : > { %7488 = vmatpush1.bf16.msra.mxu0 %v7487_v5  ;;  %6210 = vmatprep.subr.bf16.mxu1 %v6209_v6  ;;  %v1997_v5 = vld [vmem:[%s8909_s18 + $0x33c0] sm:$0xff]  ;;  %v7509_v6 = vpack.c.bf16 %v2000_v63, %v1998_v62  ;;  %v6231_v12 = vpack.c.bf16 %v719_v4, %v717_v3  ;;  %v2018_v62 = vld [vmem:[%s8909_s18 + $0x3468] sm:$0xff]  ;;  %v2020_v63 = vld [vmem:[%s8909_s18 + $0x3478] sm:$0xff] }
 0x1e0   : > { %7490 = vmatprep.subr.bf16.mxu0 %v7489_v10  ;;  %v2002_v10 = vld [vmem:[%s8909_s18 + $0x33e8] sm:$0xff]  ;;  %v7511_v13 = vpack.c.bf16 %v1999_v7, %v1997_v5  ;;  %v737_v3 = vld [vmem:[%s8909_s18 + $0xc60] sm:$0xff]  ;;  %v739_v4 = vld [vmem:[%s8909_s18 + $0xc70] sm:$0xff] }
 0x1e1   : > { %v2017_v5 = vld [vmem:[%s8909_s18 + $0x3460] sm:$0xff]  ;;  %v2019_v7 = vld [vmem:[%s8909_s18 + $0x3470] sm:$0xff] }
 0x1e2   : > { %6212 = vmatpush1.bf16.msra.mxu1 %v6211_v16  ;;  %v723_v16 = vld [vmem:[%s8909_s18 + $0xbf0] sm:$0xff] }
 0x1e3   : > { %7492 = vmatpush1.bf16.msra.mxu0 %v7491_v17  ;;  %6214 = vmatprep.subr.bf16.mxu1 %v6213_v18  ;;  %v2001_v17 = vld [vmem:[%s8909_s18 + $0x33e0] sm:$0xff]  ;;  %v7513_v18 = vpack.c.bf16 %v2004_v11, %v2002_v10  ;;  %v6235_v24 = vpack.c.bf16 %v723_v16, %v721_v15  ;;  %v2022_v10 = vld [vmem:[%s8909_s18 + $0x3488] sm:$0xff]  ;;  %v2024_v11 = vld [vmem:[%s8909_s18 + $0x3498] sm:$0xff] }
 0x1e4   : > { %7494 = vmatprep.subr.bf16.mxu0 %v7493_v22  ;;  %v2006_v22 = vld [vmem:[%s8909_s18 + $0x3408] sm:$0xff]  ;;  %v7515_v25 = vpack.c.bf16 %v2003_v19, %v2001_v17  ;;  %v741_v15 = vld [vmem:[%s8909_s18 + $0xc80] sm:$0xff]  ;;  %v743_v16 = vld [vmem:[%s8909_s18 + $0xc90] sm:$0xff] }
 0x1e5   : > { %v2021_v17 = vld [vmem:[%s8909_s18 + $0x3480] sm:$0xff]  ;;  %v2023_v19 = vld [vmem:[%s8909_s18 + $0x3490] sm:$0xff] }
 0x1e6   : > { %6216 = vmatpush1.bf16.msra.mxu1 %v6215_v28  ;;  %v727_v28 = vld [vmem:[%s8909_s18 + $0xc10] sm:$0xff] }
 0x1e7   : > { %7496 = vmatpush1.bf16.msra.mxu0 %v7495_v29  ;;  %6218 = vmatprep.subr.bf16.mxu1 %v6217_v30  ;;  %v2005_v29 = vld [vmem:[%s8909_s18 + $0x3400] sm:$0xff]  ;;  %v7517_v30 = vpack.c.bf16 %v2008_v23, %v2006_v22  ;;  %v6239_v37 = vpack.c.bf16 %v727_v28, %v725_v27  ;;  %v2026_v22 = vld [vmem:[%s8909_s18 + $0x34a8] sm:$0xff]  ;;  %v2028_v23 = vld [vmem:[%s8909_s18 + $0x34b8] sm:$0xff] }
 0x1e8   : > { %7498 = vmatprep.subr.bf16.mxu0 %v7497_v34  ;;  %v2010_v34 = vld [vmem:[%s8909_s18 + $0x3428] sm:$0xff]  ;;  %v7519_v39 = vpack.c.bf16 %v2007_v31, %v2005_v29  ;;  %v745_v27 = vld [vmem:[%s8909_s18 + $0xca0] sm:$0xff]  ;;  %v747_v28 = vld [vmem:[%s8909_s18 + $0xcb0] sm:$0xff] }
 0x1e9   : > { %v7521_v44 = vpack.c.bf16 %v2012_v35, %v2010_v34  ;;  %v2025_v29 = vld [vmem:[%s8909_s18 + $0x34a0] sm:$0xff]  ;;  %v2027_v31 = vld [vmem:[%s8909_s18 + $0x34b0] sm:$0xff]  ;;  %v2030_v34 = vld [vmem:[%s8909_s18 + $0x34c8] sm:$0xff] }
 0x1ea   : > { %6220 = vmatpush1.bf16.msra.mxu1 %v6219_v40  ;;  %v6241_v40 = vpack.c.bf16 %v732_v33, %v730_v32  ;;  %v750_v32 = vld [vmem:[%s8909_s18 + $0xcc8] sm:$0xff]  ;;  %v752_v33 = vld [vmem:[%s8909_s18 + $0xcd8] sm:$0xff] }
 0x1eb   : > { %7500 = vmatpush1.bf16.msra.mxu0 %v7499_v41  ;;  %6222 = vmatprep.subr.bf16.mxu1 %v6221_v42  ;;  %v729_v41 = vld [vmem:[%s8909_s18 + $0xc20] sm:$0xff]  ;;  %v731_v42 = vld [vmem:[%s8909_s18 + $0xc30] sm:$0xff]  ;;  %v2032_v35 = vld [vmem:[%s8909_s18 + $0x34d8] sm:$0xff] }
 0x1ec   : > { %7502 = vmatprep.subr.bf16.mxu0 %v7501_v46  ;;  %v734_v46 = vld [vmem:[%s8909_s18 + $0xc48] sm:$0xff]  ;;  %v6243_v51 = vpack.c.bf16 %v731_v42, %v729_v41  ;;  %v2029_v41 = vld [vmem:[%s8909_s18 + $0x34c0] sm:$0xff]  ;;  %v7541_v42 = vpack.c.bf16 %v2032_v35, %v2030_v34 }
 0x1ed   : > { %v769_v35 = vld [vmem:[%s8909_s18 + $0xd60] sm:$0xff] }
 0x1ee   : > { %6224 = vmatpush1.bf16.msra.mxu1 %v6223_v52  ;;  %v315_v52 = vld [vmem:[#allocation2 + $0x1a8] sm:$0xff] }
 0x1ef   : > { %7504 = vmatpush1.bf16.msra.mxu0 %v7503_v53  ;;  %6226 = vmatprep.subr.bf16.mxu1 %v6225_v54  ;;  %v7523_v53 = vpack.c.bf16 %v2011_v45, %v2009_v43  ;;  %v6245_v54 = vpack.c.bf16 %v736_v47, %v734_v46  ;;  %v2031_v43 = vld [vmem:[%s8909_s18 + $0x34d0] sm:$0xff]  ;;  %v756_v45 = vld [vmem:[%s8909_s18 + $0xcf8] sm:$0xff]  ;;  %v2034_v46 = vld [vmem:[%s8909_s18 + $0x34e8] sm:$0xff] }
 0x1f0   : > { %7506 = vmatprep.subr.bf16.mxu0 %v7505_v58  ;;  %v7525_v58 = vpack.c.bf16 %v2016_v49, %v2014_v48  ;;  %v2036_v47 = vld [vmem:[%s8909_s18 + $0x34f8] sm:$0xff]  ;;  %v7543_v49 = vpack.c.bf16 %v2031_v43, %v2029_v41 }
 0x1f1   : > { %v776_v41 = vld [vmem:[%s8909_s18 + $0xd98] sm:$0xff] }
 0x1f2   : > { %6228 = vmatpush1.bf16.msra.mxu1 %v6227_v0  ;;  %v6247_v0 = vpack.c.bf16 %v735_v56, %v733_v55  ;;  %v2035_v55 = vld [vmem:[%s8909_s18 + $0x34f0] sm:$0xff]  ;;  %v758_v56 = vld [vmem:[%s8909_s18 + $0xd08] sm:$0xff]  ;;  %v2056_v43 = vld [vmem:[%s8909_s18 + $0x3598] sm:$0xff] }
 0x1f3   : > { %7508 = vmatpush1.bf16.msra.mxu0 %v7507_v1  ;;  %6230 = vmatprep.subr.bf16.mxu1 %v6229_v2  ;;  %v7527_v1 = vpack.c.bf16 %v2015_v59, %v2013_v57  ;;  %v6249_v2 = vpack.c.bf16 %v740_v61, %v738_v60  ;;  %v760_v57 = vld [vmem:[%s8909_s18 + $0xd18] sm:$0xff] }
 0x1f4   : > { %7510 = vmatprep.subr.bf16.mxu0 %v7509_v6  ;;  %v7529_v6 = vpack.c.bf16 %v2020_v63, %v2018_v62  ;;  %v2040_v59 = vld [vmem:[%s8909_s18 + $0x3518] sm:$0xff]  ;;  %v6269_v62 = vpack.c.bf16 %v760_v57, %v758_v56  ;;  %v757_v63 = vld [vmem:[%s8909_s18 + $0xd00] sm:$0xff] }
 0x1f6   : > { %6232 = vmatpush1.bf16.msra.mxu1 %v6231_v12  ;;  %v6251_v12 = vpack.c.bf16 %v739_v4, %v737_v3  ;;  %v2039_v3 = vld [vmem:[%s8909_s18 + $0x3510] sm:$0xff]  ;;  %v762_v4 = vld [vmem:[%s8909_s18 + $0xd28] sm:$0xff] }
 0x1f7   : > { %7512 = vmatpush1.bf16.msra.mxu0 %v7511_v13  ;;  %6234 = vmatprep.subr.bf16.mxu1 %v6233_v14  ;;  %v7531_v13 = vpack.c.bf16 %v2019_v7, %v2017_v5  ;;  %v6253_v14 = vpack.c.bf16 %v744_v9, %v742_v8  ;;  %v764_v5 = vld [vmem:[%s8909_s18 + $0xd38] sm:$0xff] }
 0x1f8   : > { %7514 = vmatprep.subr.bf16.mxu0 %v7513_v18  ;;  %v7533_v18 = vpack.c.bf16 %v2024_v11, %v2022_v10  ;;  %v2044_v7 = vld [vmem:[%s8909_s18 + $0x3538] sm:$0xff]  ;;  %v6273_v10 = vpack.c.bf16 %v764_v5, %v762_v4  ;;  %v761_v11 = vld [vmem:[%s8909_s18 + $0xd20] sm:$0xff] }
 0x1fa   : > { %6236 = vmatpush1.bf16.msra.mxu1 %v6235_v24  ;;  %v6255_v24 = vpack.c.bf16 %v743_v16, %v741_v15  ;;  %v2043_v15 = vld [vmem:[%s8909_s18 + $0x3530] sm:$0xff]  ;;  %v766_v16 = vld [vmem:[%s8909_s18 + $0xd48] sm:$0xff] }
 0x1fb   : > { %7516 = vmatpush1.bf16.msra.mxu0 %v7515_v25  ;;  %6238 = vmatprep.subr.bf16.mxu1 %v6237_v26  ;;  %v7535_v25 = vpack.c.bf16 %v2023_v19, %v2021_v17  ;;  %v6257_v26 = vpack.c.bf16 %v748_v21, %v746_v20  ;;  %v768_v17 = vld [vmem:[%s8909_s18 + $0xd58] sm:$0xff] }
 0x1fc   : > { %7518 = vmatprep.subr.bf16.mxu0 %v7517_v30  ;;  %v7537_v30 = vpack.c.bf16 %v2028_v23, %v2026_v22  ;;  %v2048_v19 = vld [vmem:[%s8909_s18 + $0x3558] sm:$0xff]  ;;  %v6277_v22 = vpack.c.bf16 %v768_v17, %v766_v16  ;;  %v765_v23 = vld [vmem:[%s8909_s18 + $0xd40] sm:$0xff] }
 0x1fd   : > { %3265 = vmatmul.mubr.f32.vlgmr.msra.gmra.mrb[0].mxu1 %v272_v36  ;;  %v6259_v36 = vpack.c.bf16 %v747_v28, %v745_v27  ;;  %v2047_v27 = vld [vmem:[%s8909_s18 + $0x3550] sm:$0xff]  ;;  %v770_v28 = vld [vmem:[%s8909_s18 + $0xd68] sm:$0xff] }
 0x1fe   : > { %6240 = vmatpush1.bf16.msra.mxu1 %v6239_v37  ;;  %4685 = vmatmul.mubr.f32.vlgmr.msra.gmra.mrb[0].mxu0 %v312_v38  ;;  %v7539_v37 = vpack.c.bf16 %v2027_v31, %v2025_v29  ;;  %v6261_v38 = vpack.c.bf16 %v752_v33, %v750_v32  ;;  %v772_v29 = vld [vmem:[%s8909_s18 + $0xd78] sm:$0xff] }
 0x1ff   : > { %7520 = vmatpush1.bf16.msra.mxu0 %v7519_v39  ;;  %6242 = vmatprep.subr.bf16.mxu1 %v6241_v40  ;;  %v749_v39 = vld [vmem:[%s8909_s18 + $0xcc0] sm:$0xff]  ;;  %v751_v40 = vld [vmem:[%s8909_s18 + $0xcd0] sm:$0xff]  ;;  %v2052_v31 = vld [vmem:[%s8909_s18 + $0x3578] sm:$0xff]  ;;  %v6281_v34 = vpack.c.bf16 %v772_v29, %v770_v28 }
 0x200   : > { %7522 = vmatprep.subr.bf16.mxu0 %v7521_v44  ;;  %3335 = vmatprep.mubr.f32.mxu1 %v275_v50  ;;  %v754_v44 = vld [vmem:[%s8909_s18 + $0xce8] sm:$0xff]  ;;  %v6263_v48 = vpack.c.bf16 %v751_v40, %v749_v39  ;;  %v2051_v39 = vld [vmem:[%s8909_s18 + $0x3570] sm:$0xff] }
 0x201   : > { %4755 = vmatprep.mubr.f32.mxu0 %v315_v52  ;;  %v6265_v50 = vpack.c.bf16 %v756_v45, %v754_v44  ;;  %v755_v52 = vld [vmem:[%s8909_s18 + $0xcf0] sm:$0xff]  ;;  %v774_v40 = vld [vmem:[%s8909_s18 + $0xd88] sm:$0xff] }
 0x202   : > { %6244 = vmatpush1.bf16.msra.mxu1 %v6243_v51  ;;  %v753_v51 = vld [vmem:[%s8909_s18 + $0xce0] sm:$0xff] }
 0x203   : > { %7524 = vmatpush1.bf16.msra.mxu0 %v7523_v53  ;;  %6246 = vmatprep.subr.bf16.mxu1 %v6245_v54  ;;  %v2033_v53 = vld [vmem:[%s8909_s18 + $0x34e0] sm:$0xff]  ;;  %v7545_v54 = vpack.c.bf16 %v2036_v47, %v2034_v46  ;;  %v6267_v60 = vpack.c.bf16 %v755_v52, %v753_v51  ;;  %v6285_v46 = vpack.c.bf16 %v776_v41, %v774_v40  ;;  %v2055_v51 = vld [vmem:[%s8909_s18 + $0x3590] sm:$0xff]  ;;  %v778_v52 = vld [vmem:[%s8909_s18 + $0xda8] sm:$0xff] }
 0x204   : > { %7526 = vmatprep.subr.bf16.mxu0 %v7525_v58  ;;  %v2038_v58 = vld [vmem:[%s8909_s18 + $0x3508] sm:$0xff]  ;;  %v7547_v61 = vpack.c.bf16 %v2035_v55, %v2033_v53  ;;  %v773_v47 = vld [vmem:[%s8909_s18 + $0xd80] sm:$0xff]  ;;  %v780_v53 = vld [vmem:[%s8909_s18 + $0xdb8] sm:$0xff] }
 0x205   : > { %v2060_v55 = vld [vmem:[%s8909_s18 + $0x35b8] sm:$0xff]  ;;  %v274_v40 = vld [vmem:[#allocation2 + $0x60] sm:$0xff] }
 0x206   : > { %6248 = vmatpush1.bf16.msra.mxu1 %v6247_v0  ;;  %v759_v0 = vld [vmem:[%s8909_s18 + $0xd10] sm:$0xff] }
 0x207   : > { %7528 = vmatpush1.bf16.msra.mxu0 %v7527_v1  ;;  %6250 = vmatprep.subr.bf16.mxu1 %v6249_v2  ;;  %v2037_v1 = vld [vmem:[%s8909_s18 + $0x3500] sm:$0xff]  ;;  %v7549_v2 = vpack.c.bf16 %v2040_v59, %v2038_v58  ;;  %v6271_v8 = vpack.c.bf16 %v759_v0, %v757_v63  ;;  %v6289_v58 = vpack.c.bf16 %v780_v53, %v778_v52  ;;  %v2059_v63 = vld [vmem:[%s8909_s18 + $0x35b0] sm:$0xff]  ;;  %v782_v0 = vld [vmem:[%s8909_s18 + $0xdc8] sm:$0xff] }
 0x208   : > { %7530 = vmatprep.subr.bf16.mxu0 %v7529_v6  ;;  %v2042_v6 = vld [vmem:[%s8909_s18 + $0x3528] sm:$0xff]  ;;  %v7551_v9 = vpack.c.bf16 %v2039_v3, %v2037_v1  ;;  %v777_v59 = vld [vmem:[%s8909_s18 + $0xda0] sm:$0xff]  ;;  %v784_v1 = vld [vmem:[%s8909_s18 + $0xdd8] sm:$0xff] }
 0x209   : > { %v2064_v3 = vld [vmem:[%s8909_s18 + $0x35d8] sm:$0xff]  ;;  %v2078_v52 = vld [vmem:[%s8909_s18 + $0x3648] sm:$0xff] }
 0x20a   : > { %6252 = vmatpush1.bf16.msra.mxu1 %v6251_v12  ;;  %v763_v12 = vld [vmem:[%s8909_s18 + $0xd30] sm:$0xff]  ;;  %v2080_v53 = vld [vmem:[%s8909_s18 + $0x3658] sm:$0xff] }
 0x20b   : > { %7532 = vmatpush1.bf16.msra.mxu0 %v7531_v13  ;;  %6254 = vmatprep.subr.bf16.mxu1 %v6253_v14  ;;  %v2041_v13 = vld [vmem:[%s8909_s18 + $0x3520] sm:$0xff]  ;;  %v7553_v14 = vpack.c.bf16 %v2044_v7, %v2042_v6  ;;  %v6275_v20 = vpack.c.bf16 %v763_v12, %v761_v11  ;;  %v6293_v6 = vpack.c.bf16 %v784_v1, %v782_v0  ;;  %v2063_v11 = vld [vmem:[%s8909_s18 + $0x35d0] sm:$0xff]  ;;  %v786_v12 = vld [vmem:[%s8909_s18 + $0xde8] sm:$0xff] }
 0x20c   : > { %7534 = vmatprep.subr.bf16.mxu0 %v7533_v18  ;;  %v2046_v18 = vld [vmem:[%s8909_s18 + $0x3548] sm:$0xff]  ;;  %v7555_v21 = vpack.c.bf16 %v2043_v15, %v2041_v13  ;;  %v781_v7 = vld [vmem:[%s8909_s18 + $0xdc0] sm:$0xff]  ;;  %v788_v13 = vld [vmem:[%s8909_s18 + $0xdf8] sm:$0xff] }
 0x20d   : > { %v2068_v15 = vld [vmem:[%s8909_s18 + $0x35f8] sm:$0xff]  ;;  %v802_v0 = vld [vmem:[%s8909_s18 + $0xe68] sm:$0xff] }
 0x20e   : > { %6256 = vmatpush1.bf16.msra.mxu1 %v6255_v24  ;;  %v767_v24 = vld [vmem:[%s8909_s18 + $0xd50] sm:$0xff]  ;;  %v804_v1 = vld [vmem:[%s8909_s18 + $0xe78] sm:$0xff] }
 0x20f   : > { %7536 = vmatpush1.bf16.msra.mxu0 %v7535_v25  ;;  %6258 = vmatprep.subr.bf16.mxu1 %v6257_v26  ;;  %v2045_v25 = vld [vmem:[%s8909_s18 + $0x3540] sm:$0xff]  ;;  %v7557_v26 = vpack.c.bf16 %v2048_v19, %v2046_v18  ;;  %v6279_v32 = vpack.c.bf16 %v767_v24, %v765_v23  ;;  %v6297_v18 = vpack.c.bf16 %v788_v13, %v786_v12  ;;  %v2067_v23 = vld [vmem:[%s8909_s18 + $0x35f0] sm:$0xff]  ;;  %v790_v24 = vld [vmem:[%s8909_s18 + $0xe08] sm:$0xff] }
 0x210   : > { %7538 = vmatprep.subr.bf16.mxu0 %v7537_v30  ;;  %v2050_v30 = vld [vmem:[%s8909_s18 + $0x3568] sm:$0xff]  ;;  %v7559_v33 = vpack.c.bf16 %v2047_v27, %v2045_v25  ;;  %v785_v19 = vld [vmem:[%s8909_s18 + $0xde0] sm:$0xff]  ;;  %v792_v25 = vld [vmem:[%s8909_s18 + $0xe18] sm:$0xff] }
 0x211   : > { %v2072_v27 = vld [vmem:[%s8909_s18 + $0x3618] sm:$0xff]  ;;  %v806_v12 = vld [vmem:[%s8909_s18 + $0xe88] sm:$0xff] }
 0x212   : > { %6260 = vmatpush1.bf16.msra.mxu1 %v6259_v36  ;;  %v771_v36 = vld [vmem:[%s8909_s18 + $0xd70] sm:$0xff]  ;;  %v808_v13 = vld [vmem:[%s8909_s18 + $0xe98] sm:$0xff] }
 0x213   : > { %7540 = vmatpush1.bf16.msra.mxu0 %v7539_v37  ;;  %6262 = vmatprep.subr.bf16.mxu1 %v6261_v38  ;;  %v2049_v37 = vld [vmem:[%s8909_s18 + $0x3560] sm:$0xff]  ;;  %v7561_v38 = vpack.c.bf16 %v2052_v31, %v2050_v30  ;;  %v6283_v44 = vpack.c.bf16 %v771_v36, %v769_v35  ;;  %v6301_v30 = vpack.c.bf16 %v792_v25, %v790_v24  ;;  %v2071_v35 = vld [vmem:[%s8909_s18 + $0x3610] sm:$0xff]  ;;  %v794_v36 = vld [vmem:[%s8909_s18 + $0xe28] sm:$0xff] }
 0x214   : > { %7542 = vmatprep.subr.bf16.mxu0 %v7541_v42  ;;  %v2054_v42 = vld [vmem:[%s8909_s18 + $0x3588] sm:$0xff]  ;;  %v7563_v45 = vpack.c.bf16 %v2051_v39, %v2049_v37  ;;  %v789_v31 = vld [vmem:[%s8909_s18 + $0xe00] sm:$0xff]  ;;  %v796_v37 = vld [vmem:[%s8909_s18 + $0xe38] sm:$0xff] }
 0x215   : > { %v2076_v39 = vld [vmem:[%s8909_s18 + $0x3638] sm:$0xff]  ;;  %v810_v24 = vld [vmem:[%s8909_s18 + $0xea8] sm:$0xff] }
 0x216   : > { %6264 = vmatpush1.bf16.msra.mxu1 %v6263_v48  ;;  %v775_v48 = vld [vmem:[%s8909_s18 + $0xd90] sm:$0xff]  ;;  %v812_v25 = vld [vmem:[%s8909_s18 + $0xeb8] sm:$0xff] }
 0x217   : > { %7544 = vmatpush1.bf16.msra.mxu0 %v7543_v49  ;;  %6266 = vmatprep.subr.bf16.mxu1 %v6265_v50  ;;  %v2053_v49 = vld [vmem:[%s8909_s18 + $0x3580] sm:$0xff]  ;;  %v7565_v50 = vpack.c.bf16 %v2056_v43, %v2054_v42  ;;  %v6287_v56 = vpack.c.bf16 %v775_v48, %v773_v47  ;;  %v314_v42 = vld [vmem:[#allocation2 + $0x1a0] sm:$0xff] }
 0x218   : > { %7546 = vmatprep.subr.bf16.mxu0 %v7545_v54  ;;  %v2058_v54 = vld [vmem:[%s8909_s18 + $0x35a8] sm:$0xff]  ;;  %v7567_v57 = vpack.c.bf16 %v2055_v51, %v2053_v49  ;;  %v2073_v47 = vld [vmem:[%s8909_s18 + $0x3620] sm:$0xff]  ;;  %v2075_v49 = vld [vmem:[%s8909_s18 + $0x3630] sm:$0xff] }
 0x219   : > { %v800_v51 = vld [vmem:[%s8909_s18 + $0xe58] sm:$0xff] }
 0x21a   : > { %6268 = vmatpush1.bf16.msra.mxu1 %v6267_v60  ;;  %v779_v60 = vld [vmem:[%s8909_s18 + $0xdb0] sm:$0xff] }
 0x21b   : > { %7548 = vmatpush1.bf16.msra.mxu0 %v7547_v61  ;;  %6270 = vmatprep.subr.bf16.mxu1 %v6269_v62  ;;  %v2057_v61 = vld [vmem:[%s8909_s18 + $0x35a0] sm:$0xff]  ;;  %v7569_v62 = vpack.c.bf16 %v2060_v55, %v2058_v54  ;;  %v6291_v4 = vpack.c.bf16 %v779_v60, %v777_v59  ;;  %v799_v60 = vld [vmem:[%s8909_s18 + $0xe50] sm:$0xff] }
 0x21c   : > { %7550 = vmatprep.subr.bf16.mxu0 %v7549_v2  ;;  %v2062_v2 = vld [vmem:[%s8909_s18 + $0x35c8] sm:$0xff]  ;;  %v7571_v5 = vpack.c.bf16 %v2059_v63, %v2057_v61  ;;  %v277_v54 = vld [vmem:[#allocation2 + $0x78] sm:$0xff]  ;;  %v2079_v63 = vld [vmem:[%s8909_s18 + $0x3650] sm:$0xff] }
 0x21d   : > { %v797_v59 = vld [vmem:[%s8909_s18 + $0xe40] sm:$0xff] }
 0x21e   : > { %6272 = vmatpush1.bf16.msra.mxu1 %v6271_v8  ;;  %v783_v8 = vld [vmem:[%s8909_s18 + $0xdd0] sm:$0xff]  ;;  %v2077_v61 = vld [vmem:[%s8909_s18 + $0x3640] sm:$0xff] }
 0x21f   : > { %7552 = vmatpush1.bf16.msra.mxu0 %v7551_v9  ;;  %6274 = vmatprep.subr.bf16.mxu1 %v6273_v10  ;;  %v2061_v9 = vld [vmem:[%s8909_s18 + $0x35c0] sm:$0xff]  ;;  %v7573_v10 = vpack.c.bf16 %v2064_v3, %v2062_v2  ;;  %v6295_v16 = vpack.c.bf16 %v783_v8, %v781_v7  ;;  %v2082_v2 = vld [vmem:[%s8909_s18 + $0x3668] sm:$0xff]  ;;  %v2084_v3 = vld [vmem:[%s8909_s18 + $0x3678] sm:$0xff] }
 0x220   : > { %7554 = vmatprep.subr.bf16.mxu0 %v7553_v14  ;;  %v2066_v14 = vld [vmem:[%s8909_s18 + $0x35e8] sm:$0xff]  ;;  %v7575_v17 = vpack.c.bf16 %v2063_v11, %v2061_v9  ;;  %v801_v7 = vld [vmem:[%s8909_s18 + $0xe60] sm:$0xff]  ;;  %v803_v8 = vld [vmem:[%s8909_s18 + $0xe70] sm:$0xff] }
 0x221   : > { %v2081_v9 = vld [vmem:[%s8909_s18 + $0x3660] sm:$0xff]  ;;  %v2083_v11 = vld [vmem:[%s8909_s18 + $0x3670] sm:$0xff] }
 0x222   : > { %6276 = vmatpush1.bf16.msra.mxu1 %v6275_v20  ;;  %v787_v20 = vld [vmem:[%s8909_s18 + $0xdf0] sm:$0xff] }
 0x223   : > { %7556 = vmatpush1.bf16.msra.mxu0 %v7555_v21  ;;  %6278 = vmatprep.subr.bf16.mxu1 %v6277_v22  ;;  %v2065_v21 = vld [vmem:[%s8909_s18 + $0x35e0] sm:$0xff]  ;;  %v7577_v22 = vpack.c.bf16 %v2068_v15, %v2066_v14  ;;  %v6299_v28 = vpack.c.bf16 %v787_v20, %v785_v19  ;;  %v2086_v14 = vld [vmem:[%s8909_s18 + $0x3688] sm:$0xff]  ;;  %v2088_v15 = vld [vmem:[%s8909_s18 + $0x3698] sm:$0xff] }
 0x224   : > { %7558 = vmatprep.subr.bf16.mxu0 %v7557_v26  ;;  %v2070_v26 = vld [vmem:[%s8909_s18 + $0x3608] sm:$0xff]  ;;  %v7579_v29 = vpack.c.bf16 %v2067_v23, %v2065_v21  ;;  %v805_v19 = vld [vmem:[%s8909_s18 + $0xe80] sm:$0xff]  ;;  %v807_v20 = vld [vmem:[%s8909_s18 + $0xe90] sm:$0xff] }
 0x225   : > { %v2085_v21 = vld [vmem:[%s8909_s18 + $0x3680] sm:$0xff]  ;;  %v2087_v23 = vld [vmem:[%s8909_s18 + $0x3690] sm:$0xff] }
 0x226   : > { %6280 = vmatpush1.bf16.msra.mxu1 %v6279_v32  ;;  %v791_v32 = vld [vmem:[%s8909_s18 + $0xe10] sm:$0xff] }
 0x227   : > { %7560 = vmatpush1.bf16.msra.mxu0 %v7559_v33  ;;  %6282 = vmatprep.subr.bf16.mxu1 %v6281_v34  ;;  %v2069_v33 = vld [vmem:[%s8909_s18 + $0x3600] sm:$0xff]  ;;  %v7581_v34 = vpack.c.bf16 %v2072_v27, %v2070_v26  ;;  %v6303_v41 = vpack.c.bf16 %v791_v32, %v789_v31  ;;  %v2090_v26 = vld [vmem:[%s8909_s18 + $0x36a8] sm:$0xff]  ;;  %v2092_v27 = vld [vmem:[%s8909_s18 + $0x36b8] sm:$0xff] }
 0x228   : > { %7562 = vmatprep.subr.bf16.mxu0 %v7561_v38  ;;  %v2074_v38 = vld [vmem:[%s8909_s18 + $0x3628] sm:$0xff]  ;;  %v7583_v43 = vpack.c.bf16 %v2071_v35, %v2069_v33  ;;  %v809_v31 = vld [vmem:[%s8909_s18 + $0xea0] sm:$0xff]  ;;  %v811_v32 = vld [vmem:[%s8909_s18 + $0xeb0] sm:$0xff] }
 0x229   : > { %v7585_v48 = vpack.c.bf16 %v2076_v39, %v2074_v38  ;;  %v2089_v33 = vld [vmem:[%s8909_s18 + $0x36a0] sm:$0xff]  ;;  %v2091_v35 = vld [vmem:[%s8909_s18 + $0x36b0] sm:$0xff]  ;;  %v2094_v38 = vld [vmem:[%s8909_s18 + $0x36c8] sm:$0xff] }
 0x22a   : > { %6284 = vmatpush1.bf16.msra.mxu1 %v6283_v44  ;;  %v6305_v44 = vpack.c.bf16 %v796_v37, %v794_v36  ;;  %v814_v36 = vld [vmem:[%s8909_s18 + $0xec8] sm:$0xff]  ;;  %v816_v37 = vld [vmem:[%s8909_s18 + $0xed8] sm:$0xff] }
 0x22b   : > { %7564 = vmatpush1.bf16.msra.mxu0 %v7563_v45  ;;  %6286 = vmatprep.subr.bf16.mxu1 %v6285_v46  ;;  %v793_v45 = vld [vmem:[%s8909_s18 + $0xe20] sm:$0xff]  ;;  %v795_v46 = vld [vmem:[%s8909_s18 + $0xe30] sm:$0xff]  ;;  %v2096_v39 = vld [vmem:[%s8909_s18 + $0x36d8] sm:$0xff] }
 0x22c   : > { %7566 = vmatprep.subr.bf16.mxu0 %v7565_v50  ;;  %v798_v50 = vld [vmem:[%s8909_s18 + $0xe48] sm:$0xff]  ;;  %v6307_v55 = vpack.c.bf16 %v795_v46, %v793_v45  ;;  %v2093_v45 = vld [vmem:[%s8909_s18 + $0x36c0] sm:$0xff]  ;;  %v7605_v46 = vpack.c.bf16 %v2096_v39, %v2094_v38 }
 0x22d   : > { %v833_v39 = vld [vmem:[%s8909_s18 + $0xf60] sm:$0xff] }
 0x22e   : > { %6288 = vmatpush1.bf16.msra.mxu1 %v6287_v56  ;;  %v317_v56 = vld [vmem:[#allocation2 + $0x1b8] sm:$0xff] }
 0x22f   : > { %7568 = vmatpush1.bf16.msra.mxu0 %v7567_v57  ;;  %6290 = vmatprep.subr.bf16.mxu1 %v6289_v58  ;;  %v7587_v57 = vpack.c.bf16 %v2075_v49, %v2073_v47  ;;  %v6309_v58 = vpack.c.bf16 %v800_v51, %v798_v50  ;;  %v2095_v47 = vld [vmem:[%s8909_s18 + $0x36d0] sm:$0xff]  ;;  %v820_v49 = vld [vmem:[%s8909_s18 + $0xef8] sm:$0xff]  ;;  %v2098_v50 = vld [vmem:[%s8909_s18 + $0x36e8] sm:$0xff] }
 0x230   : > { %7570 = vmatprep.subr.bf16.mxu0 %v7569_v62  ;;  %v7589_v62 = vpack.c.bf16 %v2080_v53, %v2078_v52  ;;  %v2100_v51 = vld [vmem:[%s8909_s18 + $0x36f8] sm:$0xff]  ;;  %v7607_v53 = vpack.c.bf16 %v2095_v47, %v2093_v45 }
 0x231   : > { %v840_v45 = vld [vmem:[%s8909_s18 + $0xf98] sm:$0xff] }
 0x232   : > { %6292 = vmatpush1.bf16.msra.mxu1 %v6291_v4  ;;  %v6311_v4 = vpack.c.bf16 %v799_v60, %v797_v59  ;;  %v2099_v59 = vld [vmem:[%s8909_s18 + $0x36f0] sm:$0xff]  ;;  %v822_v60 = vld [vmem:[%s8909_s18 + $0xf08] sm:$0xff]  ;;  %v2120_v47 = vld [vmem:[%s8909_s18 + $0x3798] sm:$0xff] }
 0x233   : > { %7572 = vmatpush1.bf16.msra.mxu0 %v7571_v5  ;;  %6294 = vmatprep.subr.bf16.mxu1 %v6293_v6  ;;  %v7591_v5 = vpack.c.bf16 %v2079_v63, %v2077_v61  ;;  %v6313_v6 = vpack.c.bf16 %v804_v1, %v802_v0  ;;  %v824_v61 = vld [vmem:[%s8909_s18 + $0xf18] sm:$0xff] }
 0x234   : > { %7574 = vmatprep.subr.bf16.mxu0 %v7573_v10  ;;  %v7593_v10 = vpack.c.bf16 %v2084_v3, %v2082_v2  ;;  %v2104_v63 = vld [vmem:[%s8909_s18 + $0x3718] sm:$0xff]  ;;  %v6333_v2 = vpack.c.bf16 %v824_v61, %v822_v60  ;;  %v821_v3 = vld [vmem:[%s8909_s18 + $0xf00] sm:$0xff] }
 0x236   : > { %6296 = vmatpush1.bf16.msra.mxu1 %v6295_v16  ;;  %v6315_v16 = vpack.c.bf16 %v803_v8, %v801_v7  ;;  %v2103_v7 = vld [vmem:[%s8909_s18 + $0x3710] sm:$0xff]  ;;  %v826_v8 = vld [vmem:[%s8909_s18 + $0xf28] sm:$0xff] }
 0x237   : > { %7576 = vmatpush1.bf16.msra.mxu0 %v7575_v17  ;;  %6298 = vmatprep.subr.bf16.mxu1 %v6297_v18  ;;  %v7595_v17 = vpack.c.bf16 %v2083_v11, %v2081_v9  ;;  %v6317_v18 = vpack.c.bf16 %v808_v13, %v806_v12  ;;  %v828_v9 = vld [vmem:[%s8909_s18 + $0xf38] sm:$0xff] }
 0x238   : > { %7578 = vmatprep.subr.bf16.mxu0 %v7577_v22  ;;  %v7597_v22 = vpack.c.bf16 %v2088_v15, %v2086_v14  ;;  %v2108_v11 = vld [vmem:[%s8909_s18 + $0x3738] sm:$0xff]  ;;  %v6337_v14 = vpack.c.bf16 %v828_v9, %v826_v8  ;;  %v825_v15 = vld [vmem:[%s8909_s18 + $0xf20] sm:$0xff] }
 0x23a   : > { %6300 = vmatpush1.bf16.msra.mxu1 %v6299_v28  ;;  %v6319_v28 = vpack.c.bf16 %v807_v20, %v805_v19  ;;  %v2107_v19 = vld [vmem:[%s8909_s18 + $0x3730] sm:$0xff]  ;;  %v830_v20 = vld [vmem:[%s8909_s18 + $0xf48] sm:$0xff] }
 0x23b   : > { %7580 = vmatpush1.bf16.msra.mxu0 %v7579_v29  ;;  %6302 = vmatprep.subr.bf16.mxu1 %v6301_v30  ;;  %v7599_v29 = vpack.c.bf16 %v2087_v23, %v2085_v21  ;;  %v6321_v30 = vpack.c.bf16 %v812_v25, %v810_v24  ;;  %v832_v21 = vld [vmem:[%s8909_s18 + $0xf58] sm:$0xff] }
 0x23c   : > { %7582 = vmatprep.subr.bf16.mxu0 %v7581_v34  ;;  %v7601_v34 = vpack.c.bf16 %v2092_v27, %v2090_v26  ;;  %v2112_v23 = vld [vmem:[%s8909_s18 + $0x3758] sm:$0xff]  ;;  %v6341_v26 = vpack.c.bf16 %v832_v21, %v830_v20  ;;  %v829_v27 = vld [vmem:[%s8909_s18 + $0xf40] sm:$0xff] }
 0x23d   : > { %3336 = vmatmul.mubr.f32.vlgmr.msra.gmra.mrb[0].mxu1 %v274_v40  ;;  %v6323_v40 = vpack.c.bf16 %v811_v32, %v809_v31  ;;  %v2111_v31 = vld [vmem:[%s8909_s18 + $0x3750] sm:$0xff]  ;;  %v834_v32 = vld [vmem:[%s8909_s18 + $0xf68] sm:$0xff] }
 0x23e   : > { %6304 = vmatpush1.bf16.msra.mxu1 %v6303_v41  ;;  %4756 = vmatmul.mubr.f32.vlgmr.msra.gmra.mrb[0].mxu0 %v314_v42  ;;  %v7603_v41 = vpack.c.bf16 %v2091_v35, %v2089_v33  ;;  %v6325_v42 = vpack.c.bf16 %v816_v37, %v814_v36  ;;  %v836_v33 = vld [vmem:[%s8909_s18 + $0xf78] sm:$0xff] }
 0x23f   : > { %7584 = vmatpush1.bf16.msra.mxu0 %v7583_v43  ;;  %6306 = vmatprep.subr.bf16.mxu1 %v6305_v44  ;;  %v813_v43 = vld [vmem:[%s8909_s18 + $0xec0] sm:$0xff]  ;;  %v815_v44 = vld [vmem:[%s8909_s18 + $0xed0] sm:$0xff]  ;;  %v2116_v35 = vld [vmem:[%s8909_s18 + $0x3778] sm:$0xff]  ;;  %v6345_v38 = vpack.c.bf16 %v836_v33, %v834_v32 }
 0x240   : > { %7586 = vmatprep.subr.bf16.mxu0 %v7585_v48  ;;  %3406 = vmatprep.mubr.f32.mxu1 %v277_v54  ;;  %v818_v48 = vld [vmem:[%s8909_s18 + $0xee8] sm:$0xff]  ;;  %v6327_v52 = vpack.c.bf16 %v815_v44, %v813_v43  ;;  %v2115_v43 = vld [vmem:[%s8909_s18 + $0x3770] sm:$0xff] }
 0x241   : > { %4826 = vmatprep.mubr.f32.mxu0 %v317_v56  ;;  %v6329_v54 = vpack.c.bf16 %v820_v49, %v818_v48  ;;  %v819_v56 = vld [vmem:[%s8909_s18 + $0xef0] sm:$0xff]  ;;  %v838_v44 = vld [vmem:[%s8909_s18 + $0xf88] sm:$0xff] }
 0x242   : > { %6308 = vmatpush1.bf16.msra.mxu1 %v6307_v55  ;;  %v817_v55 = vld [vmem:[%s8909_s18 + $0xee0] sm:$0xff] }
 0x243   : > { %7588 = vmatpush1.bf16.msra.mxu0 %v7587_v57  ;;  %6310 = vmatprep.subr.bf16.mxu1 %v6309_v58  ;;  %v2097_v57 = vld [vmem:[%s8909_s18 + $0x36e0] sm:$0xff]  ;;  %v7609_v58 = vpack.c.bf16 %v2100_v51, %v2098_v50  ;;  %v6331_v0 = vpack.c.bf16 %v819_v56, %v817_v55  ;;  %v6349_v50 = vpack.c.bf16 %v840_v45, %v838_v44  ;;  %v2119_v55 = vld [vmem:[%s8909_s18 + $0x3790] sm:$0xff]  ;;  %v842_v56 = vld [vmem:[%s8909_s18 + $0xfa8] sm:$0xff] }
 0x244   : > { %7590 = vmatprep.subr.bf16.mxu0 %v7589_v62  ;;  %v2102_v62 = vld [vmem:[%s8909_s18 + $0x3708] sm:$0xff]  ;;  %v7611_v1 = vpack.c.bf16 %v2099_v59, %v2097_v57  ;;  %v837_v51 = vld [vmem:[%s8909_s18 + $0xf80] sm:$0xff]  ;;  %v844_v57 = vld [vmem:[%s8909_s18 + $0xfb8] sm:$0xff] }
 0x245   : > { %v2124_v59 = vld [vmem:[%s8909_s18 + $0x37b8] sm:$0xff] }
 0x246   : > { %6312 = vmatpush1.bf16.msra.mxu1 %v6311_v4  ;;  %v823_v4 = vld [vmem:[%s8909_s18 + $0xf10] sm:$0xff]  ;;  %v276_v44 = vld [vmem:[#allocation2 + $0x70] sm:$0xff] }
 0x247   : > { %7592 = vmatpush1.bf16.msra.mxu0 %v7591_v5  ;;  %6314 = vmatprep.subr.bf16.mxu1 %v6313_v6  ;;  %v2101_v5 = vld [vmem:[%s8909_s18 + $0x3700] sm:$0xff]  ;;  %v7613_v6 = vpack.c.bf16 %v2104_v63, %v2102_v62  ;;  %v6335_v12 = vpack.c.bf16 %v823_v4, %v821_v3  ;;  %v6353_v62 = vpack.c.bf16 %v844_v57, %v842_v56  ;;  %v2123_v3 = vld [vmem:[%s8909_s18 + $0x37b0] sm:$0xff]  ;;  %v846_v4 = vld [vmem:[%s8909_s18 + $0xfc8] sm:$0xff] }
 0x248   : > { %7594 = vmatprep.subr.bf16.mxu0 %v7593_v10  ;;  %v2106_v10 = vld [vmem:[%s8909_s18 + $0x3728] sm:$0xff]  ;;  %v7615_v13 = vpack.c.bf16 %v2103_v7, %v2101_v5  ;;  %v841_v63 = vld [vmem:[%s8909_s18 + $0xfa0] sm:$0xff]  ;;  %v848_v5 = vld [vmem:[%s8909_s18 + $0xfd8] sm:$0xff] }
 0x249   : > { %v2128_v7 = vld [vmem:[%s8909_s18 + $0x37d8] sm:$0xff]  ;;  %v2142_v56 = vld [vmem:[%s8909_s18 + $0x3848] sm:$0xff] }
 0x24a   : > { %6316 = vmatpush1.bf16.msra.mxu1 %v6315_v16  ;;  %v827_v16 = vld [vmem:[%s8909_s18 + $0xf30] sm:$0xff]  ;;  %v2144_v57 = vld [vmem:[%s8909_s18 + $0x3858] sm:$0xff] }
 0x24b   : > { %7596 = vmatpush1.bf16.msra.mxu0 %v7595_v17  ;;  %6318 = vmatprep.subr.bf16.mxu1 %v6317_v18  ;;  %v2105_v17 = vld [vmem:[%s8909_s18 + $0x3720] sm:$0xff]  ;;  %v7617_v18 = vpack.c.bf16 %v2108_v11, %v2106_v10  ;;  %v6339_v24 = vpack.c.bf16 %v827_v16, %v825_v15  ;;  %v6357_v10 = vpack.c.bf16 %v848_v5, %v846_v4  ;;  %v2127_v15 = vld [vmem:[%s8909_s18 + $0x37d0] sm:$0xff]  ;;  %v850_v16 = vld [vmem:[%s8909_s18 + $0xfe8] sm:$0xff] }
 0x24c   : > { %7598 = vmatprep.subr.bf16.mxu0 %v7597_v22  ;;  %v2110_v22 = vld [vmem:[%s8909_s18 + $0x3748] sm:$0xff]  ;;  %v7619_v25 = vpack.c.bf16 %v2107_v19, %v2105_v17  ;;  %v845_v11 = vld [vmem:[%s8909_s18 + $0xfc0] sm:$0xff]  ;;  %v852_v17 = vld [vmem:[%s8909_s18 + $0xff8] sm:$0xff] }
 0x24d   : > { %v2132_v19 = vld [vmem:[%s8909_s18 + $0x37f8] sm:$0xff]  ;;  %v866_v4 = vld [vmem:[%s8909_s18 + $0x1068] sm:$0xff] }
 0x24e   : > { %6320 = vmatpush1.bf16.msra.mxu1 %v6319_v28  ;;  %v831_v28 = vld [vmem:[%s8909_s18 + $0xf50] sm:$0xff]  ;;  %v868_v5 = vld [vmem:[%s8909_s18 + $0x1078] sm:$0xff] }
 0x24f   : > { %7600 = vmatpush1.bf16.msra.mxu0 %v7599_v29  ;;  %6322 = vmatprep.subr.bf16.mxu1 %v6321_v30  ;;  %v2109_v29 = vld [vmem:[%s8909_s18 + $0x3740] sm:$0xff]  ;;  %v7621_v30 = vpack.c.bf16 %v2112_v23, %v2110_v22  ;;  %v6343_v36 = vpack.c.bf16 %v831_v28, %v829_v27  ;;  %v6361_v22 = vpack.c.bf16 %v852_v17, %v850_v16  ;;  %v2131_v27 = vld [vmem:[%s8909_s18 + $0x37f0] sm:$0xff]  ;;  %v854_v28 = vld [vmem:[%s8909_s18 + $0x1008] sm:$0xff] }
 0x250   : > { %7602 = vmatprep.subr.bf16.mxu0 %v7601_v34  ;;  %v2114_v34 = vld [vmem:[%s8909_s18 + $0x3768] sm:$0xff]  ;;  %v7623_v37 = vpack.c.bf16 %v2111_v31, %v2109_v29  ;;  %v849_v23 = vld [vmem:[%s8909_s18 + $0xfe0] sm:$0xff]  ;;  %v856_v29 = vld [vmem:[%s8909_s18 + $0x1018] sm:$0xff] }
 0x251   : > { %v2136_v31 = vld [vmem:[%s8909_s18 + $0x3818] sm:$0xff]  ;;  %v870_v16 = vld [vmem:[%s8909_s18 + $0x1088] sm:$0xff] }
 0x252   : > { %6324 = vmatpush1.bf16.msra.mxu1 %v6323_v40  ;;  %v835_v40 = vld [vmem:[%s8909_s18 + $0xf70] sm:$0xff]  ;;  %v872_v17 = vld [vmem:[%s8909_s18 + $0x1098] sm:$0xff] }
 0x253   : > { %7604 = vmatpush1.bf16.msra.mxu0 %v7603_v41  ;;  %6326 = vmatprep.subr.bf16.mxu1 %v6325_v42  ;;  %v2113_v41 = vld [vmem:[%s8909_s18 + $0x3760] sm:$0xff]  ;;  %v7625_v42 = vpack.c.bf16 %v2116_v35, %v2114_v34  ;;  %v6347_v48 = vpack.c.bf16 %v835_v40, %v833_v39  ;;  %v6365_v34 = vpack.c.bf16 %v856_v29, %v854_v28  ;;  %v2135_v39 = vld [vmem:[%s8909_s18 + $0x3810] sm:$0xff]  ;;  %v858_v40 = vld [vmem:[%s8909_s18 + $0x1028] sm:$0xff] }
 0x254   : > { %7606 = vmatprep.subr.bf16.mxu0 %v7605_v46  ;;  %v2118_v46 = vld [vmem:[%s8909_s18 + $0x3788] sm:$0xff]  ;;  %v7627_v49 = vpack.c.bf16 %v2115_v43, %v2113_v41  ;;  %v853_v35 = vld [vmem:[%s8909_s18 + $0x1000] sm:$0xff]  ;;  %v860_v41 = vld [vmem:[%s8909_s18 + $0x1038] sm:$0xff] }
 0x255   : > { %v2140_v43 = vld [vmem:[%s8909_s18 + $0x3838] sm:$0xff]  ;;  %v874_v28 = vld [vmem:[%s8909_s18 + $0x10a8] sm:$0xff] }
 0x256   : > { %6328 = vmatpush1.bf16.msra.mxu1 %v6327_v52  ;;  %v839_v52 = vld [vmem:[%s8909_s18 + $0xf90] sm:$0xff]  ;;  %v876_v29 = vld [vmem:[%s8909_s18 + $0x10b8] sm:$0xff] }
 0x257   : > { %7608 = vmatpush1.bf16.msra.mxu0 %v7607_v53  ;;  %6330 = vmatprep.subr.bf16.mxu1 %v6329_v54  ;;  %v2117_v53 = vld [vmem:[%s8909_s18 + $0x3780] sm:$0xff]  ;;  %v7629_v54 = vpack.c.bf16 %v2120_v47, %v2118_v46  ;;  %v6351_v60 = vpack.c.bf16 %v839_v52, %v837_v51  ;;  %v316_v46 = vld [vmem:[#allocation2 + $0x1b0] sm:$0xff] }
 0x258   : > { %7610 = vmatprep.subr.bf16.mxu0 %v7609_v58  ;;  %v2122_v58 = vld [vmem:[%s8909_s18 + $0x37a8] sm:$0xff]  ;;  %v7631_v61 = vpack.c.bf16 %v2119_v55, %v2117_v53  ;;  %v2137_v51 = vld [vmem:[%s8909_s18 + $0x3820] sm:$0xff]  ;;  %v2139_v53 = vld [vmem:[%s8909_s18 + $0x3830] sm:$0xff] }
 0x259   : > { %v864_v55 = vld [vmem:[%s8909_s18 + $0x1058] sm:$0xff] }
 0x25a   : > { %6332 = vmatpush1.bf16.msra.mxu1 %v6331_v0  ;;  %v843_v0 = vld [vmem:[%s8909_s18 + $0xfb0] sm:$0xff] }
 0x25b   : > { %7612 = vmatpush1.bf16.msra.mxu0 %v7611_v1  ;;  %6334 = vmatprep.subr.bf16.mxu1 %v6333_v2  ;;  %v2121_v1 = vld [vmem:[%s8909_s18 + $0x37a0] sm:$0xff]  ;;  %v7633_v2 = vpack.c.bf16 %v2124_v59, %v2122_v58  ;;  %v6355_v8 = vpack.c.bf16 %v843_v0, %v841_v63  ;;  %v279_v58 = vld [vmem:[#allocation2 + $0x88] sm:$0xff] }
 0x25c   : > { %7614 = vmatprep.subr.bf16.mxu0 %v7613_v6  ;;  %v2126_v6 = vld [vmem:[%s8909_s18 + $0x37c8] sm:$0xff]  ;;  %v7635_v9 = vpack.c.bf16 %v2123_v3, %v2121_v1  ;;  %v861_v63 = vld [vmem:[%s8909_s18 + $0x1040] sm:$0xff]  ;;  %v863_v0 = vld [vmem:[%s8909_s18 + $0x1050] sm:$0xff] }
 0x25d   : > { %v2141_v1 = vld [vmem:[%s8909_s18 + $0x3840] sm:$0xff]  ;;  %v2143_v3 = vld [vmem:[%s8909_s18 + $0x3850] sm:$0xff] }
 0x25e   : > { %6336 = vmatpush1.bf16.msra.mxu1 %v6335_v12  ;;  %v847_v12 = vld [vmem:[%s8909_s18 + $0xfd0] sm:$0xff] }
 0x25f   : > { %7616 = vmatpush1.bf16.msra.mxu0 %v7615_v13  ;;  %6338 = vmatprep.subr.bf16.mxu1 %v6337_v14  ;;  %v2125_v13 = vld [vmem:[%s8909_s18 + $0x37c0] sm:$0xff]  ;;  %v7637_v14 = vpack.c.bf16 %v2128_v7, %v2126_v6  ;;  %v6359_v20 = vpack.c.bf16 %v847_v12, %v845_v11  ;;  %v2146_v6 = vld [vmem:[%s8909_s18 + $0x3868] sm:$0xff]  ;;  %v2148_v7 = vld [vmem:[%s8909_s18 + $0x3878] sm:$0xff] }
 0x260   : > { %7618 = vmatprep.subr.bf16.mxu0 %v7617_v18  ;;  %v2130_v18 = vld [vmem:[%s8909_s18 + $0x37e8] sm:$0xff]  ;;  %v7639_v21 = vpack.c.bf16 %v2127_v15, %v2125_v13  ;;  %v865_v11 = vld [vmem:[%s8909_s18 + $0x1060] sm:$0xff]  ;;  %v867_v12 = vld [vmem:[%s8909_s18 + $0x1070] sm:$0xff] }
 0x261   : > { %v2145_v13 = vld [vmem:[%s8909_s18 + $0x3860] sm:$0xff]  ;;  %v2147_v15 = vld [vmem:[%s8909_s18 + $0x3870] sm:$0xff] }
 0x262   : > { %6340 = vmatpush1.bf16.msra.mxu1 %v6339_v24  ;;  %v851_v24 = vld [vmem:[%s8909_s18 + $0xff0] sm:$0xff] }
 0x263   : > { %7620 = vmatpush1.bf16.msra.mxu0 %v7619_v25  ;;  %6342 = vmatprep.subr.bf16.mxu1 %v6341_v26  ;;  %v2129_v25 = vld [vmem:[%s8909_s18 + $0x37e0] sm:$0xff]  ;;  %v7641_v26 = vpack.c.bf16 %v2132_v19, %v2130_v18  ;;  %v6363_v32 = vpack.c.bf16 %v851_v24, %v849_v23  ;;  %v2150_v18 = vld [vmem:[%s8909_s18 + $0x3888] sm:$0xff]  ;;  %v2152_v19 = vld [vmem:[%s8909_s18 + $0x3898] sm:$0xff] }
 0x264   : > { %7622 = vmatprep.subr.bf16.mxu0 %v7621_v30  ;;  %v2134_v30 = vld [vmem:[%s8909_s18 + $0x3808] sm:$0xff]  ;;  %v7643_v33 = vpack.c.bf16 %v2131_v27, %v2129_v25  ;;  %v869_v23 = vld [vmem:[%s8909_s18 + $0x1080] sm:$0xff]  ;;  %v871_v24 = vld [vmem:[%s8909_s18 + $0x1090] sm:$0xff] }
 0x265   : > { %v2149_v25 = vld [vmem:[%s8909_s18 + $0x3880] sm:$0xff]  ;;  %v2151_v27 = vld [vmem:[%s8909_s18 + $0x3890] sm:$0xff] }
 0x266   : > { %6344 = vmatpush1.bf16.msra.mxu1 %v6343_v36  ;;  %v855_v36 = vld [vmem:[%s8909_s18 + $0x1010] sm:$0xff] }
 0x267   : > { %7624 = vmatpush1.bf16.msra.mxu0 %v7623_v37  ;;  %6346 = vmatprep.subr.bf16.mxu1 %v6345_v38  ;;  %v2133_v37 = vld [vmem:[%s8909_s18 + $0x3800] sm:$0xff]  ;;  %v7645_v38 = vpack.c.bf16 %v2136_v31, %v2134_v30  ;;  %v6367_v45 = vpack.c.bf16 %v855_v36, %v853_v35  ;;  %v2154_v30 = vld [vmem:[%s8909_s18 + $0x38a8] sm:$0xff]  ;;  %v2156_v31 = vld [vmem:[%s8909_s18 + $0x38b8] sm:$0xff] }
 0x268   : > { %7626 = vmatprep.subr.bf16.mxu0 %v7625_v42  ;;  %v2138_v42 = vld [vmem:[%s8909_s18 + $0x3828] sm:$0xff]  ;;  %v7647_v47 = vpack.c.bf16 %v2135_v39, %v2133_v37  ;;  %v873_v35 = vld [vmem:[%s8909_s18 + $0x10a0] sm:$0xff]  ;;  %v875_v36 = vld [vmem:[%s8909_s18 + $0x10b0] sm:$0xff] }
 0x269   : > { %v7649_v52 = vpack.c.bf16 %v2140_v43, %v2138_v42  ;;  %v2153_v37 = vld [vmem:[%s8909_s18 + $0x38a0] sm:$0xff]  ;;  %v2155_v39 = vld [vmem:[%s8909_s18 + $0x38b0] sm:$0xff]  ;;  %v2158_v42 = vld [vmem:[%s8909_s18 + $0x38c8] sm:$0xff] }
 0x26a   : > { %6348 = vmatpush1.bf16.msra.mxu1 %v6347_v48  ;;  %v6369_v48 = vpack.c.bf16 %v860_v41, %v858_v40  ;;  %v878_v40 = vld [vmem:[%s8909_s18 + $0x10c8] sm:$0xff]  ;;  %v880_v41 = vld [vmem:[%s8909_s18 + $0x10d8] sm:$0xff] }
 0x26b   : > { %7628 = vmatpush1.bf16.msra.mxu0 %v7627_v49  ;;  %6350 = vmatprep.subr.bf16.mxu1 %v6349_v50  ;;  %v857_v49 = vld [vmem:[%s8909_s18 + $0x1020] sm:$0xff]  ;;  %v859_v50 = vld [vmem:[%s8909_s18 + $0x1030] sm:$0xff]  ;;  %v2160_v43 = vld [vmem:[%s8909_s18 + $0x38d8] sm:$0xff] }
 0x26c   : > { %7630 = vmatprep.subr.bf16.mxu0 %v7629_v54  ;;  %v862_v54 = vld [vmem:[%s8909_s18 + $0x1048] sm:$0xff]  ;;  %v6371_v59 = vpack.c.bf16 %v859_v50, %v857_v49  ;;  %v2157_v49 = vld [vmem:[%s8909_s18 + $0x38c0] sm:$0xff]  ;;  %v7669_v50 = vpack.c.bf16 %v2160_v43, %v2158_v42 }
 0x26d   : > { %v897_v43 = vld [vmem:[%s8909_s18 + $0x1160] sm:$0xff] }
 0x26e   : > { %6352 = vmatpush1.bf16.msra.mxu1 %v6351_v60  ;;  %v319_v60 = vld [vmem:[#allocation2 + $0x1c8] sm:$0xff] }
 0x26f   : > { %7632 = vmatpush1.bf16.msra.mxu0 %v7631_v61  ;;  %6354 = vmatprep.subr.bf16.mxu1 %v6353_v62  ;;  %v7651_v61 = vpack.c.bf16 %v2139_v53, %v2137_v51  ;;  %v6373_v62 = vpack.c.bf16 %v864_v55, %v862_v54  ;;  %v2159_v51 = vld [vmem:[%s8909_s18 + $0x38d0] sm:$0xff]  ;;  %v884_v53 = vld [vmem:[%s8909_s18 + $0x10f8] sm:$0xff]  ;;  %v2162_v54 = vld [vmem:[%s8909_s18 + $0x38e8] sm:$0xff] }
 0x270   : > { %7634 = vmatprep.subr.bf16.mxu0 %v7633_v2  ;;  %v7653_v2 = vpack.c.bf16 %v2144_v57, %v2142_v56  ;;  %v2164_v55 = vld [vmem:[%s8909_s18 + $0x38f8] sm:$0xff]  ;;  %v7671_v57 = vpack.c.bf16 %v2159_v51, %v2157_v49 }
 0x271   : > { %v904_v49 = vld [vmem:[%s8909_s18 + $0x1198] sm:$0xff] }
 0x272   : > { %6356 = vmatpush1.bf16.msra.mxu1 %v6355_v8  ;;  %v6375_v8 = vpack.c.bf16 %v863_v0, %v861_v63  ;;  %v2163_v63 = vld [vmem:[%s8909_s18 + $0x38f0] sm:$0xff]  ;;  %v886_v0 = vld [vmem:[%s8909_s18 + $0x1108] sm:$0xff]  ;;  %v2184_v51 = vld [vmem:[%s8909_s18 + $0x3998] sm:$0xff] }
 0x273   : > { %7636 = vmatpush1.bf16.msra.mxu0 %v7635_v9  ;;  %6358 = vmatprep.subr.bf16.mxu1 %v6357_v10  ;;  %v7655_v9 = vpack.c.bf16 %v2143_v3, %v2141_v1  ;;  %v6377_v10 = vpack.c.bf16 %v868_v5, %v866_v4  ;;  %v888_v1 = vld [vmem:[%s8909_s18 + $0x1118] sm:$0xff] }
 0x274   : > { %7638 = vmatprep.subr.bf16.mxu0 %v7637_v14  ;;  %v7657_v14 = vpack.c.bf16 %v2148_v7, %v2146_v6  ;;  %v2168_v3 = vld [vmem:[%s8909_s18 + $0x3918] sm:$0xff]  ;;  %v6397_v6 = vpack.c.bf16 %v888_v1, %v886_v0  ;;  %v885_v7 = vld [vmem:[%s8909_s18 + $0x1100] sm:$0xff] }
 0x276   : > { %6360 = vmatpush1.bf16.msra.mxu1 %v6359_v20  ;;  %v6379_v20 = vpack.c.bf16 %v867_v12, %v865_v11  ;;  %v2167_v11 = vld [vmem:[%s8909_s18 + $0x3910] sm:$0xff]  ;;  %v890_v12 = vld [vmem:[%s8909_s18 + $0x1128] sm:$0xff] }
 0x277   : > { %7640 = vmatpush1.bf16.msra.mxu0 %v7639_v21  ;;  %6362 = vmatprep.subr.bf16.mxu1 %v6361_v22  ;;  %v7659_v21 = vpack.c.bf16 %v2147_v15, %v2145_v13  ;;  %v6381_v22 = vpack.c.bf16 %v872_v17, %v870_v16  ;;  %v892_v13 = vld [vmem:[%s8909_s18 + $0x1138] sm:$0xff] }
 0x278   : > { %7642 = vmatprep.subr.bf16.mxu0 %v7641_v26  ;;  %v7661_v26 = vpack.c.bf16 %v2152_v19, %v2150_v18  ;;  %v2172_v15 = vld [vmem:[%s8909_s18 + $0x3938] sm:$0xff]  ;;  %v6401_v18 = vpack.c.bf16 %v892_v13, %v890_v12  ;;  %v889_v19 = vld [vmem:[%s8909_s18 + $0x1120] sm:$0xff] }
 0x27a   : > { %6364 = vmatpush1.bf16.msra.mxu1 %v6363_v32  ;;  %v6383_v32 = vpack.c.bf16 %v871_v24, %v869_v23  ;;  %v2171_v23 = vld [vmem:[%s8909_s18 + $0x3930] sm:$0xff]  ;;  %v894_v24 = vld [vmem:[%s8909_s18 + $0x1148] sm:$0xff] }
 0x27b   : > { %7644 = vmatpush1.bf16.msra.mxu0 %v7643_v33  ;;  %6366 = vmatprep.subr.bf16.mxu1 %v6365_v34  ;;  %v7663_v33 = vpack.c.bf16 %v2151_v27, %v2149_v25  ;;  %v6385_v34 = vpack.c.bf16 %v876_v29, %v874_v28  ;;  %v896_v25 = vld [vmem:[%s8909_s18 + $0x1158] sm:$0xff] }
 0x27c   : > { %7646 = vmatprep.subr.bf16.mxu0 %v7645_v38  ;;  %v7665_v38 = vpack.c.bf16 %v2156_v31, %v2154_v30  ;;  %v2176_v27 = vld [vmem:[%s8909_s18 + $0x3958] sm:$0xff]  ;;  %v6405_v30 = vpack.c.bf16 %v896_v25, %v894_v24  ;;  %v893_v31 = vld [vmem:[%s8909_s18 + $0x1140] sm:$0xff] }
 0x27d   : > { %3407 = vmatmul.mubr.f32.vlgmr.msra.gmra.mrb[0].mxu1 %v276_v44  ;;  %v6387_v44 = vpack.c.bf16 %v875_v36, %v873_v35  ;;  %v2175_v35 = vld [vmem:[%s8909_s18 + $0x3950] sm:$0xff]  ;;  %v898_v36 = vld [vmem:[%s8909_s18 + $0x1168] sm:$0xff] }
 0x27e   : > { %6368 = vmatpush1.bf16.msra.mxu1 %v6367_v45  ;;  %4827 = vmatmul.mubr.f32.vlgmr.msra.gmra.mrb[0].mxu0 %v316_v46  ;;  %v7667_v45 = vpack.c.bf16 %v2155_v39, %v2153_v37  ;;  %v6389_v46 = vpack.c.bf16 %v880_v41, %v878_v40  ;;  %v900_v37 = vld [vmem:[%s8909_s18 + $0x1178] sm:$0xff] }
 0x27f   : > { %7648 = vmatpush1.bf16.msra.mxu0 %v7647_v47  ;;  %6370 = vmatprep.subr.bf16.mxu1 %v6369_v48  ;;  %v877_v47 = vld [vmem:[%s8909_s18 + $0x10c0] sm:$0xff]  ;;  %v879_v48 = vld [vmem:[%s8909_s18 + $0x10d0] sm:$0xff]  ;;  %v2180_v39 = vld [vmem:[%s8909_s18 + $0x3978] sm:$0xff]  ;;  %v6409_v42 = vpack.c.bf16 %v900_v37, %v898_v36 }
 0x280   : > { %7650 = vmatprep.subr.bf16.mxu0 %v7649_v52  ;;  %3477 = vmatprep.mubr.f32.mxu1 %v279_v58  ;;  %v882_v52 = vld [vmem:[%s8909_s18 + $0x10e8] sm:$0xff]  ;;  %v6391_v56 = vpack.c.bf16 %v879_v48, %v877_v47  ;;  %v2179_v47 = vld [vmem:[%s8909_s18 + $0x3970] sm:$0xff] }
 0x281   : > { %4897 = vmatprep.mubr.f32.mxu0 %v319_v60  ;;  %v6393_v58 = vpack.c.bf16 %v884_v53, %v882_v52  ;;  %v883_v60 = vld [vmem:[%s8909_s18 + $0x10f0] sm:$0xff]  ;;  %v902_v48 = vld [vmem:[%s8909_s18 + $0x1188] sm:$0xff] }
 0x282   : > { %6372 = vmatpush1.bf16.msra.mxu1 %v6371_v59  ;;  %v881_v59 = vld [vmem:[%s8909_s18 + $0x10e0] sm:$0xff] }
 0x283   : > { %7652 = vmatpush1.bf16.msra.mxu0 %v7651_v61  ;;  %6374 = vmatprep.subr.bf16.mxu1 %v6373_v62  ;;  %v2161_v61 = vld [vmem:[%s8909_s18 + $0x38e0] sm:$0xff]  ;;  %v7673_v62 = vpack.c.bf16 %v2164_v55, %v2162_v54  ;;  %v6395_v4 = vpack.c.bf16 %v883_v60, %v881_v59  ;;  %v6413_v54 = vpack.c.bf16 %v904_v49, %v902_v48  ;;  %v2183_v59 = vld [vmem:[%s8909_s18 + $0x3990] sm:$0xff]  ;;  %v906_v60 = vld [vmem:[%s8909_s18 + $0x11a8] sm:$0xff] }
 0x284   : > { %7654 = vmatprep.subr.bf16.mxu0 %v7653_v2  ;;  %v2166_v2 = vld [vmem:[%s8909_s18 + $0x3908] sm:$0xff]  ;;  %v7675_v5 = vpack.c.bf16 %v2163_v63, %v2161_v61  ;;  %v901_v55 = vld [vmem:[%s8909_s18 + $0x1180] sm:$0xff]  ;;  %v908_v61 = vld [vmem:[%s8909_s18 + $0x11b8] sm:$0xff] }
 0x285   : > { %v2188_v63 = vld [vmem:[%s8909_s18 + $0x39b8] sm:$0xff]  ;;  %v278_v48 = vld [vmem:[#allocation2 + $0x80] sm:$0xff] }
 0x286   : > { %6376 = vmatpush1.bf16.msra.mxu1 %v6375_v8  ;;  %v887_v8 = vld [vmem:[%s8909_s18 + $0x1110] sm:$0xff] }
 0x287   : > { %7656 = vmatpush1.bf16.msra.mxu0 %v7655_v9  ;;  %6378 = vmatprep.subr.bf16.mxu1 %v6377_v10  ;;  %v2165_v9 = vld [vmem:[%s8909_s18 + $0x3900] sm:$0xff]  ;;  %v7677_v10 = vpack.c.bf16 %v2168_v3, %v2166_v2  ;;  %v6399_v16 = vpack.c.bf16 %v887_v8, %v885_v7  ;;  %v6417_v2 = vpack.c.bf16 %v908_v61, %v906_v60  ;;  %v2187_v7 = vld [vmem:[%s8909_s18 + $0x39b0] sm:$0xff]  ;;  %v910_v8 = vld [vmem:[%s8909_s18 + $0x11c8] sm:$0xff] }
 0x288   : > { %7658 = vmatprep.subr.bf16.mxu0 %v7657_v14  ;;  %v2170_v14 = vld [vmem:[%s8909_s18 + $0x3928] sm:$0xff]  ;;  %v7679_v17 = vpack.c.bf16 %v2167_v11, %v2165_v9  ;;  %v905_v3 = vld [vmem:[%s8909_s18 + $0x11a0] sm:$0xff]  ;;  %v912_v9 = vld [vmem:[%s8909_s18 + $0x11d8] sm:$0xff] }
 0x289   : > { %v2192_v11 = vld [vmem:[%s8909_s18 + $0x39d8] sm:$0xff]  ;;  %v2206_v60 = vld [vmem:[%s8909_s18 + $0x3a48] sm:$0xff] }
 0x28a   : > { %6380 = vmatpush1.bf16.msra.mxu1 %v6379_v20  ;;  %v891_v20 = vld [vmem:[%s8909_s18 + $0x1130] sm:$0xff]  ;;  %v2208_v61 = vld [vmem:[%s8909_s18 + $0x3a58] sm:$0xff] }
 0x28b   : > { %7660 = vmatpush1.bf16.msra.mxu0 %v7659_v21  ;;  %6382 = vmatprep.subr.bf16.mxu1 %v6381_v22  ;;  %v2169_v21 = vld [vmem:[%s8909_s18 + $0x3920] sm:$0xff]  ;;  %v7681_v22 = vpack.c.bf16 %v2172_v15, %v2170_v14  ;;  %v6403_v28 = vpack.c.bf16 %v891_v20, %v889_v19  ;;  %v6421_v14 = vpack.c.bf16 %v912_v9, %v910_v8  ;;  %v2191_v19 = vld [vmem:[%s8909_s18 + $0x39d0] sm:$0xff]  ;;  %v914_v20 = vld [vmem:[%s8909_s18 + $0x11e8] sm:$0xff] }
 0x28c   : > { %7662 = vmatprep.subr.bf16.mxu0 %v7661_v26  ;;  %v2174_v26 = vld [vmem:[%s8909_s18 + $0x3948] sm:$0xff]  ;;  %v7683_v29 = vpack.c.bf16 %v2171_v23, %v2169_v21  ;;  %v909_v15 = vld [vmem:[%s8909_s18 + $0x11c0] sm:$0xff]  ;;  %v916_v21 = vld [vmem:[%s8909_s18 + $0x11f8] sm:$0xff] }
 0x28d   : > { %v2196_v23 = vld [vmem:[%s8909_s18 + $0x39f8] sm:$0xff]  ;;  %v930_v8 = vld [vmem:[%s8909_s18 + $0x1268] sm:$0xff] }
 0x28e   : > { %6384 = vmatpush1.bf16.msra.mxu1 %v6383_v32  ;;  %v895_v32 = vld [vmem:[%s8909_s18 + $0x1150] sm:$0xff]  ;;  %v932_v9 = vld [vmem:[%s8909_s18 + $0x1278] sm:$0xff] }
 0x28f   : > { %7664 = vmatpush1.bf16.msra.mxu0 %v7663_v33  ;;  %6386 = vmatprep.subr.bf16.mxu1 %v6385_v34  ;;  %v2173_v33 = vld [vmem:[%s8909_s18 + $0x3940] sm:$0xff]  ;;  %v7685_v34 = vpack.c.bf16 %v2176_v27, %v2174_v26  ;;  %v6407_v40 = vpack.c.bf16 %v895_v32, %v893_v31  ;;  %v6425_v26 = vpack.c.bf16 %v916_v21, %v914_v20  ;;  %v2195_v31 = vld [vmem:[%s8909_s18 + $0x39f0] sm:$0xff]  ;;  %v918_v32 = vld [vmem:[%s8909_s18 + $0x1208] sm:$0xff] }
 0x290   : > { %7666 = vmatprep.subr.bf16.mxu0 %v7665_v38  ;;  %v2178_v38 = vld [vmem:[%s8909_s18 + $0x3968] sm:$0xff]  ;;  %v7687_v41 = vpack.c.bf16 %v2175_v35, %v2173_v33  ;;  %v913_v27 = vld [vmem:[%s8909_s18 + $0x11e0] sm:$0xff]  ;;  %v920_v33 = vld [vmem:[%s8909_s18 + $0x1218] sm:$0xff] }
 0x291   : > { %v2200_v35 = vld [vmem:[%s8909_s18 + $0x3a18] sm:$0xff]  ;;  %v934_v20 = vld [vmem:[%s8909_s18 + $0x1288] sm:$0xff] }
 0x292   : > { %6388 = vmatpush1.bf16.msra.mxu1 %v6387_v44  ;;  %v899_v44 = vld [vmem:[%s8909_s18 + $0x1170] sm:$0xff]  ;;  %v936_v21 = vld [vmem:[%s8909_s18 + $0x1298] sm:$0xff] }
 0x293   : > { %7668 = vmatpush1.bf16.msra.mxu0 %v7667_v45  ;;  %6390 = vmatprep.subr.bf16.mxu1 %v6389_v46  ;;  %v2177_v45 = vld [vmem:[%s8909_s18 + $0x3960] sm:$0xff]  ;;  %v7689_v46 = vpack.c.bf16 %v2180_v39, %v2178_v38  ;;  %v6411_v52 = vpack.c.bf16 %v899_v44, %v897_v43  ;;  %v6429_v38 = vpack.c.bf16 %v920_v33, %v918_v32  ;;  %v2199_v43 = vld [vmem:[%s8909_s18 + $0x3a10] sm:$0xff]  ;;  %v922_v44 = vld [vmem:[%s8909_s18 + $0x1228] sm:$0xff] }
 0x294   : > { %7670 = vmatprep.subr.bf16.mxu0 %v7669_v50  ;;  %v2182_v50 = vld [vmem:[%s8909_s18 + $0x3988] sm:$0xff]  ;;  %v7691_v53 = vpack.c.bf16 %v2179_v47, %v2177_v45  ;;  %v917_v39 = vld [vmem:[%s8909_s18 + $0x1200] sm:$0xff]  ;;  %v924_v45 = vld [vmem:[%s8909_s18 + $0x1238] sm:$0xff] }
 0x295   : > { %v2204_v47 = vld [vmem:[%s8909_s18 + $0x3a38] sm:$0xff]  ;;  %v938_v32 = vld [vmem:[%s8909_s18 + $0x12a8] sm:$0xff] }
 0x296   : > { %6392 = vmatpush1.bf16.msra.mxu1 %v6391_v56  ;;  %v903_v56 = vld [vmem:[%s8909_s18 + $0x1190] sm:$0xff]  ;;  %v940_v33 = vld [vmem:[%s8909_s18 + $0x12b8] sm:$0xff] }
 0x297   : > { %7672 = vmatpush1.bf16.msra.mxu0 %v7671_v57  ;;  %6394 = vmatprep.subr.bf16.mxu1 %v6393_v58  ;;  %v2181_v57 = vld [vmem:[%s8909_s18 + $0x3980] sm:$0xff]  ;;  %v7693_v58 = vpack.c.bf16 %v2184_v51, %v2182_v50  ;;  %v6415_v0 = vpack.c.bf16 %v903_v56, %v901_v55  ;;  %v318_v50 = vld [vmem:[#allocation2 + $0x1c0] sm:$0xff] }
 0x298   : > { %7674 = vmatprep.subr.bf16.mxu0 %v7673_v62  ;;  %v2186_v62 = vld [vmem:[%s8909_s18 + $0x39a8] sm:$0xff]  ;;  %v7695_v1 = vpack.c.bf16 %v2183_v59, %v2181_v57  ;;  %v2201_v55 = vld [vmem:[%s8909_s18 + $0x3a20] sm:$0xff]  ;;  %v2203_v57 = vld [vmem:[%s8909_s18 + $0x3a30] sm:$0xff] }
 0x299   : > { %v928_v59 = vld [vmem:[%s8909_s18 + $0x1258] sm:$0xff] }
 0x29a   : > { %6396 = vmatpush1.bf16.msra.mxu1 %v6395_v4  ;;  %v907_v4 = vld [vmem:[%s8909_s18 + $0x11b0] sm:$0xff] }
 0x29b   : > { %7676 = vmatpush1.bf16.msra.mxu0 %v7675_v5  ;;  %6398 = vmatprep.subr.bf16.mxu1 %v6397_v6  ;;  %v2185_v5 = vld [vmem:[%s8909_s18 + $0x39a0] sm:$0xff]  ;;  %v7697_v6 = vpack.c.bf16 %v2188_v63, %v2186_v62  ;;  %v6419_v12 = vpack.c.bf16 %v907_v4, %v905_v3  ;;  %v927_v4 = vld [vmem:[%s8909_s18 + $0x1250] sm:$0xff] }
 0x29c   : > { %7678 = vmatprep.subr.bf16.mxu0 %v7677_v10  ;;  %v2190_v10 = vld [vmem:[%s8909_s18 + $0x39c8] sm:$0xff]  ;;  %v7699_v13 = vpack.c.bf16 %v2187_v7, %v2185_v5  ;;  %v281_v62 = vld [vmem:[#allocation2 + $0x98] sm:$0xff]  ;;  %v2207_v7 = vld [vmem:[%s8909_s18 + $0x3a50] sm:$0xff] }
 0x29d   : > { %v925_v3 = vld [vmem:[%s8909_s18 + $0x1240] sm:$0xff] }
 0x29e   : > { %6400 = vmatpush1.bf16.msra.mxu1 %v6399_v16  ;;  %v911_v16 = vld [vmem:[%s8909_s18 + $0x11d0] sm:$0xff]  ;;  %v2205_v5 = vld [vmem:[%s8909_s18 + $0x3a40] sm:$0xff] }
 0x29f   : > { %7680 = vmatpush1.bf16.msra.mxu0 %v7679_v17  ;;  %6402 = vmatprep.subr.bf16.mxu1 %v6401_v18  ;;  %v2189_v17 = vld [vmem:[%s8909_s18 + $0x39c0] sm:$0xff]  ;;  %v7701_v18 = vpack.c.bf16 %v2192_v11, %v2190_v10  ;;  %v6423_v24 = vpack.c.bf16 %v911_v16, %v909_v15  ;;  %v2210_v10 = vld [vmem:[%s8909_s18 + $0x3a68] sm:$0xff]  ;;  %v2212_v11 = vld [vmem:[%s8909_s18 + $0x3a78] sm:$0xff] }
 0x2a0   : > { %7682 = vmatprep.subr.bf16.mxu0 %v7681_v22  ;;  %v2194_v22 = vld [vmem:[%s8909_s18 + $0x39e8] sm:$0xff]  ;;  %v7703_v25 = vpack.c.bf16 %v2191_v19, %v2189_v17  ;;  %v929_v15 = vld [vmem:[%s8909_s18 + $0x1260] sm:$0xff]  ;;  %v931_v16 = vld [vmem:[%s8909_s18 + $0x1270] sm:$0xff] }
 0x2a1   : > { %v2209_v17 = vld [vmem:[%s8909_s18 + $0x3a60] sm:$0xff]  ;;  %v2211_v19 = vld [vmem:[%s8909_s18 + $0x3a70] sm:$0xff] }
 0x2a2   : > { %6404 = vmatpush1.bf16.msra.mxu1 %v6403_v28  ;;  %v915_v28 = vld [vmem:[%s8909_s18 + $0x11f0] sm:$0xff] }
 0x2a3   : > { %7684 = vmatpush1.bf16.msra.mxu0 %v7683_v29  ;;  %6406 = vmatprep.subr.bf16.mxu1 %v6405_v30  ;;  %v2193_v29 = vld [vmem:[%s8909_s18 + $0x39e0] sm:$0xff]  ;;  %v7705_v30 = vpack.c.bf16 %v2196_v23, %v2194_v22  ;;  %v6427_v36 = vpack.c.bf16 %v915_v28, %v913_v27  ;;  %v2214_v22 = vld [vmem:[%s8909_s18 + $0x3a88] sm:$0xff]  ;;  %v2216_v23 = vld [vmem:[%s8909_s18 + $0x3a98] sm:$0xff] }
 0x2a4   : > { %7686 = vmatprep.subr.bf16.mxu0 %v7685_v34  ;;  %v2198_v34 = vld [vmem:[%s8909_s18 + $0x3a08] sm:$0xff]  ;;  %v7707_v37 = vpack.c.bf16 %v2195_v31, %v2193_v29  ;;  %v933_v27 = vld [vmem:[%s8909_s18 + $0x1280] sm:$0xff]  ;;  %v935_v28 = vld [vmem:[%s8909_s18 + $0x1290] sm:$0xff] }
 0x2a5   : > { %v2213_v29 = vld [vmem:[%s8909_s18 + $0x3a80] sm:$0xff]  ;;  %v2215_v31 = vld [vmem:[%s8909_s18 + $0x3a90] sm:$0xff] }
 0x2a6   : > { %6408 = vmatpush1.bf16.msra.mxu1 %v6407_v40  ;;  %v919_v40 = vld [vmem:[%s8909_s18 + $0x1210] sm:$0xff] }
 0x2a7   : > { %7688 = vmatpush1.bf16.msra.mxu0 %v7687_v41  ;;  %6410 = vmatprep.subr.bf16.mxu1 %v6409_v42  ;;  %v2197_v41 = vld [vmem:[%s8909_s18 + $0x3a00] sm:$0xff]  ;;  %v7709_v42 = vpack.c.bf16 %v2200_v35, %v2198_v34  ;;  %v6431_v49 = vpack.c.bf16 %v919_v40, %v917_v39  ;;  %v2218_v34 = vld [vmem:[%s8909_s18 + $0x3aa8] sm:$0xff]  ;;  %v2220_v35 = vld [vmem:[%s8909_s18 + $0x3ab8] sm:$0xff] }
 0x2a8   : > { %7690 = vmatprep.subr.bf16.mxu0 %v7689_v46  ;;  %v2202_v46 = vld [vmem:[%s8909_s18 + $0x3a28] sm:$0xff]  ;;  %v7711_v51 = vpack.c.bf16 %v2199_v43, %v2197_v41  ;;  %v937_v39 = vld [vmem:[%s8909_s18 + $0x12a0] sm:$0xff]  ;;  %v939_v40 = vld [vmem:[%s8909_s18 + $0x12b0] sm:$0xff] }
 0x2a9   : > { %v7713_v56 = vpack.c.bf16 %v2204_v47, %v2202_v46  ;;  %v2217_v41 = vld [vmem:[%s8909_s18 + $0x3aa0] sm:$0xff]  ;;  %v2219_v43 = vld [vmem:[%s8909_s18 + $0x3ab0] sm:$0xff]  ;;  %v2222_v46 = vld [vmem:[%s8909_s18 + $0x3ac8] sm:$0xff] }
 0x2aa   : > { %6412 = vmatpush1.bf16.msra.mxu1 %v6411_v52  ;;  %v6433_v52 = vpack.c.bf16 %v924_v45, %v922_v44  ;;  %v942_v44 = vld [vmem:[%s8909_s18 + $0x12c8] sm:$0xff]  ;;  %v944_v45 = vld [vmem:[%s8909_s18 + $0x12d8] sm:$0xff] }
 0x2ab   : > { %7692 = vmatpush1.bf16.msra.mxu0 %v7691_v53  ;;  %6414 = vmatprep.subr.bf16.mxu1 %v6413_v54  ;;  %v921_v53 = vld [vmem:[%s8909_s18 + $0x1220] sm:$0xff]  ;;  %v923_v54 = vld [vmem:[%s8909_s18 + $0x1230] sm:$0xff]  ;;  %v2224_v47 = vld [vmem:[%s8909_s18 + $0x3ad8] sm:$0xff] }
 0x2ac   : > { %7694 = vmatprep.subr.bf16.mxu0 %v7693_v58  ;;  %v926_v58 = vld [vmem:[%s8909_s18 + $0x1248] sm:$0xff]  ;;  %v6435_v63 = vpack.c.bf16 %v923_v54, %v921_v53  ;;  %v2221_v53 = vld [vmem:[%s8909_s18 + $0x3ac0] sm:$0xff]  ;;  %v7733_v54 = vpack.c.bf16 %v2224_v47, %v2222_v46 }
 0x2ad   : > { %v961_v47 = vld [vmem:[%s8909_s18 + $0x1360] sm:$0xff] }
 0x2ae   : > { %6416 = vmatpush1.bf16.msra.mxu1 %v6415_v0  ;;  %v321_v0 = vld [vmem:[#allocation2 + $0x1d8] sm:$0xff] }
 0x2af   : > { %7696 = vmatpush1.bf16.msra.mxu0 %v7695_v1  ;;  %6418 = vmatprep.subr.bf16.mxu1 %v6417_v2  ;;  %v7715_v1 = vpack.c.bf16 %v2203_v57, %v2201_v55  ;;  %v6437_v2 = vpack.c.bf16 %v928_v59, %v926_v58  ;;  %v2223_v55 = vld [vmem:[%s8909_s18 + $0x3ad0] sm:$0xff]  ;;  %v948_v57 = vld [vmem:[%s8909_s18 + $0x12f8] sm:$0xff]  ;;  %v2226_v58 = vld [vmem:[%s8909_s18 + $0x3ae8] sm:$0xff] }
 0x2b0   : > { %7698 = vmatprep.subr.bf16.mxu0 %v7697_v6  ;;  %v7717_v6 = vpack.c.bf16 %v2208_v61, %v2206_v60  ;;  %v2228_v59 = vld [vmem:[%s8909_s18 + $0x3af8] sm:$0xff]  ;;  %v7735_v61 = vpack.c.bf16 %v2223_v55, %v2221_v53 }
 0x2b1   : > { %v968_v53 = vld [vmem:[%s8909_s18 + $0x1398] sm:$0xff] }
 0x2b2   : > { %6420 = vmatpush1.bf16.msra.mxu1 %v6419_v12  ;;  %v6439_v12 = vpack.c.bf16 %v927_v4, %v925_v3  ;;  %v2227_v3 = vld [vmem:[%s8909_s18 + $0x3af0] sm:$0xff]  ;;  %v950_v4 = vld [vmem:[%s8909_s18 + $0x1308] sm:$0xff]  ;;  %v2248_v55 = vld [vmem:[%s8909_s18 + $0x3b98] sm:$0xff] }
 0x2b3   : > { %7700 = vmatpush1.bf16.msra.mxu0 %v7699_v13  ;;  %6422 = vmatprep.subr.bf16.mxu1 %v6421_v14  ;;  %v7719_v13 = vpack.c.bf16 %v2207_v7, %v2205_v5  ;;  %v6441_v14 = vpack.c.bf16 %v932_v9, %v930_v8  ;;  %v952_v5 = vld [vmem:[%s8909_s18 + $0x1318] sm:$0xff] }
 0x2b4   : > { %7702 = vmatprep.subr.bf16.mxu0 %v7701_v18  ;;  %v7721_v18 = vpack.c.bf16 %v2212_v11, %v2210_v10  ;;  %v2232_v7 = vld [vmem:[%s8909_s18 + $0x3b18] sm:$0xff]  ;;  %v6461_v10 = vpack.c.bf16 %v952_v5, %v950_v4  ;;  %v949_v11 = vld [vmem:[%s8909_s18 + $0x1300] sm:$0xff] }
 0x2b6   : > { %6424 = vmatpush1.bf16.msra.mxu1 %v6423_v24  ;;  %v6443_v24 = vpack.c.bf16 %v931_v16, %v929_v15  ;;  %v2231_v15 = vld [vmem:[%s8909_s18 + $0x3b10] sm:$0xff]  ;;  %v954_v16 = vld [vmem:[%s8909_s18 + $0x1328] sm:$0xff] }
 0x2b7   : > { %7704 = vmatpush1.bf16.msra.mxu0 %v7703_v25  ;;  %6426 = vmatprep.subr.bf16.mxu1 %v6425_v26  ;;  %v7723_v25 = vpack.c.bf16 %v2211_v19, %v2209_v17  ;;  %v6445_v26 = vpack.c.bf16 %v936_v21, %v934_v20  ;;  %v956_v17 = vld [vmem:[%s8909_s18 + $0x1338] sm:$0xff] }
 0x2b8   : > { %7706 = vmatprep.subr.bf16.mxu0 %v7705_v30  ;;  %v7725_v30 = vpack.c.bf16 %v2216_v23, %v2214_v22  ;;  %v2236_v19 = vld [vmem:[%s8909_s18 + $0x3b38] sm:$0xff]  ;;  %v6465_v22 = vpack.c.bf16 %v956_v17, %v954_v16  ;;  %v953_v23 = vld [vmem:[%s8909_s18 + $0x1320] sm:$0xff] }
 0x2ba   : > { %6428 = vmatpush1.bf16.msra.mxu1 %v6427_v36  ;;  %v6447_v36 = vpack.c.bf16 %v935_v28, %v933_v27  ;;  %v2235_v27 = vld [vmem:[%s8909_s18 + $0x3b30] sm:$0xff]  ;;  %v958_v28 = vld [vmem:[%s8909_s18 + $0x1348] sm:$0xff] }
 0x2bb   : > { %7708 = vmatpush1.bf16.msra.mxu0 %v7707_v37  ;;  %6430 = vmatprep.subr.bf16.mxu1 %v6429_v38  ;;  %v7727_v37 = vpack.c.bf16 %v2215_v31, %v2213_v29  ;;  %v6449_v38 = vpack.c.bf16 %v940_v33, %v938_v32  ;;  %v960_v29 = vld [vmem:[%s8909_s18 + $0x1358] sm:$0xff] }
 0x2bc   : > { %7710 = vmatprep.subr.bf16.mxu0 %v7709_v42  ;;  %v7729_v42 = vpack.c.bf16 %v2220_v35, %v2218_v34  ;;  %v2240_v31 = vld [vmem:[%s8909_s18 + $0x3b58] sm:$0xff]  ;;  %v6469_v34 = vpack.c.bf16 %v960_v29, %v958_v28  ;;  %v957_v35 = vld [vmem:[%s8909_s18 + $0x1340] sm:$0xff] }
 0x2bd   : > { %3478 = vmatmul.mubr.f32.vlgmr.msra.gmra.mrb[0].mxu1 %v278_v48  ;;  %v6451_v48 = vpack.c.bf16 %v939_v40, %v937_v39  ;;  %v2239_v39 = vld [vmem:[%s8909_s18 + $0x3b50] sm:$0xff]  ;;  %v962_v40 = vld [vmem:[%s8909_s18 + $0x1368] sm:$0xff] }
 0x2be   : > { %6432 = vmatpush1.bf16.msra.mxu1 %v6431_v49  ;;  %4898 = vmatmul.mubr.f32.vlgmr.msra.gmra.mrb[0].mxu0 %v318_v50  ;;  %v7731_v49 = vpack.c.bf16 %v2219_v43, %v2217_v41  ;;  %v6453_v50 = vpack.c.bf16 %v944_v45, %v942_v44  ;;  %v964_v41 = vld [vmem:[%s8909_s18 + $0x1378] sm:$0xff] }
 0x2bf   : > { %7712 = vmatpush1.bf16.msra.mxu0 %v7711_v51  ;;  %6434 = vmatprep.subr.bf16.mxu1 %v6433_v52  ;;  %v941_v51 = vld [vmem:[%s8909_s18 + $0x12c0] sm:$0xff]  ;;  %v943_v52 = vld [vmem:[%s8909_s18 + $0x12d0] sm:$0xff]  ;;  %v2244_v43 = vld [vmem:[%s8909_s18 + $0x3b78] sm:$0xff]  ;;  %v6473_v46 = vpack.c.bf16 %v964_v41, %v962_v40 }
 0x2c0   : > { %7714 = vmatprep.subr.bf16.mxu0 %v7713_v56  ;;  %3548 = vmatprep.mubr.f32.mxu1 %v281_v62  ;;  %v946_v56 = vld [vmem:[%s8909_s18 + $0x12e8] sm:$0xff]  ;;  %v6455_v60 = vpack.c.bf16 %v943_v52, %v941_v51  ;;  %v2243_v51 = vld [vmem:[%s8909_s18 + $0x3b70] sm:$0xff] }
 0x2c1   : > { %4968 = vmatprep.mubr.f32.mxu0 %v321_v0  ;;  %v6457_v62 = vpack.c.bf16 %v948_v57, %v946_v56  ;;  %v947_v0 = vld [vmem:[%s8909_s18 + $0x12f0] sm:$0xff]  ;;  %v966_v52 = vld [vmem:[%s8909_s18 + $0x1388] sm:$0xff] }
 0x2c2   : > { %6436 = vmatpush1.bf16.msra.mxu1 %v6435_v63  ;;  %v945_v63 = vld [vmem:[%s8909_s18 + $0x12e0] sm:$0xff] }
 0x2c3   : > { %7716 = vmatpush1.bf16.msra.mxu0 %v7715_v1  ;;  %6438 = vmatprep.subr.bf16.mxu1 %v6437_v2  ;;  %v2225_v1 = vld [vmem:[%s8909_s18 + $0x3ae0] sm:$0xff]  ;;  %v7737_v2 = vpack.c.bf16 %v2228_v59, %v2226_v58  ;;  %v6459_v8 = vpack.c.bf16 %v947_v0, %v945_v63  ;;  %v6477_v58 = vpack.c.bf16 %v968_v53, %v966_v52  ;;  %v2247_v63 = vld [vmem:[%s8909_s18 + $0x3b90] sm:$0xff]  ;;  %v970_v0 = vld [vmem:[%s8909_s18 + $0x13a8] sm:$0xff] }
 0x2c4   : > { %7718 = vmatprep.subr.bf16.mxu0 %v7717_v6  ;;  %v2230_v6 = vld [vmem:[%s8909_s18 + $0x3b08] sm:$0xff]  ;;  %v7739_v9 = vpack.c.bf16 %v2227_v3, %v2225_v1  ;;  %v965_v59 = vld [vmem:[%s8909_s18 + $0x1380] sm:$0xff]  ;;  %v972_v1 = vld [vmem:[%s8909_s18 + $0x13b8] sm:$0xff] }
 0x2c5   : > { %v2252_v3 = vld [vmem:[%s8909_s18 + $0x3bb8] sm:$0xff] }
 0x2c6   : > { %6440 = vmatpush1.bf16.msra.mxu1 %v6439_v12  ;;  %v951_v12 = vld [vmem:[%s8909_s18 + $0x1310] sm:$0xff]  ;;  %v280_v52 = vld [vmem:[#allocation2 + $0x90] sm:$0xff] }
 0x2c7   : > { %7720 = vmatpush1.bf16.msra.mxu0 %v7719_v13  ;;  %6442 = vmatprep.subr.bf16.mxu1 %v6441_v14  ;;  %v2229_v13 = vld [vmem:[%s8909_s18 + $0x3b00] sm:$0xff]  ;;  %v7741_v14 = vpack.c.bf16 %v2232_v7, %v2230_v6  ;;  %v6463_v20 = vpack.c.bf16 %v951_v12, %v949_v11  ;;  %v6481_v6 = vpack.c.bf16 %v972_v1, %v970_v0  ;;  %v2251_v11 = vld [vmem:[%s8909_s18 + $0x3bb0] sm:$0xff]  ;;  %v974_v12 = vld [vmem:[%s8909_s18 + $0x13c8] sm:$0xff] }
 0x2c8   : > { %7722 = vmatprep.subr.bf16.mxu0 %v7721_v18  ;;  %v2234_v18 = vld [vmem:[%s8909_s18 + $0x3b28] sm:$0xff]  ;;  %v7743_v21 = vpack.c.bf16 %v2231_v15, %v2229_v13  ;;  %v969_v7 = vld [vmem:[%s8909_s18 + $0x13a0] sm:$0xff]  ;;  %v976_v13 = vld [vmem:[%s8909_s18 + $0x13d8] sm:$0xff] }
 0x2c9   : > { %v2256_v15 = vld [vmem:[%s8909_s18 + $0x3bd8] sm:$0xff]  ;;  %v2270_v0 = vld [vmem:[%s8909_s18 + $0x3c48] sm:$0xff] }
 0x2ca   : > { %6444 = vmatpush1.bf16.msra.mxu1 %v6443_v24  ;;  %v955_v24 = vld [vmem:[%s8909_s18 + $0x1330] sm:$0xff]  ;;  %v2272_v1 = vld [vmem:[%s8909_s18 + $0x3c58] sm:$0xff] }
 0x2cb   : > { %7724 = vmatpush1.bf16.msra.mxu0 %v7723_v25  ;;  %6446 = vmatprep.subr.bf16.mxu1 %v6445_v26  ;;  %v2233_v25 = vld [vmem:[%s8909_s18 + $0x3b20] sm:$0xff]  ;;  %v7745_v26 = vpack.c.bf16 %v2236_v19, %v2234_v18  ;;  %v6467_v32 = vpack.c.bf16 %v955_v24, %v953_v23  ;;  %v6485_v18 = vpack.c.bf16 %v976_v13, %v974_v12  ;;  %v2255_v23 = vld [vmem:[%s8909_s18 + $0x3bd0] sm:$0xff]  ;;  %v978_v24 = vld [vmem:[%s8909_s18 + $0x13e8] sm:$0xff] }
 0x2cc   : > { %7726 = vmatprep.subr.bf16.mxu0 %v7725_v30  ;;  %v2238_v30 = vld [vmem:[%s8909_s18 + $0x3b48] sm:$0xff]  ;;  %v7747_v33 = vpack.c.bf16 %v2235_v27, %v2233_v25  ;;  %v973_v19 = vld [vmem:[%s8909_s18 + $0x13c0] sm:$0xff]  ;;  %v980_v25 = vld [vmem:[%s8909_s18 + $0x13f8] sm:$0xff] }
 0x2cd   : > { %v2260_v27 = vld [vmem:[%s8909_s18 + $0x3bf8] sm:$0xff]  ;;  %v994_v12 = vld [vmem:[%s8909_s18 + $0x1468] sm:$0xff] }
 0x2ce   : > { %6448 = vmatpush1.bf16.msra.mxu1 %v6447_v36  ;;  %v959_v36 = vld [vmem:[%s8909_s18 + $0x1350] sm:$0xff]  ;;  %v996_v13 = vld [vmem:[%s8909_s18 + $0x1478] sm:$0xff] }
 0x2cf   : > { %7728 = vmatpush1.bf16.msra.mxu0 %v7727_v37  ;;  %6450 = vmatprep.subr.bf16.mxu1 %v6449_v38  ;;  %v2237_v37 = vld [vmem:[%s8909_s18 + $0x3b40] sm:$0xff]  ;;  %v7749_v38 = vpack.c.bf16 %v2240_v31, %v2238_v30  ;;  %v6471_v44 = vpack.c.bf16 %v959_v36, %v957_v35  ;;  %v6489_v30 = vpack.c.bf16 %v980_v25, %v978_v24  ;;  %v2259_v35 = vld [vmem:[%s8909_s18 + $0x3bf0] sm:$0xff]  ;;  %v982_v36 = vld [vmem:[%s8909_s18 + $0x1408] sm:$0xff] }
 0x2d0   : > { %7730 = vmatprep.subr.bf16.mxu0 %v7729_v42  ;;  %v2242_v42 = vld [vmem:[%s8909_s18 + $0x3b68] sm:$0xff]  ;;  %v7751_v45 = vpack.c.bf16 %v2239_v39, %v2237_v37  ;;  %v977_v31 = vld [vmem:[%s8909_s18 + $0x13e0] sm:$0xff]  ;;  %v984_v37 = vld [vmem:[%s8909_s18 + $0x1418] sm:$0xff] }
 0x2d1   : > { %v2264_v39 = vld [vmem:[%s8909_s18 + $0x3c18] sm:$0xff]  ;;  %v998_v24 = vld [vmem:[%s8909_s18 + $0x1488] sm:$0xff] }
 0x2d2   : > { %6452 = vmatpush1.bf16.msra.mxu1 %v6451_v48  ;;  %v963_v48 = vld [vmem:[%s8909_s18 + $0x1370] sm:$0xff]  ;;  %v1000_v25 = vld [vmem:[%s8909_s18 + $0x1498] sm:$0xff] }
 0x2d3   : > { %7732 = vmatpush1.bf16.msra.mxu0 %v7731_v49  ;;  %6454 = vmatprep.subr.bf16.mxu1 %v6453_v50  ;;  %v2241_v49 = vld [vmem:[%s8909_s18 + $0x3b60] sm:$0xff]  ;;  %v7753_v50 = vpack.c.bf16 %v2244_v43, %v2242_v42  ;;  %v6475_v56 = vpack.c.bf16 %v963_v48, %v961_v47  ;;  %v6493_v42 = vpack.c.bf16 %v984_v37, %v982_v36  ;;  %v2263_v47 = vld [vmem:[%s8909_s18 + $0x3c10] sm:$0xff]  ;;  %v986_v48 = vld [vmem:[%s8909_s18 + $0x1428] sm:$0xff] }
 0x2d4   : > { %7734 = vmatprep.subr.bf16.mxu0 %v7733_v54  ;;  %v2246_v54 = vld [vmem:[%s8909_s18 + $0x3b88] sm:$0xff]  ;;  %v7755_v57 = vpack.c.bf16 %v2243_v51, %v2241_v49  ;;  %v981_v43 = vld [vmem:[%s8909_s18 + $0x1400] sm:$0xff]  ;;  %v988_v49 = vld [vmem:[%s8909_s18 + $0x1438] sm:$0xff] }
 0x2d5   : > { %v2268_v51 = vld [vmem:[%s8909_s18 + $0x3c38] sm:$0xff]  ;;  %v1002_v36 = vld [vmem:[%s8909_s18 + $0x14a8] sm:$0xff] }
 0x2d6   : > { %6456 = vmatpush1.bf16.msra.mxu1 %v6455_v60  ;;  %v967_v60 = vld [vmem:[%s8909_s18 + $0x1390] sm:$0xff]  ;;  %v1004_v37 = vld [vmem:[%s8909_s18 + $0x14b8] sm:$0xff] }
 0x2d7   : > { %7736 = vmatpush1.bf16.msra.mxu0 %v7735_v61  ;;  %6458 = vmatprep.subr.bf16.mxu1 %v6457_v62  ;;  %v2245_v61 = vld [vmem:[%s8909_s18 + $0x3b80] sm:$0xff]  ;;  %v7757_v62 = vpack.c.bf16 %v2248_v55, %v2246_v54  ;;  %v6479_v4 = vpack.c.bf16 %v967_v60, %v965_v59  ;;  %v320_v54 = vld [vmem:[#allocation2 + $0x1d0] sm:$0xff] }
 0x2d8   : > { %7738 = vmatprep.subr.bf16.mxu0 %v7737_v2  ;;  %v2250_v2 = vld [vmem:[%s8909_s18 + $0x3ba8] sm:$0xff]  ;;  %v7759_v5 = vpack.c.bf16 %v2247_v63, %v2245_v61  ;;  %v2265_v59 = vld [vmem:[%s8909_s18 + $0x3c20] sm:$0xff]  ;;  %v2267_v61 = vld [vmem:[%s8909_s18 + $0x3c30] sm:$0xff] }
 0x2d9   : > { %v992_v63 = vld [vmem:[%s8909_s18 + $0x1458] sm:$0xff] }
 0x2da   : > { %6460 = vmatpush1.bf16.msra.mxu1 %v6459_v8  ;;  %v971_v8 = vld [vmem:[%s8909_s18 + $0x13b0] sm:$0xff] }
 0x2db   : > { %7740 = vmatpush1.bf16.msra.mxu0 %v7739_v9  ;;  %6462 = vmatprep.subr.bf16.mxu1 %v6461_v10  ;;  %v2249_v9 = vld [vmem:[%s8909_s18 + $0x3ba0] sm:$0xff]  ;;  %v7761_v10 = vpack.c.bf16 %v2252_v3, %v2250_v2  ;;  %v6483_v16 = vpack.c.bf16 %v971_v8, %v969_v7  ;;  %v283_v2 = vld [vmem:[#allocation2 + $0xa8] sm:$0xff] }
 0x2dc   : > { %7742 = vmatprep.subr.bf16.mxu0 %v7741_v14  ;;  %v2254_v14 = vld [vmem:[%s8909_s18 + $0x3bc8] sm:$0xff]  ;;  %v7763_v17 = vpack.c.bf16 %v2251_v11, %v2249_v9  ;;  %v989_v7 = vld [vmem:[%s8909_s18 + $0x1440] sm:$0xff]  ;;  %v991_v8 = vld [vmem:[%s8909_s18 + $0x1450] sm:$0xff] }
 0x2dd   : > { %v2269_v9 = vld [vmem:[%s8909_s18 + $0x3c40] sm:$0xff]  ;;  %v2271_v11 = vld [vmem:[%s8909_s18 + $0x3c50] sm:$0xff] }
 0x2de   : > { %6464 = vmatpush1.bf16.msra.mxu1 %v6463_v20  ;;  %v975_v20 = vld [vmem:[%s8909_s18 + $0x13d0] sm:$0xff] }
 0x2df   : > { %7744 = vmatpush1.bf16.msra.mxu0 %v7743_v21  ;;  %6466 = vmatprep.subr.bf16.mxu1 %v6465_v22  ;;  %v2253_v21 = vld [vmem:[%s8909_s18 + $0x3bc0] sm:$0xff]  ;;  %v7765_v22 = vpack.c.bf16 %v2256_v15, %v2254_v14  ;;  %v6487_v28 = vpack.c.bf16 %v975_v20, %v973_v19  ;;  %v2274_v14 = vld [vmem:[%s8909_s18 + $0x3c68] sm:$0xff]  ;;  %v2276_v15 = vld [vmem:[%s8909_s18 + $0x3c78] sm:$0xff] }
 0x2e0   : > { %7746 = vmatprep.subr.bf16.mxu0 %v7745_v26  ;;  %v2258_v26 = vld [vmem:[%s8909_s18 + $0x3be8] sm:$0xff]  ;;  %v7767_v29 = vpack.c.bf16 %v2255_v23, %v2253_v21  ;;  %v993_v19 = vld [vmem:[%s8909_s18 + $0x1460] sm:$0xff]  ;;  %v995_v20 = vld [vmem:[%s8909_s18 + $0x1470] sm:$0xff] }
 0x2e1   : > { %v2273_v21 = vld [vmem:[%s8909_s18 + $0x3c60] sm:$0xff]  ;;  %v2275_v23 = vld [vmem:[%s8909_s18 + $0x3c70] sm:$0xff] }
 0x2e2   : > { %6468 = vmatpush1.bf16.msra.mxu1 %v6467_v32  ;;  %v979_v32 = vld [vmem:[%s8909_s18 + $0x13f0] sm:$0xff] }
 0x2e3   : > { %7748 = vmatpush1.bf16.msra.mxu0 %v7747_v33  ;;  %6470 = vmatprep.subr.bf16.mxu1 %v6469_v34  ;;  %v2257_v33 = vld [vmem:[%s8909_s18 + $0x3be0] sm:$0xff]  ;;  %v7769_v34 = vpack.c.bf16 %v2260_v27, %v2258_v26  ;;  %v6491_v40 = vpack.c.bf16 %v979_v32, %v977_v31  ;;  %v2278_v26 = vld [vmem:[%s8909_s18 + $0x3c88] sm:$0xff]  ;;  %v2280_v27 = vld [vmem:[%s8909_s18 + $0x3c98] sm:$0xff] }
 0x2e4   : > { %7750 = vmatprep.subr.bf16.mxu0 %v7749_v38  ;;  %v2262_v38 = vld [vmem:[%s8909_s18 + $0x3c08] sm:$0xff]  ;;  %v7771_v41 = vpack.c.bf16 %v2259_v35, %v2257_v33  ;;  %v997_v31 = vld [vmem:[%s8909_s18 + $0x1480] sm:$0xff]  ;;  %v999_v32 = vld [vmem:[%s8909_s18 + $0x1490] sm:$0xff] }
 0x2e5   : > { %v2277_v33 = vld [vmem:[%s8909_s18 + $0x3c80] sm:$0xff]  ;;  %v2279_v35 = vld [vmem:[%s8909_s18 + $0x3c90] sm:$0xff] }
 0x2e6   : > { %6472 = vmatpush1.bf16.msra.mxu1 %v6471_v44  ;;  %v983_v44 = vld [vmem:[%s8909_s18 + $0x1410] sm:$0xff] }
 0x2e7   : > { %7752 = vmatpush1.bf16.msra.mxu0 %v7751_v45  ;;  %6474 = vmatprep.subr.bf16.mxu1 %v6473_v46  ;;  %v2261_v45 = vld [vmem:[%s8909_s18 + $0x3c00] sm:$0xff]  ;;  %v7773_v46 = vpack.c.bf16 %v2264_v39, %v2262_v38  ;;  %v6495_v53 = vpack.c.bf16 %v983_v44, %v981_v43  ;;  %v2282_v38 = vld [vmem:[%s8909_s18 + $0x3ca8] sm:$0xff]  ;;  %v2284_v39 = vld [vmem:[%s8909_s18 + $0x3cb8] sm:$0xff] }
 0x2e8   : > { %7754 = vmatprep.subr.bf16.mxu0 %v7753_v50  ;;  %v2266_v50 = vld [vmem:[%s8909_s18 + $0x3c28] sm:$0xff]  ;;  %v7775_v55 = vpack.c.bf16 %v2263_v47, %v2261_v45  ;;  %v1001_v43 = vld [vmem:[%s8909_s18 + $0x14a0] sm:$0xff]  ;;  %v1003_v44 = vld [vmem:[%s8909_s18 + $0x14b0] sm:$0xff] }
 0x2e9   : > { %v7777_v60 = vpack.c.bf16 %v2268_v51, %v2266_v50  ;;  %v2281_v45 = vld [vmem:[%s8909_s18 + $0x3ca0] sm:$0xff]  ;;  %v2283_v47 = vld [vmem:[%s8909_s18 + $0x3cb0] sm:$0xff]  ;;  %v2286_v50 = vld [vmem:[%s8909_s18 + $0x3cc8] sm:$0xff] }
 0x2ea   : > { %6476 = vmatpush1.bf16.msra.mxu1 %v6475_v56  ;;  %v6497_v56 = vpack.c.bf16 %v988_v49, %v986_v48  ;;  %v1006_v48 = vld [vmem:[%s8909_s18 + $0x14c8] sm:$0xff]  ;;  %v1008_v49 = vld [vmem:[%s8909_s18 + $0x14d8] sm:$0xff] }
 0x2eb   : > { %7756 = vmatpush1.bf16.msra.mxu0 %v7755_v57  ;;  %6478 = vmatprep.subr.bf16.mxu1 %v6477_v58  ;;  %v985_v57 = vld [vmem:[%s8909_s18 + $0x1420] sm:$0xff]  ;;  %v987_v58 = vld [vmem:[%s8909_s18 + $0x1430] sm:$0xff]  ;;  %v2288_v51 = vld [vmem:[%s8909_s18 + $0x3cd8] sm:$0xff] }
 0x2ec   : > { %7758 = vmatprep.subr.bf16.mxu0 %v7757_v62  ;;  %v990_v62 = vld [vmem:[%s8909_s18 + $0x1448] sm:$0xff]  ;;  %v6499_v3 = vpack.c.bf16 %v987_v58, %v985_v57  ;;  %v2285_v57 = vld [vmem:[%s8909_s18 + $0x3cc0] sm:$0xff]  ;;  %v7797_v58 = vpack.c.bf16 %v2288_v51, %v2286_v50 }
 0x2ed   : > { %v1025_v51 = vld [vmem:[%s8909_s18 + $0x1560] sm:$0xff] }
 0x2ee   : > { %6480 = vmatpush1.bf16.msra.mxu1 %v6479_v4  ;;  %v323_v4 = vld [vmem:[#allocation2 + $0x1e8] sm:$0xff] }
 0x2ef   : > { %7760 = vmatpush1.bf16.msra.mxu0 %v7759_v5  ;;  %6482 = vmatprep.subr.bf16.mxu1 %v6481_v6  ;;  %v7779_v5 = vpack.c.bf16 %v2267_v61, %v2265_v59  ;;  %v6501_v6 = vpack.c.bf16 %v992_v63, %v990_v62  ;;  %v2287_v59 = vld [vmem:[%s8909_s18 + $0x3cd0] sm:$0xff]  ;;  %v1012_v61 = vld [vmem:[%s8909_s18 + $0x14f8] sm:$0xff]  ;;  %v2290_v62 = vld [vmem:[%s8909_s18 + $0x3ce8] sm:$0xff] }
 0x2f0   : > { %7762 = vmatprep.subr.bf16.mxu0 %v7761_v10  ;;  %v7781_v10 = vpack.c.bf16 %v2272_v1, %v2270_v0  ;;  %v2292_v63 = vld [vmem:[%s8909_s18 + $0x3cf8] sm:$0xff]  ;;  %v7799_v1 = vpack.c.bf16 %v2287_v59, %v2285_v57 }
 0x2f1   : > { %v1032_v57 = vld [vmem:[%s8909_s18 + $0x1598] sm:$0xff] }
 0x2f2   : > { %6484 = vmatpush1.bf16.msra.mxu1 %v6483_v16  ;;  %v6503_v16 = vpack.c.bf16 %v991_v8, %v989_v7  ;;  %v2291_v7 = vld [vmem:[%s8909_s18 + $0x3cf0] sm:$0xff]  ;;  %v1014_v8 = vld [vmem:[%s8909_s18 + $0x1508] sm:$0xff]  ;;  %v2312_v59 = vld [vmem:[%s8909_s18 + $0x3d98] sm:$0xff] }
 0x2f3   : > { %7764 = vmatpush1.bf16.msra.mxu0 %v7763_v17  ;;  %6486 = vmatprep.subr.bf16.mxu1 %v6485_v18  ;;  %v7783_v17 = vpack.c.bf16 %v2271_v11, %v2269_v9  ;;  %v6505_v18 = vpack.c.bf16 %v996_v13, %v994_v12  ;;  %v1016_v9 = vld [vmem:[%s8909_s18 + $0x1518] sm:$0xff] }
 0x2f4   : > { %7766 = vmatprep.subr.bf16.mxu0 %v7765_v22  ;;  %v7785_v22 = vpack.c.bf16 %v2276_v15, %v2274_v14  ;;  %v2296_v11 = vld [vmem:[%s8909_s18 + $0x3d18] sm:$0xff]  ;;  %v6525_v14 = vpack.c.bf16 %v1016_v9, %v1014_v8  ;;  %v1013_v15 = vld [vmem:[%s8909_s18 + $0x1500] sm:$0xff] }
 0x2f6   : > { %6488 = vmatpush1.bf16.msra.mxu1 %v6487_v28  ;;  %v6507_v28 = vpack.c.bf16 %v995_v20, %v993_v19  ;;  %v2295_v19 = vld [vmem:[%s8909_s18 + $0x3d10] sm:$0xff]  ;;  %v1018_v20 = vld [vmem:[%s8909_s18 + $0x1528] sm:$0xff] }
 0x2f7   : > { %7768 = vmatpush1.bf16.msra.mxu0 %v7767_v29  ;;  %6490 = vmatprep.subr.bf16.mxu1 %v6489_v30  ;;  %v7787_v29 = vpack.c.bf16 %v2275_v23, %v2273_v21  ;;  %v6509_v30 = vpack.c.bf16 %v1000_v25, %v998_v24  ;;  %v1020_v21 = vld [vmem:[%s8909_s18 + $0x1538] sm:$0xff] }
 0x2f8   : > { %7770 = vmatprep.subr.bf16.mxu0 %v7769_v34  ;;  %v7789_v34 = vpack.c.bf16 %v2280_v27, %v2278_v26  ;;  %v2300_v23 = vld [vmem:[%s8909_s18 + $0x3d38] sm:$0xff]  ;;  %v6529_v26 = vpack.c.bf16 %v1020_v21, %v1018_v20  ;;  %v1017_v27 = vld [vmem:[%s8909_s18 + $0x1520] sm:$0xff] }
 0x2fa   : > { %6492 = vmatpush1.bf16.msra.mxu1 %v6491_v40  ;;  %v6511_v40 = vpack.c.bf16 %v999_v32, %v997_v31  ;;  %v2299_v31 = vld [vmem:[%s8909_s18 + $0x3d30] sm:$0xff]  ;;  %v1022_v32 = vld [vmem:[%s8909_s18 + $0x1548] sm:$0xff] }
 0x2fb   : > { %7772 = vmatpush1.bf16.msra.mxu0 %v7771_v41  ;;  %6494 = vmatprep.subr.bf16.mxu1 %v6493_v42  ;;  %v7791_v41 = vpack.c.bf16 %v2279_v35, %v2277_v33  ;;  %v6513_v42 = vpack.c.bf16 %v1004_v37, %v1002_v36  ;;  %v1024_v33 = vld [vmem:[%s8909_s18 + $0x1558] sm:$0xff] }
 0x2fc   : > { %7774 = vmatprep.subr.bf16.mxu0 %v7773_v46  ;;  %v7793_v46 = vpack.c.bf16 %v2284_v39, %v2282_v38  ;;  %v2304_v35 = vld [vmem:[%s8909_s18 + $0x3d58] sm:$0xff]  ;;  %v6533_v38 = vpack.c.bf16 %v1024_v33, %v1022_v32  ;;  %v1021_v39 = vld [vmem:[%s8909_s18 + $0x1540] sm:$0xff] }
 0x2fd   : > { %3549 = vmatmul.mubr.f32.vlgmr.msra.gmra.mrb[0].mxu1 %v280_v52  ;;  %v6515_v52 = vpack.c.bf16 %v1003_v44, %v1001_v43  ;;  %v2303_v43 = vld [vmem:[%s8909_s18 + $0x3d50] sm:$0xff]  ;;  %v1026_v44 = vld [vmem:[%s8909_s18 + $0x1568] sm:$0xff] }
 0x2fe   : > { %6496 = vmatpush1.bf16.msra.mxu1 %v6495_v53  ;;  %4969 = vmatmul.mubr.f32.vlgmr.msra.gmra.mrb[0].mxu0 %v320_v54  ;;  %v7795_v53 = vpack.c.bf16 %v2283_v47, %v2281_v45  ;;  %v6517_v54 = vpack.c.bf16 %v1008_v49, %v1006_v48  ;;  %v1028_v45 = vld [vmem:[%s8909_s18 + $0x1578] sm:$0xff] }
 0x2ff   : > { %7776 = vmatpush1.bf16.msra.mxu0 %v7775_v55  ;;  %6498 = vmatprep.subr.bf16.mxu1 %v6497_v56  ;;  %v1005_v55 = vld [vmem:[%s8909_s18 + $0x14c0] sm:$0xff]  ;;  %v1007_v56 = vld [vmem:[%s8909_s18 + $0x14d0] sm:$0xff]  ;;  %v2308_v47 = vld [vmem:[%s8909_s18 + $0x3d78] sm:$0xff]  ;;  %v6537_v50 = vpack.c.bf16 %v1028_v45, %v1026_v44 }
 0x300   : > { %7778 = vmatprep.subr.bf16.mxu0 %v7777_v60  ;;  %3619 = vmatprep.mubr.f32.mxu1 %v283_v2  ;;  %v1010_v60 = vld [vmem:[%s8909_s18 + $0x14e8] sm:$0xff]  ;;  %v6519_v0 = vpack.c.bf16 %v1007_v56, %v1005_v55  ;;  %v2307_v55 = vld [vmem:[%s8909_s18 + $0x3d70] sm:$0xff] }
 0x301   : > { %5039 = vmatprep.mubr.f32.mxu0 %v323_v4  ;;  %v6521_v2 = vpack.c.bf16 %v1012_v61, %v1010_v60  ;;  %v1011_v4 = vld [vmem:[%s8909_s18 + $0x14f0] sm:$0xff]  ;;  %v1030_v56 = vld [vmem:[%s8909_s18 + $0x1588] sm:$0xff] }
 0x302   : > { %6500 = vmatpush1.bf16.msra.mxu1 %v6499_v3  ;;  %v1009_v3 = vld [vmem:[%s8909_s18 + $0x14e0] sm:$0xff] }
 0x303   : > { %7780 = vmatpush1.bf16.msra.mxu0 %v7779_v5  ;;  %6502 = vmatprep.subr.bf16.mxu1 %v6501_v6  ;;  %v2289_v5 = vld [vmem:[%s8909_s18 + $0x3ce0] sm:$0xff]  ;;  %v7801_v6 = vpack.c.bf16 %v2292_v63, %v2290_v62  ;;  %v6523_v12 = vpack.c.bf16 %v1011_v4, %v1009_v3  ;;  %v6541_v62 = vpack.c.bf16 %v1032_v57, %v1030_v56  ;;  %v2311_v3 = vld [vmem:[%s8909_s18 + $0x3d90] sm:$0xff]  ;;  %v1034_v4 = vld [vmem:[%s8909_s18 + $0x15a8] sm:$0xff] }
 0x304   : > { %7782 = vmatprep.subr.bf16.mxu0 %v7781_v10  ;;  %v2294_v10 = vld [vmem:[%s8909_s18 + $0x3d08] sm:$0xff]  ;;  %v7803_v13 = vpack.c.bf16 %v2291_v7, %v2289_v5  ;;  %v1029_v63 = vld [vmem:[%s8909_s18 + $0x1580] sm:$0xff]  ;;  %v1036_v5 = vld [vmem:[%s8909_s18 + $0x15b8] sm:$0xff] }
 0x305   : > { %v2316_v7 = vld [vmem:[%s8909_s18 + $0x3db8] sm:$0xff]  ;;  %v282_v56 = vld [vmem:[#allocation2 + $0xa0] sm:$0xff] }
 0x306   : > { %6504 = vmatpush1.bf16.msra.mxu1 %v6503_v16  ;;  %v1015_v16 = vld [vmem:[%s8909_s18 + $0x1510] sm:$0xff] }
 0x307   : > { %7784 = vmatpush1.bf16.msra.mxu0 %v7783_v17  ;;  %6506 = vmatprep.subr.bf16.mxu1 %v6505_v18  ;;  %v2293_v17 = vld [vmem:[%s8909_s18 + $0x3d00] sm:$0xff]  ;;  %v7805_v18 = vpack.c.bf16 %v2296_v11, %v2294_v10  ;;  %v6527_v24 = vpack.c.bf16 %v1015_v16, %v1013_v15  ;;  %v6545_v10 = vpack.c.bf16 %v1036_v5, %v1034_v4  ;;  %v2315_v15 = vld [vmem:[%s8909_s18 + $0x3db0] sm:$0xff]  ;;  %v1038_v16 = vld [vmem:[%s8909_s18 + $0x15c8] sm:$0xff] }
 0x308   : > { %7786 = vmatprep.subr.bf16.mxu0 %v7785_v22  ;;  %v2298_v22 = vld [vmem:[%s8909_s18 + $0x3d28] sm:$0xff]  ;;  %v7807_v25 = vpack.c.bf16 %v2295_v19, %v2293_v17  ;;  %v1033_v11 = vld [vmem:[%s8909_s18 + $0x15a0] sm:$0xff]  ;;  %v1040_v17 = vld [vmem:[%s8909_s18 + $0x15d8] sm:$0xff] }
 0x309   : > { %v2320_v19 = vld [vmem:[%s8909_s18 + $0x3dd8] sm:$0xff]  ;;  %v2334_v4 = vld [vmem:[%s8909_s18 + $0x3e48] sm:$0xff] }
 0x30a   : > { %6508 = vmatpush1.bf16.msra.mxu1 %v6507_v28  ;;  %v1019_v28 = vld [vmem:[%s8909_s18 + $0x1530] sm:$0xff]  ;;  %v2336_v5 = vld [vmem:[%s8909_s18 + $0x3e58] sm:$0xff] }
 0x30b   : > { %7788 = vmatpush1.bf16.msra.mxu0 %v7787_v29  ;;  %6510 = vmatprep.subr.bf16.mxu1 %v6509_v30  ;;  %v2297_v29 = vld [vmem:[%s8909_s18 + $0x3d20] sm:$0xff]  ;;  %v7809_v30 = vpack.c.bf16 %v2300_v23, %v2298_v22  ;;  %v6531_v36 = vpack.c.bf16 %v1019_v28, %v1017_v27  ;;  %v6549_v22 = vpack.c.bf16 %v1040_v17, %v1038_v16  ;;  %v2319_v27 = vld [vmem:[%s8909_s18 + $0x3dd0] sm:$0xff]  ;;  %v1042_v28 = vld [vmem:[%s8909_s18 + $0x15e8] sm:$0xff] }
 0x30c   : > { %7790 = vmatprep.subr.bf16.mxu0 %v7789_v34  ;;  %v2302_v34 = vld [vmem:[%s8909_s18 + $0x3d48] sm:$0xff]  ;;  %v7811_v37 = vpack.c.bf16 %v2299_v31, %v2297_v29  ;;  %v1037_v23 = vld [vmem:[%s8909_s18 + $0x15c0] sm:$0xff]  ;;  %v1044_v29 = vld [vmem:[%s8909_s18 + $0x15f8] sm:$0xff] }
 0x30d   : > { %v2324_v31 = vld [vmem:[%s8909_s18 + $0x3df8] sm:$0xff]  ;;  %v1058_v16 = vld [vmem:[%s8909_s18 + $0x1668] sm:$0xff] }
 0x30e   : > { %6512 = vmatpush1.bf16.msra.mxu1 %v6511_v40  ;;  %v1023_v40 = vld [vmem:[%s8909_s18 + $0x1550] sm:$0xff]  ;;  %v1060_v17 = vld [vmem:[%s8909_s18 + $0x1678] sm:$0xff] }
 0x30f   : > { %7792 = vmatpush1.bf16.msra.mxu0 %v7791_v41  ;;  %6514 = vmatprep.subr.bf16.mxu1 %v6513_v42  ;;  %v2301_v41 = vld [vmem:[%s8909_s18 + $0x3d40] sm:$0xff]  ;;  %v7813_v42 = vpack.c.bf16 %v2304_v35, %v2302_v34  ;;  %v6535_v48 = vpack.c.bf16 %v1023_v40, %v1021_v39  ;;  %v6553_v34 = vpack.c.bf16 %v1044_v29, %v1042_v28  ;;  %v2323_v39 = vld [vmem:[%s8909_s18 + $0x3df0] sm:$0xff]  ;;  %v1046_v40 = vld [vmem:[%s8909_s18 + $0x1608] sm:$0xff] }
 0x310   : > { %7794 = vmatprep.subr.bf16.mxu0 %v7793_v46  ;;  %v2306_v46 = vld [vmem:[%s8909_s18 + $0x3d68] sm:$0xff]  ;;  %v7815_v49 = vpack.c.bf16 %v2303_v43, %v2301_v41  ;;  %v1041_v35 = vld [vmem:[%s8909_s18 + $0x15e0] sm:$0xff]  ;;  %v1048_v41 = vld [vmem:[%s8909_s18 + $0x1618] sm:$0xff] }
 0x311   : > { %v2328_v43 = vld [vmem:[%s8909_s18 + $0x3e18] sm:$0xff]  ;;  %v1062_v28 = vld [vmem:[%s8909_s18 + $0x1688] sm:$0xff] }
 0x312   : > { %6516 = vmatpush1.bf16.msra.mxu1 %v6515_v52  ;;  %v1027_v52 = vld [vmem:[%s8909_s18 + $0x1570] sm:$0xff]  ;;  %v1064_v29 = vld [vmem:[%s8909_s18 + $0x1698] sm:$0xff] }
 0x313   : > { %7796 = vmatpush1.bf16.msra.mxu0 %v7795_v53  ;;  %6518 = vmatprep.subr.bf16.mxu1 %v6517_v54  ;;  %v2305_v53 = vld [vmem:[%s8909_s18 + $0x3d60] sm:$0xff]  ;;  %v7817_v54 = vpack.c.bf16 %v2308_v47, %v2306_v46  ;;  %v6539_v60 = vpack.c.bf16 %v1027_v52, %v1025_v51  ;;  %v6557_v46 = vpack.c.bf16 %v1048_v41, %v1046_v40  ;;  %v2327_v51 = vld [vmem:[%s8909_s18 + $0x3e10] sm:$0xff]  ;;  %v1050_v52 = vld [vmem:[%s8909_s18 + $0x1628] sm:$0xff] }
 0x314   : > { %7798 = vmatprep.subr.bf16.mxu0 %v7797_v58  ;;  %v2310_v58 = vld [vmem:[%s8909_s18 + $0x3d88] sm:$0xff]  ;;  %v7819_v61 = vpack.c.bf16 %v2307_v55, %v2305_v53  ;;  %v1045_v47 = vld [vmem:[%s8909_s18 + $0x1600] sm:$0xff]  ;;  %v1052_v53 = vld [vmem:[%s8909_s18 + $0x1638] sm:$0xff] }
 0x315   : > { %v2332_v55 = vld [vmem:[%s8909_s18 + $0x3e38] sm:$0xff]  ;;  %v1066_v40 = vld [vmem:[%s8909_s18 + $0x16a8] sm:$0xff] }
 0x316   : > { %6520 = vmatpush1.bf16.msra.mxu1 %v6519_v0  ;;  %v1031_v0 = vld [vmem:[%s8909_s18 + $0x1590] sm:$0xff]  ;;  %v1068_v41 = vld [vmem:[%s8909_s18 + $0x16b8] sm:$0xff] }
 0x317   : > { %7800 = vmatpush1.bf16.msra.mxu0 %v7799_v1  ;;  %6522 = vmatprep.subr.bf16.mxu1 %v6521_v2  ;;  %v2309_v1 = vld [vmem:[%s8909_s18 + $0x3d80] sm:$0xff]  ;;  %v7821_v2 = vpack.c.bf16 %v2312_v59, %v2310_v58  ;;  %v6543_v8 = vpack.c.bf16 %v1031_v0, %v1029_v63  ;;  %v322_v58 = vld [vmem:[#allocation2 + $0x1e0] sm:$0xff] }
 0x318   : > { %7802 = vmatprep.subr.bf16.mxu0 %v7801_v6  ;;  %v2314_v6 = vld [vmem:[%s8909_s18 + $0x3da8] sm:$0xff]  ;;  %v7823_v9 = vpack.c.bf16 %v2311_v3, %v2309_v1  ;;  %v2329_v63 = vld [vmem:[%s8909_s18 + $0x3e20] sm:$0xff]  ;;  %v2331_v1 = vld [vmem:[%s8909_s18 + $0x3e30] sm:$0xff] }
 0x319   : > { %v1056_v3 = vld [vmem:[%s8909_s18 + $0x1658] sm:$0xff] }
 0x31a   : > { %6524 = vmatpush1.bf16.msra.mxu1 %v6523_v12  ;;  %v1035_v12 = vld [vmem:[%s8909_s18 + $0x15b0] sm:$0xff] }
 0x31b   : > { %7804 = vmatpush1.bf16.msra.mxu0 %v7803_v13  ;;  %6526 = vmatprep.subr.bf16.mxu1 %v6525_v14  ;;  %v2313_v13 = vld [vmem:[%s8909_s18 + $0x3da0] sm:$0xff]  ;;  %v7825_v14 = vpack.c.bf16 %v2316_v7, %v2314_v6  ;;  %v6547_v20 = vpack.c.bf16 %v1035_v12, %v1033_v11  ;;  %v1055_v12 = vld [vmem:[%s8909_s18 + $0x1650] sm:$0xff] }
 0x31c   : > { %7806 = vmatprep.subr.bf16.mxu0 %v7805_v18  ;;  %v2318_v18 = vld [vmem:[%s8909_s18 + $0x3dc8] sm:$0xff]  ;;  %v7827_v21 = vpack.c.bf16 %v2315_v15, %v2313_v13  ;;  %v285_v6 = vld [vmem:[#allocation2 + $0xb8] sm:$0xff]  ;;  %v2335_v15 = vld [vmem:[%s8909_s18 + $0x3e50] sm:$0xff] }
 0x31d   : > { %v1053_v11 = vld [vmem:[%s8909_s18 + $0x1640] sm:$0xff] }
 0x31e   : > { %6528 = vmatpush1.bf16.msra.mxu1 %v6527_v24  ;;  %v1039_v24 = vld [vmem:[%s8909_s18 + $0x15d0] sm:$0xff]  ;;  %v2333_v13 = vld [vmem:[%s8909_s18 + $0x3e40] sm:$0xff] }
 0x31f   : > { %7808 = vmatpush1.bf16.msra.mxu0 %v7807_v25  ;;  %6530 = vmatprep.subr.bf16.mxu1 %v6529_v26  ;;  %v2317_v25 = vld [vmem:[%s8909_s18 + $0x3dc0] sm:$0xff]  ;;  %v7829_v26 = vpack.c.bf16 %v2320_v19, %v2318_v18  ;;  %v6551_v32 = vpack.c.bf16 %v1039_v24, %v1037_v23  ;;  %v2338_v18 = vld [vmem:[%s8909_s18 + $0x3e68] sm:$0xff]  ;;  %v2340_v19 = vld [vmem:[%s8909_s18 + $0x3e78] sm:$0xff] }
 0x320   : > { %7810 = vmatprep.subr.bf16.mxu0 %v7809_v30  ;;  %v2322_v30 = vld [vmem:[%s8909_s18 + $0x3de8] sm:$0xff]  ;;  %v7831_v33 = vpack.c.bf16 %v2319_v27, %v2317_v25  ;;  %v1057_v23 = vld [vmem:[%s8909_s18 + $0x1660] sm:$0xff]  ;;  %v1059_v24 = vld [vmem:[%s8909_s18 + $0x1670] sm:$0xff] }
 0x321   : > { %v2337_v25 = vld [vmem:[%s8909_s18 + $0x3e60] sm:$0xff]  ;;  %v2339_v27 = vld [vmem:[%s8909_s18 + $0x3e70] sm:$0xff] }
 0x322   : > { %6532 = vmatpush1.bf16.msra.mxu1 %v6531_v36  ;;  %v1043_v36 = vld [vmem:[%s8909_s18 + $0x15f0] sm:$0xff] }
 0x323   : > { %7812 = vmatpush1.bf16.msra.mxu0 %v7811_v37  ;;  %6534 = vmatprep.subr.bf16.mxu1 %v6533_v38  ;;  %v2321_v37 = vld [vmem:[%s8909_s18 + $0x3de0] sm:$0xff]  ;;  %v7833_v38 = vpack.c.bf16 %v2324_v31, %v2322_v30  ;;  %v6555_v44 = vpack.c.bf16 %v1043_v36, %v1041_v35  ;;  %v2342_v30 = vld [vmem:[%s8909_s18 + $0x3e88] sm:$0xff]  ;;  %v2344_v31 = vld [vmem:[%s8909_s18 + $0x3e98] sm:$0xff] }
 0x324   : > { %7814 = vmatprep.subr.bf16.mxu0 %v7813_v42  ;;  %v2326_v42 = vld [vmem:[%s8909_s18 + $0x3e08] sm:$0xff]  ;;  %v7835_v45 = vpack.c.bf16 %v2323_v39, %v2321_v37  ;;  %v1061_v35 = vld [vmem:[%s8909_s18 + $0x1680] sm:$0xff]  ;;  %v1063_v36 = vld [vmem:[%s8909_s18 + $0x1690] sm:$0xff] }
 0x325   : > { %v2341_v37 = vld [vmem:[%s8909_s18 + $0x3e80] sm:$0xff]  ;;  %v2343_v39 = vld [vmem:[%s8909_s18 + $0x3e90] sm:$0xff] }
 0x326   : > { %6536 = vmatpush1.bf16.msra.mxu1 %v6535_v48  ;;  %v1047_v48 = vld [vmem:[%s8909_s18 + $0x1610] sm:$0xff] }
 0x327   : > { %7816 = vmatpush1.bf16.msra.mxu0 %v7815_v49  ;;  %6538 = vmatprep.subr.bf16.mxu1 %v6537_v50  ;;  %v2325_v49 = vld [vmem:[%s8909_s18 + $0x3e00] sm:$0xff]  ;;  %v7837_v50 = vpack.c.bf16 %v2328_v43, %v2326_v42  ;;  %v6559_v57 = vpack.c.bf16 %v1047_v48, %v1045_v47  ;;  %v2346_v42 = vld [vmem:[%s8909_s18 + $0x3ea8] sm:$0xff]  ;;  %v2348_v43 = vld [vmem:[%s8909_s18 + $0x3eb8] sm:$0xff] }
 0x328   : > { %7818 = vmatprep.subr.bf16.mxu0 %v7817_v54  ;;  %v2330_v54 = vld [vmem:[%s8909_s18 + $0x3e28] sm:$0xff]  ;;  %v7839_v59 = vpack.c.bf16 %v2327_v51, %v2325_v49  ;;  %v1065_v47 = vld [vmem:[%s8909_s18 + $0x16a0] sm:$0xff]  ;;  %v1067_v48 = vld [vmem:[%s8909_s18 + $0x16b0] sm:$0xff] }
 0x329   : > { %v7841_v0 = vpack.c.bf16 %v2332_v55, %v2330_v54  ;;  %v2345_v49 = vld [vmem:[%s8909_s18 + $0x3ea0] sm:$0xff]  ;;  %v2347_v51 = vld [vmem:[%s8909_s18 + $0x3eb0] sm:$0xff]  ;;  %v2350_v54 = vld [vmem:[%s8909_s18 + $0x3ec8] sm:$0xff] }
 0x32a   : > { %6540 = vmatpush1.bf16.msra.mxu1 %v6539_v60  ;;  %v6561_v60 = vpack.c.bf16 %v1052_v53, %v1050_v52  ;;  %v1070_v52 = vld [vmem:[%s8909_s18 + $0x16c8] sm:$0xff]  ;;  %v1072_v53 = vld [vmem:[%s8909_s18 + $0x16d8] sm:$0xff] }
 0x32b   : > { %7820 = vmatpush1.bf16.msra.mxu0 %v7819_v61  ;;  %6542 = vmatprep.subr.bf16.mxu1 %v6541_v62  ;;  %v1049_v61 = vld [vmem:[%s8909_s18 + $0x1620] sm:$0xff]  ;;  %v1051_v62 = vld [vmem:[%s8909_s18 + $0x1630] sm:$0xff]  ;;  %v2352_v55 = vld [vmem:[%s8909_s18 + $0x3ed8] sm:$0xff] }
 0x32c   : > { %7822 = vmatprep.subr.bf16.mxu0 %v7821_v2  ;;  %v1054_v2 = vld [vmem:[%s8909_s18 + $0x1648] sm:$0xff]  ;;  %v6563_v7 = vpack.c.bf16 %v1051_v62, %v1049_v61  ;;  %v2349_v61 = vld [vmem:[%s8909_s18 + $0x3ec0] sm:$0xff]  ;;  %v7861_v62 = vpack.c.bf16 %v2352_v55, %v2350_v54 }
 0x32d   : > { %v1089_v55 = vld [vmem:[%s8909_s18 + $0x1760] sm:$0xff] }
 0x32e   : > { %6544 = vmatpush1.bf16.msra.mxu1 %v6543_v8  ;;  %v325_v8 = vld [vmem:[#allocation2 + $0x1f8] sm:$0xff] }
 0x32f   : > { %7824 = vmatpush1.bf16.msra.mxu0 %v7823_v9  ;;  %6546 = vmatprep.subr.bf16.mxu1 %v6545_v10  ;;  %v7843_v9 = vpack.c.bf16 %v2331_v1, %v2329_v63  ;;  %v6565_v10 = vpack.c.bf16 %v1056_v3, %v1054_v2  ;;  %v2351_v63 = vld [vmem:[%s8909_s18 + $0x3ed0] sm:$0xff]  ;;  %v1076_v1 = vld [vmem:[%s8909_s18 + $0x16f8] sm:$0xff]  ;;  %v2354_v2 = vld [vmem:[%s8909_s18 + $0x3ee8] sm:$0xff] }
 0x330   : > { %7826 = vmatprep.subr.bf16.mxu0 %v7825_v14  ;;  %v7845_v14 = vpack.c.bf16 %v2336_v5, %v2334_v4  ;;  %v2356_v3 = vld [vmem:[%s8909_s18 + $0x3ef8] sm:$0xff]  ;;  %v7863_v5 = vpack.c.bf16 %v2351_v63, %v2349_v61 }
 0x331   : > { %v1096_v61 = vld [vmem:[%s8909_s18 + $0x1798] sm:$0xff] }
 0x332   : > { %6548 = vmatpush1.bf16.msra.mxu1 %v6547_v20  ;;  %v6567_v20 = vpack.c.bf16 %v1055_v12, %v1053_v11  ;;  %v2355_v11 = vld [vmem:[%s8909_s18 + $0x3ef0] sm:$0xff]  ;;  %v1078_v12 = vld [vmem:[%s8909_s18 + $0x1708] sm:$0xff]  ;;  %v2376_v63 = vld [vmem:[%s8909_s18 + $0x3f98] sm:$0xff] }
 0x333   : > { %7828 = vmatpush1.bf16.msra.mxu0 %v7827_v21  ;;  %6550 = vmatprep.subr.bf16.mxu1 %v6549_v22  ;;  %v7847_v21 = vpack.c.bf16 %v2335_v15, %v2333_v13  ;;  %v6569_v22 = vpack.c.bf16 %v1060_v17, %v1058_v16  ;;  %v1080_v13 = vld [vmem:[%s8909_s18 + $0x1718] sm:$0xff] }
 0x334   : > { %7830 = vmatprep.subr.bf16.mxu0 %v7829_v26  ;;  %v7849_v26 = vpack.c.bf16 %v2340_v19, %v2338_v18  ;;  %v2360_v15 = vld [vmem:[%s8909_s18 + $0x3f18] sm:$0xff]  ;;  %v6589_v18 = vpack.c.bf16 %v1080_v13, %v1078_v12  ;;  %v1077_v19 = vld [vmem:[%s8909_s18 + $0x1700] sm:$0xff] }
 0x336   : > { %6552 = vmatpush1.bf16.msra.mxu1 %v6551_v32  ;;  %v6571_v32 = vpack.c.bf16 %v1059_v24, %v1057_v23  ;;  %v2359_v23 = vld [vmem:[%s8909_s18 + $0x3f10] sm:$0xff]  ;;  %v1082_v24 = vld [vmem:[%s8909_s18 + $0x1728] sm:$0xff] }
 0x337   : > { %7832 = vmatpush1.bf16.msra.mxu0 %v7831_v33  ;;  %6554 = vmatprep.subr.bf16.mxu1 %v6553_v34  ;;  %v7851_v33 = vpack.c.bf16 %v2339_v27, %v2337_v25  ;;  %v6573_v34 = vpack.c.bf16 %v1064_v29, %v1062_v28  ;;  %v1084_v25 = vld [vmem:[%s8909_s18 + $0x1738] sm:$0xff] }
 0x338   : > { %7834 = vmatprep.subr.bf16.mxu0 %v7833_v38  ;;  %v7853_v38 = vpack.c.bf16 %v2344_v31, %v2342_v30  ;;  %v2364_v27 = vld [vmem:[%s8909_s18 + $0x3f38] sm:$0xff]  ;;  %v6593_v30 = vpack.c.bf16 %v1084_v25, %v1082_v24  ;;  %v1081_v31 = vld [vmem:[%s8909_s18 + $0x1720] sm:$0xff] }
 0x33a   : > { %6556 = vmatpush1.bf16.msra.mxu1 %v6555_v44  ;;  %v6575_v44 = vpack.c.bf16 %v1063_v36, %v1061_v35  ;;  %v2363_v35 = vld [vmem:[%s8909_s18 + $0x3f30] sm:$0xff]  ;;  %v1086_v36 = vld [vmem:[%s8909_s18 + $0x1748] sm:$0xff] }
 0x33b   : > { %7836 = vmatpush1.bf16.msra.mxu0 %v7835_v45  ;;  %6558 = vmatprep.subr.bf16.mxu1 %v6557_v46  ;;  %v7855_v45 = vpack.c.bf16 %v2343_v39, %v2341_v37  ;;  %v6577_v46 = vpack.c.bf16 %v1068_v41, %v1066_v40  ;;  %v1088_v37 = vld [vmem:[%s8909_s18 + $0x1758] sm:$0xff] }
 0x33c   : > { %7838 = vmatprep.subr.bf16.mxu0 %v7837_v50  ;;  %v7857_v50 = vpack.c.bf16 %v2348_v43, %v2346_v42  ;;  %v2368_v39 = vld [vmem:[%s8909_s18 + $0x3f58] sm:$0xff]  ;;  %v6597_v42 = vpack.c.bf16 %v1088_v37, %v1086_v36  ;;  %v1085_v43 = vld [vmem:[%s8909_s18 + $0x1740] sm:$0xff] }
 0x33d   : > { %3620 = vmatmul.mubr.f32.vlgmr.msra.gmra.mrb[0].mxu1 %v282_v56  ;;  %v6579_v56 = vpack.c.bf16 %v1067_v48, %v1065_v47  ;;  %v2367_v47 = vld [vmem:[%s8909_s18 + $0x3f50] sm:$0xff]  ;;  %v1090_v48 = vld [vmem:[%s8909_s18 + $0x1768] sm:$0xff] }
 0x33e   : > { %6560 = vmatpush1.bf16.msra.mxu1 %v6559_v57  ;;  %5040 = vmatmul.mubr.f32.vlgmr.msra.gmra.mrb[0].mxu0 %v322_v58  ;;  %v7859_v57 = vpack.c.bf16 %v2347_v51, %v2345_v49  ;;  %v6581_v58 = vpack.c.bf16 %v1072_v53, %v1070_v52  ;;  %v1092_v49 = vld [vmem:[%s8909_s18 + $0x1778] sm:$0xff] }
 0x33f   : > { %7840 = vmatpush1.bf16.msra.mxu0 %v7839_v59  ;;  %6562 = vmatprep.subr.bf16.mxu1 %v6561_v60  ;;  %v1069_v59 = vld [vmem:[%s8909_s18 + $0x16c0] sm:$0xff]  ;;  %v1071_v60 = vld [vmem:[%s8909_s18 + $0x16d0] sm:$0xff]  ;;  %v2372_v51 = vld [vmem:[%s8909_s18 + $0x3f78] sm:$0xff]  ;;  %v6601_v54 = vpack.c.bf16 %v1092_v49, %v1090_v48 }
 0x340   : > { %7842 = vmatprep.subr.bf16.mxu0 %v7841_v0  ;;  %3690 = vmatprep.mubr.f32.mxu1 %v285_v6  ;;  %v1074_v0 = vld [vmem:[%s8909_s18 + $0x16e8] sm:$0xff]  ;;  %v6583_v4 = vpack.c.bf16 %v1071_v60, %v1069_v59  ;;  %v2371_v59 = vld [vmem:[%s8909_s18 + $0x3f70] sm:$0xff] }
 0x341   : > { %5110 = vmatprep.mubr.f32.mxu0 %v325_v8  ;;  %v6585_v6 = vpack.c.bf16 %v1076_v1, %v1074_v0  ;;  %v1075_v8 = vld [vmem:[%s8909_s18 + $0x16f0] sm:$0xff]  ;;  %v1094_v60 = vld [vmem:[%s8909_s18 + $0x1788] sm:$0xff] }
 0x342   : > { %6564 = vmatpush1.bf16.msra.mxu1 %v6563_v7  ;;  %v1073_v7 = vld [vmem:[%s8909_s18 + $0x16e0] sm:$0xff] }
 0x343   : > { %7844 = vmatpush1.bf16.msra.mxu0 %v7843_v9  ;;  %6566 = vmatprep.subr.bf16.mxu1 %v6565_v10  ;;  %v2353_v9 = vld [vmem:[%s8909_s18 + $0x3ee0] sm:$0xff]  ;;  %v7865_v10 = vpack.c.bf16 %v2356_v3, %v2354_v2  ;;  %v6587_v16 = vpack.c.bf16 %v1075_v8, %v1073_v7  ;;  %v6605_v2 = vpack.c.bf16 %v1096_v61, %v1094_v60  ;;  %v2375_v7 = vld [vmem:[%s8909_s18 + $0x3f90] sm:$0xff]  ;;  %v1098_v8 = vld [vmem:[%s8909_s18 + $0x17a8] sm:$0xff] }
 0x344   : > { %7846 = vmatprep.subr.bf16.mxu0 %v7845_v14  ;;  %v2358_v14 = vld [vmem:[%s8909_s18 + $0x3f08] sm:$0xff]  ;;  %v7867_v17 = vpack.c.bf16 %v2355_v11, %v2353_v9  ;;  %v1093_v3 = vld [vmem:[%s8909_s18 + $0x1780] sm:$0xff]  ;;  %v1100_v9 = vld [vmem:[%s8909_s18 + $0x17b8] sm:$0xff] }
 0x345   : > { %v2380_v11 = vld [vmem:[%s8909_s18 + $0x3fb8] sm:$0xff] }
 0x346   : > { %6568 = vmatpush1.bf16.msra.mxu1 %v6567_v20  ;;  %v1079_v20 = vld [vmem:[%s8909_s18 + $0x1710] sm:$0xff]  ;;  %v284_v60 = vld [vmem:[#allocation2 + $0xb0] sm:$0xff] }
 0x347   : > { %7848 = vmatpush1.bf16.msra.mxu0 %v7847_v21  ;;  %6570 = vmatprep.subr.bf16.mxu1 %v6569_v22  ;;  %v2357_v21 = vld [vmem:[%s8909_s18 + $0x3f00] sm:$0xff]  ;;  %v7869_v22 = vpack.c.bf16 %v2360_v15, %v2358_v14  ;;  %v6591_v28 = vpack.c.bf16 %v1079_v20, %v1077_v19  ;;  %v6609_v14 = vpack.c.bf16 %v1100_v9, %v1098_v8  ;;  %v2379_v19 = vld [vmem:[%s8909_s18 + $0x3fb0] sm:$0xff]  ;;  %v1102_v20 = vld [vmem:[%s8909_s18 + $0x17c8] sm:$0xff] }
 0x348   : > { %7850 = vmatprep.subr.bf16.mxu0 %v7849_v26  ;;  %v2362_v26 = vld [vmem:[%s8909_s18 + $0x3f28] sm:$0xff]  ;;  %v7871_v29 = vpack.c.bf16 %v2359_v23, %v2357_v21  ;;  %v1097_v15 = vld [vmem:[%s8909_s18 + $0x17a0] sm:$0xff]  ;;  %v1104_v21 = vld [vmem:[%s8909_s18 + $0x17d8] sm:$0xff] }
 0x349   : > { %v2384_v23 = vld [vmem:[%s8909_s18 + $0x3fd8] sm:$0xff]  ;;  %v2398_v8 = vld [vmem:[%s8909_s18 + $0x4048] sm:$0xff] }
 0x34a   : > { %6572 = vmatpush1.bf16.msra.mxu1 %v6571_v32  ;;  %v1083_v32 = vld [vmem:[%s8909_s18 + $0x1730] sm:$0xff]  ;;  %v2400_v9 = vld [vmem:[%s8909_s18 + $0x4058] sm:$0xff] }
 0x34b   : > { %7852 = vmatpush1.bf16.msra.mxu0 %v7851_v33  ;;  %6574 = vmatprep.subr.bf16.mxu1 %v6573_v34  ;;  %v2361_v33 = vld [vmem:[%s8909_s18 + $0x3f20] sm:$0xff]  ;;  %v7873_v34 = vpack.c.bf16 %v2364_v27, %v2362_v26  ;;  %v6595_v40 = vpack.c.bf16 %v1083_v32, %v1081_v31  ;;  %v6613_v26 = vpack.c.bf16 %v1104_v21, %v1102_v20  ;;  %v2383_v31 = vld [vmem:[%s8909_s18 + $0x3fd0] sm:$0xff]  ;;  %v1106_v32 = vld [vmem:[%s8909_s18 + $0x17e8] sm:$0xff] }
 0x34c   : > { %7854 = vmatprep.subr.bf16.mxu0 %v7853_v38  ;;  %v2366_v38 = vld [vmem:[%s8909_s18 + $0x3f48] sm:$0xff]  ;;  %v7875_v41 = vpack.c.bf16 %v2363_v35, %v2361_v33  ;;  %v1101_v27 = vld [vmem:[%s8909_s18 + $0x17c0] sm:$0xff]  ;;  %v1108_v33 = vld [vmem:[%s8909_s18 + $0x17f8] sm:$0xff] }
 0x34d   : > { %v2388_v35 = vld [vmem:[%s8909_s18 + $0x3ff8] sm:$0xff]  ;;  %v1122_v20 = vld [vmem:[%s8909_s18 + $0x1868] sm:$0xff] }
 0x34e   : > { %6576 = vmatpush1.bf16.msra.mxu1 %v6575_v44  ;;  %v1087_v44 = vld [vmem:[%s8909_s18 + $0x1750] sm:$0xff]  ;;  %v1124_v21 = vld [vmem:[%s8909_s18 + $0x1878] sm:$0xff] }
 0x34f   : > { %7856 = vmatpush1.bf16.msra.mxu0 %v7855_v45  ;;  %6578 = vmatprep.subr.bf16.mxu1 %v6577_v46  ;;  %v2365_v45 = vld [vmem:[%s8909_s18 + $0x3f40] sm:$0xff]  ;;  %v7877_v46 = vpack.c.bf16 %v2368_v39, %v2366_v38  ;;  %v6599_v52 = vpack.c.bf16 %v1087_v44, %v1085_v43  ;;  %v6617_v38 = vpack.c.bf16 %v1108_v33, %v1106_v32  ;;  %v2387_v43 = vld [vmem:[%s8909_s18 + $0x3ff0] sm:$0xff]  ;;  %v1110_v44 = vld [vmem:[%s8909_s18 + $0x1808] sm:$0xff] }
 0x350   : > { %7858 = vmatprep.subr.bf16.mxu0 %v7857_v50  ;;  %v2370_v50 = vld [vmem:[%s8909_s18 + $0x3f68] sm:$0xff]  ;;  %v7879_v53 = vpack.c.bf16 %v2367_v47, %v2365_v45  ;;  %v1105_v39 = vld [vmem:[%s8909_s18 + $0x17e0] sm:$0xff]  ;;  %v1112_v45 = vld [vmem:[%s8909_s18 + $0x1818] sm:$0xff] }
 0x351   : > { %v2392_v47 = vld [vmem:[%s8909_s18 + $0x4018] sm:$0xff]  ;;  %v1126_v32 = vld [vmem:[%s8909_s18 + $0x1888] sm:$0xff] }
 0x352   : > { %6580 = vmatpush1.bf16.msra.mxu1 %v6579_v56  ;;  %v1091_v56 = vld [vmem:[%s8909_s18 + $0x1770] sm:$0xff]  ;;  %v1128_v33 = vld [vmem:[%s8909_s18 + $0x1898] sm:$0xff] }
 0x353   : > { %7860 = vmatpush1.bf16.msra.mxu0 %v7859_v57  ;;  %6582 = vmatprep.subr.bf16.mxu1 %v6581_v58  ;;  %v2369_v57 = vld [vmem:[%s8909_s18 + $0x3f60] sm:$0xff]  ;;  %v7881_v58 = vpack.c.bf16 %v2372_v51, %v2370_v50  ;;  %v6603_v0 = vpack.c.bf16 %v1091_v56, %v1089_v55  ;;  %v6621_v50 = vpack.c.bf16 %v1112_v45, %v1110_v44  ;;  %v2391_v55 = vld [vmem:[%s8909_s18 + $0x4010] sm:$0xff]  ;;  %v1114_v56 = vld [vmem:[%s8909_s18 + $0x1828] sm:$0xff] }
 0x354   : > { %7862 = vmatprep.subr.bf16.mxu0 %v7861_v62  ;;  %v2374_v62 = vld [vmem:[%s8909_s18 + $0x3f88] sm:$0xff]  ;;  %v7883_v1 = vpack.c.bf16 %v2371_v59, %v2369_v57  ;;  %v1109_v51 = vld [vmem:[%s8909_s18 + $0x1800] sm:$0xff]  ;;  %v1116_v57 = vld [vmem:[%s8909_s18 + $0x1838] sm:$0xff] }
 0x355   : > { %v2396_v59 = vld [vmem:[%s8909_s18 + $0x4038] sm:$0xff]  ;;  %v1130_v44 = vld [vmem:[%s8909_s18 + $0x18a8] sm:$0xff] }
 0x356   : > { %6584 = vmatpush1.bf16.msra.mxu1 %v6583_v4  ;;  %v1095_v4 = vld [vmem:[%s8909_s18 + $0x1790] sm:$0xff]  ;;  %v1132_v45 = vld [vmem:[%s8909_s18 + $0x18b8] sm:$0xff] }
 0x357   : > { %7864 = vmatpush1.bf16.msra.mxu0 %v7863_v5  ;;  %6586 = vmatprep.subr.bf16.mxu1 %v6585_v6  ;;  %v2373_v5 = vld [vmem:[%s8909_s18 + $0x3f80] sm:$0xff]  ;;  %v7885_v6 = vpack.c.bf16 %v2376_v63, %v2374_v62  ;;  %v6607_v12 = vpack.c.bf16 %v1095_v4, %v1093_v3  ;;  %v324_v62 = vld [vmem:[#allocation2 + $0x1f0] sm:$0xff] }
 0x358   : > { %7866 = vmatprep.subr.bf16.mxu0 %v7865_v10  ;;  %v2378_v10 = vld [vmem:[%s8909_s18 + $0x3fa8] sm:$0xff]  ;;  %v7887_v13 = vpack.c.bf16 %v2375_v7, %v2373_v5  ;;  %v2393_v3 = vld [vmem:[%s8909_s18 + $0x4020] sm:$0xff]  ;;  %v2395_v5 = vld [vmem:[%s8909_s18 + $0x4030] sm:$0xff] }
 0x359   : > { %v1120_v7 = vld [vmem:[%s8909_s18 + $0x1858] sm:$0xff] }
 0x35a   : > { %6588 = vmatpush1.bf16.msra.mxu1 %v6587_v16  ;;  %v1099_v16 = vld [vmem:[%s8909_s18 + $0x17b0] sm:$0xff] }
 0x35b   : > { %7868 = vmatpush1.bf16.msra.mxu0 %v7867_v17  ;;  %6590 = vmatprep.subr.bf16.mxu1 %v6589_v18  ;;  %v2377_v17 = vld [vmem:[%s8909_s18 + $0x3fa0] sm:$0xff]  ;;  %v7889_v18 = vpack.c.bf16 %v2380_v11, %v2378_v10  ;;  %v6611_v24 = vpack.c.bf16 %v1099_v16, %v1097_v15  ;;  %v287_v10 = vld [vmem:[#allocation2 + $0xc8] sm:$0xff] }
 0x35c   : > { %7870 = vmatprep.subr.bf16.mxu0 %v7869_v22  ;;  %v2382_v22 = vld [vmem:[%s8909_s18 + $0x3fc8] sm:$0xff]  ;;  %v7891_v25 = vpack.c.bf16 %v2379_v19, %v2377_v17  ;;  %v1117_v15 = vld [vmem:[%s8909_s18 + $0x1840] sm:$0xff]  ;;  %v1119_v16 = vld [vmem:[%s8909_s18 + $0x1850] sm:$0xff] }
 0x35d   : > { %v2397_v17 = vld [vmem:[%s8909_s18 + $0x4040] sm:$0xff]  ;;  %v2399_v19 = vld [vmem:[%s8909_s18 + $0x4050] sm:$0xff] }
 0x35e   : > { %6592 = vmatpush1.bf16.msra.mxu1 %v6591_v28  ;;  %v1103_v28 = vld [vmem:[%s8909_s18 + $0x17d0] sm:$0xff] }
 0x35f   : > { %7872 = vmatpush1.bf16.msra.mxu0 %v7871_v29  ;;  %6594 = vmatprep.subr.bf16.mxu1 %v6593_v30  ;;  %v2381_v29 = vld [vmem:[%s8909_s18 + $0x3fc0] sm:$0xff]  ;;  %v7893_v30 = vpack.c.bf16 %v2384_v23, %v2382_v22  ;;  %v6615_v36 = vpack.c.bf16 %v1103_v28, %v1101_v27  ;;  %v2402_v22 = vld [vmem:[%s8909_s18 + $0x4068] sm:$0xff]  ;;  %v2404_v23 = vld [vmem:[%s8909_s18 + $0x4078] sm:$0xff] }
 0x360   : > { %7874 = vmatprep.subr.bf16.mxu0 %v7873_v34  ;;  %v2386_v34 = vld [vmem:[%s8909_s18 + $0x3fe8] sm:$0xff]  ;;  %v7895_v37 = vpack.c.bf16 %v2383_v31, %v2381_v29  ;;  %v1121_v27 = vld [vmem:[%s8909_s18 + $0x1860] sm:$0xff]  ;;  %v1123_v28 = vld [vmem:[%s8909_s18 + $0x1870] sm:$0xff] }
 0x361   : > { %v2401_v29 = vld [vmem:[%s8909_s18 + $0x4060] sm:$0xff]  ;;  %v2403_v31 = vld [vmem:[%s8909_s18 + $0x4070] sm:$0xff] }
 0x362   : > { %6596 = vmatpush1.bf16.msra.mxu1 %v6595_v40  ;;  %v1107_v40 = vld [vmem:[%s8909_s18 + $0x17f0] sm:$0xff] }
 0x363   : > { %7876 = vmatpush1.bf16.msra.mxu0 %v7875_v41  ;;  %6598 = vmatprep.subr.bf16.mxu1 %v6597_v42  ;;  %v2385_v41 = vld [vmem:[%s8909_s18 + $0x3fe0] sm:$0xff]  ;;  %v7897_v42 = vpack.c.bf16 %v2388_v35, %v2386_v34  ;;  %v6619_v48 = vpack.c.bf16 %v1107_v40, %v1105_v39  ;;  %v2406_v34 = vld [vmem:[%s8909_s18 + $0x4088] sm:$0xff]  ;;  %v2408_v35 = vld [vmem:[%s8909_s18 + $0x4098] sm:$0xff] }
 0x364   : > { %7878 = vmatprep.subr.bf16.mxu0 %v7877_v46  ;;  %v2390_v46 = vld [vmem:[%s8909_s18 + $0x4008] sm:$0xff]  ;;  %v7899_v49 = vpack.c.bf16 %v2387_v43, %v2385_v41  ;;  %v1125_v39 = vld [vmem:[%s8909_s18 + $0x1880] sm:$0xff]  ;;  %v1127_v40 = vld [vmem:[%s8909_s18 + $0x1890] sm:$0xff] }
 0x365   : > { %v2405_v41 = vld [vmem:[%s8909_s18 + $0x4080] sm:$0xff]  ;;  %v2407_v43 = vld [vmem:[%s8909_s18 + $0x4090] sm:$0xff] }
 0x366   : > { %6600 = vmatpush1.bf16.msra.mxu1 %v6599_v52  ;;  %v1111_v52 = vld [vmem:[%s8909_s18 + $0x1810] sm:$0xff] }
 0x367   : > { %7880 = vmatpush1.bf16.msra.mxu0 %v7879_v53  ;;  %6602 = vmatprep.subr.bf16.mxu1 %v6601_v54  ;;  %v2389_v53 = vld [vmem:[%s8909_s18 + $0x4000] sm:$0xff]  ;;  %v7901_v54 = vpack.c.bf16 %v2392_v47, %v2390_v46  ;;  %v6623_v61 = vpack.c.bf16 %v1111_v52, %v1109_v51  ;;  %v2410_v46 = vld [vmem:[%s8909_s18 + $0x40a8] sm:$0xff]  ;;  %v2412_v47 = vld [vmem:[%s8909_s18 + $0x40b8] sm:$0xff] }
 0x368   : > { %7882 = vmatprep.subr.bf16.mxu0 %v7881_v58  ;;  %v2394_v58 = vld [vmem:[%s8909_s18 + $0x4028] sm:$0xff]  ;;  %v7903_v63 = vpack.c.bf16 %v2391_v55, %v2389_v53  ;;  %v1129_v51 = vld [vmem:[%s8909_s18 + $0x18a0] sm:$0xff]  ;;  %v1131_v52 = vld [vmem:[%s8909_s18 + $0x18b0] sm:$0xff] }
 0x369   : > { %v7905_v4 = vpack.c.bf16 %v2396_v59, %v2394_v58  ;;  %v2409_v53 = vld [vmem:[%s8909_s18 + $0x40a0] sm:$0xff]  ;;  %v2411_v55 = vld [vmem:[%s8909_s18 + $0x40b0] sm:$0xff]  ;;  %v2414_v58 = vld [vmem:[%s8909_s18 + $0x40c8] sm:$0xff] }
 0x36a   : > { %6604 = vmatpush1.bf16.msra.mxu1 %v6603_v0  ;;  %v6625_v0 = vpack.c.bf16 %v1116_v57, %v1114_v56  ;;  %v1134_v56 = vld [vmem:[%s8909_s18 + $0x18c8] sm:$0xff]  ;;  %v1136_v57 = vld [vmem:[%s8909_s18 + $0x18d8] sm:$0xff] }
 0x36b   : > { %7884 = vmatpush1.bf16.msra.mxu0 %v7883_v1  ;;  %6606 = vmatprep.subr.bf16.mxu1 %v6605_v2  ;;  %v1113_v1 = vld [vmem:[%s8909_s18 + $0x1820] sm:$0xff]  ;;  %v1115_v2 = vld [vmem:[%s8909_s18 + $0x1830] sm:$0xff]  ;;  %v2416_v59 = vld [vmem:[%s8909_s18 + $0x40d8] sm:$0xff] }
 0x36c   : > { %7886 = vmatprep.subr.bf16.mxu0 %v7885_v6  ;;  %v1118_v6 = vld [vmem:[%s8909_s18 + $0x1848] sm:$0xff]  ;;  %v6627_v11 = vpack.c.bf16 %v1115_v2, %v1113_v1  ;;  %v2413_v1 = vld [vmem:[%s8909_s18 + $0x40c0] sm:$0xff]  ;;  %v7925_v2 = vpack.c.bf16 %v2416_v59, %v2414_v58 }
 0x36d   : > { %v1153_v59 = vld [vmem:[%s8909_s18 + $0x1960] sm:$0xff] }
 0x36e   : > { %6608 = vmatpush1.bf16.msra.mxu1 %v6607_v12  ;;  %v327_v12 = vld [vmem:[#allocation2 + $0x208] sm:$0xff] }
 0x36f   : > { %7888 = vmatpush1.bf16.msra.mxu0 %v7887_v13  ;;  %6610 = vmatprep.subr.bf16.mxu1 %v6609_v14  ;;  %v7907_v13 = vpack.c.bf16 %v2395_v5, %v2393_v3  ;;  %v6629_v14 = vpack.c.bf16 %v1120_v7, %v1118_v6  ;;  %v2415_v3 = vld [vmem:[%s8909_s18 + $0x40d0] sm:$0xff]  ;;  %v1140_v5 = vld [vmem:[%s8909_s18 + $0x18f8] sm:$0xff]  ;;  %v2418_v6 = vld [vmem:[%s8909_s18 + $0x40e8] sm:$0xff] }
 0x370   : > { %7890 = vmatprep.subr.bf16.mxu0 %v7889_v18  ;;  %v7909_v18 = vpack.c.bf16 %v2400_v9, %v2398_v8  ;;  %v2420_v7 = vld [vmem:[%s8909_s18 + $0x40f8] sm:$0xff]  ;;  %v7927_v9 = vpack.c.bf16 %v2415_v3, %v2413_v1 }
 0x371   : > { %v1160_v1 = vld [vmem:[%s8909_s18 + $0x1998] sm:$0xff] }
 0x372   : > { %6612 = vmatpush1.bf16.msra.mxu1 %v6611_v24  ;;  %v6631_v24 = vpack.c.bf16 %v1119_v16, %v1117_v15  ;;  %v2419_v15 = vld [vmem:[%s8909_s18 + $0x40f0] sm:$0xff]  ;;  %v1142_v16 = vld [vmem:[%s8909_s18 + $0x1908] sm:$0xff]  ;;  %v2440_v3 = vld [vmem:[%s8909_s18 + $0x4198] sm:$0xff] }
 0x373   : > { %7892 = vmatpush1.bf16.msra.mxu0 %v7891_v25  ;;  %6614 = vmatprep.subr.bf16.mxu1 %v6613_v26  ;;  %v7911_v25 = vpack.c.bf16 %v2399_v19, %v2397_v17  ;;  %v6633_v26 = vpack.c.bf16 %v1124_v21, %v1122_v20  ;;  %v1144_v17 = vld [vmem:[%s8909_s18 + $0x1918] sm:$0xff] }
 0x374   : > { %7894 = vmatprep.subr.bf16.mxu0 %v7893_v30  ;;  %v7913_v30 = vpack.c.bf16 %v2404_v23, %v2402_v22  ;;  %v2424_v19 = vld [vmem:[%s8909_s18 + $0x4118] sm:$0xff]  ;;  %v6653_v22 = vpack.c.bf16 %v1144_v17, %v1142_v16  ;;  %v1141_v23 = vld [vmem:[%s8909_s18 + $0x1900] sm:$0xff] }
 0x376   : > { %6616 = vmatpush1.bf16.msra.mxu1 %v6615_v36  ;;  %v6635_v36 = vpack.c.bf16 %v1123_v28, %v1121_v27  ;;  %v2423_v27 = vld [vmem:[%s8909_s18 + $0x4110] sm:$0xff]  ;;  %v1146_v28 = vld [vmem:[%s8909_s18 + $0x1928] sm:$0xff] }
 0x377   : > { %7896 = vmatpush1.bf16.msra.mxu0 %v7895_v37  ;;  %6618 = vmatprep.subr.bf16.mxu1 %v6617_v38  ;;  %v7915_v37 = vpack.c.bf16 %v2403_v31, %v2401_v29  ;;  %v6637_v38 = vpack.c.bf16 %v1128_v33, %v1126_v32  ;;  %v1148_v29 = vld [vmem:[%s8909_s18 + $0x1938] sm:$0xff] }
 0x378   : > { %7898 = vmatprep.subr.bf16.mxu0 %v7897_v42  ;;  %v7917_v42 = vpack.c.bf16 %v2408_v35, %v2406_v34  ;;  %v2428_v31 = vld [vmem:[%s8909_s18 + $0x4138] sm:$0xff]  ;;  %v6657_v34 = vpack.c.bf16 %v1148_v29, %v1146_v28  ;;  %v1145_v35 = vld [vmem:[%s8909_s18 + $0x1920] sm:$0xff] }
 0x37a   : > { %6620 = vmatpush1.bf16.msra.mxu1 %v6619_v48  ;;  %v6639_v48 = vpack.c.bf16 %v1127_v40, %v1125_v39  ;;  %v2427_v39 = vld [vmem:[%s8909_s18 + $0x4130] sm:$0xff]  ;;  %v1150_v40 = vld [vmem:[%s8909_s18 + $0x1948] sm:$0xff] }
 0x37b   : > { %7900 = vmatpush1.bf16.msra.mxu0 %v7899_v49  ;;  %6622 = vmatprep.subr.bf16.mxu1 %v6621_v50  ;;  %v7919_v49 = vpack.c.bf16 %v2407_v43, %v2405_v41  ;;  %v6641_v50 = vpack.c.bf16 %v1132_v45, %v1130_v44  ;;  %v1152_v41 = vld [vmem:[%s8909_s18 + $0x1958] sm:$0xff] }
 0x37c   : > { %7902 = vmatprep.subr.bf16.mxu0 %v7901_v54  ;;  %v7921_v54 = vpack.c.bf16 %v2412_v47, %v2410_v46  ;;  %v2432_v43 = vld [vmem:[%s8909_s18 + $0x4158] sm:$0xff]  ;;  %v6661_v46 = vpack.c.bf16 %v1152_v41, %v1150_v40  ;;  %v1149_v47 = vld [vmem:[%s8909_s18 + $0x1940] sm:$0xff] }
 0x37d   : > { %3691 = vmatmul.mubr.f32.vlgmr.msra.gmra.mrb[0].mxu1 %v284_v60  ;;  %v6643_v60 = vpack.c.bf16 %v1131_v52, %v1129_v51  ;;  %v2431_v51 = vld [vmem:[%s8909_s18 + $0x4150] sm:$0xff]  ;;  %v1154_v52 = vld [vmem:[%s8909_s18 + $0x1968] sm:$0xff] }
 0x37e   : > { %6624 = vmatpush1.bf16.msra.mxu1 %v6623_v61  ;;  %5111 = vmatmul.mubr.f32.vlgmr.msra.gmra.mrb[0].mxu0 %v324_v62  ;;  %v7923_v61 = vpack.c.bf16 %v2411_v55, %v2409_v53  ;;  %v6645_v62 = vpack.c.bf16 %v1136_v57, %v1134_v56  ;;  %v1156_v53 = vld [vmem:[%s8909_s18 + $0x1978] sm:$0xff] }
 0x37f   : > { %7904 = vmatpush1.bf16.msra.mxu0 %v7903_v63  ;;  %6626 = vmatprep.subr.bf16.mxu1 %v6625_v0  ;;  %v1133_v63 = vld [vmem:[%s8909_s18 + $0x18c0] sm:$0xff]  ;;  %v1135_v0 = vld [vmem:[%s8909_s18 + $0x18d0] sm:$0xff]  ;;  %v2436_v55 = vld [vmem:[%s8909_s18 + $0x4178] sm:$0xff]  ;;  %v6665_v58 = vpack.c.bf16 %v1156_v53, %v1154_v52 }
 0x380   : > { %7906 = vmatprep.subr.bf16.mxu0 %v7905_v4  ;;  %3761 = vmatprep.mubr.f32.mxu1 %v287_v10  ;;  %v1138_v4 = vld [vmem:[%s8909_s18 + $0x18e8] sm:$0xff]  ;;  %v6647_v8 = vpack.c.bf16 %v1135_v0, %v1133_v63  ;;  %v2435_v63 = vld [vmem:[%s8909_s18 + $0x4170] sm:$0xff] }
 0x381   : > { %5181 = vmatprep.mubr.f32.mxu0 %v327_v12  ;;  %v6649_v10 = vpack.c.bf16 %v1140_v5, %v1138_v4  ;;  %v1139_v12 = vld [vmem:[%s8909_s18 + $0x18f0] sm:$0xff]  ;;  %v1158_v0 = vld [vmem:[%s8909_s18 + $0x1988] sm:$0xff] }
 0x382   : > { %6628 = vmatpush1.bf16.msra.mxu1 %v6627_v11  ;;  %v1137_v11 = vld [vmem:[%s8909_s18 + $0x18e0] sm:$0xff] }
 0x383   : > { %7908 = vmatpush1.bf16.msra.mxu0 %v7907_v13  ;;  %6630 = vmatprep.subr.bf16.mxu1 %v6629_v14  ;;  %v2417_v13 = vld [vmem:[%s8909_s18 + $0x40e0] sm:$0xff]  ;;  %v7929_v14 = vpack.c.bf16 %v2420_v7, %v2418_v6  ;;  %v6651_v20 = vpack.c.bf16 %v1139_v12, %v1137_v11  ;;  %v6669_v6 = vpack.c.bf16 %v1160_v1, %v1158_v0  ;;  %v2439_v11 = vld [vmem:[%s8909_s18 + $0x4190] sm:$0xff]  ;;  %v1162_v12 = vld [vmem:[%s8909_s18 + $0x19a8] sm:$0xff] }
 0x384   : > { %7910 = vmatprep.subr.bf16.mxu0 %v7909_v18  ;;  %v2422_v18 = vld [vmem:[%s8909_s18 + $0x4108] sm:$0xff]  ;;  %v7931_v21 = vpack.c.bf16 %v2419_v15, %v2417_v13  ;;  %v1157_v7 = vld [vmem:[%s8909_s18 + $0x1980] sm:$0xff]  ;;  %v1164_v13 = vld [vmem:[%s8909_s18 + $0x19b8] sm:$0xff] }
 0x385   : > { %v2444_v15 = vld [vmem:[%s8909_s18 + $0x41b8] sm:$0xff]  ;;  %v286_v0 = vld [vmem:[#allocation2 + $0xc0] sm:$0xff] }
 0x386   : > { %6632 = vmatpush1.bf16.msra.mxu1 %v6631_v24  ;;  %v1143_v24 = vld [vmem:[%s8909_s18 + $0x1910] sm:$0xff] }
 0x387   : > { %7912 = vmatpush1.bf16.msra.mxu0 %v7911_v25  ;;  %6634 = vmatprep.subr.bf16.mxu1 %v6633_v26  ;;  %v2421_v25 = vld [vmem:[%s8909_s18 + $0x4100] sm:$0xff]  ;;  %v7933_v26 = vpack.c.bf16 %v2424_v19, %v2422_v18  ;;  %v6655_v32 = vpack.c.bf16 %v1143_v24, %v1141_v23  ;;  %v6673_v18 = vpack.c.bf16 %v1164_v13, %v1162_v12  ;;  %v2443_v23 = vld [vmem:[%s8909_s18 + $0x41b0] sm:$0xff]  ;;  %v1166_v24 = vld [vmem:[%s8909_s18 + $0x19c8] sm:$0xff] }
 0x388   : > { %7914 = vmatprep.subr.bf16.mxu0 %v7913_v30  ;;  %v2426_v30 = vld [vmem:[%s8909_s18 + $0x4128] sm:$0xff]  ;;  %v7935_v33 = vpack.c.bf16 %v2423_v27, %v2421_v25  ;;  %v1161_v19 = vld [vmem:[%s8909_s18 + $0x19a0] sm:$0xff]  ;;  %v1168_v25 = vld [vmem:[%s8909_s18 + $0x19d8] sm:$0xff] }
 0x389   : > { %v2448_v27 = vld [vmem:[%s8909_s18 + $0x41d8] sm:$0xff]  ;;  %v2462_v12 = vld [vmem:[%s8909_s18 + $0x4248] sm:$0xff] }
 0x38a   : > { %6636 = vmatpush1.bf16.msra.mxu1 %v6635_v36  ;;  %v1147_v36 = vld [vmem:[%s8909_s18 + $0x1930] sm:$0xff]  ;;  %v2464_v13 = vld [vmem:[%s8909_s18 + $0x4258] sm:$0xff] }
 0x38b   : > { %7916 = vmatpush1.bf16.msra.mxu0 %v7915_v37  ;;  %6638 = vmatprep.subr.bf16.mxu1 %v6637_v38  ;;  %v2425_v37 = vld [vmem:[%s8909_s18 + $0x4120] sm:$0xff]  ;;  %v7937_v38 = vpack.c.bf16 %v2428_v31, %v2426_v30  ;;  %v6659_v44 = vpack.c.bf16 %v1147_v36, %v1145_v35  ;;  %v6677_v30 = vpack.c.bf16 %v1168_v25, %v1166_v24  ;;  %v2447_v35 = vld [vmem:[%s8909_s18 + $0x41d0] sm:$0xff]  ;;  %v1170_v36 = vld [vmem:[%s8909_s18 + $0x19e8] sm:$0xff] }
 0x38c   : > { %7918 = vmatprep.subr.bf16.mxu0 %v7917_v42  ;;  %v2430_v42 = vld [vmem:[%s8909_s18 + $0x4148] sm:$0xff]  ;;  %v7939_v45 = vpack.c.bf16 %v2427_v39, %v2425_v37  ;;  %v1165_v31 = vld [vmem:[%s8909_s18 + $0x19c0] sm:$0xff]  ;;  %v1172_v37 = vld [vmem:[%s8909_s18 + $0x19f8] sm:$0xff] }
 0x38d   : > { %v2452_v39 = vld [vmem:[%s8909_s18 + $0x41f8] sm:$0xff]  ;;  %v1186_v24 = vld [vmem:[%s8909_s18 + $0x1a68] sm:$0xff] }
 0x38e   : > { %6640 = vmatpush1.bf16.msra.mxu1 %v6639_v48  ;;  %v1151_v48 = vld [vmem:[%s8909_s18 + $0x1950] sm:$0xff]  ;;  %v1188_v25 = vld [vmem:[%s8909_s18 + $0x1a78] sm:$0xff] }
 0x38f   : > { %7920 = vmatpush1.bf16.msra.mxu0 %v7919_v49  ;;  %6642 = vmatprep.subr.bf16.mxu1 %v6641_v50  ;;  %v2429_v49 = vld [vmem:[%s8909_s18 + $0x4140] sm:$0xff]  ;;  %v7941_v50 = vpack.c.bf16 %v2432_v43, %v2430_v42  ;;  %v6663_v56 = vpack.c.bf16 %v1151_v48, %v1149_v47  ;;  %v6681_v42 = vpack.c.bf16 %v1172_v37, %v1170_v36  ;;  %v2451_v47 = vld [vmem:[%s8909_s18 + $0x41f0] sm:$0xff]  ;;  %v1174_v48 = vld [vmem:[%s8909_s18 + $0x1a08] sm:$0xff] }
 0x390   : > { %7922 = vmatprep.subr.bf16.mxu0 %v7921_v54  ;;  %v2434_v54 = vld [vmem:[%s8909_s18 + $0x4168] sm:$0xff]  ;;  %v7943_v57 = vpack.c.bf16 %v2431_v51, %v2429_v49  ;;  %v1169_v43 = vld [vmem:[%s8909_s18 + $0x19e0] sm:$0xff]  ;;  %v1176_v49 = vld [vmem:[%s8909_s18 + $0x1a18] sm:$0xff] }
 0x391   : > { %v2456_v51 = vld [vmem:[%s8909_s18 + $0x4218] sm:$0xff]  ;;  %v1190_v36 = vld [vmem:[%s8909_s18 + $0x1a88] sm:$0xff] }
 0x392   : > { %6644 = vmatpush1.bf16.msra.mxu1 %v6643_v60  ;;  %v1155_v60 = vld [vmem:[%s8909_s18 + $0x1970] sm:$0xff]  ;;  %v1192_v37 = vld [vmem:[%s8909_s18 + $0x1a98] sm:$0xff] }
 0x393   : > { %7924 = vmatpush1.bf16.msra.mxu0 %v7923_v61  ;;  %6646 = vmatprep.subr.bf16.mxu1 %v6645_v62  ;;  %v2433_v61 = vld [vmem:[%s8909_s18 + $0x4160] sm:$0xff]  ;;  %v7945_v62 = vpack.c.bf16 %v2436_v55, %v2434_v54  ;;  %v6667_v4 = vpack.c.bf16 %v1155_v60, %v1153_v59  ;;  %v6685_v54 = vpack.c.bf16 %v1176_v49, %v1174_v48  ;;  %v2455_v59 = vld [vmem:[%s8909_s18 + $0x4210] sm:$0xff]  ;;  %v1178_v60 = vld [vmem:[%s8909_s18 + $0x1a28] sm:$0xff] }
 0x394   : > { %7926 = vmatprep.subr.bf16.mxu0 %v7925_v2  ;;  %v2438_v2 = vld [vmem:[%s8909_s18 + $0x4188] sm:$0xff]  ;;  %v7947_v5 = vpack.c.bf16 %v2435_v63, %v2433_v61  ;;  %v1173_v55 = vld [vmem:[%s8909_s18 + $0x1a00] sm:$0xff]  ;;  %v1180_v61 = vld [vmem:[%s8909_s18 + $0x1a38] sm:$0xff] }
 0x395   : > { %v2460_v63 = vld [vmem:[%s8909_s18 + $0x4238] sm:$0xff]  ;;  %v1194_v48 = vld [vmem:[%s8909_s18 + $0x1aa8] sm:$0xff] }
 0x396   : > { %6648 = vmatpush1.bf16.msra.mxu1 %v6647_v8  ;;  %v1159_v8 = vld [vmem:[%s8909_s18 + $0x1990] sm:$0xff]  ;;  %v1196_v49 = vld [vmem:[%s8909_s18 + $0x1ab8] sm:$0xff] }
 0x397   : > { %7928 = vmatpush1.bf16.msra.mxu0 %v7927_v9  ;;  %6650 = vmatprep.subr.bf16.mxu1 %v6649_v10  ;;  %v2437_v9 = vld [vmem:[%s8909_s18 + $0x4180] sm:$0xff]  ;;  %v7949_v10 = vpack.c.bf16 %v2440_v3, %v2438_v2  ;;  %v6671_v16 = vpack.c.bf16 %v1159_v8, %v1157_v7  ;;  %v326_v2 = vld [vmem:[#allocation2 + $0x200] sm:$0xff] }
 0x398   : > { %7930 = vmatprep.subr.bf16.mxu0 %v7929_v14  ;;  %v2442_v14 = vld [vmem:[%s8909_s18 + $0x41a8] sm:$0xff]  ;;  %v7951_v17 = vpack.c.bf16 %v2439_v11, %v2437_v9  ;;  %v2457_v7 = vld [vmem:[%s8909_s18 + $0x4220] sm:$0xff]  ;;  %v2459_v9 = vld [vmem:[%s8909_s18 + $0x4230] sm:$0xff] }
 0x399   : > { %v1184_v11 = vld [vmem:[%s8909_s18 + $0x1a58] sm:$0xff] }
 0x39a   : > { %6652 = vmatpush1.bf16.msra.mxu1 %v6651_v20  ;;  %v1163_v20 = vld [vmem:[%s8909_s18 + $0x19b0] sm:$0xff] }
 0x39b   : > { %7932 = vmatpush1.bf16.msra.mxu0 %v7931_v21  ;;  %6654 = vmatprep.subr.bf16.mxu1 %v6653_v22  ;;  %v2441_v21 = vld [vmem:[%s8909_s18 + $0x41a0] sm:$0xff]  ;;  %v7953_v22 = vpack.c.bf16 %v2444_v15, %v2442_v14  ;;  %v6675_v28 = vpack.c.bf16 %v1163_v20, %v1161_v19  ;;  %v1183_v20 = vld [vmem:[%s8909_s18 + $0x1a50] sm:$0xff] }
 0x39c   : > { %7934 = vmatprep.subr.bf16.mxu0 %v7933_v26  ;;  %v2446_v26 = vld [vmem:[%s8909_s18 + $0x41c8] sm:$0xff]  ;;  %v7955_v29 = vpack.c.bf16 %v2443_v23, %v2441_v21  ;;  %v289_v14 = vld [vmem:[#allocation2 + $0xd8] sm:$0xff]  ;;  %v2463_v23 = vld [vmem:[%s8909_s18 + $0x4250] sm:$0xff] }
 0x39d   : > { %v1181_v19 = vld [vmem:[%s8909_s18 + $0x1a40] sm:$0xff] }
 0x39e   : > { %6656 = vmatpush1.bf16.msra.mxu1 %v6655_v32  ;;  %v1167_v32 = vld [vmem:[%s8909_s18 + $0x19d0] sm:$0xff]  ;;  %v2461_v21 = vld [vmem:[%s8909_s18 + $0x4240] sm:$0xff] }
 0x39f   : > { %7936 = vmatpush1.bf16.msra.mxu0 %v7935_v33  ;;  %6658 = vmatprep.subr.bf16.mxu1 %v6657_v34  ;;  %v2445_v33 = vld [vmem:[%s8909_s18 + $0x41c0] sm:$0xff]  ;;  %v7957_v34 = vpack.c.bf16 %v2448_v27, %v2446_v26  ;;  %v6679_v40 = vpack.c.bf16 %v1167_v32, %v1165_v31  ;;  %v2466_v26 = vld [vmem:[%s8909_s18 + $0x4268] sm:$0xff]  ;;  %v2468_v27 = vld [vmem:[%s8909_s18 + $0x4278] sm:$0xff] }
 0x3a0   : > { %7938 = vmatprep.subr.bf16.mxu0 %v7937_v38  ;;  %v2450_v38 = vld [vmem:[%s8909_s18 + $0x41e8] sm:$0xff]  ;;  %v7959_v41 = vpack.c.bf16 %v2447_v35, %v2445_v33  ;;  %v1185_v31 = vld [vmem:[%s8909_s18 + $0x1a60] sm:$0xff]  ;;  %v1187_v32 = vld [vmem:[%s8909_s18 + $0x1a70] sm:$0xff] }
 0x3a1   : > { %v2465_v33 = vld [vmem:[%s8909_s18 + $0x4260] sm:$0xff]  ;;  %v2467_v35 = vld [vmem:[%s8909_s18 + $0x4270] sm:$0xff] }
 0x3a2   : > { %6660 = vmatpush1.bf16.msra.mxu1 %v6659_v44  ;;  %v1171_v44 = vld [vmem:[%s8909_s18 + $0x19f0] sm:$0xff] }
 0x3a3   : > { %7940 = vmatpush1.bf16.msra.mxu0 %v7939_v45  ;;  %6662 = vmatprep.subr.bf16.mxu1 %v6661_v46  ;;  %v2449_v45 = vld [vmem:[%s8909_s18 + $0x41e0] sm:$0xff]  ;;  %v7961_v46 = vpack.c.bf16 %v2452_v39, %v2450_v38  ;;  %v6683_v52 = vpack.c.bf16 %v1171_v44, %v1169_v43  ;;  %v2470_v38 = vld [vmem:[%s8909_s18 + $0x4288] sm:$0xff]  ;;  %v2472_v39 = vld [vmem:[%s8909_s18 + $0x4298] sm:$0xff] }
 0x3a4   : > { %7942 = vmatprep.subr.bf16.mxu0 %v7941_v50  ;;  %v2454_v50 = vld [vmem:[%s8909_s18 + $0x4208] sm:$0xff]  ;;  %v7963_v53 = vpack.c.bf16 %v2451_v47, %v2449_v45  ;;  %v1189_v43 = vld [vmem:[%s8909_s18 + $0x1a80] sm:$0xff]  ;;  %v1191_v44 = vld [vmem:[%s8909_s18 + $0x1a90] sm:$0xff] }
 0x3a5   : > { %v2469_v45 = vld [vmem:[%s8909_s18 + $0x4280] sm:$0xff]  ;;  %v2471_v47 = vld [vmem:[%s8909_s18 + $0x4290] sm:$0xff] }
 0x3a6   : > { %6664 = vmatpush1.bf16.msra.mxu1 %v6663_v56  ;;  %v1175_v56 = vld [vmem:[%s8909_s18 + $0x1a10] sm:$0xff] }
 0x3a7   : > { %7944 = vmatpush1.bf16.msra.mxu0 %v7943_v57  ;;  %6666 = vmatprep.subr.bf16.mxu1 %v6665_v58  ;;  %v2453_v57 = vld [vmem:[%s8909_s18 + $0x4200] sm:$0xff]  ;;  %v7965_v58 = vpack.c.bf16 %v2456_v51, %v2454_v50  ;;  %v6687_v1 = vpack.c.bf16 %v1175_v56, %v1173_v55  ;;  %v2474_v50 = vld [vmem:[%s8909_s18 + $0x42a8] sm:$0xff]  ;;  %v2476_v51 = vld [vmem:[%s8909_s18 + $0x42b8] sm:$0xff] }
 0x3a8   : > { %7946 = vmatprep.subr.bf16.mxu0 %v7945_v62  ;;  %v2458_v62 = vld [vmem:[%s8909_s18 + $0x4228] sm:$0xff]  ;;  %v7967_v3 = vpack.c.bf16 %v2455_v59, %v2453_v57  ;;  %v1193_v55 = vld [vmem:[%s8909_s18 + $0x1aa0] sm:$0xff]  ;;  %v1195_v56 = vld [vmem:[%s8909_s18 + $0x1ab0] sm:$0xff] }
 0x3a9   : > { %v7969_v8 = vpack.c.bf16 %v2460_v63, %v2458_v62  ;;  %v2473_v57 = vld [vmem:[%s8909_s18 + $0x42a0] sm:$0xff]  ;;  %v2475_v59 = vld [vmem:[%s8909_s18 + $0x42b0] sm:$0xff]  ;;  %v2478_v62 = vld [vmem:[%s8909_s18 + $0x42c8] sm:$0xff] }
 0x3aa   : > { %6668 = vmatpush1.bf16.msra.mxu1 %v6667_v4  ;;  %v6689_v4 = vpack.c.bf16 %v1180_v61, %v1178_v60  ;;  %v1198_v60 = vld [vmem:[%s8909_s18 + $0x1ac8] sm:$0xff]  ;;  %v1200_v61 = vld [vmem:[%s8909_s18 + $0x1ad8] sm:$0xff] }
 0x3ab   : > { %7948 = vmatpush1.bf16.msra.mxu0 %v7947_v5  ;;  %6670 = vmatprep.subr.bf16.mxu1 %v6669_v6  ;;  %v1177_v5 = vld [vmem:[%s8909_s18 + $0x1a20] sm:$0xff]  ;;  %v1179_v6 = vld [vmem:[%s8909_s18 + $0x1a30] sm:$0xff]  ;;  %v2480_v63 = vld [vmem:[%s8909_s18 + $0x42d8] sm:$0xff] }
 0x3ac   : > { %7950 = vmatprep.subr.bf16.mxu0 %v7949_v10  ;;  %v1182_v10 = vld [vmem:[%s8909_s18 + $0x1a48] sm:$0xff]  ;;  %v6691_v15 = vpack.c.bf16 %v1179_v6, %v1177_v5  ;;  %v2477_v5 = vld [vmem:[%s8909_s18 + $0x42c0] sm:$0xff]  ;;  %v7989_v6 = vpack.c.bf16 %v2480_v63, %v2478_v62 }
 0x3ad   : > { %v1217_v63 = vld [vmem:[%s8909_s18 + $0x1b60] sm:$0xff] }
 0x3ae   : > { %6672 = vmatpush1.bf16.msra.mxu1 %v6671_v16  ;;  %v329_v16 = vld [vmem:[#allocation2 + $0x218] sm:$0xff] }
 0x3af   : > { %7952 = vmatpush1.bf16.msra.mxu0 %v7951_v17  ;;  %6674 = vmatprep.subr.bf16.mxu1 %v6673_v18  ;;  %v7971_v17 = vpack.c.bf16 %v2459_v9, %v2457_v7  ;;  %v6693_v18 = vpack.c.bf16 %v1184_v11, %v1182_v10  ;;  %v2479_v7 = vld [vmem:[%s8909_s18 + $0x42d0] sm:$0xff]  ;;  %v1204_v9 = vld [vmem:[%s8909_s18 + $0x1af8] sm:$0xff]  ;;  %v2482_v10 = vld [vmem:[%s8909_s18 + $0x42e8] sm:$0xff] }
 0x3b0   : > { %7954 = vmatprep.subr.bf16.mxu0 %v7953_v22  ;;  %v7973_v22 = vpack.c.bf16 %v2464_v13, %v2462_v12  ;;  %v2484_v11 = vld [vmem:[%s8909_s18 + $0x42f8] sm:$0xff]  ;;  %v7991_v13 = vpack.c.bf16 %v2479_v7, %v2477_v5 }
 0x3b1   : > { %v1224_v5 = vld [vmem:[%s8909_s18 + $0x1b98] sm:$0xff] }
 0x3b2   : > { %6676 = vmatpush1.bf16.msra.mxu1 %v6675_v28  ;;  %v6695_v28 = vpack.c.bf16 %v1183_v20, %v1181_v19  ;;  %v2483_v19 = vld [vmem:[%s8909_s18 + $0x42f0] sm:$0xff]  ;;  %v1206_v20 = vld [vmem:[%s8909_s18 + $0x1b08] sm:$0xff]  ;;  %v2504_v7 = vld [vmem:[%s8909_s18 + $0x4398] sm:$0xff] }
 0x3b3   : > { %7956 = vmatpush1.bf16.msra.mxu0 %v7955_v29  ;;  %6678 = vmatprep.subr.bf16.mxu1 %v6677_v30  ;;  %v7975_v29 = vpack.c.bf16 %v2463_v23, %v2461_v21  ;;  %v6697_v30 = vpack.c.bf16 %v1188_v25, %v1186_v24  ;;  %v1208_v21 = vld [vmem:[%s8909_s18 + $0x1b18] sm:$0xff] }
 0x3b4   : > { %7958 = vmatprep.subr.bf16.mxu0 %v7957_v34  ;;  %v7977_v34 = vpack.c.bf16 %v2468_v27, %v2466_v26  ;;  %v2488_v23 = vld [vmem:[%s8909_s18 + $0x4318] sm:$0xff]  ;;  %v6717_v26 = vpack.c.bf16 %v1208_v21, %v1206_v20  ;;  %v1205_v27 = vld [vmem:[%s8909_s18 + $0x1b00] sm:$0xff] }
 0x3b6   : > { %6680 = vmatpush1.bf16.msra.mxu1 %v6679_v40  ;;  %v6699_v40 = vpack.c.bf16 %v1187_v32, %v1185_v31  ;;  %v2487_v31 = vld [vmem:[%s8909_s18 + $0x4310] sm:$0xff]  ;;  %v1210_v32 = vld [vmem:[%s8909_s18 + $0x1b28] sm:$0xff] }
 0x3b7   : > { %7960 = vmatpush1.bf16.msra.mxu0 %v7959_v41  ;;  %6682 = vmatprep.subr.bf16.mxu1 %v6681_v42  ;;  %v7979_v41 = vpack.c.bf16 %v2467_v35, %v2465_v33  ;;  %v6701_v42 = vpack.c.bf16 %v1192_v37, %v1190_v36  ;;  %v1212_v33 = vld [vmem:[%s8909_s18 + $0x1b38] sm:$0xff] }
 0x3b8   : > { %7962 = vmatprep.subr.bf16.mxu0 %v7961_v46  ;;  %v7981_v46 = vpack.c.bf16 %v2472_v39, %v2470_v38  ;;  %v2492_v35 = vld [vmem:[%s8909_s18 + $0x4338] sm:$0xff]  ;;  %v6721_v38 = vpack.c.bf16 %v1212_v33, %v1210_v32  ;;  %v1209_v39 = vld [vmem:[%s8909_s18 + $0x1b20] sm:$0xff] }
 0x3ba   : > { %6684 = vmatpush1.bf16.msra.mxu1 %v6683_v52  ;;  %v6703_v52 = vpack.c.bf16 %v1191_v44, %v1189_v43  ;;  %v2491_v43 = vld [vmem:[%s8909_s18 + $0x4330] sm:$0xff]  ;;  %v1214_v44 = vld [vmem:[%s8909_s18 + $0x1b48] sm:$0xff] }
 0x3bb   : > { %7964 = vmatpush1.bf16.msra.mxu0 %v7963_v53  ;;  %6686 = vmatprep.subr.bf16.mxu1 %v6685_v54  ;;  %v7983_v53 = vpack.c.bf16 %v2471_v47, %v2469_v45  ;;  %v6705_v54 = vpack.c.bf16 %v1196_v49, %v1194_v48  ;;  %v1216_v45 = vld [vmem:[%s8909_s18 + $0x1b58] sm:$0xff] }
 0x3bc   : > { %7966 = vmatprep.subr.bf16.mxu0 %v7965_v58  ;;  %v7985_v58 = vpack.c.bf16 %v2476_v51, %v2474_v50  ;;  %v2496_v47 = vld [vmem:[%s8909_s18 + $0x4358] sm:$0xff]  ;;  %v6725_v50 = vpack.c.bf16 %v1216_v45, %v1214_v44  ;;  %v1213_v51 = vld [vmem:[%s8909_s18 + $0x1b40] sm:$0xff] }
 0x3bd   : > { %3762 = vmatmul.mubr.f32.vlgmr.msra.gmra.mrb[0].mxu1 %v286_v0  ;;  %v6707_v0 = vpack.c.bf16 %v1195_v56, %v1193_v55  ;;  %v2495_v55 = vld [vmem:[%s8909_s18 + $0x4350] sm:$0xff]  ;;  %v1218_v56 = vld [vmem:[%s8909_s18 + $0x1b68] sm:$0xff] }
 0x3be   : > { %6688 = vmatpush1.bf16.msra.mxu1 %v6687_v1  ;;  %5182 = vmatmul.mubr.f32.vlgmr.msra.gmra.mrb[0].mxu0 %v326_v2  ;;  %v7987_v1 = vpack.c.bf16 %v2475_v59, %v2473_v57  ;;  %v6709_v2 = vpack.c.bf16 %v1200_v61, %v1198_v60  ;;  %v1220_v57 = vld [vmem:[%s8909_s18 + $0x1b78] sm:$0xff] }
 0x3bf   : > { %7968 = vmatpush1.bf16.msra.mxu0 %v7967_v3  ;;  %6690 = vmatprep.subr.bf16.mxu1 %v6689_v4  ;;  %v1197_v3 = vld [vmem:[%s8909_s18 + $0x1ac0] sm:$0xff]  ;;  %v1199_v4 = vld [vmem:[%s8909_s18 + $0x1ad0] sm:$0xff]  ;;  %v2500_v59 = vld [vmem:[%s8909_s18 + $0x4378] sm:$0xff]  ;;  %v6729_v62 = vpack.c.bf16 %v1220_v57, %v1218_v56 }
 0x3c0   : > { %7970 = vmatprep.subr.bf16.mxu0 %v7969_v8  ;;  %3832 = vmatprep.mubr.f32.mxu1 %v289_v14  ;;  %v1202_v8 = vld [vmem:[%s8909_s18 + $0x1ae8] sm:$0xff]  ;;  %v6711_v12 = vpack.c.bf16 %v1199_v4, %v1197_v3  ;;  %v2499_v3 = vld [vmem:[%s8909_s18 + $0x4370] sm:$0xff] }
 0x3c1   : > { %5252 = vmatprep.mubr.f32.mxu0 %v329_v16  ;;  %v6713_v14 = vpack.c.bf16 %v1204_v9, %v1202_v8  ;;  %v1203_v16 = vld [vmem:[%s8909_s18 + $0x1af0] sm:$0xff]  ;;  %v1222_v4 = vld [vmem:[%s8909_s18 + $0x1b88] sm:$0xff] }
 0x3c2   : > { %6692 = vmatpush1.bf16.msra.mxu1 %v6691_v15  ;;  %v1201_v15 = vld [vmem:[%s8909_s18 + $0x1ae0] sm:$0xff] }
 0x3c3   : > { %7972 = vmatpush1.bf16.msra.mxu0 %v7971_v17  ;;  %6694 = vmatprep.subr.bf16.mxu1 %v6693_v18  ;;  %v2481_v17 = vld [vmem:[%s8909_s18 + $0x42e0] sm:$0xff]  ;;  %v7993_v18 = vpack.c.bf16 %v2484_v11, %v2482_v10  ;;  %v6715_v24 = vpack.c.bf16 %v1203_v16, %v1201_v15  ;;  %v6733_v10 = vpack.c.bf16 %v1224_v5, %v1222_v4  ;;  %v2503_v15 = vld [vmem:[%s8909_s18 + $0x4390] sm:$0xff]  ;;  %v1226_v16 = vld [vmem:[%s8909_s18 + $0x1ba8] sm:$0xff] }
 0x3c4   : > { %7974 = vmatprep.subr.bf16.mxu0 %v7973_v22  ;;  %v2486_v22 = vld [vmem:[%s8909_s18 + $0x4308] sm:$0xff]  ;;  %v7995_v25 = vpack.c.bf16 %v2483_v19, %v2481_v17  ;;  %v1221_v11 = vld [vmem:[%s8909_s18 + $0x1b80] sm:$0xff]  ;;  %v1228_v17 = vld [vmem:[%s8909_s18 + $0x1bb8] sm:$0xff] }
 0x3c5   : > { %v2508_v19 = vld [vmem:[%s8909_s18 + $0x43b8] sm:$0xff] }
 0x3c6   : > { %6696 = vmatpush1.bf16.msra.mxu1 %v6695_v28  ;;  %v1207_v28 = vld [vmem:[%s8909_s18 + $0x1b10] sm:$0xff]  ;;  %v288_v4 = vld [vmem:[#allocation2 + $0xd0] sm:$0xff] }
 0x3c7   : > { %7976 = vmatpush1.bf16.msra.mxu0 %v7975_v29  ;;  %6698 = vmatprep.subr.bf16.mxu1 %v6697_v30  ;;  %v2485_v29 = vld [vmem:[%s8909_s18 + $0x4300] sm:$0xff]  ;;  %v7997_v30 = vpack.c.bf16 %v2488_v23, %v2486_v22  ;;  %v6719_v36 = vpack.c.bf16 %v1207_v28, %v1205_v27  ;;  %v6737_v22 = vpack.c.bf16 %v1228_v17, %v1226_v16  ;;  %v2507_v27 = vld [vmem:[%s8909_s18 + $0x43b0] sm:$0xff]  ;;  %v1230_v28 = vld [vmem:[%s8909_s18 + $0x1bc8] sm:$0xff] }
 0x3c8   : > { %7978 = vmatprep.subr.bf16.mxu0 %v7977_v34  ;;  %v2490_v34 = vld [vmem:[%s8909_s18 + $0x4328] sm:$0xff]  ;;  %v7999_v37 = vpack.c.bf16 %v2487_v31, %v2485_v29  ;;  %v1225_v23 = vld [vmem:[%s8909_s18 + $0x1ba0] sm:$0xff]  ;;  %v1232_v29 = vld [vmem:[%s8909_s18 + $0x1bd8] sm:$0xff] }
 0x3c9   : > { %v2512_v31 = vld [vmem:[%s8909_s18 + $0x43d8] sm:$0xff]  ;;  %v2526_v16 = vld [vmem:[%s8909_s18 + $0x4448] sm:$0xff] }
 0x3ca   : > { %6700 = vmatpush1.bf16.msra.mxu1 %v6699_v40  ;;  %v1211_v40 = vld [vmem:[%s8909_s18 + $0x1b30] sm:$0xff]  ;;  %v2528_v17 = vld [vmem:[%s8909_s18 + $0x4458] sm:$0xff] }
 0x3cb   : > { %7980 = vmatpush1.bf16.msra.mxu0 %v7979_v41  ;;  %6702 = vmatprep.subr.bf16.mxu1 %v6701_v42  ;;  %v2489_v41 = vld [vmem:[%s8909_s18 + $0x4320] sm:$0xff]  ;;  %v8001_v42 = vpack.c.bf16 %v2492_v35, %v2490_v34  ;;  %v6723_v48 = vpack.c.bf16 %v1211_v40, %v1209_v39  ;;  %v6741_v34 = vpack.c.bf16 %v1232_v29, %v1230_v28  ;;  %v2511_v39 = vld [vmem:[%s8909_s18 + $0x43d0] sm:$0xff]  ;;  %v1234_v40 = vld [vmem:[%s8909_s18 + $0x1be8] sm:$0xff] }
 0x3cc   : > { %7982 = vmatprep.subr.bf16.mxu0 %v7981_v46  ;;  %v2494_v46 = vld [vmem:[%s8909_s18 + $0x4348] sm:$0xff]  ;;  %v8003_v49 = vpack.c.bf16 %v2491_v43, %v2489_v41  ;;  %v1229_v35 = vld [vmem:[%s8909_s18 + $0x1bc0] sm:$0xff]  ;;  %v1236_v41 = vld [vmem:[%s8909_s18 + $0x1bf8] sm:$0xff] }
 0x3cd   : > { %v2516_v43 = vld [vmem:[%s8909_s18 + $0x43f8] sm:$0xff]  ;;  %v1250_v28 = vld [vmem:[%s8909_s18 + $0x1c68] sm:$0xff] }
 0x3ce   : > { %6704 = vmatpush1.bf16.msra.mxu1 %v6703_v52  ;;  %v1215_v52 = vld [vmem:[%s8909_s18 + $0x1b50] sm:$0xff]  ;;  %v1252_v29 = vld [vmem:[%s8909_s18 + $0x1c78] sm:$0xff] }
 0x3cf   : > { %7984 = vmatpush1.bf16.msra.mxu0 %v7983_v53  ;;  %6706 = vmatprep.subr.bf16.mxu1 %v6705_v54  ;;  %v2493_v53 = vld [vmem:[%s8909_s18 + $0x4340] sm:$0xff]  ;;  %v8005_v54 = vpack.c.bf16 %v2496_v47, %v2494_v46  ;;  %v6727_v60 = vpack.c.bf16 %v1215_v52, %v1213_v51  ;;  %v6745_v46 = vpack.c.bf16 %v1236_v41, %v1234_v40  ;;  %v2515_v51 = vld [vmem:[%s8909_s18 + $0x43f0] sm:$0xff]  ;;  %v1238_v52 = vld [vmem:[%s8909_s18 + $0x1c08] sm:$0xff] }
 0x3d0   : > { %7986 = vmatprep.subr.bf16.mxu0 %v7985_v58  ;;  %v2498_v58 = vld [vmem:[%s8909_s18 + $0x4368] sm:$0xff]  ;;  %v8007_v61 = vpack.c.bf16 %v2495_v55, %v2493_v53  ;;  %v1233_v47 = vld [vmem:[%s8909_s18 + $0x1be0] sm:$0xff]  ;;  %v1240_v53 = vld [vmem:[%s8909_s18 + $0x1c18] sm:$0xff] }
 0x3d1   : > { %v2520_v55 = vld [vmem:[%s8909_s18 + $0x4418] sm:$0xff]  ;;  %v1254_v40 = vld [vmem:[%s8909_s18 + $0x1c88] sm:$0xff] }
 0x3d2   : > { %6708 = vmatpush1.bf16.msra.mxu1 %v6707_v0  ;;  %v1219_v0 = vld [vmem:[%s8909_s18 + $0x1b70] sm:$0xff]  ;;  %v1256_v41 = vld [vmem:[%s8909_s18 + $0x1c98] sm:$0xff] }
 0x3d3   : > { %7988 = vmatpush1.bf16.msra.mxu0 %v7987_v1  ;;  %6710 = vmatprep.subr.bf16.mxu1 %v6709_v2  ;;  %v2497_v1 = vld [vmem:[%s8909_s18 + $0x4360] sm:$0xff]  ;;  %v8009_v2 = vpack.c.bf16 %v2500_v59, %v2498_v58  ;;  %v6731_v8 = vpack.c.bf16 %v1219_v0, %v1217_v63  ;;  %v6749_v58 = vpack.c.bf16 %v1240_v53, %v1238_v52  ;;  %v2519_v63 = vld [vmem:[%s8909_s18 + $0x4410] sm:$0xff]  ;;  %v1242_v0 = vld [vmem:[%s8909_s18 + $0x1c28] sm:$0xff] }
 0x3d4   : > { %7990 = vmatprep.subr.bf16.mxu0 %v7989_v6  ;;  %v2502_v6 = vld [vmem:[%s8909_s18 + $0x4388] sm:$0xff]  ;;  %v8011_v9 = vpack.c.bf16 %v2499_v3, %v2497_v1  ;;  %v1237_v59 = vld [vmem:[%s8909_s18 + $0x1c00] sm:$0xff]  ;;  %v1244_v1 = vld [vmem:[%s8909_s18 + $0x1c38] sm:$0xff] }
 0x3d5   : > { %v2524_v3 = vld [vmem:[%s8909_s18 + $0x4438] sm:$0xff]  ;;  %v1258_v52 = vld [vmem:[%s8909_s18 + $0x1ca8] sm:$0xff] }
 0x3d6   : > { %6712 = vmatpush1.bf16.msra.mxu1 %v6711_v12  ;;  %v1223_v12 = vld [vmem:[%s8909_s18 + $0x1b90] sm:$0xff]  ;;  %v1260_v53 = vld [vmem:[%s8909_s18 + $0x1cb8] sm:$0xff] }
 0x3d7   : > { %7992 = vmatpush1.bf16.msra.mxu0 %v7991_v13  ;;  %6714 = vmatprep.subr.bf16.mxu1 %v6713_v14  ;;  %v2501_v13 = vld [vmem:[%s8909_s18 + $0x4380] sm:$0xff]  ;;  %v8013_v14 = vpack.c.bf16 %v2504_v7, %v2502_v6  ;;  %v6735_v20 = vpack.c.bf16 %v1223_v12, %v1221_v11  ;;  %v328_v6 = vld [vmem:[#allocation2 + $0x210] sm:$0xff] }
 0x3d8   : > { %7994 = vmatprep.subr.bf16.mxu0 %v7993_v18  ;;  %v2506_v18 = vld [vmem:[%s8909_s18 + $0x43a8] sm:$0xff]  ;;  %v8015_v21 = vpack.c.bf16 %v2503_v15, %v2501_v13  ;;  %v2521_v11 = vld [vmem:[%s8909_s18 + $0x4420] sm:$0xff]  ;;  %v2523_v13 = vld [vmem:[%s8909_s18 + $0x4430] sm:$0xff] }
 0x3d9   : > { %v1248_v15 = vld [vmem:[%s8909_s18 + $0x1c58] sm:$0xff] }
 0x3da   : > { %6716 = vmatpush1.bf16.msra.mxu1 %v6715_v24  ;;  %v1227_v24 = vld [vmem:[%s8909_s18 + $0x1bb0] sm:$0xff] }
 0x3db   : > { %7996 = vmatpush1.bf16.msra.mxu0 %v7995_v25  ;;  %6718 = vmatprep.subr.bf16.mxu1 %v6717_v26  ;;  %v2505_v25 = vld [vmem:[%s8909_s18 + $0x43a0] sm:$0xff]  ;;  %v8017_v26 = vpack.c.bf16 %v2508_v19, %v2506_v18  ;;  %v6739_v32 = vpack.c.bf16 %v1227_v24, %v1225_v23  ;;  %v291_v18 = vld [vmem:[#allocation2 + $0xe8] sm:$0xff] }
 0x3dc   : > { %7998 = vmatprep.subr.bf16.mxu0 %v7997_v30  ;;  %v2510_v30 = vld [vmem:[%s8909_s18 + $0x43c8] sm:$0xff]  ;;  %v8019_v33 = vpack.c.bf16 %v2507_v27, %v2505_v25  ;;  %v1245_v23 = vld [vmem:[%s8909_s18 + $0x1c40] sm:$0xff]  ;;  %v1247_v24 = vld [vmem:[%s8909_s18 + $0x1c50] sm:$0xff] }
 0x3dd   : > { %v2525_v25 = vld [vmem:[%s8909_s18 + $0x4440] sm:$0xff]  ;;  %v2527_v27 = vld [vmem:[%s8909_s18 + $0x4450] sm:$0xff] }
 0x3de   : > { %6720 = vmatpush1.bf16.msra.mxu1 %v6719_v36  ;;  %v1231_v36 = vld [vmem:[%s8909_s18 + $0x1bd0] sm:$0xff] }
 0x3df   : > { %8000 = vmatpush1.bf16.msra.mxu0 %v7999_v37  ;;  %6722 = vmatprep.subr.bf16.mxu1 %v6721_v38  ;;  %v2509_v37 = vld [vmem:[%s8909_s18 + $0x43c0] sm:$0xff]  ;;  %v8021_v38 = vpack.c.bf16 %v2512_v31, %v2510_v30  ;;  %v6743_v44 = vpack.c.bf16 %v1231_v36, %v1229_v35  ;;  %v2530_v30 = vld [vmem:[%s8909_s18 + $0x4468] sm:$0xff]  ;;  %v2532_v31 = vld [vmem:[%s8909_s18 + $0x4478] sm:$0xff] }
 0x3e0   : > { %8002 = vmatprep.subr.bf16.mxu0 %v8001_v42  ;;  %v2514_v42 = vld [vmem:[%s8909_s18 + $0x43e8] sm:$0xff]  ;;  %v8023_v45 = vpack.c.bf16 %v2511_v39, %v2509_v37  ;;  %v1249_v35 = vld [vmem:[%s8909_s18 + $0x1c60] sm:$0xff]  ;;  %v1251_v36 = vld [vmem:[%s8909_s18 + $0x1c70] sm:$0xff] }
 0x3e1   : > { %v2529_v37 = vld [vmem:[%s8909_s18 + $0x4460] sm:$0xff]  ;;  %v2531_v39 = vld [vmem:[%s8909_s18 + $0x4470] sm:$0xff] }
 0x3e2   : > { %6724 = vmatpush1.bf16.msra.mxu1 %v6723_v48  ;;  %v1235_v48 = vld [vmem:[%s8909_s18 + $0x1bf0] sm:$0xff] }
 0x3e3   : > { %8004 = vmatpush1.bf16.msra.mxu0 %v8003_v49  ;;  %6726 = vmatprep.subr.bf16.mxu1 %v6725_v50  ;;  %v2513_v49 = vld [vmem:[%s8909_s18 + $0x43e0] sm:$0xff]  ;;  %v8025_v50 = vpack.c.bf16 %v2516_v43, %v2514_v42  ;;  %v6747_v56 = vpack.c.bf16 %v1235_v48, %v1233_v47  ;;  %v2534_v42 = vld [vmem:[%s8909_s18 + $0x4488] sm:$0xff]  ;;  %v2536_v43 = vld [vmem:[%s8909_s18 + $0x4498] sm:$0xff] }
 0x3e4   : > { %8006 = vmatprep.subr.bf16.mxu0 %v8005_v54  ;;  %v2518_v54 = vld [vmem:[%s8909_s18 + $0x4408] sm:$0xff]  ;;  %v8027_v57 = vpack.c.bf16 %v2515_v51, %v2513_v49  ;;  %v1253_v47 = vld [vmem:[%s8909_s18 + $0x1c80] sm:$0xff]  ;;  %v1255_v48 = vld [vmem:[%s8909_s18 + $0x1c90] sm:$0xff] }
 0x3e5   : > { %v2533_v49 = vld [vmem:[%s8909_s18 + $0x4480] sm:$0xff]  ;;  %v2535_v51 = vld [vmem:[%s8909_s18 + $0x4490] sm:$0xff] }
 0x3e6   : > { %6728 = vmatpush1.bf16.msra.mxu1 %v6727_v60  ;;  %v1239_v60 = vld [vmem:[%s8909_s18 + $0x1c10] sm:$0xff] }
 0x3e7   : > { %8008 = vmatpush1.bf16.msra.mxu0 %v8007_v61  ;;  %6730 = vmatprep.subr.bf16.mxu1 %v6729_v62  ;;  %v2517_v61 = vld [vmem:[%s8909_s18 + $0x4400] sm:$0xff]  ;;  %v8029_v62 = vpack.c.bf16 %v2520_v55, %v2518_v54  ;;  %v6751_v5 = vpack.c.bf16 %v1239_v60, %v1237_v59  ;;  %v2538_v54 = vld [vmem:[%s8909_s18 + $0x44a8] sm:$0xff]  ;;  %v2540_v55 = vld [vmem:[%s8909_s18 + $0x44b8] sm:$0xff] }
 0x3e8   : > { %8010 = vmatprep.subr.bf16.mxu0 %v8009_v2  ;;  %v2522_v2 = vld [vmem:[%s8909_s18 + $0x4428] sm:$0xff]  ;;  %v8031_v7 = vpack.c.bf16 %v2519_v63, %v2517_v61  ;;  %v1257_v59 = vld [vmem:[%s8909_s18 + $0x1ca0] sm:$0xff]  ;;  %v1259_v60 = vld [vmem:[%s8909_s18 + $0x1cb0] sm:$0xff] }
 0x3e9   : > { %v8033_v12 = vpack.c.bf16 %v2524_v3, %v2522_v2  ;;  %v2537_v61 = vld [vmem:[%s8909_s18 + $0x44a0] sm:$0xff]  ;;  %v2539_v63 = vld [vmem:[%s8909_s18 + $0x44b0] sm:$0xff]  ;;  %v2542_v2 = vld [vmem:[%s8909_s18 + $0x44c8] sm:$0xff] }
 0x3ea   : > { %6732 = vmatpush1.bf16.msra.mxu1 %v6731_v8  ;;  %v6753_v8 = vpack.c.bf16 %v1244_v1, %v1242_v0  ;;  %v1262_v0 = vld [vmem:[%s8909_s18 + $0x1cc8] sm:$0xff]  ;;  %v1264_v1 = vld [vmem:[%s8909_s18 + $0x1cd8] sm:$0xff] }
 0x3eb   : > { %8012 = vmatpush1.bf16.msra.mxu0 %v8011_v9  ;;  %6734 = vmatprep.subr.bf16.mxu1 %v6733_v10  ;;  %v1241_v9 = vld [vmem:[%s8909_s18 + $0x1c20] sm:$0xff]  ;;  %v1243_v10 = vld [vmem:[%s8909_s18 + $0x1c30] sm:$0xff]  ;;  %v2544_v3 = vld [vmem:[%s8909_s18 + $0x44d8] sm:$0xff] }
 0x3ec   : > { %8014 = vmatprep.subr.bf16.mxu0 %v8013_v14  ;;  %v1246_v14 = vld [vmem:[%s8909_s18 + $0x1c48] sm:$0xff]  ;;  %v6755_v19 = vpack.c.bf16 %v1243_v10, %v1241_v9  ;;  %v2541_v9 = vld [vmem:[%s8909_s18 + $0x44c0] sm:$0xff]  ;;  %v8053_v10 = vpack.c.bf16 %v2544_v3, %v2542_v2 }
 0x3ed   : > { %v1281_v3 = vld [vmem:[%s8909_s18 + $0x1d60] sm:$0xff] }
 0x3ee   : > { %6736 = vmatpush1.bf16.msra.mxu1 %v6735_v20  ;;  %v331_v20 = vld [vmem:[#allocation2 + $0x228] sm:$0xff] }
 0x3ef   : > { %8016 = vmatpush1.bf16.msra.mxu0 %v8015_v21  ;;  %6738 = vmatprep.subr.bf16.mxu1 %v6737_v22  ;;  %v8035_v21 = vpack.c.bf16 %v2523_v13, %v2521_v11  ;;  %v6757_v22 = vpack.c.bf16 %v1248_v15, %v1246_v14  ;;  %v2543_v11 = vld [vmem:[%s8909_s18 + $0x44d0] sm:$0xff]  ;;  %v1268_v13 = vld [vmem:[%s8909_s18 + $0x1cf8] sm:$0xff]  ;;  %v2546_v14 = vld [vmem:[%s8909_s18 + $0x44e8] sm:$0xff] }
 0x3f0   : > { %8018 = vmatprep.subr.bf16.mxu0 %v8017_v26  ;;  %v8037_v26 = vpack.c.bf16 %v2528_v17, %v2526_v16  ;;  %v2548_v15 = vld [vmem:[%s8909_s18 + $0x44f8] sm:$0xff]  ;;  %v8055_v17 = vpack.c.bf16 %v2543_v11, %v2541_v9 }
 0x3f1   : > { %v1288_v9 = vld [vmem:[%s8909_s18 + $0x1d98] sm:$0xff] }
 0x3f2   : > { %6740 = vmatpush1.bf16.msra.mxu1 %v6739_v32  ;;  %v6759_v32 = vpack.c.bf16 %v1247_v24, %v1245_v23  ;;  %v2547_v23 = vld [vmem:[%s8909_s18 + $0x44f0] sm:$0xff]  ;;  %v1270_v24 = vld [vmem:[%s8909_s18 + $0x1d08] sm:$0xff]  ;;  %v2568_v11 = vld [vmem:[%s8909_s18 + $0x4598] sm:$0xff] }
 0x3f3   : > { %8020 = vmatpush1.bf16.msra.mxu0 %v8019_v33  ;;  %6742 = vmatprep.subr.bf16.mxu1 %v6741_v34  ;;  %v8039_v33 = vpack.c.bf16 %v2527_v27, %v2525_v25  ;;  %v6761_v34 = vpack.c.bf16 %v1252_v29, %v1250_v28  ;;  %v1272_v25 = vld [vmem:[%s8909_s18 + $0x1d18] sm:$0xff] }
 0x3f4   : > { %8022 = vmatprep.subr.bf16.mxu0 %v8021_v38  ;;  %v8041_v38 = vpack.c.bf16 %v2532_v31, %v2530_v30  ;;  %v2552_v27 = vld [vmem:[%s8909_s18 + $0x4518] sm:$0xff]  ;;  %v6781_v30 = vpack.c.bf16 %v1272_v25, %v1270_v24  ;;  %v1269_v31 = vld [vmem:[%s8909_s18 + $0x1d00] sm:$0xff] }
 0x3f6   : > { %6744 = vmatpush1.bf16.msra.mxu1 %v6743_v44  ;;  %v6763_v44 = vpack.c.bf16 %v1251_v36, %v1249_v35  ;;  %v2551_v35 = vld [vmem:[%s8909_s18 + $0x4510] sm:$0xff]  ;;  %v1274_v36 = vld [vmem:[%s8909_s18 + $0x1d28] sm:$0xff] }
 0x3f7   : > { %8024 = vmatpush1.bf16.msra.mxu0 %v8023_v45  ;;  %6746 = vmatprep.subr.bf16.mxu1 %v6745_v46  ;;  %v8043_v45 = vpack.c.bf16 %v2531_v39, %v2529_v37  ;;  %v6765_v46 = vpack.c.bf16 %v1256_v41, %v1254_v40  ;;  %v1276_v37 = vld [vmem:[%s8909_s18 + $0x1d38] sm:$0xff] }
 0x3f8   : > { %8026 = vmatprep.subr.bf16.mxu0 %v8025_v50  ;;  %v8045_v50 = vpack.c.bf16 %v2536_v43, %v2534_v42  ;;  %v2556_v39 = vld [vmem:[%s8909_s18 + $0x4538] sm:$0xff]  ;;  %v6785_v42 = vpack.c.bf16 %v1276_v37, %v1274_v36  ;;  %v1273_v43 = vld [vmem:[%s8909_s18 + $0x1d20] sm:$0xff] }
 0x3fa   : > { %6748 = vmatpush1.bf16.msra.mxu1 %v6747_v56  ;;  %v6767_v56 = vpack.c.bf16 %v1255_v48, %v1253_v47  ;;  %v2555_v47 = vld [vmem:[%s8909_s18 + $0x4530] sm:$0xff]  ;;  %v1278_v48 = vld [vmem:[%s8909_s18 + $0x1d48] sm:$0xff] }
 0x3fb   : > { %8028 = vmatpush1.bf16.msra.mxu0 %v8027_v57  ;;  %6750 = vmatprep.subr.bf16.mxu1 %v6749_v58  ;;  %v8047_v57 = vpack.c.bf16 %v2535_v51, %v2533_v49  ;;  %v6769_v58 = vpack.c.bf16 %v1260_v53, %v1258_v52  ;;  %v1280_v49 = vld [vmem:[%s8909_s18 + $0x1d58] sm:$0xff] }
 0x3fc   : > { %8030 = vmatprep.subr.bf16.mxu0 %v8029_v62  ;;  %v8049_v62 = vpack.c.bf16 %v2540_v55, %v2538_v54  ;;  %v2560_v51 = vld [vmem:[%s8909_s18 + $0x4558] sm:$0xff]  ;;  %v6789_v54 = vpack.c.bf16 %v1280_v49, %v1278_v48  ;;  %v1277_v55 = vld [vmem:[%s8909_s18 + $0x1d40] sm:$0xff] }
 0x3fd   : > { %3833 = vmatmul.mubr.f32.vlgmr.msra.gmra.mrb[0].mxu1 %v288_v4  ;;  %v6771_v4 = vpack.c.bf16 %v1259_v60, %v1257_v59  ;;  %v2559_v59 = vld [vmem:[%s8909_s18 + $0x4550] sm:$0xff]  ;;  %v1282_v60 = vld [vmem:[%s8909_s18 + $0x1d68] sm:$0xff] }
 0x3fe   : > { %6752 = vmatpush1.bf16.msra.mxu1 %v6751_v5  ;;  %5253 = vmatmul.mubr.f32.vlgmr.msra.gmra.mrb[0].mxu0 %v328_v6  ;;  %v8051_v5 = vpack.c.bf16 %v2539_v63, %v2537_v61  ;;  %v6773_v6 = vpack.c.bf16 %v1264_v1, %v1262_v0  ;;  %v1284_v61 = vld [vmem:[%s8909_s18 + $0x1d78] sm:$0xff] }
 0x3ff   : > { %8032 = vmatpush1.bf16.msra.mxu0 %v8031_v7  ;;  %6754 = vmatprep.subr.bf16.mxu1 %v6753_v8  ;;  %v1261_v7 = vld [vmem:[%s8909_s18 + $0x1cc0] sm:$0xff]  ;;  %v1263_v8 = vld [vmem:[%s8909_s18 + $0x1cd0] sm:$0xff]  ;;  %v2564_v63 = vld [vmem:[%s8909_s18 + $0x4578] sm:$0xff]  ;;  %v6793_v2 = vpack.c.bf16 %v1284_v61, %v1282_v60 }
 0x400   : > { %8034 = vmatprep.subr.bf16.mxu0 %v8033_v12  ;;  %3903 = vmatprep.mubr.f32.mxu1 %v291_v18  ;;  %v1266_v12 = vld [vmem:[%s8909_s18 + $0x1ce8] sm:$0xff]  ;;  %v6775_v16 = vpack.c.bf16 %v1263_v8, %v1261_v7  ;;  %v2563_v7 = vld [vmem:[%s8909_s18 + $0x4570] sm:$0xff] }
 0x401   : > { %5323 = vmatprep.mubr.f32.mxu0 %v331_v20  ;;  %v6777_v18 = vpack.c.bf16 %v1268_v13, %v1266_v12  ;;  %v1267_v20 = vld [vmem:[%s8909_s18 + $0x1cf0] sm:$0xff]  ;;  %v1286_v8 = vld [vmem:[%s8909_s18 + $0x1d88] sm:$0xff] }
 0x402   : > { %6756 = vmatpush1.bf16.msra.mxu1 %v6755_v19  ;;  %v1265_v19 = vld [vmem:[%s8909_s18 + $0x1ce0] sm:$0xff] }
 0x403   : > { %8036 = vmatpush1.bf16.msra.mxu0 %v8035_v21  ;;  %6758 = vmatprep.subr.bf16.mxu1 %v6757_v22  ;;  %v2545_v21 = vld [vmem:[%s8909_s18 + $0x44e0] sm:$0xff]  ;;  %v8057_v22 = vpack.c.bf16 %v2548_v15, %v2546_v14  ;;  %v6779_v28 = vpack.c.bf16 %v1267_v20, %v1265_v19  ;;  %v6797_v14 = vpack.c.bf16 %v1288_v9, %v1286_v8  ;;  %v2567_v19 = vld [vmem:[%s8909_s18 + $0x4590] sm:$0xff]  ;;  %v1290_v20 = vld [vmem:[%s8909_s18 + $0x1da8] sm:$0xff] }
 0x404   : > { %8038 = vmatprep.subr.bf16.mxu0 %v8037_v26  ;;  %v2550_v26 = vld [vmem:[%s8909_s18 + $0x4508] sm:$0xff]  ;;  %v8059_v29 = vpack.c.bf16 %v2547_v23, %v2545_v21  ;;  %v1285_v15 = vld [vmem:[%s8909_s18 + $0x1d80] sm:$0xff]  ;;  %v1292_v21 = vld [vmem:[%s8909_s18 + $0x1db8] sm:$0xff] }
 0x405   : > { %v2572_v23 = vld [vmem:[%s8909_s18 + $0x45b8] sm:$0xff]  ;;  %v290_v8 = vld [vmem:[#allocation2 + $0xe0] sm:$0xff] }
 0x406   : > { %6760 = vmatpush1.bf16.msra.mxu1 %v6759_v32  ;;  %v1271_v32 = vld [vmem:[%s8909_s18 + $0x1d10] sm:$0xff] }
 0x407   : > { %8040 = vmatpush1.bf16.msra.mxu0 %v8039_v33  ;;  %6762 = vmatprep.subr.bf16.mxu1 %v6761_v34  ;;  %v2549_v33 = vld [vmem:[%s8909_s18 + $0x4500] sm:$0xff]  ;;  %v8061_v34 = vpack.c.bf16 %v2552_v27, %v2550_v26  ;;  %v6783_v40 = vpack.c.bf16 %v1271_v32, %v1269_v31  ;;  %v6801_v26 = vpack.c.bf16 %v1292_v21, %v1290_v20  ;;  %v2571_v31 = vld [vmem:[%s8909_s18 + $0x45b0] sm:$0xff]  ;;  %v1294_v32 = vld [vmem:[%s8909_s18 + $0x1dc8] sm:$0xff] }
 0x408   : > { %8042 = vmatprep.subr.bf16.mxu0 %v8041_v38  ;;  %v2554_v38 = vld [vmem:[%s8909_s18 + $0x4528] sm:$0xff]  ;;  %v8063_v41 = vpack.c.bf16 %v2551_v35, %v2549_v33  ;;  %v1289_v27 = vld [vmem:[%s8909_s18 + $0x1da0] sm:$0xff]  ;;  %v1296_v33 = vld [vmem:[%s8909_s18 + $0x1dd8] sm:$0xff] }
 0x409   : > { %v2576_v35 = vld [vmem:[%s8909_s18 + $0x45d8] sm:$0xff]  ;;  %v2590_v20 = vld [vmem:[%s8909_s18 + $0x4648] sm:$0xff] }
 0x40a   : > { %6764 = vmatpush1.bf16.msra.mxu1 %v6763_v44  ;;  %v1275_v44 = vld [vmem:[%s8909_s18 + $0x1d30] sm:$0xff]  ;;  %v2592_v21 = vld [vmem:[%s8909_s18 + $0x4658] sm:$0xff] }
 0x40b   : > { %8044 = vmatpush1.bf16.msra.mxu0 %v8043_v45  ;;  %6766 = vmatprep.subr.bf16.mxu1 %v6765_v46  ;;  %v2553_v45 = vld [vmem:[%s8909_s18 + $0x4520] sm:$0xff]  ;;  %v8065_v46 = vpack.c.bf16 %v2556_v39, %v2554_v38  ;;  %v6787_v52 = vpack.c.bf16 %v1275_v44, %v1273_v43  ;;  %v6805_v38 = vpack.c.bf16 %v1296_v33, %v1294_v32  ;;  %v2575_v43 = vld [vmem:[%s8909_s18 + $0x45d0] sm:$0xff]  ;;  %v1298_v44 = vld [vmem:[%s8909_s18 + $0x1de8] sm:$0xff] }
 0x40c   : > { %8046 = vmatprep.subr.bf16.mxu0 %v8045_v50  ;;  %v2558_v50 = vld [vmem:[%s8909_s18 + $0x4548] sm:$0xff]  ;;  %v8067_v53 = vpack.c.bf16 %v2555_v47, %v2553_v45  ;;  %v1293_v39 = vld [vmem:[%s8909_s18 + $0x1dc0] sm:$0xff]  ;;  %v1300_v45 = vld [vmem:[%s8909_s18 + $0x1df8] sm:$0xff] }
 0x40d   : > { %v2580_v47 = vld [vmem:[%s8909_s18 + $0x45f8] sm:$0xff]  ;;  %v1314_v32 = vld [vmem:[%s8909_s18 + $0x1e68] sm:$0xff] }
 0x40e   : > { %6768 = vmatpush1.bf16.msra.mxu1 %v6767_v56  ;;  %v1279_v56 = vld [vmem:[%s8909_s18 + $0x1d50] sm:$0xff]  ;;  %v1316_v33 = vld [vmem:[%s8909_s18 + $0x1e78] sm:$0xff] }
 0x40f   : > { %8048 = vmatpush1.bf16.msra.mxu0 %v8047_v57  ;;  %6770 = vmatprep.subr.bf16.mxu1 %v6769_v58  ;;  %v2557_v57 = vld [vmem:[%s8909_s18 + $0x4540] sm:$0xff]  ;;  %v8069_v58 = vpack.c.bf16 %v2560_v51, %v2558_v50  ;;  %v6791_v0 = vpack.c.bf16 %v1279_v56, %v1277_v55  ;;  %v6809_v50 = vpack.c.bf16 %v1300_v45, %v1298_v44  ;;  %v2579_v55 = vld [vmem:[%s8909_s18 + $0x45f0] sm:$0xff]  ;;  %v1302_v56 = vld [vmem:[%s8909_s18 + $0x1e08] sm:$0xff] }
 0x410   : > { %8050 = vmatprep.subr.bf16.mxu0 %v8049_v62  ;;  %v2562_v62 = vld [vmem:[%s8909_s18 + $0x4568] sm:$0xff]  ;;  %v8071_v1 = vpack.c.bf16 %v2559_v59, %v2557_v57  ;;  %v1297_v51 = vld [vmem:[%s8909_s18 + $0x1de0] sm:$0xff]  ;;  %v1304_v57 = vld [vmem:[%s8909_s18 + $0x1e18] sm:$0xff] }
 0x411   : > { %v2584_v59 = vld [vmem:[%s8909_s18 + $0x4618] sm:$0xff]  ;;  %v1318_v44 = vld [vmem:[%s8909_s18 + $0x1e88] sm:$0xff] }
 0x412   : > { %6772 = vmatpush1.bf16.msra.mxu1 %v6771_v4  ;;  %v1283_v4 = vld [vmem:[%s8909_s18 + $0x1d70] sm:$0xff]  ;;  %v1320_v45 = vld [vmem:[%s8909_s18 + $0x1e98] sm:$0xff] }
 0x413   : > { %8052 = vmatpush1.bf16.msra.mxu0 %v8051_v5  ;;  %6774 = vmatprep.subr.bf16.mxu1 %v6773_v6  ;;  %v2561_v5 = vld [vmem:[%s8909_s18 + $0x4560] sm:$0xff]  ;;  %v8073_v6 = vpack.c.bf16 %v2564_v63, %v2562_v62  ;;  %v6795_v12 = vpack.c.bf16 %v1283_v4, %v1281_v3  ;;  %v6813_v62 = vpack.c.bf16 %v1304_v57, %v1302_v56  ;;  %v2583_v3 = vld [vmem:[%s8909_s18 + $0x4610] sm:$0xff]  ;;  %v1306_v4 = vld [vmem:[%s8909_s18 + $0x1e28] sm:$0xff] }
 0x414   : > { %8054 = vmatprep.subr.bf16.mxu0 %v8053_v10  ;;  %v2566_v10 = vld [vmem:[%s8909_s18 + $0x4588] sm:$0xff]  ;;  %v8075_v13 = vpack.c.bf16 %v2563_v7, %v2561_v5  ;;  %v1301_v63 = vld [vmem:[%s8909_s18 + $0x1e00] sm:$0xff]  ;;  %v1308_v5 = vld [vmem:[%s8909_s18 + $0x1e38] sm:$0xff] }
 0x415   : > { %v2588_v7 = vld [vmem:[%s8909_s18 + $0x4638] sm:$0xff]  ;;  %v1322_v56 = vld [vmem:[%s8909_s18 + $0x1ea8] sm:$0xff] }
 0x416   : > { %6776 = vmatpush1.bf16.msra.mxu1 %v6775_v16  ;;  %v1287_v16 = vld [vmem:[%s8909_s18 + $0x1d90] sm:$0xff]  ;;  %v1324_v57 = vld [vmem:[%s8909_s18 + $0x1eb8] sm:$0xff] }
 0x417   : > { %8056 = vmatpush1.bf16.msra.mxu0 %v8055_v17  ;;  %6778 = vmatprep.subr.bf16.mxu1 %v6777_v18  ;;  %v2565_v17 = vld [vmem:[%s8909_s18 + $0x4580] sm:$0xff]  ;;  %v8077_v18 = vpack.c.bf16 %v2568_v11, %v2566_v10  ;;  %v6799_v24 = vpack.c.bf16 %v1287_v16, %v1285_v15  ;;  %v330_v10 = vld [vmem:[#allocation2 + $0x220] sm:$0xff] }
 0x418   : > { %8058 = vmatprep.subr.bf16.mxu0 %v8057_v22  ;;  %v2570_v22 = vld [vmem:[%s8909_s18 + $0x45a8] sm:$0xff]  ;;  %v8079_v25 = vpack.c.bf16 %v2567_v19, %v2565_v17  ;;  %v2585_v15 = vld [vmem:[%s8909_s18 + $0x4620] sm:$0xff]  ;;  %v2587_v17 = vld [vmem:[%s8909_s18 + $0x4630] sm:$0xff] }
 0x419   : > { %v1312_v19 = vld [vmem:[%s8909_s18 + $0x1e58] sm:$0xff] }
 0x41a   : > { %6780 = vmatpush1.bf16.msra.mxu1 %v6779_v28  ;;  %v1291_v28 = vld [vmem:[%s8909_s18 + $0x1db0] sm:$0xff] }
 0x41b   : > { %8060 = vmatpush1.bf16.msra.mxu0 %v8059_v29  ;;  %6782 = vmatprep.subr.bf16.mxu1 %v6781_v30  ;;  %v2569_v29 = vld [vmem:[%s8909_s18 + $0x45a0] sm:$0xff]  ;;  %v8081_v30 = vpack.c.bf16 %v2572_v23, %v2570_v22  ;;  %v6803_v36 = vpack.c.bf16 %v1291_v28, %v1289_v27  ;;  %v1311_v28 = vld [vmem:[%s8909_s18 + $0x1e50] sm:$0xff] }
 0x41c   : > { %8062 = vmatprep.subr.bf16.mxu0 %v8061_v34  ;;  %v2574_v34 = vld [vmem:[%s8909_s18 + $0x45c8] sm:$0xff]  ;;  %v8083_v37 = vpack.c.bf16 %v2571_v31, %v2569_v29  ;;  %v293_v22 = vld [vmem:[#allocation2 + $0xf8] sm:$0xff]  ;;  %v2591_v31 = vld [vmem:[%s8909_s18 + $0x4650] sm:$0xff] }
 0x41d   : > { %v1309_v27 = vld [vmem:[%s8909_s18 + $0x1e40] sm:$0xff] }
 0x41e   : > { %6784 = vmatpush1.bf16.msra.mxu1 %v6783_v40  ;;  %v1295_v40 = vld [vmem:[%s8909_s18 + $0x1dd0] sm:$0xff]  ;;  %v2589_v29 = vld [vmem:[%s8909_s18 + $0x4640] sm:$0xff] }
 0x41f   : > { %8064 = vmatpush1.bf16.msra.mxu0 %v8063_v41  ;;  %6786 = vmatprep.subr.bf16.mxu1 %v6785_v42  ;;  %v2573_v41 = vld [vmem:[%s8909_s18 + $0x45c0] sm:$0xff]  ;;  %v8085_v42 = vpack.c.bf16 %v2576_v35, %v2574_v34  ;;  %v6807_v48 = vpack.c.bf16 %v1295_v40, %v1293_v39  ;;  %v2594_v34 = vld [vmem:[%s8909_s18 + $0x4668] sm:$0xff]  ;;  %v2596_v35 = vld [vmem:[%s8909_s18 + $0x4678] sm:$0xff] }
 0x420   : > { %8066 = vmatprep.subr.bf16.mxu0 %v8065_v46  ;;  %v2578_v46 = vld [vmem:[%s8909_s18 + $0x45e8] sm:$0xff]  ;;  %v8087_v49 = vpack.c.bf16 %v2575_v43, %v2573_v41  ;;  %v1313_v39 = vld [vmem:[%s8909_s18 + $0x1e60] sm:$0xff]  ;;  %v1315_v40 = vld [vmem:[%s8909_s18 + $0x1e70] sm:$0xff] }
 0x421   : > { %v2593_v41 = vld [vmem:[%s8909_s18 + $0x4660] sm:$0xff]  ;;  %v2595_v43 = vld [vmem:[%s8909_s18 + $0x4670] sm:$0xff] }
 0x422   : > { %6788 = vmatpush1.bf16.msra.mxu1 %v6787_v52  ;;  %v1299_v52 = vld [vmem:[%s8909_s18 + $0x1df0] sm:$0xff] }
 0x423   : > { %8068 = vmatpush1.bf16.msra.mxu0 %v8067_v53  ;;  %6790 = vmatprep.subr.bf16.mxu1 %v6789_v54  ;;  %v2577_v53 = vld [vmem:[%s8909_s18 + $0x45e0] sm:$0xff]  ;;  %v8089_v54 = vpack.c.bf16 %v2580_v47, %v2578_v46  ;;  %v6811_v60 = vpack.c.bf16 %v1299_v52, %v1297_v51  ;;  %v2598_v46 = vld [vmem:[%s8909_s18 + $0x4688] sm:$0xff]  ;;  %v2600_v47 = vld [vmem:[%s8909_s18 + $0x4698] sm:$0xff] }
 0x424   : > { %8070 = vmatprep.subr.bf16.mxu0 %v8069_v58  ;;  %v2582_v58 = vld [vmem:[%s8909_s18 + $0x4608] sm:$0xff]  ;;  %v8091_v61 = vpack.c.bf16 %v2579_v55, %v2577_v53  ;;  %v1317_v51 = vld [vmem:[%s8909_s18 + $0x1e80] sm:$0xff]  ;;  %v1319_v52 = vld [vmem:[%s8909_s18 + $0x1e90] sm:$0xff] }
 0x425   : > { %v2597_v53 = vld [vmem:[%s8909_s18 + $0x4680] sm:$0xff]  ;;  %v2599_v55 = vld [vmem:[%s8909_s18 + $0x4690] sm:$0xff] }
 0x426   : > { %6792 = vmatpush1.bf16.msra.mxu1 %v6791_v0  ;;  %v1303_v0 = vld [vmem:[%s8909_s18 + $0x1e10] sm:$0xff] }
 0x427   : > { %8072 = vmatpush1.bf16.msra.mxu0 %v8071_v1  ;;  %6794 = vmatprep.subr.bf16.mxu1 %v6793_v2  ;;  %v2581_v1 = vld [vmem:[%s8909_s18 + $0x4600] sm:$0xff]  ;;  %v8093_v2 = vpack.c.bf16 %v2584_v59, %v2582_v58  ;;  %v6815_v9 = vpack.c.bf16 %v1303_v0, %v1301_v63  ;;  %v2602_v58 = vld [vmem:[%s8909_s18 + $0x46a8] sm:$0xff]  ;;  %v2604_v59 = vld [vmem:[%s8909_s18 + $0x46b8] sm:$0xff] }
 0x428   : > { %8074 = vmatprep.subr.bf16.mxu0 %v8073_v6  ;;  %v2586_v6 = vld [vmem:[%s8909_s18 + $0x4628] sm:$0xff]  ;;  %v8095_v11 = vpack.c.bf16 %v2583_v3, %v2581_v1  ;;  %v1321_v63 = vld [vmem:[%s8909_s18 + $0x1ea0] sm:$0xff]  ;;  %v1323_v0 = vld [vmem:[%s8909_s18 + $0x1eb0] sm:$0xff] }
 0x429   : > { %v8097_v16 = vpack.c.bf16 %v2588_v7, %v2586_v6  ;;  %v2601_v1 = vld [vmem:[%s8909_s18 + $0x46a0] sm:$0xff]  ;;  %v2603_v3 = vld [vmem:[%s8909_s18 + $0x46b0] sm:$0xff]  ;;  %v2606_v6 = vld [vmem:[%s8909_s18 + $0x46c8] sm:$0xff] }
 0x42a   : > { %6796 = vmatpush1.bf16.msra.mxu1 %v6795_v12  ;;  %v6817_v12 = vpack.c.bf16 %v1308_v5, %v1306_v4  ;;  %v1326_v4 = vld [vmem:[%s8909_s18 + $0x1ec8] sm:$0xff]  ;;  %v1328_v5 = vld [vmem:[%s8909_s18 + $0x1ed8] sm:$0xff] }
 0x42b   : > { %8076 = vmatpush1.bf16.msra.mxu0 %v8075_v13  ;;  %6798 = vmatprep.subr.bf16.mxu1 %v6797_v14  ;;  %v1305_v13 = vld [vmem:[%s8909_s18 + $0x1e20] sm:$0xff]  ;;  %v1307_v14 = vld [vmem:[%s8909_s18 + $0x1e30] sm:$0xff]  ;;  %v2608_v7 = vld [vmem:[%s8909_s18 + $0x46d8] sm:$0xff] }
 0x42c   : > { %8078 = vmatprep.subr.bf16.mxu0 %v8077_v18  ;;  %v1310_v18 = vld [vmem:[%s8909_s18 + $0x1e48] sm:$0xff]  ;;  %v6819_v23 = vpack.c.bf16 %v1307_v14, %v1305_v13  ;;  %v2605_v13 = vld [vmem:[%s8909_s18 + $0x46c0] sm:$0xff]  ;;  %v8117_v14 = vpack.c.bf16 %v2608_v7, %v2606_v6 }
 0x42d   : > { %v1345_v7 = vld [vmem:[%s8909_s18 + $0x1f60] sm:$0xff] }
 0x42e   : > { %6800 = vmatpush1.bf16.msra.mxu1 %v6799_v24  ;;  %v333_v24 = vld [vmem:[#allocation2 + $0x238] sm:$0xff] }
 0x42f   : > { %8080 = vmatpush1.bf16.msra.mxu0 %v8079_v25  ;;  %6802 = vmatprep.subr.bf16.mxu1 %v6801_v26  ;;  %v8099_v25 = vpack.c.bf16 %v2587_v17, %v2585_v15  ;;  %v6821_v26 = vpack.c.bf16 %v1312_v19, %v1310_v18  ;;  %v2607_v15 = vld [vmem:[%s8909_s18 + $0x46d0] sm:$0xff]  ;;  %v1332_v17 = vld [vmem:[%s8909_s18 + $0x1ef8] sm:$0xff]  ;;  %v2610_v18 = vld [vmem:[%s8909_s18 + $0x46e8] sm:$0xff] }
 0x430   : > { %8082 = vmatprep.subr.bf16.mxu0 %v8081_v30  ;;  %v8101_v30 = vpack.c.bf16 %v2592_v21, %v2590_v20  ;;  %v2612_v19 = vld [vmem:[%s8909_s18 + $0x46f8] sm:$0xff]  ;;  %v8119_v21 = vpack.c.bf16 %v2607_v15, %v2605_v13 }
 0x431   : > { %v1352_v13 = vld [vmem:[%s8909_s18 + $0x1f98] sm:$0xff] }
 0x432   : > { %6804 = vmatpush1.bf16.msra.mxu1 %v6803_v36  ;;  %v6823_v36 = vpack.c.bf16 %v1311_v28, %v1309_v27  ;;  %v2611_v27 = vld [vmem:[%s8909_s18 + $0x46f0] sm:$0xff]  ;;  %v1334_v28 = vld [vmem:[%s8909_s18 + $0x1f08] sm:$0xff]  ;;  %v2632_v15 = vld [vmem:[%s8909_s18 + $0x4798] sm:$0xff] }
 0x433   : > { %8084 = vmatpush1.bf16.msra.mxu0 %v8083_v37  ;;  %6806 = vmatprep.subr.bf16.mxu1 %v6805_v38  ;;  %v8103_v37 = vpack.c.bf16 %v2591_v31, %v2589_v29  ;;  %v6825_v38 = vpack.c.bf16 %v1316_v33, %v1314_v32  ;;  %v1336_v29 = vld [vmem:[%s8909_s18 + $0x1f18] sm:$0xff] }
 0x434   : > { %8086 = vmatprep.subr.bf16.mxu0 %v8085_v42  ;;  %v8105_v42 = vpack.c.bf16 %v2596_v35, %v2594_v34  ;;  %v2616_v31 = vld [vmem:[%s8909_s18 + $0x4718] sm:$0xff]  ;;  %v6845_v34 = vpack.c.bf16 %v1336_v29, %v1334_v28  ;;  %v1333_v35 = vld [vmem:[%s8909_s18 + $0x1f00] sm:$0xff] }
 0x436   : > { %6808 = vmatpush1.bf16.msra.mxu1 %v6807_v48  ;;  %v6827_v48 = vpack.c.bf16 %v1315_v40, %v1313_v39  ;;  %v2615_v39 = vld [vmem:[%s8909_s18 + $0x4710] sm:$0xff]  ;;  %v1338_v40 = vld [vmem:[%s8909_s18 + $0x1f28] sm:$0xff] }
 0x437   : > { %8088 = vmatpush1.bf16.msra.mxu0 %v8087_v49  ;;  %6810 = vmatprep.subr.bf16.mxu1 %v6809_v50  ;;  %v8107_v49 = vpack.c.bf16 %v2595_v43, %v2593_v41  ;;  %v6829_v50 = vpack.c.bf16 %v1320_v45, %v1318_v44  ;;  %v1340_v41 = vld [vmem:[%s8909_s18 + $0x1f38] sm:$0xff] }
 0x438   : > { %8090 = vmatprep.subr.bf16.mxu0 %v8089_v54  ;;  %v8109_v54 = vpack.c.bf16 %v2600_v47, %v2598_v46  ;;  %v2620_v43 = vld [vmem:[%s8909_s18 + $0x4738] sm:$0xff]  ;;  %v6849_v46 = vpack.c.bf16 %v1340_v41, %v1338_v40  ;;  %v1337_v47 = vld [vmem:[%s8909_s18 + $0x1f20] sm:$0xff] }
 0x43a   : > { %6812 = vmatpush1.bf16.msra.mxu1 %v6811_v60  ;;  %v6831_v60 = vpack.c.bf16 %v1319_v52, %v1317_v51  ;;  %v2619_v51 = vld [vmem:[%s8909_s18 + $0x4730] sm:$0xff]  ;;  %v1342_v52 = vld [vmem:[%s8909_s18 + $0x1f48] sm:$0xff] }
 0x43b   : > { %8092 = vmatpush1.bf16.msra.mxu0 %v8091_v61  ;;  %6814 = vmatprep.subr.bf16.mxu1 %v6813_v62  ;;  %v8111_v61 = vpack.c.bf16 %v2599_v55, %v2597_v53  ;;  %v6833_v62 = vpack.c.bf16 %v1324_v57, %v1322_v56  ;;  %v1344_v53 = vld [vmem:[%s8909_s18 + $0x1f58] sm:$0xff] }
 0x43c   : > { %8094 = vmatprep.subr.bf16.mxu0 %v8093_v2  ;;  %v8113_v2 = vpack.c.bf16 %v2604_v59, %v2602_v58  ;;  %v2624_v55 = vld [vmem:[%s8909_s18 + $0x4758] sm:$0xff]  ;;  %v6853_v58 = vpack.c.bf16 %v1344_v53, %v1342_v52  ;;  %v1341_v59 = vld [vmem:[%s8909_s18 + $0x1f40] sm:$0xff] }
 0x43d   : > { %3904 = vmatmul.mubr.f32.vlgmr.msra.gmra.mrb[0].mxu1 %v290_v8  ;;  %v6835_v8 = vpack.c.bf16 %v1323_v0, %v1321_v63  ;;  %v2623_v63 = vld [vmem:[%s8909_s18 + $0x4750] sm:$0xff]  ;;  %v1346_v0 = vld [vmem:[%s8909_s18 + $0x1f68] sm:$0xff] }
 0x43e   : > { %6816 = vmatpush1.bf16.msra.mxu1 %v6815_v9  ;;  %5324 = vmatmul.mubr.f32.vlgmr.msra.gmra.mrb[0].mxu0 %v330_v10  ;;  %v8115_v9 = vpack.c.bf16 %v2603_v3, %v2601_v1  ;;  %v6837_v10 = vpack.c.bf16 %v1328_v5, %v1326_v4  ;;  %v1348_v1 = vld [vmem:[%s8909_s18 + $0x1f78] sm:$0xff] }
 0x43f   : > { %8096 = vmatpush1.bf16.msra.mxu0 %v8095_v11  ;;  %6818 = vmatprep.subr.bf16.mxu1 %v6817_v12  ;;  %v1325_v11 = vld [vmem:[%s8909_s18 + $0x1ec0] sm:$0xff]  ;;  %v1327_v12 = vld [vmem:[%s8909_s18 + $0x1ed0] sm:$0xff]  ;;  %v2628_v3 = vld [vmem:[%s8909_s18 + $0x4778] sm:$0xff]  ;;  %v6857_v6 = vpack.c.bf16 %v1348_v1, %v1346_v0 }
 0x440   : > { %8098 = vmatprep.subr.bf16.mxu0 %v8097_v16  ;;  %3974 = vmatprep.mubr.f32.mxu1 %v293_v22  ;;  %v1330_v16 = vld [vmem:[%s8909_s18 + $0x1ee8] sm:$0xff]  ;;  %v6839_v20 = vpack.c.bf16 %v1327_v12, %v1325_v11  ;;  %v2627_v11 = vld [vmem:[%s8909_s18 + $0x4770] sm:$0xff] }
 0x441   : > { %5394 = vmatprep.mubr.f32.mxu0 %v333_v24  ;;  %v6841_v22 = vpack.c.bf16 %v1332_v17, %v1330_v16  ;;  %v1331_v24 = vld [vmem:[%s8909_s18 + $0x1ef0] sm:$0xff]  ;;  %v1350_v12 = vld [vmem:[%s8909_s18 + $0x1f88] sm:$0xff] }
 0x442   : > { %6820 = vmatpush1.bf16.msra.mxu1 %v6819_v23  ;;  %v1329_v23 = vld [vmem:[%s8909_s18 + $0x1ee0] sm:$0xff] }
 0x443   : > { %8100 = vmatpush1.bf16.msra.mxu0 %v8099_v25  ;;  %6822 = vmatprep.subr.bf16.mxu1 %v6821_v26  ;;  %v2609_v25 = vld [vmem:[%s8909_s18 + $0x46e0] sm:$0xff]  ;;  %v8121_v26 = vpack.c.bf16 %v2612_v19, %v2610_v18  ;;  %v6843_v32 = vpack.c.bf16 %v1331_v24, %v1329_v23  ;;  %v6861_v18 = vpack.c.bf16 %v1352_v13, %v1350_v12  ;;  %v2631_v23 = vld [vmem:[%s8909_s18 + $0x4790] sm:$0xff]  ;;  %v1354_v24 = vld [vmem:[%s8909_s18 + $0x1fa8] sm:$0xff] }
 0x444   : > { %8102 = vmatprep.subr.bf16.mxu0 %v8101_v30  ;;  %v2614_v30 = vld [vmem:[%s8909_s18 + $0x4708] sm:$0xff]  ;;  %v8123_v33 = vpack.c.bf16 %v2611_v27, %v2609_v25  ;;  %v1349_v19 = vld [vmem:[%s8909_s18 + $0x1f80] sm:$0xff]  ;;  %v1356_v25 = vld [vmem:[%s8909_s18 + $0x1fb8] sm:$0xff] }
 0x445   : > { %v2636_v27 = vld [vmem:[%s8909_s18 + $0x47b8] sm:$0xff] }
 0x446   : > { %6824 = vmatpush1.bf16.msra.mxu1 %v6823_v36  ;;  %v1335_v36 = vld [vmem:[%s8909_s18 + $0x1f10] sm:$0xff]  ;;  %v292_v12 = vld [vmem:[#allocation2 + $0xf0] sm:$0xff] }
 0x447   : > { %8104 = vmatpush1.bf16.msra.mxu0 %v8103_v37  ;;  %6826 = vmatprep.subr.bf16.mxu1 %v6825_v38  ;;  %v2613_v37 = vld [vmem:[%s8909_s18 + $0x4700] sm:$0xff]  ;;  %v8125_v38 = vpack.c.bf16 %v2616_v31, %v2614_v30  ;;  %v6847_v44 = vpack.c.bf16 %v1335_v36, %v1333_v35  ;;  %v6865_v30 = vpack.c.bf16 %v1356_v25, %v1354_v24  ;;  %v2635_v35 = vld [vmem:[%s8909_s18 + $0x47b0] sm:$0xff]  ;;  %v1358_v36 = vld [vmem:[%s8909_s18 + $0x1fc8] sm:$0xff] }
 0x448   : > { %8106 = vmatprep.subr.bf16.mxu0 %v8105_v42  ;;  %v2618_v42 = vld [vmem:[%s8909_s18 + $0x4728] sm:$0xff]  ;;  %v8127_v45 = vpack.c.bf16 %v2615_v39, %v2613_v37  ;;  %v1353_v31 = vld [vmem:[%s8909_s18 + $0x1fa0] sm:$0xff]  ;;  %v1360_v37 = vld [vmem:[%s8909_s18 + $0x1fd8] sm:$0xff] }
 0x449   : > { %v2640_v39 = vld [vmem:[%s8909_s18 + $0x47d8] sm:$0xff]  ;;  %v2654_v24 = vld [vmem:[%s8909_s18 + $0x4848] sm:$0xff] }
 0x44a   : > { %6828 = vmatpush1.bf16.msra.mxu1 %v6827_v48  ;;  %v1339_v48 = vld [vmem:[%s8909_s18 + $0x1f30] sm:$0xff]  ;;  %v2656_v25 = vld [vmem:[%s8909_s18 + $0x4858] sm:$0xff] }
 0x44b   : > { %8108 = vmatpush1.bf16.msra.mxu0 %v8107_v49  ;;  %6830 = vmatprep.subr.bf16.mxu1 %v6829_v50  ;;  %v2617_v49 = vld [vmem:[%s8909_s18 + $0x4720] sm:$0xff]  ;;  %v8129_v50 = vpack.c.bf16 %v2620_v43, %v2618_v42  ;;  %v6851_v56 = vpack.c.bf16 %v1339_v48, %v1337_v47  ;;  %v6869_v42 = vpack.c.bf16 %v1360_v37, %v1358_v36  ;;  %v2639_v47 = vld [vmem:[%s8909_s18 + $0x47d0] sm:$0xff]  ;;  %v1362_v48 = vld [vmem:[%s8909_s18 + $0x1fe8] sm:$0xff] }
 0x44c   : > { %8110 = vmatprep.subr.bf16.mxu0 %v8109_v54  ;;  %v2622_v54 = vld [vmem:[%s8909_s18 + $0x4748] sm:$0xff]  ;;  %v8131_v57 = vpack.c.bf16 %v2619_v51, %v2617_v49  ;;  %v1357_v43 = vld [vmem:[%s8909_s18 + $0x1fc0] sm:$0xff]  ;;  %v1364_v49 = vld [vmem:[%s8909_s18 + $0x1ff8] sm:$0xff] }
 0x44d   : > { %v2644_v51 = vld [vmem:[%s8909_s18 + $0x47f8] sm:$0xff]  ;;  %v1378_v36 = vld [vmem:[%s8909_s18 + $0x2068] sm:$0xff] }
 0x44e   : > { %6832 = vmatpush1.bf16.msra.mxu1 %v6831_v60  ;;  %v1343_v60 = vld [vmem:[%s8909_s18 + $0x1f50] sm:$0xff]  ;;  %v1380_v37 = vld [vmem:[%s8909_s18 + $0x2078] sm:$0xff] }
 0x44f   : > { %8112 = vmatpush1.bf16.msra.mxu0 %v8111_v61  ;;  %6834 = vmatprep.subr.bf16.mxu1 %v6833_v62  ;;  %v2621_v61 = vld [vmem:[%s8909_s18 + $0x4740] sm:$0xff]  ;;  %v8133_v62 = vpack.c.bf16 %v2624_v55, %v2622_v54  ;;  %v6855_v4 = vpack.c.bf16 %v1343_v60, %v1341_v59  ;;  %v6873_v54 = vpack.c.bf16 %v1364_v49, %v1362_v48  ;;  %v2643_v59 = vld [vmem:[%s8909_s18 + $0x47f0] sm:$0xff]  ;;  %v1366_v60 = vld [vmem:[%s8909_s18 + $0x2008] sm:$0xff] }
 0x450   : > { %8114 = vmatprep.subr.bf16.mxu0 %v8113_v2  ;;  %v2626_v2 = vld [vmem:[%s8909_s18 + $0x4768] sm:$0xff]  ;;  %v8135_v5 = vpack.c.bf16 %v2623_v63, %v2621_v61  ;;  %v1361_v55 = vld [vmem:[%s8909_s18 + $0x1fe0] sm:$0xff]  ;;  %v1368_v61 = vld [vmem:[%s8909_s18 + $0x2018] sm:$0xff] }
 0x451   : > { %v2648_v63 = vld [vmem:[%s8909_s18 + $0x4818] sm:$0xff]  ;;  %v1382_v48 = vld [vmem:[%s8909_s18 + $0x2088] sm:$0xff] }
 0x452   : > { %6836 = vmatpush1.bf16.msra.mxu1 %v6835_v8  ;;  %v1347_v8 = vld [vmem:[%s8909_s18 + $0x1f70] sm:$0xff]  ;;  %v1384_v49 = vld [vmem:[%s8909_s18 + $0x2098] sm:$0xff] }
 0x453   : > { %8116 = vmatpush1.bf16.msra.mxu0 %v8115_v9  ;;  %6838 = vmatprep.subr.bf16.mxu1 %v6837_v10  ;;  %v2625_v9 = vld [vmem:[%s8909_s18 + $0x4760] sm:$0xff]  ;;  %v8137_v10 = vpack.c.bf16 %v2628_v3, %v2626_v2  ;;  %v6859_v16 = vpack.c.bf16 %v1347_v8, %v1345_v7  ;;  %v6877_v2 = vpack.c.bf16 %v1368_v61, %v1366_v60  ;;  %v2647_v7 = vld [vmem:[%s8909_s18 + $0x4810] sm:$0xff]  ;;  %v1370_v8 = vld [vmem:[%s8909_s18 + $0x2028] sm:$0xff] }
 0x454   : > { %8118 = vmatprep.subr.bf16.mxu0 %v8117_v14  ;;  %v2630_v14 = vld [vmem:[%s8909_s18 + $0x4788] sm:$0xff]  ;;  %v8139_v17 = vpack.c.bf16 %v2627_v11, %v2625_v9  ;;  %v1365_v3 = vld [vmem:[%s8909_s18 + $0x2000] sm:$0xff]  ;;  %v1372_v9 = vld [vmem:[%s8909_s18 + $0x2038] sm:$0xff] }
 0x455   : > { %v2652_v11 = vld [vmem:[%s8909_s18 + $0x4838] sm:$0xff]  ;;  %v1386_v60 = vld [vmem:[%s8909_s18 + $0x20a8] sm:$0xff] }
 0x456   : > { %6840 = vmatpush1.bf16.msra.mxu1 %v6839_v20  ;;  %v1351_v20 = vld [vmem:[%s8909_s18 + $0x1f90] sm:$0xff]  ;;  %v1388_v61 = vld [vmem:[%s8909_s18 + $0x20b8] sm:$0xff] }
 0x457   : > { %8120 = vmatpush1.bf16.msra.mxu0 %v8119_v21  ;;  %6842 = vmatprep.subr.bf16.mxu1 %v6841_v22  ;;  %v2629_v21 = vld [vmem:[%s8909_s18 + $0x4780] sm:$0xff]  ;;  %v8141_v22 = vpack.c.bf16 %v2632_v15, %v2630_v14  ;;  %v6863_v28 = vpack.c.bf16 %v1351_v20, %v1349_v19  ;;  %v332_v14 = vld [vmem:[#allocation2 + $0x230] sm:$0xff] }
 0x458   : > { %8122 = vmatprep.subr.bf16.mxu0 %v8121_v26  ;;  %v2634_v26 = vld [vmem:[%s8909_s18 + $0x47a8] sm:$0xff]  ;;  %v8143_v29 = vpack.c.bf16 %v2631_v23, %v2629_v21  ;;  %v2649_v19 = vld [vmem:[%s8909_s18 + $0x4820] sm:$0xff]  ;;  %v2651_v21 = vld [vmem:[%s8909_s18 + $0x4830] sm:$0xff] }
 0x459   : > { %v1376_v23 = vld [vmem:[%s8909_s18 + $0x2058] sm:$0xff] }
 0x45a   : > { %6844 = vmatpush1.bf16.msra.mxu1 %v6843_v32  ;;  %v1355_v32 = vld [vmem:[%s8909_s18 + $0x1fb0] sm:$0xff] }
 0x45b   : > { %8124 = vmatpush1.bf16.msra.mxu0 %v8123_v33  ;;  %6846 = vmatprep.subr.bf16.mxu1 %v6845_v34  ;;  %v2633_v33 = vld [vmem:[%s8909_s18 + $0x47a0] sm:$0xff]  ;;  %v8145_v34 = vpack.c.bf16 %v2636_v27, %v2634_v26  ;;  %v6867_v40 = vpack.c.bf16 %v1355_v32, %v1353_v31  ;;  %v295_v26 = vld [vmem:[#allocation2 + $0x108] sm:$0xff] }
 0x45c   : > { %8126 = vmatprep.subr.bf16.mxu0 %v8125_v38  ;;  %v2638_v38 = vld [vmem:[%s8909_s18 + $0x47c8] sm:$0xff]  ;;  %v8147_v41 = vpack.c.bf16 %v2635_v35, %v2633_v33  ;;  %v1373_v31 = vld [vmem:[%s8909_s18 + $0x2040] sm:$0xff]  ;;  %v1375_v32 = vld [vmem:[%s8909_s18 + $0x2050] sm:$0xff] }
 0x45d   : > { %v2653_v33 = vld [vmem:[%s8909_s18 + $0x4840] sm:$0xff]  ;;  %v2655_v35 = vld [vmem:[%s8909_s18 + $0x4850] sm:$0xff] }
 0x45e   : > { %6848 = vmatpush1.bf16.msra.mxu1 %v6847_v44  ;;  %v1359_v44 = vld [vmem:[%s8909_s18 + $0x1fd0] sm:$0xff] }
 0x45f   : > { %8128 = vmatpush1.bf16.msra.mxu0 %v8127_v45  ;;  %6850 = vmatprep.subr.bf16.mxu1 %v6849_v46  ;;  %v2637_v45 = vld [vmem:[%s8909_s18 + $0x47c0] sm:$0xff]  ;;  %v8149_v46 = vpack.c.bf16 %v2640_v39, %v2638_v38  ;;  %v6871_v52 = vpack.c.bf16 %v1359_v44, %v1357_v43  ;;  %v2658_v38 = vld [vmem:[%s8909_s18 + $0x4868] sm:$0xff]  ;;  %v2660_v39 = vld [vmem:[%s8909_s18 + $0x4878] sm:$0xff] }
 0x460   : > { %8130 = vmatprep.subr.bf16.mxu0 %v8129_v50  ;;  %v2642_v50 = vld [vmem:[%s8909_s18 + $0x47e8] sm:$0xff]  ;;  %v8151_v53 = vpack.c.bf16 %v2639_v47, %v2637_v45  ;;  %v1377_v43 = vld [vmem:[%s8909_s18 + $0x2060] sm:$0xff]  ;;  %v1379_v44 = vld [vmem:[%s8909_s18 + $0x2070] sm:$0xff] }
 0x461   : > { %v2657_v45 = vld [vmem:[%s8909_s18 + $0x4860] sm:$0xff]  ;;  %v2659_v47 = vld [vmem:[%s8909_s18 + $0x4870] sm:$0xff] }
 0x462   : > { %6852 = vmatpush1.bf16.msra.mxu1 %v6851_v56  ;;  %v1363_v56 = vld [vmem:[%s8909_s18 + $0x1ff0] sm:$0xff] }
 0x463   : > { %8132 = vmatpush1.bf16.msra.mxu0 %v8131_v57  ;;  %6854 = vmatprep.subr.bf16.mxu1 %v6853_v58  ;;  %v2641_v57 = vld [vmem:[%s8909_s18 + $0x47e0] sm:$0xff]  ;;  %v8153_v58 = vpack.c.bf16 %v2644_v51, %v2642_v50  ;;  %v6875_v0 = vpack.c.bf16 %v1363_v56, %v1361_v55  ;;  %v2662_v50 = vld [vmem:[%s8909_s18 + $0x4888] sm:$0xff]  ;;  %v2664_v51 = vld [vmem:[%s8909_s18 + $0x4898] sm:$0xff] }
 0x464   : > { %8134 = vmatprep.subr.bf16.mxu0 %v8133_v62  ;;  %v2646_v62 = vld [vmem:[%s8909_s18 + $0x4808] sm:$0xff]  ;;  %v8155_v1 = vpack.c.bf16 %v2643_v59, %v2641_v57  ;;  %v1381_v55 = vld [vmem:[%s8909_s18 + $0x2080] sm:$0xff]  ;;  %v1383_v56 = vld [vmem:[%s8909_s18 + $0x2090] sm:$0xff] }
 0x465   : > { %v2661_v57 = vld [vmem:[%s8909_s18 + $0x4880] sm:$0xff]  ;;  %v2663_v59 = vld [vmem:[%s8909_s18 + $0x4890] sm:$0xff] }
 0x466   : > { %6856 = vmatpush1.bf16.msra.mxu1 %v6855_v4  ;;  %v1367_v4 = vld [vmem:[%s8909_s18 + $0x2010] sm:$0xff] }
 0x467   : > { %8136 = vmatpush1.bf16.msra.mxu0 %v8135_v5  ;;  %6858 = vmatprep.subr.bf16.mxu1 %v6857_v6  ;;  %v2645_v5 = vld [vmem:[%s8909_s18 + $0x4800] sm:$0xff]  ;;  %v8157_v6 = vpack.c.bf16 %v2648_v63, %v2646_v62  ;;  %v6879_v13 = vpack.c.bf16 %v1367_v4, %v1365_v3  ;;  %v2666_v62 = vld [vmem:[%s8909_s18 + $0x48a8] sm:$0xff]  ;;  %v2668_v63 = vld [vmem:[%s8909_s18 + $0x48b8] sm:$0xff] }
 0x468   : > { %8138 = vmatprep.subr.bf16.mxu0 %v8137_v10  ;;  %v2650_v10 = vld [vmem:[%s8909_s18 + $0x4828] sm:$0xff]  ;;  %v8159_v15 = vpack.c.bf16 %v2647_v7, %v2645_v5  ;;  %v1385_v3 = vld [vmem:[%s8909_s18 + $0x20a0] sm:$0xff]  ;;  %v1387_v4 = vld [vmem:[%s8909_s18 + $0x20b0] sm:$0xff] }
 0x469   : > { %v8161_v20 = vpack.c.bf16 %v2652_v11, %v2650_v10  ;;  %v2665_v5 = vld [vmem:[%s8909_s18 + $0x48a0] sm:$0xff]  ;;  %v2667_v7 = vld [vmem:[%s8909_s18 + $0x48b0] sm:$0xff]  ;;  %v2670_v10 = vld [vmem:[%s8909_s18 + $0x48c8] sm:$0xff] }
 0x46a   : > { %6860 = vmatpush1.bf16.msra.mxu1 %v6859_v16  ;;  %v6881_v16 = vpack.c.bf16 %v1372_v9, %v1370_v8  ;;  %v1390_v8 = vld [vmem:[%s8909_s18 + $0x20c8] sm:$0xff]  ;;  %v1392_v9 = vld [vmem:[%s8909_s18 + $0x20d8] sm:$0xff] }
 0x46b   : > { %8140 = vmatpush1.bf16.msra.mxu0 %v8139_v17  ;;  %6862 = vmatprep.subr.bf16.mxu1 %v6861_v18  ;;  %v1369_v17 = vld [vmem:[%s8909_s18 + $0x2020] sm:$0xff]  ;;  %v1371_v18 = vld [vmem:[%s8909_s18 + $0x2030] sm:$0xff]  ;;  %v2672_v11 = vld [vmem:[%s8909_s18 + $0x48d8] sm:$0xff] }
 0x46c   : > { %8142 = vmatprep.subr.bf16.mxu0 %v8141_v22  ;;  %v1374_v22 = vld [vmem:[%s8909_s18 + $0x2048] sm:$0xff]  ;;  %v6883_v27 = vpack.c.bf16 %v1371_v18, %v1369_v17  ;;  %v2669_v17 = vld [vmem:[%s8909_s18 + $0x48c0] sm:$0xff]  ;;  %v8181_v18 = vpack.c.bf16 %v2672_v11, %v2670_v10 }
 0x46d   : > { %v1409_v11 = vld [vmem:[%s8909_s18 + $0x2160] sm:$0xff] }
 0x46e   : > { %6864 = vmatpush1.bf16.msra.mxu1 %v6863_v28  ;;  %v335_v28 = vld [vmem:[#allocation2 + $0x248] sm:$0xff] }
 0x46f   : > { %8144 = vmatpush1.bf16.msra.mxu0 %v8143_v29  ;;  %6866 = vmatprep.subr.bf16.mxu1 %v6865_v30  ;;  %v8163_v29 = vpack.c.bf16 %v2651_v21, %v2649_v19  ;;  %v6885_v30 = vpack.c.bf16 %v1376_v23, %v1374_v22  ;;  %v2671_v19 = vld [vmem:[%s8909_s18 + $0x48d0] sm:$0xff]  ;;  %v1396_v21 = vld [vmem:[%s8909_s18 + $0x20f8] sm:$0xff]  ;;  %v2674_v22 = vld [vmem:[%s8909_s18 + $0x48e8] sm:$0xff] }
 0x470   : > { %8146 = vmatprep.subr.bf16.mxu0 %v8145_v34  ;;  %v8165_v34 = vpack.c.bf16 %v2656_v25, %v2654_v24  ;;  %v2676_v23 = vld [vmem:[%s8909_s18 + $0x48f8] sm:$0xff]  ;;  %v8183_v25 = vpack.c.bf16 %v2671_v19, %v2669_v17 }
 0x471   : > { %v1416_v17 = vld [vmem:[%s8909_s18 + $0x2198] sm:$0xff] }
 0x472   : > { %6868 = vmatpush1.bf16.msra.mxu1 %v6867_v40  ;;  %v6887_v40 = vpack.c.bf16 %v1375_v32, %v1373_v31  ;;  %v2675_v31 = vld [vmem:[%s8909_s18 + $0x48f0] sm:$0xff]  ;;  %v1398_v32 = vld [vmem:[%s8909_s18 + $0x2108] sm:$0xff]  ;;  %v2696_v19 = vld [vmem:[%s8909_s18 + $0x4998] sm:$0xff] }
 0x473   : > { %8148 = vmatpush1.bf16.msra.mxu0 %v8147_v41  ;;  %6870 = vmatprep.subr.bf16.mxu1 %v6869_v42  ;;  %v8167_v41 = vpack.c.bf16 %v2655_v35, %v2653_v33  ;;  %v6889_v42 = vpack.c.bf16 %v1380_v37, %v1378_v36  ;;  %v1400_v33 = vld [vmem:[%s8909_s18 + $0x2118] sm:$0xff] }
 0x474   : > { %8150 = vmatprep.subr.bf16.mxu0 %v8149_v46  ;;  %v8169_v46 = vpack.c.bf16 %v2660_v39, %v2658_v38  ;;  %v2680_v35 = vld [vmem:[%s8909_s18 + $0x4918] sm:$0xff]  ;;  %v6909_v38 = vpack.c.bf16 %v1400_v33, %v1398_v32  ;;  %v1397_v39 = vld [vmem:[%s8909_s18 + $0x2100] sm:$0xff] }
 0x476   : > { %6872 = vmatpush1.bf16.msra.mxu1 %v6871_v52  ;;  %v6891_v52 = vpack.c.bf16 %v1379_v44, %v1377_v43  ;;  %v2679_v43 = vld [vmem:[%s8909_s18 + $0x4910] sm:$0xff]  ;;  %v1402_v44 = vld [vmem:[%s8909_s18 + $0x2128] sm:$0xff] }
 0x477   : > { %8152 = vmatpush1.bf16.msra.mxu0 %v8151_v53  ;;  %6874 = vmatprep.subr.bf16.mxu1 %v6873_v54  ;;  %v8171_v53 = vpack.c.bf16 %v2659_v47, %v2657_v45  ;;  %v6893_v54 = vpack.c.bf16 %v1384_v49, %v1382_v48  ;;  %v1404_v45 = vld [vmem:[%s8909_s18 + $0x2138] sm:$0xff] }
 0x478   : > { %8154 = vmatprep.subr.bf16.mxu0 %v8153_v58  ;;  %v8173_v58 = vpack.c.bf16 %v2664_v51, %v2662_v50  ;;  %v2684_v47 = vld [vmem:[%s8909_s18 + $0x4938] sm:$0xff]  ;;  %v6913_v50 = vpack.c.bf16 %v1404_v45, %v1402_v44  ;;  %v1401_v51 = vld [vmem:[%s8909_s18 + $0x2120] sm:$0xff] }
 0x47a   : > { %6876 = vmatpush1.bf16.msra.mxu1 %v6875_v0  ;;  %v6895_v0 = vpack.c.bf16 %v1383_v56, %v1381_v55  ;;  %v2683_v55 = vld [vmem:[%s8909_s18 + $0x4930] sm:$0xff]  ;;  %v1406_v56 = vld [vmem:[%s8909_s18 + $0x2148] sm:$0xff] }
 0x47b   : > { %8156 = vmatpush1.bf16.msra.mxu0 %v8155_v1  ;;  %6878 = vmatprep.subr.bf16.mxu1 %v6877_v2  ;;  %v8175_v1 = vpack.c.bf16 %v2663_v59, %v2661_v57  ;;  %v6897_v2 = vpack.c.bf16 %v1388_v61, %v1386_v60  ;;  %v1408_v57 = vld [vmem:[%s8909_s18 + $0x2158] sm:$0xff] }
 0x47c   : > { %8158 = vmatprep.subr.bf16.mxu0 %v8157_v6  ;;  %v8177_v6 = vpack.c.bf16 %v2668_v63, %v2666_v62  ;;  %v2688_v59 = vld [vmem:[%s8909_s18 + $0x4958] sm:$0xff]  ;;  %v6917_v62 = vpack.c.bf16 %v1408_v57, %v1406_v56  ;;  %v1405_v63 = vld [vmem:[%s8909_s18 + $0x2140] sm:$0xff] }
 0x47d   : > { %3975 = vmatmul.mubr.f32.vlgmr.msra.gmra.mrb[0].mxu1 %v292_v12  ;;  %v6899_v12 = vpack.c.bf16 %v1387_v4, %v1385_v3  ;;  %v2687_v3 = vld [vmem:[%s8909_s18 + $0x4950] sm:$0xff]  ;;  %v1410_v4 = vld [vmem:[%s8909_s18 + $0x2168] sm:$0xff] }
 0x47e   : > { %6880 = vmatpush1.bf16.msra.mxu1 %v6879_v13  ;;  %5395 = vmatmul.mubr.f32.vlgmr.msra.gmra.mrb[0].mxu0 %v332_v14  ;;  %v8179_v13 = vpack.c.bf16 %v2667_v7, %v2665_v5  ;;  %v6901_v14 = vpack.c.bf16 %v1392_v9, %v1390_v8  ;;  %v1412_v5 = vld [vmem:[%s8909_s18 + $0x2178] sm:$0xff] }
 0x47f   : > { %8160 = vmatpush1.bf16.msra.mxu0 %v8159_v15  ;;  %6882 = vmatprep.subr.bf16.mxu1 %v6881_v16  ;;  %v1389_v15 = vld [vmem:[%s8909_s18 + $0x20c0] sm:$0xff]  ;;  %v1391_v16 = vld [vmem:[%s8909_s18 + $0x20d0] sm:$0xff]  ;;  %v2692_v7 = vld [vmem:[%s8909_s18 + $0x4978] sm:$0xff]  ;;  %v6921_v10 = vpack.c.bf16 %v1412_v5, %v1410_v4 }
 0x480   : > { %8162 = vmatprep.subr.bf16.mxu0 %v8161_v20  ;;  %4045 = vmatprep.mubr.f32.mxu1 %v295_v26  ;;  %v1394_v20 = vld [vmem:[%s8909_s18 + $0x20e8] sm:$0xff]  ;;  %v6903_v24 = vpack.c.bf16 %v1391_v16, %v1389_v15  ;;  %v2691_v15 = vld [vmem:[%s8909_s18 + $0x4970] sm:$0xff] }
 0x481   : > { %5465 = vmatprep.mubr.f32.mxu0 %v335_v28  ;;  %v6905_v26 = vpack.c.bf16 %v1396_v21, %v1394_v20  ;;  %v1395_v28 = vld [vmem:[%s8909_s18 + $0x20f0] sm:$0xff]  ;;  %v1414_v16 = vld [vmem:[%s8909_s18 + $0x2188] sm:$0xff] }
 0x482   : > { %6884 = vmatpush1.bf16.msra.mxu1 %v6883_v27  ;;  %v1393_v27 = vld [vmem:[%s8909_s18 + $0x20e0] sm:$0xff] }
 0x483   : > { %8164 = vmatpush1.bf16.msra.mxu0 %v8163_v29  ;;  %6886 = vmatprep.subr.bf16.mxu1 %v6885_v30  ;;  %v2673_v29 = vld [vmem:[%s8909_s18 + $0x48e0] sm:$0xff]  ;;  %v8185_v30 = vpack.c.bf16 %v2676_v23, %v2674_v22  ;;  %v6907_v36 = vpack.c.bf16 %v1395_v28, %v1393_v27  ;;  %v6925_v22 = vpack.c.bf16 %v1416_v17, %v1414_v16  ;;  %v2695_v27 = vld [vmem:[%s8909_s18 + $0x4990] sm:$0xff]  ;;  %v1418_v28 = vld [vmem:[%s8909_s18 + $0x21a8] sm:$0xff] }
 0x484   : > { %8166 = vmatprep.subr.bf16.mxu0 %v8165_v34  ;;  %v2678_v34 = vld [vmem:[%s8909_s18 + $0x4908] sm:$0xff]  ;;  %v8187_v37 = vpack.c.bf16 %v2675_v31, %v2673_v29  ;;  %v1413_v23 = vld [vmem:[%s8909_s18 + $0x2180] sm:$0xff]  ;;  %v1420_v29 = vld [vmem:[%s8909_s18 + $0x21b8] sm:$0xff] }
 0x485   : > { %v2700_v31 = vld [vmem:[%s8909_s18 + $0x49b8] sm:$0xff]  ;;  %v294_v16 = vld [vmem:[#allocation2 + $0x100] sm:$0xff] }
 0x486   : > { %6888 = vmatpush1.bf16.msra.mxu1 %v6887_v40  ;;  %v1399_v40 = vld [vmem:[%s8909_s18 + $0x2110] sm:$0xff] }
 0x487   : > { %8168 = vmatpush1.bf16.msra.mxu0 %v8167_v41  ;;  %6890 = vmatprep.subr.bf16.mxu1 %v6889_v42  ;;  %v2677_v41 = vld [vmem:[%s8909_s18 + $0x4900] sm:$0xff]  ;;  %v8189_v42 = vpack.c.bf16 %v2680_v35, %v2678_v34  ;;  %v6911_v48 = vpack.c.bf16 %v1399_v40, %v1397_v39  ;;  %v6929_v34 = vpack.c.bf16 %v1420_v29, %v1418_v28  ;;  %v2699_v39 = vld [vmem:[%s8909_s18 + $0x49b0] sm:$0xff]  ;;  %v1422_v40 = vld [vmem:[%s8909_s18 + $0x21c8] sm:$0xff] }
 0x488   : > { %8170 = vmatprep.subr.bf16.mxu0 %v8169_v46  ;;  %v2682_v46 = vld [vmem:[%s8909_s18 + $0x4928] sm:$0xff]  ;;  %v8191_v49 = vpack.c.bf16 %v2679_v43, %v2677_v41  ;;  %v1417_v35 = vld [vmem:[%s8909_s18 + $0x21a0] sm:$0xff]  ;;  %v1424_v41 = vld [vmem:[%s8909_s18 + $0x21d8] sm:$0xff] }
 0x489   : > { %v2704_v43 = vld [vmem:[%s8909_s18 + $0x49d8] sm:$0xff]  ;;  %v2718_v28 = vld [vmem:[%s8909_s18 + $0x4a48] sm:$0xff] }
 0x48a   : > { %6892 = vmatpush1.bf16.msra.mxu1 %v6891_v52  ;;  %v1403_v52 = vld [vmem:[%s8909_s18 + $0x2130] sm:$0xff]  ;;  %v2720_v29 = vld [vmem:[%s8909_s18 + $0x4a58] sm:$0xff] }
 0x48b   : > { %8172 = vmatpush1.bf16.msra.mxu0 %v8171_v53  ;;  %6894 = vmatprep.subr.bf16.mxu1 %v6893_v54  ;;  %v2681_v53 = vld [vmem:[%s8909_s18 + $0x4920] sm:$0xff]  ;;  %v8193_v54 = vpack.c.bf16 %v2684_v47, %v2682_v46  ;;  %v6915_v60 = vpack.c.bf16 %v1403_v52, %v1401_v51  ;;  %v6933_v46 = vpack.c.bf16 %v1424_v41, %v1422_v40  ;;  %v2703_v51 = vld [vmem:[%s8909_s18 + $0x49d0] sm:$0xff]  ;;  %v1426_v52 = vld [vmem:[%s8909_s18 + $0x21e8] sm:$0xff] }
 0x48c   : > { %8174 = vmatprep.subr.bf16.mxu0 %v8173_v58  ;;  %v2686_v58 = vld [vmem:[%s8909_s18 + $0x4948] sm:$0xff]  ;;  %v8195_v61 = vpack.c.bf16 %v2683_v55, %v2681_v53  ;;  %v1421_v47 = vld [vmem:[%s8909_s18 + $0x21c0] sm:$0xff]  ;;  %v1428_v53 = vld [vmem:[%s8909_s18 + $0x21f8] sm:$0xff] }
 0x48d   : > { %v2708_v55 = vld [vmem:[%s8909_s18 + $0x49f8] sm:$0xff]  ;;  %v1442_v40 = vld [vmem:[%s8909_s18 + $0x2268] sm:$0xff] }
 0x48e   : > { %6896 = vmatpush1.bf16.msra.mxu1 %v6895_v0  ;;  %v1407_v0 = vld [vmem:[%s8909_s18 + $0x2150] sm:$0xff]  ;;  %v1444_v41 = vld [vmem:[%s8909_s18 + $0x2278] sm:$0xff] }
 0x48f   : > { %8176 = vmatpush1.bf16.msra.mxu0 %v8175_v1  ;;  %6898 = vmatprep.subr.bf16.mxu1 %v6897_v2  ;;  %v2685_v1 = vld [vmem:[%s8909_s18 + $0x4940] sm:$0xff]  ;;  %v8197_v2 = vpack.c.bf16 %v2688_v59, %v2686_v58  ;;  %v6919_v8 = vpack.c.bf16 %v1407_v0, %v1405_v63  ;;  %v6937_v58 = vpack.c.bf16 %v1428_v53, %v1426_v52  ;;  %v2707_v63 = vld [vmem:[%s8909_s18 + $0x49f0] sm:$0xff]  ;;  %v1430_v0 = vld [vmem:[%s8909_s18 + $0x2208] sm:$0xff] }
 0x490   : > { %8178 = vmatprep.subr.bf16.mxu0 %v8177_v6  ;;  %v2690_v6 = vld [vmem:[%s8909_s18 + $0x4968] sm:$0xff]  ;;  %v8199_v9 = vpack.c.bf16 %v2687_v3, %v2685_v1  ;;  %v1425_v59 = vld [vmem:[%s8909_s18 + $0x21e0] sm:$0xff]  ;;  %v1432_v1 = vld [vmem:[%s8909_s18 + $0x2218] sm:$0xff] }
 0x491   : > { %v2712_v3 = vld [vmem:[%s8909_s18 + $0x4a18] sm:$0xff]  ;;  %v1446_v52 = vld [vmem:[%s8909_s18 + $0x2288] sm:$0xff] }
 0x492   : > { %6900 = vmatpush1.bf16.msra.mxu1 %v6899_v12  ;;  %v1411_v12 = vld [vmem:[%s8909_s18 + $0x2170] sm:$0xff]  ;;  %v1448_v53 = vld [vmem:[%s8909_s18 + $0x2298] sm:$0xff] }
 0x493   : > { %8180 = vmatpush1.bf16.msra.mxu0 %v8179_v13  ;;  %6902 = vmatprep.subr.bf16.mxu1 %v6901_v14  ;;  %v2689_v13 = vld [vmem:[%s8909_s18 + $0x4960] sm:$0xff]  ;;  %v8201_v14 = vpack.c.bf16 %v2692_v7, %v2690_v6  ;;  %v6923_v20 = vpack.c.bf16 %v1411_v12, %v1409_v11  ;;  %v6941_v6 = vpack.c.bf16 %v1432_v1, %v1430_v0  ;;  %v2711_v11 = vld [vmem:[%s8909_s18 + $0x4a10] sm:$0xff]  ;;  %v1434_v12 = vld [vmem:[%s8909_s18 + $0x2228] sm:$0xff] }
 0x494   : > { %8182 = vmatprep.subr.bf16.mxu0 %v8181_v18  ;;  %v2694_v18 = vld [vmem:[%s8909_s18 + $0x4988] sm:$0xff]  ;;  %v8203_v21 = vpack.c.bf16 %v2691_v15, %v2689_v13  ;;  %v1429_v7 = vld [vmem:[%s8909_s18 + $0x2200] sm:$0xff]  ;;  %v1436_v13 = vld [vmem:[%s8909_s18 + $0x2238] sm:$0xff] }
 0x495   : > { %v2716_v15 = vld [vmem:[%s8909_s18 + $0x4a38] sm:$0xff]  ;;  %v1450_v0 = vld [vmem:[%s8909_s18 + $0x22a8] sm:$0xff] }
 0x496   : > { %6904 = vmatpush1.bf16.msra.mxu1 %v6903_v24  ;;  %v1415_v24 = vld [vmem:[%s8909_s18 + $0x2190] sm:$0xff]  ;;  %v1452_v1 = vld [vmem:[%s8909_s18 + $0x22b8] sm:$0xff] }
 0x497   : > { %8184 = vmatpush1.bf16.msra.mxu0 %v8183_v25  ;;  %6906 = vmatprep.subr.bf16.mxu1 %v6905_v26  ;;  %v2693_v25 = vld [vmem:[%s8909_s18 + $0x4980] sm:$0xff]  ;;  %v8205_v26 = vpack.c.bf16 %v2696_v19, %v2694_v18  ;;  %v6927_v32 = vpack.c.bf16 %v1415_v24, %v1413_v23  ;;  %v334_v18 = vld [vmem:[#allocation2 + $0x240] sm:$0xff] }
 0x498   : > { %8186 = vmatprep.subr.bf16.mxu0 %v8185_v30  ;;  %v2698_v30 = vld [vmem:[%s8909_s18 + $0x49a8] sm:$0xff]  ;;  %v8207_v33 = vpack.c.bf16 %v2695_v27, %v2693_v25  ;;  %v2713_v23 = vld [vmem:[%s8909_s18 + $0x4a20] sm:$0xff]  ;;  %v2715_v25 = vld [vmem:[%s8909_s18 + $0x4a30] sm:$0xff] }
 0x499   : > { %v1440_v27 = vld [vmem:[%s8909_s18 + $0x2258] sm:$0xff] }
 0x49a   : > { %6908 = vmatpush1.bf16.msra.mxu1 %v6907_v36  ;;  %v1419_v36 = vld [vmem:[%s8909_s18 + $0x21b0] sm:$0xff] }
 0x49b   : > { %8188 = vmatpush1.bf16.msra.mxu0 %v8187_v37  ;;  %6910 = vmatprep.subr.bf16.mxu1 %v6909_v38  ;;  %v2697_v37 = vld [vmem:[%s8909_s18 + $0x49a0] sm:$0xff]  ;;  %v8209_v38 = vpack.c.bf16 %v2700_v31, %v2698_v30  ;;  %v6931_v44 = vpack.c.bf16 %v1419_v36, %v1417_v35  ;;  %v1439_v36 = vld [vmem:[%s8909_s18 + $0x2250] sm:$0xff] }
 0x49c   : > { %8190 = vmatprep.subr.bf16.mxu0 %v8189_v42  ;;  %v2702_v42 = vld [vmem:[%s8909_s18 + $0x49c8] sm:$0xff]  ;;  %v8211_v45 = vpack.c.bf16 %v2699_v39, %v2697_v37  ;;  %v297_v30 = vld [vmem:[#allocation2 + $0x118] sm:$0xff]  ;;  %v2719_v39 = vld [vmem:[%s8909_s18 + $0x4a50] sm:$0xff] }
 0x49d   : > { %v1437_v35 = vld [vmem:[%s8909_s18 + $0x2240] sm:$0xff] }
 0x49e   : > { %6912 = vmatpush1.bf16.msra.mxu1 %v6911_v48  ;;  %v1423_v48 = vld [vmem:[%s8909_s18 + $0x21d0] sm:$0xff]  ;;  %v2717_v37 = vld [vmem:[%s8909_s18 + $0x4a40] sm:$0xff] }
 0x49f   : > { %8192 = vmatpush1.bf16.msra.mxu0 %v8191_v49  ;;  %6914 = vmatprep.subr.bf16.mxu1 %v6913_v50  ;;  %v2701_v49 = vld [vmem:[%s8909_s18 + $0x49c0] sm:$0xff]  ;;  %v8213_v50 = vpack.c.bf16 %v2704_v43, %v2702_v42  ;;  %v6935_v56 = vpack.c.bf16 %v1423_v48, %v1421_v47  ;;  %v2722_v42 = vld [vmem:[%s8909_s18 + $0x4a68] sm:$0xff]  ;;  %v2724_v43 = vld [vmem:[%s8909_s18 + $0x4a78] sm:$0xff] }
 0x4a0   : > { %8194 = vmatprep.subr.bf16.mxu0 %v8193_v54  ;;  %v2706_v54 = vld [vmem:[%s8909_s18 + $0x49e8] sm:$0xff]  ;;  %v8215_v57 = vpack.c.bf16 %v2703_v51, %v2701_v49  ;;  %v1441_v47 = vld [vmem:[%s8909_s18 + $0x2260] sm:$0xff]  ;;  %v1443_v48 = vld [vmem:[%s8909_s18 + $0x2270] sm:$0xff] }
 0x4a1   : > { %v2721_v49 = vld [vmem:[%s8909_s18 + $0x4a60] sm:$0xff]  ;;  %v2723_v51 = vld [vmem:[%s8909_s18 + $0x4a70] sm:$0xff] }
 0x4a2   : > { %6916 = vmatpush1.bf16.msra.mxu1 %v6915_v60  ;;  %v1427_v60 = vld [vmem:[%s8909_s18 + $0x21f0] sm:$0xff] }
 0x4a3   : > { %8196 = vmatpush1.bf16.msra.mxu0 %v8195_v61  ;;  %6918 = vmatprep.subr.bf16.mxu1 %v6917_v62  ;;  %v2705_v61 = vld [vmem:[%s8909_s18 + $0x49e0] sm:$0xff]  ;;  %v8217_v62 = vpack.c.bf16 %v2708_v55, %v2706_v54  ;;  %v6939_v4 = vpack.c.bf16 %v1427_v60, %v1425_v59  ;;  %v2726_v54 = vld [vmem:[%s8909_s18 + $0x4a88] sm:$0xff]  ;;  %v2728_v55 = vld [vmem:[%s8909_s18 + $0x4a98] sm:$0xff] }
 0x4a4   : > { %8198 = vmatprep.subr.bf16.mxu0 %v8197_v2  ;;  %v2710_v2 = vld [vmem:[%s8909_s18 + $0x4a08] sm:$0xff]  ;;  %v8219_v5 = vpack.c.bf16 %v2707_v63, %v2705_v61  ;;  %v1445_v59 = vld [vmem:[%s8909_s18 + $0x2280] sm:$0xff]  ;;  %v1447_v60 = vld [vmem:[%s8909_s18 + $0x2290] sm:$0xff] }
 0x4a5   : > { %v2725_v61 = vld [vmem:[%s8909_s18 + $0x4a80] sm:$0xff]  ;;  %v2727_v63 = vld [vmem:[%s8909_s18 + $0x4a90] sm:$0xff] }
 0x4a6   : > { %6920 = vmatpush1.bf16.msra.mxu1 %v6919_v8  ;;  %v1431_v8 = vld [vmem:[%s8909_s18 + $0x2210] sm:$0xff] }
 0x4a7   : > { %8200 = vmatpush1.bf16.msra.mxu0 %v8199_v9  ;;  %6922 = vmatprep.subr.bf16.mxu1 %v6921_v10  ;;  %v2709_v9 = vld [vmem:[%s8909_s18 + $0x4a00] sm:$0xff]  ;;  %v8221_v10 = vpack.c.bf16 %v2712_v3, %v2710_v2  ;;  %v6943_v17 = vpack.c.bf16 %v1431_v8, %v1429_v7  ;;  %v2730_v2 = vld [vmem:[%s8909_s18 + $0x4aa8] sm:$0xff]  ;;  %v2732_v3 = vld [vmem:[%s8909_s18 + $0x4ab8] sm:$0xff] }
 0x4a8   : > { %8202 = vmatprep.subr.bf16.mxu0 %v8201_v14  ;;  %v2714_v14 = vld [vmem:[%s8909_s18 + $0x4a28] sm:$0xff]  ;;  %v8223_v19 = vpack.c.bf16 %v2711_v11, %v2709_v9  ;;  %v1449_v7 = vld [vmem:[%s8909_s18 + $0x22a0] sm:$0xff]  ;;  %v1451_v8 = vld [vmem:[%s8909_s18 + $0x22b0] sm:$0xff] }
 0x4a9   : > { %v8225_v24 = vpack.c.bf16 %v2716_v15, %v2714_v14  ;;  %v2729_v9 = vld [vmem:[%s8909_s18 + $0x4aa0] sm:$0xff]  ;;  %v2731_v11 = vld [vmem:[%s8909_s18 + $0x4ab0] sm:$0xff]  ;;  %v2734_v14 = vld [vmem:[%s8909_s18 + $0x4ac8] sm:$0xff] }
 0x4aa   : > { %6924 = vmatpush1.bf16.msra.mxu1 %v6923_v20  ;;  %v6945_v20 = vpack.c.bf16 %v1436_v13, %v1434_v12  ;;  %v1454_v12 = vld [vmem:[%s8909_s18 + $0x22c8] sm:$0xff]  ;;  %v1456_v13 = vld [vmem:[%s8909_s18 + $0x22d8] sm:$0xff] }
 0x4ab   : > { %8204 = vmatpush1.bf16.msra.mxu0 %v8203_v21  ;;  %6926 = vmatprep.subr.bf16.mxu1 %v6925_v22  ;;  %v1433_v21 = vld [vmem:[%s8909_s18 + $0x2220] sm:$0xff]  ;;  %v1435_v22 = vld [vmem:[%s8909_s18 + $0x2230] sm:$0xff]  ;;  %v2736_v15 = vld [vmem:[%s8909_s18 + $0x4ad8] sm:$0xff] }
 0x4ac   : > { %8206 = vmatprep.subr.bf16.mxu0 %v8205_v26  ;;  %v1438_v26 = vld [vmem:[%s8909_s18 + $0x2248] sm:$0xff]  ;;  %v6947_v31 = vpack.c.bf16 %v1435_v22, %v1433_v21  ;;  %v2733_v21 = vld [vmem:[%s8909_s18 + $0x4ac0] sm:$0xff]  ;;  %v8245_v22 = vpack.c.bf16 %v2736_v15, %v2734_v14 }
 0x4ad   : > { %v1473_v15 = vld [vmem:[%s8909_s18 + $0x2360] sm:$0xff] }
 0x4ae   : > { %6928 = vmatpush1.bf16.msra.mxu1 %v6927_v32  ;;  %v337_v32 = vld [vmem:[#allocation2 + $0x258] sm:$0xff] }
 0x4af   : > { %8208 = vmatpush1.bf16.msra.mxu0 %v8207_v33  ;;  %6930 = vmatprep.subr.bf16.mxu1 %v6929_v34  ;;  %v8227_v33 = vpack.c.bf16 %v2715_v25, %v2713_v23  ;;  %v6949_v34 = vpack.c.bf16 %v1440_v27, %v1438_v26  ;;  %v2735_v23 = vld [vmem:[%s8909_s18 + $0x4ad0] sm:$0xff]  ;;  %v1460_v25 = vld [vmem:[%s8909_s18 + $0x22f8] sm:$0xff]  ;;  %v2738_v26 = vld [vmem:[%s8909_s18 + $0x4ae8] sm:$0xff] }
 0x4b0   : > { %8210 = vmatprep.subr.bf16.mxu0 %v8209_v38  ;;  %v8229_v38 = vpack.c.bf16 %v2720_v29, %v2718_v28  ;;  %v2740_v27 = vld [vmem:[%s8909_s18 + $0x4af8] sm:$0xff]  ;;  %v8247_v29 = vpack.c.bf16 %v2735_v23, %v2733_v21 }
 0x4b1   : > { %v1480_v21 = vld [vmem:[%s8909_s18 + $0x2398] sm:$0xff] }
 0x4b2   : > { %6932 = vmatpush1.bf16.msra.mxu1 %v6931_v44  ;;  %v6951_v44 = vpack.c.bf16 %v1439_v36, %v1437_v35  ;;  %v2739_v35 = vld [vmem:[%s8909_s18 + $0x4af0] sm:$0xff]  ;;  %v1462_v36 = vld [vmem:[%s8909_s18 + $0x2308] sm:$0xff]  ;;  %v2760_v23 = vld [vmem:[%s8909_s18 + $0x4b98] sm:$0xff] }
 0x4b3   : > { %8212 = vmatpush1.bf16.msra.mxu0 %v8211_v45  ;;  %6934 = vmatprep.subr.bf16.mxu1 %v6933_v46  ;;  %v8231_v45 = vpack.c.bf16 %v2719_v39, %v2717_v37  ;;  %v6953_v46 = vpack.c.bf16 %v1444_v41, %v1442_v40  ;;  %v1464_v37 = vld [vmem:[%s8909_s18 + $0x2318] sm:$0xff] }
 0x4b4   : > { %8214 = vmatprep.subr.bf16.mxu0 %v8213_v50  ;;  %v8233_v50 = vpack.c.bf16 %v2724_v43, %v2722_v42  ;;  %v2744_v39 = vld [vmem:[%s8909_s18 + $0x4b18] sm:$0xff]  ;;  %v6973_v42 = vpack.c.bf16 %v1464_v37, %v1462_v36  ;;  %v1461_v43 = vld [vmem:[%s8909_s18 + $0x2300] sm:$0xff] }
 0x4b6   : > { %6936 = vmatpush1.bf16.msra.mxu1 %v6935_v56  ;;  %v6955_v56 = vpack.c.bf16 %v1443_v48, %v1441_v47  ;;  %v2743_v47 = vld [vmem:[%s8909_s18 + $0x4b10] sm:$0xff]  ;;  %v1466_v48 = vld [vmem:[%s8909_s18 + $0x2328] sm:$0xff] }
 0x4b7   : > { %8216 = vmatpush1.bf16.msra.mxu0 %v8215_v57  ;;  %6938 = vmatprep.subr.bf16.mxu1 %v6937_v58  ;;  %v8235_v57 = vpack.c.bf16 %v2723_v51, %v2721_v49  ;;  %v6957_v58 = vpack.c.bf16 %v1448_v53, %v1446_v52  ;;  %v1468_v49 = vld [vmem:[%s8909_s18 + $0x2338] sm:$0xff] }
 0x4b8   : > { %8218 = vmatprep.subr.bf16.mxu0 %v8217_v62  ;;  %v8237_v62 = vpack.c.bf16 %v2728_v55, %v2726_v54  ;;  %v2748_v51 = vld [vmem:[%s8909_s18 + $0x4b38] sm:$0xff]  ;;  %v6977_v54 = vpack.c.bf16 %v1468_v49, %v1466_v48  ;;  %v1465_v55 = vld [vmem:[%s8909_s18 + $0x2320] sm:$0xff] }
 0x4ba   : > { %6940 = vmatpush1.bf16.msra.mxu1 %v6939_v4  ;;  %v6959_v4 = vpack.c.bf16 %v1447_v60, %v1445_v59  ;;  %v2747_v59 = vld [vmem:[%s8909_s18 + $0x4b30] sm:$0xff]  ;;  %v1470_v60 = vld [vmem:[%s8909_s18 + $0x2348] sm:$0xff] }
 0x4bb   : > { %8220 = vmatpush1.bf16.msra.mxu0 %v8219_v5  ;;  %6942 = vmatprep.subr.bf16.mxu1 %v6941_v6  ;;  %v8239_v5 = vpack.c.bf16 %v2727_v63, %v2725_v61  ;;  %v6961_v6 = vpack.c.bf16 %v1452_v1, %v1450_v0  ;;  %v1472_v61 = vld [vmem:[%s8909_s18 + $0x2358] sm:$0xff] }
 0x4bc   : > { %8222 = vmatprep.subr.bf16.mxu0 %v8221_v10  ;;  %v8241_v10 = vpack.c.bf16 %v2732_v3, %v2730_v2  ;;  %v2752_v63 = vld [vmem:[%s8909_s18 + $0x4b58] sm:$0xff]  ;;  %v6981_v2 = vpack.c.bf16 %v1472_v61, %v1470_v60  ;;  %v1469_v3 = vld [vmem:[%s8909_s18 + $0x2340] sm:$0xff] }
 0x4bd   : > { %4046 = vmatmul.mubr.f32.vlgmr.msra.gmra.mrb[0].mxu1 %v294_v16  ;;  %v6963_v16 = vpack.c.bf16 %v1451_v8, %v1449_v7  ;;  %v2751_v7 = vld [vmem:[%s8909_s18 + $0x4b50] sm:$0xff]  ;;  %v1474_v8 = vld [vmem:[%s8909_s18 + $0x2368] sm:$0xff] }
 0x4be   : > { %6944 = vmatpush1.bf16.msra.mxu1 %v6943_v17  ;;  %5466 = vmatmul.mubr.f32.vlgmr.msra.gmra.mrb[0].mxu0 %v334_v18  ;;  %v8243_v17 = vpack.c.bf16 %v2731_v11, %v2729_v9  ;;  %v6965_v18 = vpack.c.bf16 %v1456_v13, %v1454_v12  ;;  %v1476_v9 = vld [vmem:[%s8909_s18 + $0x2378] sm:$0xff] }
 0x4bf   : > { %8224 = vmatpush1.bf16.msra.mxu0 %v8223_v19  ;;  %6946 = vmatprep.subr.bf16.mxu1 %v6945_v20  ;;  %v1453_v19 = vld [vmem:[%s8909_s18 + $0x22c0] sm:$0xff]  ;;  %v1455_v20 = vld [vmem:[%s8909_s18 + $0x22d0] sm:$0xff]  ;;  %v2756_v11 = vld [vmem:[%s8909_s18 + $0x4b78] sm:$0xff]  ;;  %v6985_v14 = vpack.c.bf16 %v1476_v9, %v1474_v8 }
 0x4c0   : > { %8226 = vmatprep.subr.bf16.mxu0 %v8225_v24  ;;  %4116 = vmatprep.mubr.f32.mxu1 %v297_v30  ;;  %v1458_v24 = vld [vmem:[%s8909_s18 + $0x22e8] sm:$0xff]  ;;  %v6967_v28 = vpack.c.bf16 %v1455_v20, %v1453_v19  ;;  %v2755_v19 = vld [vmem:[%s8909_s18 + $0x4b70] sm:$0xff] }
 0x4c1   : > { %5536 = vmatprep.mubr.f32.mxu0 %v337_v32  ;;  %v6969_v30 = vpack.c.bf16 %v1460_v25, %v1458_v24  ;;  %v1459_v32 = vld [vmem:[%s8909_s18 + $0x22f0] sm:$0xff]  ;;  %v1478_v20 = vld [vmem:[%s8909_s18 + $0x2388] sm:$0xff] }
 0x4c2   : > { %6948 = vmatpush1.bf16.msra.mxu1 %v6947_v31  ;;  %v1457_v31 = vld [vmem:[%s8909_s18 + $0x22e0] sm:$0xff] }
 0x4c3   : > { %8228 = vmatpush1.bf16.msra.mxu0 %v8227_v33  ;;  %6950 = vmatprep.subr.bf16.mxu1 %v6949_v34  ;;  %v2737_v33 = vld [vmem:[%s8909_s18 + $0x4ae0] sm:$0xff]  ;;  %v8249_v34 = vpack.c.bf16 %v2740_v27, %v2738_v26  ;;  %v6971_v40 = vpack.c.bf16 %v1459_v32, %v1457_v31  ;;  %v6989_v26 = vpack.c.bf16 %v1480_v21, %v1478_v20  ;;  %v2759_v31 = vld [vmem:[%s8909_s18 + $0x4b90] sm:$0xff]  ;;  %v1482_v32 = vld [vmem:[%s8909_s18 + $0x23a8] sm:$0xff] }
 0x4c4   : > { %8230 = vmatprep.subr.bf16.mxu0 %v8229_v38  ;;  %v2742_v38 = vld [vmem:[%s8909_s18 + $0x4b08] sm:$0xff]  ;;  %v8251_v41 = vpack.c.bf16 %v2739_v35, %v2737_v33  ;;  %v1477_v27 = vld [vmem:[%s8909_s18 + $0x2380] sm:$0xff]  ;;  %v1484_v33 = vld [vmem:[%s8909_s18 + $0x23b8] sm:$0xff] }
 0x4c5   : > { %v2764_v35 = vld [vmem:[%s8909_s18 + $0x4bb8] sm:$0xff] }
 0x4c6   : > { %6952 = vmatpush1.bf16.msra.mxu1 %v6951_v44  ;;  %v1463_v44 = vld [vmem:[%s8909_s18 + $0x2310] sm:$0xff]  ;;  %v296_v20 = vld [vmem:[#allocation2 + $0x110] sm:$0xff] }
 0x4c7   : > { %8232 = vmatpush1.bf16.msra.mxu0 %v8231_v45  ;;  %6954 = vmatprep.subr.bf16.mxu1 %v6953_v46  ;;  %v2741_v45 = vld [vmem:[%s8909_s18 + $0x4b00] sm:$0xff]  ;;  %v8253_v46 = vpack.c.bf16 %v2744_v39, %v2742_v38  ;;  %v6975_v52 = vpack.c.bf16 %v1463_v44, %v1461_v43  ;;  %v6993_v38 = vpack.c.bf16 %v1484_v33, %v1482_v32  ;;  %v2763_v43 = vld [vmem:[%s8909_s18 + $0x4bb0] sm:$0xff]  ;;  %v1486_v44 = vld [vmem:[%s8909_s18 + $0x23c8] sm:$0xff] }
 0x4c8   : > { %8234 = vmatprep.subr.bf16.mxu0 %v8233_v50  ;;  %v2746_v50 = vld [vmem:[%s8909_s18 + $0x4b28] sm:$0xff]  ;;  %v8255_v53 = vpack.c.bf16 %v2743_v47, %v2741_v45  ;;  %v1481_v39 = vld [vmem:[%s8909_s18 + $0x23a0] sm:$0xff]  ;;  %v1488_v45 = vld [vmem:[%s8909_s18 + $0x23d8] sm:$0xff] }
 0x4c9   : > { %v2768_v47 = vld [vmem:[%s8909_s18 + $0x4bd8] sm:$0xff]  ;;  %v2782_v32 = vld [vmem:[%s8909_s18 + $0x4c48] sm:$0xff] }
 0x4ca   : > { %6956 = vmatpush1.bf16.msra.mxu1 %v6955_v56  ;;  %v1467_v56 = vld [vmem:[%s8909_s18 + $0x2330] sm:$0xff]  ;;  %v2784_v33 = vld [vmem:[%s8909_s18 + $0x4c58] sm:$0xff] }
 0x4cb   : > { %8236 = vmatpush1.bf16.msra.mxu0 %v8235_v57  ;;  %6958 = vmatprep.subr.bf16.mxu1 %v6957_v58  ;;  %v2745_v57 = vld [vmem:[%s8909_s18 + $0x4b20] sm:$0xff]  ;;  %v8257_v58 = vpack.c.bf16 %v2748_v51, %v2746_v50  ;;  %v6979_v0 = vpack.c.bf16 %v1467_v56, %v1465_v55  ;;  %v6997_v50 = vpack.c.bf16 %v1488_v45, %v1486_v44  ;;  %v2767_v55 = vld [vmem:[%s8909_s18 + $0x4bd0] sm:$0xff]  ;;  %v1490_v56 = vld [vmem:[%s8909_s18 + $0x23e8] sm:$0xff] }
 0x4cc   : > { %8238 = vmatprep.subr.bf16.mxu0 %v8237_v62  ;;  %v2750_v62 = vld [vmem:[%s8909_s18 + $0x4b48] sm:$0xff]  ;;  %v8259_v1 = vpack.c.bf16 %v2747_v59, %v2745_v57  ;;  %v1485_v51 = vld [vmem:[%s8909_s18 + $0x23c0] sm:$0xff]  ;;  %v1492_v57 = vld [vmem:[%s8909_s18 + $0x23f8] sm:$0xff] }
 0x4cd   : > { %v2772_v59 = vld [vmem:[%s8909_s18 + $0x4bf8] sm:$0xff]  ;;  %v1506_v44 = vld [vmem:[%s8909_s18 + $0x2468] sm:$0xff] }
 0x4ce   : > { %6960 = vmatpush1.bf16.msra.mxu1 %v6959_v4  ;;  %v1471_v4 = vld [vmem:[%s8909_s18 + $0x2350] sm:$0xff]  ;;  %v1508_v45 = vld [vmem:[%s8909_s18 + $0x2478] sm:$0xff] }
 0x4cf   : > { %8240 = vmatpush1.bf16.msra.mxu0 %v8239_v5  ;;  %6962 = vmatprep.subr.bf16.mxu1 %v6961_v6  ;;  %v2749_v5 = vld [vmem:[%s8909_s18 + $0x4b40] sm:$0xff]  ;;  %v8261_v6 = vpack.c.bf16 %v2752_v63, %v2750_v62  ;;  %v6983_v12 = vpack.c.bf16 %v1471_v4, %v1469_v3  ;;  %v7001_v62 = vpack.c.bf16 %v1492_v57, %v1490_v56  ;;  %v2771_v3 = vld [vmem:[%s8909_s18 + $0x4bf0] sm:$0xff]  ;;  %v1494_v4 = vld [vmem:[%s8909_s18 + $0x2408] sm:$0xff] }
 0x4d0   : > { %8242 = vmatprep.subr.bf16.mxu0 %v8241_v10  ;;  %v2754_v10 = vld [vmem:[%s8909_s18 + $0x4b68] sm:$0xff]  ;;  %v8263_v13 = vpack.c.bf16 %v2751_v7, %v2749_v5  ;;  %v1489_v63 = vld [vmem:[%s8909_s18 + $0x23e0] sm:$0xff]  ;;  %v1496_v5 = vld [vmem:[%s8909_s18 + $0x2418] sm:$0xff] }
 0x4d1   : > { %v2776_v7 = vld [vmem:[%s8909_s18 + $0x4c18] sm:$0xff]  ;;  %v1510_v56 = vld [vmem:[%s8909_s18 + $0x2488] sm:$0xff] }
 0x4d2   : > { %6964 = vmatpush1.bf16.msra.mxu1 %v6963_v16  ;;  %v1475_v16 = vld [vmem:[%s8909_s18 + $0x2370] sm:$0xff]  ;;  %v1512_v57 = vld [vmem:[%s8909_s18 + $0x2498] sm:$0xff] }
 0x4d3   : > { %8244 = vmatpush1.bf16.msra.mxu0 %v8243_v17  ;;  %6966 = vmatprep.subr.bf16.mxu1 %v6965_v18  ;;  %v2753_v17 = vld [vmem:[%s8909_s18 + $0x4b60] sm:$0xff]  ;;  %v8265_v18 = vpack.c.bf16 %v2756_v11, %v2754_v10  ;;  %v6987_v24 = vpack.c.bf16 %v1475_v16, %v1473_v15  ;;  %v7005_v10 = vpack.c.bf16 %v1496_v5, %v1494_v4  ;;  %v2775_v15 = vld [vmem:[%s8909_s18 + $0x4c10] sm:$0xff]  ;;  %v1498_v16 = vld [vmem:[%s8909_s18 + $0x2428] sm:$0xff] }
 0x4d4   : > { %8246 = vmatprep.subr.bf16.mxu0 %v8245_v22  ;;  %v2758_v22 = vld [vmem:[%s8909_s18 + $0x4b88] sm:$0xff]  ;;  %v8267_v25 = vpack.c.bf16 %v2755_v19, %v2753_v17  ;;  %v1493_v11 = vld [vmem:[%s8909_s18 + $0x2400] sm:$0xff]  ;;  %v1500_v17 = vld [vmem:[%s8909_s18 + $0x2438] sm:$0xff] }
 0x4d5   : > { %v2780_v19 = vld [vmem:[%s8909_s18 + $0x4c38] sm:$0xff]  ;;  %v1514_v4 = vld [vmem:[%s8909_s18 + $0x24a8] sm:$0xff] }
 0x4d6   : > { %6968 = vmatpush1.bf16.msra.mxu1 %v6967_v28  ;;  %v1479_v28 = vld [vmem:[%s8909_s18 + $0x2390] sm:$0xff]  ;;  %v1516_v5 = vld [vmem:[%s8909_s18 + $0x24b8] sm:$0xff] }
 0x4d7   : > { %8248 = vmatpush1.bf16.msra.mxu0 %v8247_v29  ;;  %6970 = vmatprep.subr.bf16.mxu1 %v6969_v30  ;;  %v2757_v29 = vld [vmem:[%s8909_s18 + $0x4b80] sm:$0xff]  ;;  %v8269_v30 = vpack.c.bf16 %v2760_v23, %v2758_v22  ;;  %v6991_v36 = vpack.c.bf16 %v1479_v28, %v1477_v27  ;;  %v336_v22 = vld [vmem:[#allocation2 + $0x250] sm:$0xff] }
 0x4d8   : > { %8250 = vmatprep.subr.bf16.mxu0 %v8249_v34  ;;  %v2762_v34 = vld [vmem:[%s8909_s18 + $0x4ba8] sm:$0xff]  ;;  %v8271_v37 = vpack.c.bf16 %v2759_v31, %v2757_v29  ;;  %v2777_v27 = vld [vmem:[%s8909_s18 + $0x4c20] sm:$0xff]  ;;  %v2779_v29 = vld [vmem:[%s8909_s18 + $0x4c30] sm:$0xff] }
 0x4d9   : > { %v1504_v31 = vld [vmem:[%s8909_s18 + $0x2458] sm:$0xff] }
 0x4da   : > { %6972 = vmatpush1.bf16.msra.mxu1 %v6971_v40  ;;  %v1483_v40 = vld [vmem:[%s8909_s18 + $0x23b0] sm:$0xff] }
 0x4db   : > { %8252 = vmatpush1.bf16.msra.mxu0 %v8251_v41  ;;  %6974 = vmatprep.subr.bf16.mxu1 %v6973_v42  ;;  %v2761_v41 = vld [vmem:[%s8909_s18 + $0x4ba0] sm:$0xff]  ;;  %v8273_v42 = vpack.c.bf16 %v2764_v35, %v2762_v34  ;;  %v6995_v48 = vpack.c.bf16 %v1483_v40, %v1481_v39  ;;  %v339_v34 = vld [vmem:[#allocation2 + $0x268] sm:$0xff] }
 0x4dc   : > { %8254 = vmatprep.subr.bf16.mxu0 %v8253_v46  ;;  %v2766_v46 = vld [vmem:[%s8909_s18 + $0x4bc8] sm:$0xff]  ;;  %v8275_v49 = vpack.c.bf16 %v2763_v43, %v2761_v41  ;;  %v1501_v39 = vld [vmem:[%s8909_s18 + $0x2440] sm:$0xff]  ;;  %v1503_v40 = vld [vmem:[%s8909_s18 + $0x2450] sm:$0xff] }
 0x4dd   : > { %v2781_v41 = vld [vmem:[%s8909_s18 + $0x4c40] sm:$0xff]  ;;  %v2783_v43 = vld [vmem:[%s8909_s18 + $0x4c50] sm:$0xff] }
 0x4de   : > { %6976 = vmatpush1.bf16.msra.mxu1 %v6975_v52  ;;  %v1487_v52 = vld [vmem:[%s8909_s18 + $0x23d0] sm:$0xff] }
 0x4df   : > { %8256 = vmatpush1.bf16.msra.mxu0 %v8255_v53  ;;  %6978 = vmatprep.subr.bf16.mxu1 %v6977_v54  ;;  %v2765_v53 = vld [vmem:[%s8909_s18 + $0x4bc0] sm:$0xff]  ;;  %v8277_v54 = vpack.c.bf16 %v2768_v47, %v2766_v46  ;;  %v6999_v60 = vpack.c.bf16 %v1487_v52, %v1485_v51  ;;  %v2786_v46 = vld [vmem:[%s8909_s18 + $0x4c68] sm:$0xff]  ;;  %v2788_v47 = vld [vmem:[%s8909_s18 + $0x4c78] sm:$0xff] }
 0x4e0   : > { %8258 = vmatprep.subr.bf16.mxu0 %v8257_v58  ;;  %v2770_v58 = vld [vmem:[%s8909_s18 + $0x4be8] sm:$0xff]  ;;  %v8279_v61 = vpack.c.bf16 %v2767_v55, %v2765_v53  ;;  %v1505_v51 = vld [vmem:[%s8909_s18 + $0x2460] sm:$0xff]  ;;  %v1507_v52 = vld [vmem:[%s8909_s18 + $0x2470] sm:$0xff] }
 0x4e1   : > { %v2785_v53 = vld [vmem:[%s8909_s18 + $0x4c60] sm:$0xff]  ;;  %v2787_v55 = vld [vmem:[%s8909_s18 + $0x4c70] sm:$0xff] }
 0x4e2   : > { %6980 = vmatpush1.bf16.msra.mxu1 %v6979_v0  ;;  %v1491_v0 = vld [vmem:[%s8909_s18 + $0x23f0] sm:$0xff] }
 0x4e3   : > { %8260 = vmatpush1.bf16.msra.mxu0 %v8259_v1  ;;  %6982 = vmatprep.subr.bf16.mxu1 %v6981_v2  ;;  %v2769_v1 = vld [vmem:[%s8909_s18 + $0x4be0] sm:$0xff]  ;;  %v8281_v2 = vpack.c.bf16 %v2772_v59, %v2770_v58  ;;  %v7003_v8 = vpack.c.bf16 %v1491_v0, %v1489_v63  ;;  %v2790_v58 = vld [vmem:[%s8909_s18 + $0x4c88] sm:$0xff]  ;;  %v2792_v59 = vld [vmem:[%s8909_s18 + $0x4c98] sm:$0xff] }
 0x4e4   : > { %8262 = vmatprep.subr.bf16.mxu0 %v8261_v6  ;;  %v2774_v6 = vld [vmem:[%s8909_s18 + $0x4c08] sm:$0xff]  ;;  %v8283_v9 = vpack.c.bf16 %v2771_v3, %v2769_v1  ;;  %v1509_v63 = vld [vmem:[%s8909_s18 + $0x2480] sm:$0xff]  ;;  %v1511_v0 = vld [vmem:[%s8909_s18 + $0x2490] sm:$0xff] }
 0x4e5   : > { %v2789_v1 = vld [vmem:[%s8909_s18 + $0x4c80] sm:$0xff]  ;;  %v2791_v3 = vld [vmem:[%s8909_s18 + $0x4c90] sm:$0xff] }
 0x4e6   : > { %6984 = vmatpush1.bf16.msra.mxu1 %v6983_v12  ;;  %v1495_v12 = vld [vmem:[%s8909_s18 + $0x2410] sm:$0xff] }
 0x4e7   : > { %8264 = vmatpush1.bf16.msra.mxu0 %v8263_v13  ;;  %6986 = vmatprep.subr.bf16.mxu1 %v6985_v14  ;;  %v2773_v13 = vld [vmem:[%s8909_s18 + $0x4c00] sm:$0xff]  ;;  %v8285_v14 = vpack.c.bf16 %v2776_v7, %v2774_v6  ;;  %v7007_v21 = vpack.c.bf16 %v1495_v12, %v1493_v11  ;;  %v2794_v6 = vld [vmem:[%s8909_s18 + $0x4ca8] sm:$0xff]  ;;  %v2796_v7 = vld [vmem:[%s8909_s18 + $0x4cb8] sm:$0xff] }
 0x4e8   : > { %8266 = vmatprep.subr.bf16.mxu0 %v8265_v18  ;;  %v2778_v18 = vld [vmem:[%s8909_s18 + $0x4c28] sm:$0xff]  ;;  %v8287_v23 = vpack.c.bf16 %v2775_v15, %v2773_v13  ;;  %v1513_v11 = vld [vmem:[%s8909_s18 + $0x24a0] sm:$0xff]  ;;  %v1515_v12 = vld [vmem:[%s8909_s18 + $0x24b0] sm:$0xff] }
 0x4e9   : > { %v8289_v28 = vpack.c.bf16 %v2780_v19, %v2778_v18  ;;  %v2793_v13 = vld [vmem:[%s8909_s18 + $0x4ca0] sm:$0xff]  ;;  %v2795_v15 = vld [vmem:[%s8909_s18 + $0x4cb0] sm:$0xff]  ;;  %v2798_v18 = vld [vmem:[%s8909_s18 + $0x4cc8] sm:$0xff] }
 0x4ea   : > { %6988 = vmatpush1.bf16.msra.mxu1 %v6987_v24  ;;  %v7009_v24 = vpack.c.bf16 %v1500_v17, %v1498_v16  ;;  %v1518_v16 = vld [vmem:[%s8909_s18 + $0x24c8] sm:$0xff]  ;;  %v1520_v17 = vld [vmem:[%s8909_s18 + $0x24d8] sm:$0xff] }
 0x4eb   : > { %8268 = vmatpush1.bf16.msra.mxu0 %v8267_v25  ;;  %6990 = vmatprep.subr.bf16.mxu1 %v6989_v26  ;;  %v1497_v25 = vld [vmem:[%s8909_s18 + $0x2420] sm:$0xff]  ;;  %v1499_v26 = vld [vmem:[%s8909_s18 + $0x2430] sm:$0xff]  ;;  %v2800_v19 = vld [vmem:[%s8909_s18 + $0x4cd8] sm:$0xff] }
 0x4ec   : > { %8270 = vmatprep.subr.bf16.mxu0 %v8269_v30  ;;  %v1502_v30 = vld [vmem:[%s8909_s18 + $0x2448] sm:$0xff]  ;;  %v7011_v35 = vpack.c.bf16 %v1499_v26, %v1497_v25  ;;  %v2797_v25 = vld [vmem:[%s8909_s18 + $0x4cc0] sm:$0xff]  ;;  %v8309_v26 = vpack.c.bf16 %v2800_v19, %v2798_v18 }
 0x4ed   : > { %v1537_v19 = vld [vmem:[%s8909_s18 + $0x2560] sm:$0xff] }
 0x4ee   : > { %6992 = vmatpush1.bf16.msra.mxu1 %v6991_v36  ;;  %v299_v36 = vld [vmem:[#allocation2 + $0x128] sm:$0xff] }
 0x4ef   : > { %8272 = vmatpush1.bf16.msra.mxu0 %v8271_v37  ;;  %6994 = vmatprep.subr.bf16.mxu1 %v6993_v38  ;;  %v8291_v37 = vpack.c.bf16 %v2779_v29, %v2777_v27  ;;  %v7013_v38 = vpack.c.bf16 %v1504_v31, %v1502_v30  ;;  %v2799_v27 = vld [vmem:[%s8909_s18 + $0x4cd0] sm:$0xff]  ;;  %v1524_v29 = vld [vmem:[%s8909_s18 + $0x24f8] sm:$0xff]  ;;  %v2802_v30 = vld [vmem:[%s8909_s18 + $0x4ce8] sm:$0xff] }
 0x4f0   : > { %8274 = vmatprep.subr.bf16.mxu0 %v8273_v42  ;;  %v8293_v42 = vpack.c.bf16 %v2784_v33, %v2782_v32  ;;  %v2804_v31 = vld [vmem:[%s8909_s18 + $0x4cf8] sm:$0xff]  ;;  %v8311_v33 = vpack.c.bf16 %v2799_v27, %v2797_v25 }
 0x4f1   : > { %v1544_v25 = vld [vmem:[%s8909_s18 + $0x2598] sm:$0xff] }
 0x4f2   : > { %6996 = vmatpush1.bf16.msra.mxu1 %v6995_v48  ;;  %v7015_v48 = vpack.c.bf16 %v1503_v40, %v1501_v39  ;;  %v2803_v39 = vld [vmem:[%s8909_s18 + $0x4cf0] sm:$0xff]  ;;  %v1526_v40 = vld [vmem:[%s8909_s18 + $0x2508] sm:$0xff]  ;;  %v2824_v27 = vld [vmem:[%s8909_s18 + $0x4d98] sm:$0xff] }
 0x4f3   : > { %8276 = vmatpush1.bf16.msra.mxu0 %v8275_v49  ;;  %6998 = vmatprep.subr.bf16.mxu1 %v6997_v50  ;;  %v8295_v49 = vpack.c.bf16 %v2783_v43, %v2781_v41  ;;  %v7017_v50 = vpack.c.bf16 %v1508_v45, %v1506_v44  ;;  %v1528_v41 = vld [vmem:[%s8909_s18 + $0x2518] sm:$0xff] }
 0x4f4   : > { %8278 = vmatprep.subr.bf16.mxu0 %v8277_v54  ;;  %v8297_v54 = vpack.c.bf16 %v2788_v47, %v2786_v46  ;;  %v2808_v43 = vld [vmem:[%s8909_s18 + $0x4d18] sm:$0xff]  ;;  %v7037_v46 = vpack.c.bf16 %v1528_v41, %v1526_v40  ;;  %v1525_v47 = vld [vmem:[%s8909_s18 + $0x2500] sm:$0xff] }
 0x4f6   : > { %7000 = vmatpush1.bf16.msra.mxu1 %v6999_v60  ;;  %v7019_v60 = vpack.c.bf16 %v1507_v52, %v1505_v51  ;;  %v2807_v51 = vld [vmem:[%s8909_s18 + $0x4d10] sm:$0xff]  ;;  %v1530_v52 = vld [vmem:[%s8909_s18 + $0x2528] sm:$0xff] }
 0x4f7   : > { %8280 = vmatpush1.bf16.msra.mxu0 %v8279_v61  ;;  %7002 = vmatprep.subr.bf16.mxu1 %v7001_v62  ;;  %v8299_v61 = vpack.c.bf16 %v2787_v55, %v2785_v53  ;;  %v7021_v62 = vpack.c.bf16 %v1512_v57, %v1510_v56  ;;  %v1532_v53 = vld [vmem:[%s8909_s18 + $0x2538] sm:$0xff] }
 0x4f8   : > { %8282 = vmatprep.subr.bf16.mxu0 %v8281_v2  ;;  %v8301_v2 = vpack.c.bf16 %v2792_v59, %v2790_v58  ;;  %v2812_v55 = vld [vmem:[%s8909_s18 + $0x4d38] sm:$0xff]  ;;  %v7041_v58 = vpack.c.bf16 %v1532_v53, %v1530_v52  ;;  %v1529_v59 = vld [vmem:[%s8909_s18 + $0x2520] sm:$0xff] }
 0x4fa   : > { %7004 = vmatpush1.bf16.msra.mxu1 %v7003_v8  ;;  %v7023_v8 = vpack.c.bf16 %v1511_v0, %v1509_v63  ;;  %v2811_v63 = vld [vmem:[%s8909_s18 + $0x4d30] sm:$0xff]  ;;  %v1534_v0 = vld [vmem:[%s8909_s18 + $0x2548] sm:$0xff] }
 0x4fb   : > { %8284 = vmatpush1.bf16.msra.mxu0 %v8283_v9  ;;  %7006 = vmatprep.subr.bf16.mxu1 %v7005_v10  ;;  %v8303_v9 = vpack.c.bf16 %v2791_v3, %v2789_v1  ;;  %v7025_v10 = vpack.c.bf16 %v1516_v5, %v1514_v4  ;;  %v1536_v1 = vld [vmem:[%s8909_s18 + $0x2558] sm:$0xff] }
 0x4fc   : > { %8286 = vmatprep.subr.bf16.mxu0 %v8285_v14  ;;  %v8305_v14 = vpack.c.bf16 %v2796_v7, %v2794_v6  ;;  %v2816_v3 = vld [vmem:[%s8909_s18 + $0x4d58] sm:$0xff]  ;;  %v7045_v6 = vpack.c.bf16 %v1536_v1, %v1534_v0  ;;  %v1533_v7 = vld [vmem:[%s8909_s18 + $0x2540] sm:$0xff] }
 0x4fd   : > { %4117 = vmatmul.mubr.f32.vlgmr.msra.gmra.mrb[0].mxu1 %v296_v20  ;;  %v7027_v20 = vpack.c.bf16 %v1515_v12, %v1513_v11  ;;  %v2815_v11 = vld [vmem:[%s8909_s18 + $0x4d50] sm:$0xff]  ;;  %v1538_v12 = vld [vmem:[%s8909_s18 + $0x2568] sm:$0xff] }
 0x4fe   : > { %7008 = vmatpush1.bf16.msra.mxu1 %v7007_v21  ;;  %5537 = vmatmul.mubr.f32.vlgmr.msra.gmra.mrb[0].mxu0 %v336_v22  ;;  %v8307_v21 = vpack.c.bf16 %v2795_v15, %v2793_v13  ;;  %v7029_v22 = vpack.c.bf16 %v1520_v17, %v1518_v16  ;;  %v1540_v13 = vld [vmem:[%s8909_s18 + $0x2578] sm:$0xff] }
 0x4ff   : > { %8288 = vmatpush1.bf16.msra.mxu0 %v8287_v23  ;;  %7010 = vmatprep.subr.bf16.mxu1 %v7009_v24  ;;  %v1517_v23 = vld [vmem:[%s8909_s18 + $0x24c0] sm:$0xff]  ;;  %v1519_v24 = vld [vmem:[%s8909_s18 + $0x24d0] sm:$0xff]  ;;  %v2820_v15 = vld [vmem:[%s8909_s18 + $0x4d78] sm:$0xff]  ;;  %v7049_v18 = vpack.c.bf16 %v1540_v13, %v1538_v12 }
 0x500   : > { %8290 = vmatprep.subr.bf16.mxu0 %v8289_v28  ;;  %5607 = vmatprep.mubr.f32.mxu0 %v339_v34  ;;  %v1522_v28 = vld [vmem:[%s8909_s18 + $0x24e8] sm:$0xff]  ;;  %v7031_v32 = vpack.c.bf16 %v1519_v24, %v1517_v23  ;;  %v2819_v23 = vld [vmem:[%s8909_s18 + $0x4d70] sm:$0xff] }
 0x501   : > { %4187 = vmatprep.mubr.f32.mxu1 %v299_v36  ;;  %v7033_v34 = vpack.c.bf16 %v1524_v29, %v1522_v28  ;;  %v1523_v36 = vld [vmem:[%s8909_s18 + $0x24f0] sm:$0xff]  ;;  %v1542_v24 = vld [vmem:[%s8909_s18 + $0x2588] sm:$0xff] }
 0x502   : > { %7012 = vmatpush1.bf16.msra.mxu1 %v7011_v35  ;;  %v1521_v35 = vld [vmem:[%s8909_s18 + $0x24e0] sm:$0xff] }
 0x503   : > { %8292 = vmatpush1.bf16.msra.mxu0 %v8291_v37  ;;  %7014 = vmatprep.subr.bf16.mxu1 %v7013_v38  ;;  %v2801_v37 = vld [vmem:[%s8909_s18 + $0x4ce0] sm:$0xff]  ;;  %v8313_v38 = vpack.c.bf16 %v2804_v31, %v2802_v30  ;;  %v7035_v44 = vpack.c.bf16 %v1523_v36, %v1521_v35  ;;  %v7053_v30 = vpack.c.bf16 %v1544_v25, %v1542_v24  ;;  %v2823_v35 = vld [vmem:[%s8909_s18 + $0x4d90] sm:$0xff]  ;;  %v1546_v36 = vld [vmem:[%s8909_s18 + $0x25a8] sm:$0xff] }
 0x504   : > { %8294 = vmatprep.subr.bf16.mxu0 %v8293_v42  ;;  %v2806_v42 = vld [vmem:[%s8909_s18 + $0x4d08] sm:$0xff]  ;;  %v8315_v45 = vpack.c.bf16 %v2803_v39, %v2801_v37  ;;  %v1541_v31 = vld [vmem:[%s8909_s18 + $0x2580] sm:$0xff]  ;;  %v1548_v37 = vld [vmem:[%s8909_s18 + $0x25b8] sm:$0xff] }
 0x505   : > { %v2828_v39 = vld [vmem:[%s8909_s18 + $0x4db8] sm:$0xff]  ;;  %v338_v24 = vld [vmem:[#allocation2 + $0x260] sm:$0xff] }
 0x506   : > { %7016 = vmatpush1.bf16.msra.mxu1 %v7015_v48  ;;  %v1527_v48 = vld [vmem:[%s8909_s18 + $0x2510] sm:$0xff] }
 0x507   : > { %8296 = vmatpush1.bf16.msra.mxu0 %v8295_v49  ;;  %7018 = vmatprep.subr.bf16.mxu1 %v7017_v50  ;;  %v2805_v49 = vld [vmem:[%s8909_s18 + $0x4d00] sm:$0xff]  ;;  %v8317_v50 = vpack.c.bf16 %v2808_v43, %v2806_v42  ;;  %v7039_v56 = vpack.c.bf16 %v1527_v48, %v1525_v47  ;;  %v7057_v42 = vpack.c.bf16 %v1548_v37, %v1546_v36  ;;  %v2827_v47 = vld [vmem:[%s8909_s18 + $0x4db0] sm:$0xff]  ;;  %v1550_v48 = vld [vmem:[%s8909_s18 + $0x25c8] sm:$0xff]  ;;  %v8696_v36 = vmov 0.0  }
 0x508   : > { %8298 = vmatprep.subr.bf16.mxu0 %v8297_v54  ;;  %v2810_v54 = vld [vmem:[%s8909_s18 + $0x4d28] sm:$0xff]  ;;  %v8319_v57 = vpack.c.bf16 %v2807_v51, %v2805_v49  ;;  %v1545_v43 = vld [vmem:[%s8909_s18 + $0x25a0] sm:$0xff]  ;;  %v1552_v49 = vld [vmem:[%s8909_s18 + $0x25d8] sm:$0xff] }
 0x509   : > { %v2832_v51 = vld [vmem:[%s8909_s18 + $0x4dd8] sm:$0xff]  ;;  %v1570_v37 = vld [vmem:[%s8909_s18 + $0x2668] sm:$0xff] }
 0x50a   : > { %7020 = vmatpush1.bf16.msra.mxu1 %v7019_v60  ;;  %v1531_v60 = vld [vmem:[%s8909_s18 + $0x2530] sm:$0xff] }
 0x50b   : > { %8300 = vmatpush1.bf16.msra.mxu0 %v8299_v61  ;;  %7022 = vmatprep.subr.bf16.mxu1 %v7021_v62  ;;  %v2809_v61 = vld [vmem:[%s8909_s18 + $0x4d20] sm:$0xff]  ;;  %v8321_v62 = vpack.c.bf16 %v2812_v55, %v2810_v54  ;;  %v7043_v4 = vpack.c.bf16 %v1531_v60, %v1529_v59  ;;  %v7061_v54 = vpack.c.bf16 %v1552_v49, %v1550_v48  ;;  %v2831_v59 = vld [vmem:[%s8909_s18 + $0x4dd0] sm:$0xff]  ;;  %v1554_v60 = vld [vmem:[%s8909_s18 + $0x25e8] sm:$0xff] }
 0x50c   : > { %8302 = vmatprep.subr.bf16.mxu0 %v8301_v2  ;;  %v2814_v2 = vld [vmem:[%s8909_s18 + $0x4d48] sm:$0xff]  ;;  %v8323_v5 = vpack.c.bf16 %v2811_v63, %v2809_v61  ;;  %v1549_v55 = vld [vmem:[%s8909_s18 + $0x25c0] sm:$0xff]  ;;  %v1556_v61 = vld [vmem:[%s8909_s18 + $0x25f8] sm:$0xff] }
 0x50d   : > { %v2836_v63 = vld [vmem:[%s8909_s18 + $0x4df8] sm:$0xff]  ;;  %v1573_v48 = vld [vmem:[%s8909_s18 + $0x2680] sm:$0xff]  ;;  %v1575_v49 = vld [vmem:[%s8909_s18 + $0x2690] sm:$0xff] }
 0x50e   : > { %7024 = vmatpush1.bf16.msra.mxu1 %v7023_v8  ;;  %v1535_v8 = vld [vmem:[%s8909_s18 + $0x2550] sm:$0xff] }
 0x50f   : > { %8304 = vmatpush1.bf16.msra.mxu0 %v8303_v9  ;;  %7026 = vmatprep.subr.bf16.mxu1 %v7025_v10  ;;  %v2813_v9 = vld [vmem:[%s8909_s18 + $0x4d40] sm:$0xff]  ;;  %v8325_v10 = vpack.c.bf16 %v2816_v3, %v2814_v2  ;;  %v7047_v16 = vpack.c.bf16 %v1535_v8, %v1533_v7  ;;  %v7065_v2 = vpack.c.bf16 %v1556_v61, %v1554_v60  ;;  %v2835_v7 = vld [vmem:[%s8909_s18 + $0x4df0] sm:$0xff]  ;;  %v1558_v8 = vld [vmem:[%s8909_s18 + $0x2608] sm:$0xff] }
 0x510   : > { %8306 = vmatprep.subr.bf16.mxu0 %v8305_v14  ;;  %v2818_v14 = vld [vmem:[%s8909_s18 + $0x4d68] sm:$0xff]  ;;  %v8327_v17 = vpack.c.bf16 %v2815_v11, %v2813_v9  ;;  %v1553_v3 = vld [vmem:[%s8909_s18 + $0x25e0] sm:$0xff]  ;;  %v1560_v9 = vld [vmem:[%s8909_s18 + $0x2618] sm:$0xff] }
 0x511   : > { %v2840_v11 = vld [vmem:[%s8909_s18 + $0x4e18] sm:$0xff]  ;;  %v1581_v60 = vld [vmem:[%s8909_s18 + $0x26c0] sm:$0xff]  ;;  %v1583_v61 = vld [vmem:[%s8909_s18 + $0x26d0] sm:$0xff] }
 0x512   : > { %7028 = vmatpush1.bf16.msra.mxu1 %v7027_v20  ;;  %v1539_v20 = vld [vmem:[%s8909_s18 + $0x2570] sm:$0xff] }
 0x513   : > { %8308 = vmatpush1.bf16.msra.mxu0 %v8307_v21  ;;  %7030 = vmatprep.subr.bf16.mxu1 %v7029_v22  ;;  %v2817_v21 = vld [vmem:[%s8909_s18 + $0x4d60] sm:$0xff]  ;;  %v8329_v22 = vpack.c.bf16 %v2820_v15, %v2818_v14  ;;  %v7051_v28 = vpack.c.bf16 %v1539_v20, %v1537_v19  ;;  %v7069_v14 = vpack.c.bf16 %v1560_v9, %v1558_v8  ;;  %v1591_v9 = vld [vmem:[%s8909_s18 + $0x2710] sm:$0xff] }
 0x514   : > { %8310 = vmatprep.subr.bf16.mxu0 %v8309_v26  ;;  %v2822_v26 = vld [vmem:[%s8909_s18 + $0x4d88] sm:$0xff]  ;;  %v8331_v29 = vpack.c.bf16 %v2819_v23, %v2817_v21  ;;  %v1557_v15 = vld [vmem:[%s8909_s18 + $0x2600] sm:$0xff]  ;;  %v2839_v21 = vld [vmem:[%s8909_s18 + $0x4e10] sm:$0xff] }
 0x515   : > { %v2837_v20 = vld [vmem:[%s8909_s18 + $0x4e00] sm:$0xff] }
 0x516   : > { %7032 = vmatpush1.bf16.msra.mxu1 %v7031_v32  ;;  %v1543_v32 = vld [vmem:[%s8909_s18 + $0x2590] sm:$0xff]  ;;  %v1589_v8 = vld [vmem:[%s8909_s18 + $0x2700] sm:$0xff] }
 0x517   : > { %8312 = vmatpush1.bf16.msra.mxu0 %v8311_v33  ;;  %7034 = vmatprep.subr.bf16.mxu1 %v7033_v34  ;;  %v2821_v33 = vld [vmem:[%s8909_s18 + $0x4d80] sm:$0xff]  ;;  %v8333_v34 = vpack.c.bf16 %v2824_v27, %v2822_v26  ;;  %v7055_v40 = vpack.c.bf16 %v1543_v32, %v1541_v31  ;;  %v1563_v27 = vld [vmem:[%s8909_s18 + $0x2630] sm:$0xff] }
 0x518   : > { %8314 = vmatprep.subr.bf16.mxu0 %v8313_v38  ;;  %v2826_v38 = vld [vmem:[%s8909_s18 + $0x4da8] sm:$0xff]  ;;  %v8335_v41 = vpack.c.bf16 %v2823_v35, %v2821_v33  ;;  %v1561_v26 = vld [vmem:[%s8909_s18 + $0x2620] sm:$0xff]  ;;  %v1567_v35 = vld [vmem:[%s8909_s18 + $0x2650] sm:$0xff] }
 0x519   : > { %v301_v31 = vld [vmem:[#allocation2 + $0x138] sm:$0xff]  ;;  %v7075_v32 = vpack.c.bf16 %v1563_v27, %v1561_v26  ;;  %v1603_v27 = vld [vmem:[%s8909_s18 + $0x2770] sm:$0xff] }
 0x51a   : > { %7036 = vmatpush1.bf16.msra.mxu1 %v7035_v44  ;;  %v1547_v44 = vld [vmem:[%s8909_s18 + $0x25b0] sm:$0xff]  ;;  %v1601_v26 = vld [vmem:[%s8909_s18 + $0x2760] sm:$0xff] }
 0x51b   : > { %8316 = vmatpush1.bf16.msra.mxu0 %v8315_v45  ;;  %7038 = vmatprep.subr.bf16.mxu1 %v7037_v46  ;;  %v2825_v45 = vld [vmem:[%s8909_s18 + $0x4da0] sm:$0xff]  ;;  %v8337_v46 = vpack.c.bf16 %v2828_v39, %v2826_v38  ;;  %v7059_v52 = vpack.c.bf16 %v1547_v44, %v1545_v43  ;;  %v1572_v38 = vld [vmem:[%s8909_s18 + $0x2678] sm:$0xff]  ;;  %v1571_v43 = vld [vmem:[%s8909_s18 + $0x2670] sm:$0xff] }
 0x51c   : > { %8318 = vmatprep.subr.bf16.mxu0 %v8317_v50  ;;  %v2830_v50 = vld [vmem:[%s8909_s18 + $0x4dc8] sm:$0xff]  ;;  %v8339_v53 = vpack.c.bf16 %v2827_v47, %v2825_v45  ;;  %v1576_v45 = vld [vmem:[%s8909_s18 + $0x2698] sm:$0xff] }
 0x51d   : > { %v1574_v44 = vld [vmem:[%s8909_s18 + $0x2688] sm:$0xff] }
 0x51e   : > { %7040 = vmatpush1.bf16.msra.mxu1 %v7039_v56  ;;  %v1551_v56 = vld [vmem:[%s8909_s18 + $0x25d0] sm:$0xff]  ;;  %v7085_v47 = vpack.c.bf16 %v1576_v45, %v1574_v44  ;;  %v1613_v44 = vld [vmem:[%s8909_s18 + $0x27c0] sm:$0xff] }
 0x51f   : > { %8320 = vmatpush1.bf16.msra.mxu0 %v8319_v57  ;;  %7042 = vmatprep.subr.bf16.mxu1 %v7041_v58  ;;  %v2829_v57 = vld [vmem:[%s8909_s18 + $0x4dc0] sm:$0xff]  ;;  %v8341_v58 = vpack.c.bf16 %v2832_v51, %v2830_v50  ;;  %v7063_v0 = vpack.c.bf16 %v1551_v56, %v1549_v55  ;;  %v1578_v50 = vld [vmem:[%s8909_s18 + $0x26a8] sm:$0xff]  ;;  %v1580_v51 = vld [vmem:[%s8909_s18 + $0x26b8] sm:$0xff] }
 0x520   : > { %8322 = vmatprep.subr.bf16.mxu0 %v8321_v62  ;;  %v2834_v62 = vld [vmem:[%s8909_s18 + $0x4de8] sm:$0xff]  ;;  %v8343_v1 = vpack.c.bf16 %v2831_v59, %v2829_v57  ;;  %v1579_v55 = vld [vmem:[%s8909_s18 + $0x26b0] sm:$0xff]  ;;  %v1584_v57 = vld [vmem:[%s8909_s18 + $0x26d8] sm:$0xff] }
 0x521   : > { %v1582_v56 = vld [vmem:[%s8909_s18 + $0x26c8] sm:$0xff]  ;;  %v1615_v45 = vld [vmem:[%s8909_s18 + $0x27d0] sm:$0xff] }
 0x522   : > { %7044 = vmatpush1.bf16.msra.mxu1 %v7043_v4  ;;  %v1555_v4 = vld [vmem:[%s8909_s18 + $0x25f0] sm:$0xff]  ;;  %v7093_v59 = vpack.c.bf16 %v1584_v57, %v1582_v56  ;;  %v5686_v56 = vlaneseq }
 0x523   : > { %8324 = vmatpush1.bf16.msra.mxu0 %v8323_v5  ;;  %7046 = vmatprep.subr.bf16.mxu1 %v7045_v6  ;;  %v2833_v5 = vld [vmem:[%s8909_s18 + $0x4de0] sm:$0xff]  ;;  %v8345_v6 = vpack.c.bf16 %v2836_v63, %v2834_v62  ;;  %v7067_v12 = vpack.c.bf16 %v1555_v4, %v1553_v3  ;;  %v1586_v62 = vld [vmem:[%s8909_s18 + $0x26e8] sm:$0xff]  ;;  %v1588_v63 = vld [vmem:[%s8909_s18 + $0x26f8] sm:$0xff] }
 0x524   : > { %8326 = vmatprep.subr.bf16.mxu0 %v8325_v10  ;;  %v2838_v10 = vld [vmem:[%s8909_s18 + $0x4e08] sm:$0xff]  ;;  %v8347_v13 = vpack.c.bf16 %v2835_v7, %v2833_v5  ;;  %v1587_v3 = vld [vmem:[%s8909_s18 + $0x26f0] sm:$0xff]  ;;  %v1592_v5 = vld [vmem:[%s8909_s18 + $0x2718] sm:$0xff]  ;;  %v5687_v57 = vshrl.u32 %v5686_v56, 7 }
 0x525   : > { %v8349_v19 = vpack.c.bf16 %v2840_v11, %v2838_v10  ;;  %v1590_v4 = vld [vmem:[%s8909_s18 + $0x2708] sm:$0xff]  ;;  %v1596_v11 = vld [vmem:[%s8909_s18 + $0x2738] sm:$0xff] }
 0x526   : > { %7048 = vmatpush1.bf16.msra.mxu1 %v7047_v16  ;;  %v1559_v16 = vld [vmem:[%s8909_s18 + $0x2610] sm:$0xff]  ;;  %v7101_v7 = vpack.c.bf16 %v1592_v5, %v1590_v4  ;;  %v1594_v10 = vld [vmem:[%s8909_s18 + $0x2728] sm:$0xff] }
 0x527   : > { %8328 = vmatpush1.bf16.msra.mxu0 %v8327_v17  ;;  %7050 = vmatprep.subr.bf16.mxu1 %v7049_v18  ;;  %v1562_v17 = vld [vmem:[%s8909_s18 + $0x2628] sm:$0xff]  ;;  %v1564_v18 = vld [vmem:[%s8909_s18 + $0x2638] sm:$0xff]  ;;  %v7071_v23 = vpack.c.bf16 %v1559_v16, %v1557_v15  ;;  %v1595_v15 = vld [vmem:[%s8909_s18 + $0x2730] sm:$0xff] }
 0x528   : > { %8330 = vmatprep.subr.bf16.mxu0 %v8329_v22  ;;  %v298_v22 = vld [vmem:[#allocation2 + $0x120] sm:$0xff]  ;;  %v7073_v25 = vpack.c.bf16 %v1564_v18, %v1562_v17  ;;  %v1600_v17 = vld [vmem:[%s8909_s18 + $0x2758] sm:$0xff] }
 0x529   : > { %v1598_v16 = vld [vmem:[%s8909_s18 + $0x2748] sm:$0xff] }
 0x52a   : > { %7052 = vmatpush1.bf16.msra.mxu1 %v7051_v28  ;;  %v8351_v28 = vpack.c.bf16 %v2839_v21, %v2837_v20  ;;  %v1597_v20 = vld [vmem:[%s8909_s18 + $0x2740] sm:$0xff]  ;;  %v1599_v21 = vld [vmem:[%s8909_s18 + $0x2750] sm:$0xff] }
 0x52b   : > { %8332 = vmatpush1.bf16.msra.mxu0 %v8331_v29  ;;  %7054 = vmatprep.subr.bf16.mxu1 %v7053_v30  ;;  %v1566_v29 = vld [vmem:[%s8909_s18 + $0x2648] sm:$0xff]  ;;  %v1568_v30 = vld [vmem:[%s8909_s18 + $0x2658] sm:$0xff] }
 0x52c   : > { %8334 = vmatprep.subr.bf16.mxu0 %v8333_v34  ;;  %v7077_v33 = vpack.c.bf16 %v1568_v30, %v1566_v29  ;;  %v1565_v34 = vld [vmem:[%s8909_s18 + $0x2640] sm:$0xff]  ;;  %v1608_v29 = vld [vmem:[%s8909_s18 + $0x2798] sm:$0xff]  ;;  %v7115_v30 = vpack.c.bf16 %v1603_v27, %v1601_v26 }
 0x52d   : > { %v7079_v39 = vpack.c.bf16 %v1567_v35, %v1565_v34  ;;  %v1610_v34 = vld [vmem:[%s8909_s18 + $0x27a8] sm:$0xff]  ;;  %v1612_v35 = vld [vmem:[%s8909_s18 + $0x27b8] sm:$0xff] }
 0x52e   : > { %7056 = vmatpush1.bf16.msra.mxu1 %v7055_v40  ;;  %v340_v40 = vld [vmem:[#allocation2 + $0x270] sm:$0xff] }
 0x52f   : > { %8336 = vmatpush1.bf16.msra.mxu0 %v8335_v41  ;;  %7058 = vmatprep.subr.bf16.mxu1 %v7057_v42  ;;  %v7081_v41 = vpack.c.bf16 %v1572_v38, %v1570_v37  ;;  %v1569_v42 = vld [vmem:[%s8909_s18 + $0x2660] sm:$0xff]  ;;  %v7121_v37 = vpack.c.bf16 %v1612_v35, %v1610_v34 }
 0x530   : > { %8338 = vmatprep.subr.bf16.mxu0 %v8337_v46  ;;  %v7083_v46 = vpack.c.bf16 %v1571_v43, %v1569_v42  ;;  %v1609_v38 = vld [vmem:[%s8909_s18 + $0x27a0] sm:$0xff] }
 0x532   : > { %7060 = vmatpush1.bf16.msra.mxu1 %v7059_v52  ;;  %v7087_v52 = vpack.c.bf16 %v1575_v49, %v1573_v48  ;;  %v7127_v48 = vpack.c.bf16 %v1615_v45, %v1613_v44 }
 0x533   : > { %8340 = vmatpush1.bf16.msra.mxu0 %v8339_v53  ;;  %7062 = vmatprep.subr.bf16.mxu1 %v7061_v54  ;;  %v7089_v53 = vpack.c.bf16 %v1580_v51, %v1578_v50  ;;  %v1577_v54 = vld [vmem:[%s8909_s18 + $0x26a0] sm:$0xff]  ;;  %v1619_v51 = vld [vmem:[%s8909_s18 + $0x27f0] sm:$0xff] }
 0x534   : > { %8342 = vmatprep.subr.bf16.mxu0 %v8341_v58  ;;  %v7091_v58 = vpack.c.bf16 %v1579_v55, %v1577_v54  ;;  %v1617_v50 = vld [vmem:[%s8909_s18 + $0x27e0] sm:$0xff] }
 0x536   : > { %7064 = vmatpush1.bf16.msra.mxu1 %v7063_v0  ;;  %v7095_v0 = vpack.c.bf16 %v1583_v61, %v1581_v60  ;;  %v5692_v60 = vsub.s32 1, %v5687_v57 }
 0x537   : > { %8344 = vmatpush1.bf16.msra.mxu0 %v8343_v1  ;;  %7066 = vmatprep.subr.bf16.mxu1 %v7065_v2  ;;  %v7097_v1 = vpack.c.bf16 %v1588_v63, %v1586_v62  ;;  %v1585_v2 = vld [vmem:[%s8909_s18 + $0x26e0] sm:$0xff] }
 0x538   : > { %8346 = vmatprep.subr.bf16.mxu0 %v8345_v6  ;;  %v7099_v6 = vpack.c.bf16 %v1587_v3, %v1585_v2 }
 0x53a   : > { %7068 = vmatpush1.bf16.msra.mxu1 %v7067_v12  ;;  %v7103_v12 = vpack.c.bf16 %v1591_v9, %v1589_v8 }
 0x53b   : > { %8348 = vmatpush1.bf16.msra.mxu0 %v8347_v13  ;;  %7070 = vmatprep.subr.bf16.mxu1 %v7069_v14  ;;  %v7105_v13 = vpack.c.bf16 %v1596_v11, %v1594_v10  ;;  %v1593_v14 = vld [vmem:[%s8909_s18 + $0x2720] sm:$0xff] }
 0x53c   : > { %8350 = vmatprep.subr.bf16.mxu0 %v8349_v19  ;;  %v7107_v18 = vpack.c.bf16 %v1595_v15, %v1593_v14  ;;  %v7109_v19 = vpack.c.bf16 %v1600_v17, %v1598_v16 }
 0x53d   : > { %4188 = vmatmul.mubr.f32.vlgmr.msra.gmra.mrb[0].mxu1 %v298_v22  ;;  %v1602_v22 = vld [vmem:[%s8909_s18 + $0x2768] sm:$0xff] }
 0x53e   : > { %5608 = vmatmul.mubr.f32.vlgmr.msra.gmra.mrb[0].mxu0 %v338_v24  ;;  %7072 = vmatpush1.bf16.msra.mxu1 %v7071_v23  ;;  %v1604_v23 = vld [vmem:[%s8909_s18 + $0x2778] sm:$0xff]  ;;  %v7111_v24 = vpack.c.bf16 %v1599_v21, %v1597_v20 }
 0x53f   : > { %7074 = vmatprep.subr.bf16.mxu1 %v7073_v25  ;;  %8352 = vmatpush1.bf16.msra.mxu0 %v8351_v28  ;;  %v7113_v25 = vpack.c.bf16 %v1604_v23, %v1602_v22  ;;  %v1606_v28 = vld [vmem:[%s8909_s18 + $0x2788] sm:$0xff] }
 0x540   : > { %5678 = vmatprep.mubr.f32.mxu0 %v8696_v36  ;;  %4258 = vmatprep.mubr.f32.mxu1 %v301_v31  ;;  %v7117_v31 = vpack.c.bf16 %v1608_v29, %v1606_v28 }
 0x542   : > { %7076 = vmatpush1.bf16.msra.mxu1 %v7075_v32  ;;  %v1605_v32 = vld [vmem:[%s8909_s18 + $0x2780] sm:$0xff] }
 0x543   : > { %7078 = vmatprep.subr.bf16.mxu1 %v7077_v33  ;;  %v1607_v33 = vld [vmem:[%s8909_s18 + $0x2790] sm:$0xff] }
 0x544   : > { %v7119_v36 = vpack.c.bf16 %v1607_v33, %v1605_v32 }
 0x546   : > { %5845 = vmatmul.mubr.msk.f32.vlgmr.msra.gmra.mrb[0].mxu0 %vm2841_vm0, %v340_v40  ;;  %7080 = vmatpush1.bf16.msra.mxu1 %v7079_v39  ;;  %v1611_v39 = vld [vmem:[%s8909_s18 + $0x27b0] sm:$0xff]  ;;  %v1614_v40 = vld [vmem:[%s8909_s18 + $0x27c8] sm:$0xff] }
 0x547   : > { %7082 = vmatprep.subr.bf16.mxu1 %v7081_v41  ;;  %v1616_v41 = vld [vmem:[%s8909_s18 + $0x27d8] sm:$0xff]  ;;  %v7123_v42 = vpack.c.bf16 %v1611_v39, %v1609_v38 }
 0x548   : > { %v7125_v43 = vpack.c.bf16 %v1616_v41, %v1614_v40 }
 0x54a   : > { %7084 = vmatpush1.bf16.msra.mxu1 %v7083_v46  ;;  %v1618_v46 = vld [vmem:[%s8909_s18 + $0x27e8] sm:$0xff] }
 0x54b   : > { %7086 = vmatprep.subr.bf16.mxu1 %v7085_v47  ;;  %v1620_v47 = vld [vmem:[%s8909_s18 + $0x27f8] sm:$0xff] }
 0x54c   : > { %v7129_v49 = vpack.c.bf16 %v1620_v47, %v1618_v46 }
 0x54e   : > { %7088 = vmatpush1.bf16.msra.mxu1 %v7087_v52  ;;  %v7131_v52 = vpack.c.bf16 %v1619_v51, %v1617_v50 }
 0x54f   : > { %7090 = vmatprep.subr.bf16.mxu1 %v7089_v53  ;;  %v300_v53 = vld [vmem:[#allocation2 + $0x130] sm:$0xff] }
 0x552   : > { %7092 = vmatpush1.bf16.msra.mxu1 %v7091_v58  ;;  %v5688_v58 = vsub.s32 0, %v5687_v57 }
 0x553   : > { %7094 = vmatprep.subr.bf16.mxu1 %v7093_v59  ;;  %v261_v59 = vld [vmem:[%s231_s6] sm:$0x3] }
 0x554   : > { %v5689_v61 = vrot.slane %v261_v59, %v5688_v58  ;;  %v5693_v63 = vrot.slane %v261_v59, %v5692_v60 }
 0x556   : > { %7096 = vmatpush1.bf16.msra.mxu1 %v7095_v0 }
 0x557   : > { %7098 = vmatprep.subr.bf16.mxu1 %v7097_v1 }
 0x55a   : > { %7100 = vmatpush1.bf16.msra.mxu1 %v7099_v6 }
 0x55b   : > { %7102 = vmatprep.subr.bf16.mxu1 %v7101_v7 }
 0x55e   : > { %7104 = vmatpush1.bf16.msra.mxu1 %v7103_v12 }
 0x55f   : > { %7106 = vmatprep.subr.bf16.mxu1 %v7105_v13 }
 0x562   : > { %7108 = vmatpush1.bf16.msra.mxu1 %v7107_v18 }
 0x563   : > { %7110 = vmatprep.subr.bf16.mxu1 %v7109_v19 }
 0x566   : > { %7112 = vmatpush1.bf16.msra.mxu1 %v7111_v24 }
 0x567   : > { %7114 = vmatprep.subr.bf16.mxu1 %v7113_v25 }
 0x56a   : > { %7116 = vmatpush1.bf16.msra.mxu1 %v7115_v30 }
 0x56b   : > { %7118 = vmatprep.subr.bf16.mxu1 %v7117_v31 }
 0x56e   : > { %7120 = vmatpush1.bf16.msra.mxu1 %v7119_v36 }
 0x56f   : > { %7122 = vmatprep.subr.bf16.mxu1 %v7121_v37 }
 0x572   : > { %7124 = vmatpush1.bf16.msra.mxu1 %v7123_v42 }
 0x573   : > { %7126 = vmatprep.subr.bf16.mxu1 %v7125_v43 }
 0x576   : > { %7128 = vmatpush1.bf16.msra.mxu1 %v7127_v48 }
 0x577   : > { %7130 = vmatprep.subr.bf16.mxu1 %v7129_v49 }
 0x57a   : > { %7132 = vmatpush1.bf16.msra.mxu1 %v7131_v52 }
 0x57d   : > { %4259 = vmatmul.mubr.f32.vlgmr.msra.gmra.mrb[0].mxu1 %v300_v53 }
 0x619   : > { %v5680_v54 = vpop.f32.mrb[0].mxu0 }
 0x61a   : > { %v5682_v55 = vpop.f32.mrb[1].mxu0 }
 0x650   : > { %v4260_v62 = vpop.f32.mrb[0].mxu1 }
 0x651   : > { %v8353_v0 = vadd.f32 %v5680_v54, %v4260_v62  ;;  %v4262_v1 = vpop.f32.mrb[1].mxu1 }
 0x652   : > { %v8354_v2 = vadd.f32 %v5682_v55, %v4262_v1 }
 0x653   : > { %v5696_v3 = vadd.f32 %v8353_v0, %v5689_v61 }
 0x654   : > { %v5697_v4 = vadd.f32 %v8354_v2, %v5693_v63 }
 0x655   : > { %5698 = vst [vmem:[%s258_s20] sm:$0xff] %v5696_v3 }
 0x656   : > { %5699 = vst [vmem:[%s258_s20 + $0x8] sm:$0xff] %v5697_v4 }
 0x657   : > { %8616 = shalt.err (!%p8613_p2)
}
 0x658   : > { %s8617_s11 = scalar_lea.hbm %s11421_s21, 256  ;;  %s8621_s29 = scalar_lea.hbm %s11473_s3, 512 }
 0x659   : > { %p8618_p7 = scmp.ne.s32.totalorder %s11421_s21, %s8617_s11  ;;  %p8622_p8 = scmp.lt.u32.totalorder %s11421_s21, %s11473_s3 }
 0x65a   : > { %p8623_p10 = scmp.lt.u32.totalorder %s8621_s29, %s8617_s11  ;;  %p8625_p13 = scmp.lt.u32.totalorder %s8617_s11, %s11421_s21 }
 0x65b   : > { %p8619_p6 = pnand %p8618_p7, %p11498_p5 }
 0x65c   : > { %p8624_p11 = por %p8623_p10, %p8622_p8 }
 0x65d   : > { %p8620_p4 = pneg %p8619_p6 }
 0x65e   : > { %p8626_p1 = por %p8625_p13, %p8624_p11 }
 0x660   : > { %p8627_p12 = pnand %p8626_p1, %p8620_p4 }
 0x662   : > { %8630 = shalt.err (!%p8627_p12)
}
 0x663   : > { %8442 = dma.vmem_to_hbm [thread:$0]  (%p11498_p5), %s11423_s26, 256, %s11421_s21, %s5701_s8  }
 0x664 PF: > { %s5729_s5 = sand.u32 1, %s8669_s12   ;;  %p11499_p0 = scmp.ne.s32.totalorder %s11488_s4, 0 }
 0x665   : > { %p11500_p3 = scmp.ge.s32.totalorder %s8689_s17, 2  ;;  %s5730_s27 = scalar_lea.sflag [#allocation4], %s5729_s5 }
 0x667   : > { %p8456_p9 = pnand %p11500_p3, %p11499_p0 }
 0x669   : > { %8664 = dma.done.wait (!%p8456_p9), %s5730_s27, 256  }
 0x66a   : > { %8666 = vsyncadd (!%p8456_p9), %s5730_s27, 4294967040  ;;  %s20_s17 = sadd.s32 1, %s8689_s17   ;;  %s11501_s28 = sld [smem:[#allocation12_spill]] }
 0x66b   : > { %p17_p2 = scmp.ge.s32.totalorder %s20_s17, 4   ;;  %s11502_s12 = smov %s8673_s13 }
 0x66c   : > { %s11503_s13 = smov %s8677_s14  ;;  %s11504_s14 = smov %s8766_s24 }
 0x66d   : > { %s11505_s15 = smov %s8685_s16  ;;  %19 = sbr.rel (!%p17_p2) target bundleno = 9 (0x9), region = 94 }
 0x670   : > { %s11506_s16 = smov %s11501_s28 }
 0x674   :  { %5735 = vsyncpa [#allocation3], 1 }
 0x675   :  { %5737 = vsyncpa [#allocation3 + $0x1], 1 }
 0x676   :  { %5738 = vsyncpa [#allocation6], 1 }
 0x677   :  { %5740 = vsyncpa [#allocation6 + $0x1], 1 }
 0x678   :  { %5741 = vsyncpa [#allocation4], 1 }
 0x679   :  { %5743 = vsyncpa [#allocation4 + $0x1], 1 }

</bundles_post_ra>
